<compile_context>
chip_gen: v6e
topology: v6e:2x2x1
jax: 0.10.0
libtpu: 0.0.40
codegen_flags: <defaults>
</compile_context>

<pallas_src>
import functools

import jax
import jax.numpy as jnp
from jax import lax
from jax.experimental import pallas as pl
from jax.experimental.pallas import tpu as pltpu


# ----------------------------- small helpers -----------------------------

def _cdiv(a, b):
    return -(-a // b)


def _round_up(x, m):
    return _cdiv(x, m) * m


def _apply_act(v, act):
    if act == "leaky_relu":
        return jnp.where(v >= 0, v, 0.2 * v)          # LeakyReLU(0.2) as in the module
    if act == "tanh":
        return jnp.tanh(v)
    return v


@functools.lru_cache(maxsize=None)
def _vmem_limit_bytes():
    """Generation-aware scoped-VMEM budget.

    ~half of physical VMEM, capped at 64 MiB: v5e/v6e (128 MiB) -> 64 MiB,
    v7x (64 MiB/TC) -> 32 MiB.  Conservative 32 MiB if the query is unavailable."""
    cap = 0
    try:
        get_info = getattr(pltpu, "get_tpu_info", None)
        if get_info is not None:
            cap = int(getattr(get_info(), "vmem_capacity_bytes", 0) or 0)
    except Exception:
        cap = 0
    if cap <= 0:
        return 32 * 1024 * 1024
    return int(max(16 * 1024 * 1024, min(cap // 2, 64 * 1024 * 1024)))


def _fits_vmem(nbytes):
    return nbytes <= int(0.8 * _vmem_limit_bytes())


# ----------------------------- generic fused matmul kernel -----------------------------

def _matmul_bias_act_kernel(x_ref, w_ref, b_ref, o_ref, *, act):
    y = jnp.dot(x_ref[...], w_ref[...], preferred_element_type=jnp.float32)
    y = _apply_act(y + b_ref[...], act)
    o_ref[...] = y.astype(o_ref.dtype)


def _choose_tiling(M, row_bytes, resident_bytes):
    """Pick (tm, Mp) with explicit VMEM accounting.

    budget = vmem_limit - resident (weight + bias, assumed double-buffered);
    the LHS/output tiles are double-buffered by the pipeline -> 2*row_bytes per row.
    Prefers tm that divides M exactly (no pad copy / ragged tail), multiples of 16
    (bf16 sublane packing), and an even step count >1 so v7x megacore gets work."""
    usable = max(_vmem_limit_bytes() - resident_bytes, 2 * 1024 * 1024)
    cap = int(min(max(usable // (2 * row_bytes), 128), 8192))
    if M <= 512 and M <= cap:
        return M, M                                   # tiny layer: one grid step
    best = 0
    d = 16
    while d <= min(cap, M):
        if M % d == 0:
            steps = M // d
            if steps > 1 and steps % 2 == 0:
                best = d
        d += 16
    if best >= 128:
        return best, M
    # fallback: pad the LHS rows (extra copy, only for awkward M factorizations)
    steps = max(2, _cdiv(M, cap))
    if steps % 2:
        steps += 1
    tm = _round_up(_cdiv(M, steps), 16)
    return tm, tm * steps


def matmul_bias_act(x, w, b, act="none", out_dtype=jnp.bfloat16):
    """(M, K) @ (K, N) + b with fused activation; bf16 operands, f32 accumulation.

    For N < 128 the product is computed in a folded form: f = 128 // next_pow2(N)
    consecutive LHS rows are merged (free reshape outside the kernel) and multiplied
    against a block-diagonal (f*K, 128) weight, so the kernel's output tile is
    128-lane dense (unmasked vst) at zero extra HBM traffic and no in-kernel relayout."""
    M, K = x.shape
    Kw, N = w.shape
    assert K == Kw
    x = x.astype(jnp.bfloat16)
    w = w.astype(jnp.bfloat16)
    b = b.astype(jnp.float32)

    Np, f = N, 1
    if N < 128:
        Np = max(8, 1 << (N - 1).bit_length())        # pad channels to a divisor of 128
        f = 128 // Np
        if f > 1 and M % f == 0:
            if Np != N:
                w = jnp.pad(w, ((0, 0), (0, Np - N)))
                b = jnp.pad(b, (0, Np - N))
            wbd = jnp.zeros((f, K, f, Np), w.dtype)   # block-diagonal weight
            for a in range(f):
                wbd = wbd.at[a, :, a, :].set(w)
            w = wbd.reshape(f * K, f * Np)
            b = jnp.tile(b, f)
            x = x.reshape(M // f, f * K)              # free row-major reshape
        else:
            Np, f = N, 1

    Mk, Kk = x.shape
    Nk = w.shape[1]
    b2 = b.reshape(1, Nk)

    resident = 2 * (Kk * Nk * 2 + Nk * 4)             # weight + bias (double-buffered)
    row_bytes = 2 * Kk + jnp.dtype(out_dtype).itemsize * Nk
    tm, Mp = _choose_tiling(Mk, row_bytes, resident)
    if Mp != Mk:
        x = jnp.pad(x, ((0, Mp - Mk), (0, 0)))

    out = pl.pallas_call(
        functools.partial(_matmul_bias_act_kernel, act=act),
        out_shape=jax.ShapeDtypeStruct((Mp, Nk), out_dtype),
        grid=(Mp // tm,),
        in_specs=[
            pl.BlockSpec((tm, Kk), lambda i: (i, 0)),
            pl.BlockSpec((Kk, Nk), lambda i: (0, 0)),   # weight stays VMEM-resident
            pl.BlockSpec((1, Nk), lambda i: (0, 0)),
        ],
        out_specs=pl.BlockSpec((tm, Nk), lambda i: (i, 0)),
        compiler_params=pltpu.CompilerParams(
            dimension_semantics=("parallel",),
            vmem_limit_bytes=_vmem_limit_bytes(),
        ),
    )(x, w, b2)

    out = out[:Mk]
    if f > 1:
        out = out.reshape(M, Np)
        if Np != N:
            out = out[:, :N]
    return out


# ----------------------------- fused stride-3 Conv2d -----------------------------

def _conv_s3_kernel(x_ref, w_ref, b_ref, o_ref, acc_ref, *, act):
    t = pl.program_id(1)                               # kh tap index (reduction axis)

    @pl.when(t == 0)
    def _():
        acc_ref[...] = jnp.zeros_like(acc_ref)

    x = x_ref[...]                                     # (1, Ho, 1, Wo_p, 3*Cin)
    rows = x.shape[1] * x.shape[3]
    acc_ref[...] += jnp.dot(x.reshape(rows, x.shape[4]), w_ref[0],
                            preferred_element_type=jnp.float32)

    @pl.when(t == pl.num_programs(1) - 1)
    def _():
        y = _apply_act(acc_ref[...] + b_ref[...], act)
        o_ref[...] = y.reshape(o_ref.shape).astype(o_ref.dtype)


def _conv3x3_s3_fused(x, w, b, act, Ho, Wo, Wo_p):
    B, H, W, Cin = x.shape
    Cout = w.shape[0]
    # pad=1 on top/left; bottom/right padded (or cropped, via negative high padding)
    # so the padded image is exactly (3*Ho, 3*Wo_p) and free-reshapes below.
    cfg = ((0, 0, 0), (1, 3 * Ho - H - 1, 0), (1, 3 * Wo_p - W - 1, 0), (0, 0, 0))
    xp = lax.pad(x, jnp.array(0, x.dtype), cfg)
    xr = xp.reshape(B, Ho, 3, Wo_p, 3 * Cin)           # free (bitcast) reshape
    wk = jnp.transpose(w, (2, 3, 1, 0)).reshape(3, 3 * Cin, Cout).astype(jnp.bfloat16)
    b2 = b.astype(jnp.float32).reshape(1, Cout)

    out = pl.pallas_call(
        functools.partial(_conv_s3_kernel, act=act),
        out_shape=jax.ShapeDtypeStruct((B, Ho, Wo_p, Cout), jnp.bfloat16),
        grid=(B, 3),
        in_specs=[
            pl.BlockSpec((1, Ho, 1, Wo_p, 3 * Cin), lambda bi, t: (bi, 0, t, 0, 0)),
            pl.BlockSpec((1, 3 * Cin, Cout), lambda bi, t: (t, 0, 0)),
            pl.BlockSpec((1, Cout), lambda bi, t: (0, 0)),
        ],
        out_specs=pl.BlockSpec((1, Ho, Wo_p, Cout), lambda bi, t: (bi, 0, 0, 0)),
        scratch_shapes=[pltpu.VMEM((Ho * Wo_p, Cout), jnp.float32)],
        compiler_params=pltpu.CompilerParams(
            dimension_semantics=("parallel", "arbitrary"),
            vmem_limit_bytes=_vmem_limit_bytes(),
        ),
    )(xr, wk, b2)
    return out[:, :, :Wo, :]


def _conv3x3_im2col(x, w, b, stride, act, Ho, Wo):
    """Generic im2col-in-XLA path (stride-2 enc0 / very large stride-3 fallback)."""
    B, H, W, Cin = x.shape
    Cout = w.shape[0]
    xp = jnp.pad(x, ((0, 0), (1, 1), (1, 1), (0, 0)))
    taps = [xp[:, kh:kh + stride * (Ho - 1) + 1:stride,
               kw:kw + stride * (Wo - 1) + 1:stride, :]
            for kh in range(3) for kw in range(3)]
    patches = jnp.stack(taps, axis=3).reshape(B * Ho * Wo, 9 * Cin)
    wmat = jnp.transpose(w, (2, 3, 1, 0)).reshape(9 * Cin, Cout)   # (kh,kw,cin) x cout
    y = matmul_bias_act(patches, wmat, b, act=act)
    return y.reshape(B, Ho, Wo, Cout)


def conv3x3(x, w, b, stride, act):
    """Conv2d(kernel=3, stride, padding=1). x: NHWC. w: PyTorch (Cout, Cin, 3, 3)."""
    B, H, W, Cin = x.shape
    Cout = w.shape[0]
    Ho = (H - 1) // stride + 1
    Wo = (W - 1) // stride + 1
    x = x.astype(jnp.bfloat16)

    if stride == 3:
        Wo_p = _round_up(Wo, 8)                        # keep in-kernel reshapes free
        est = (2 * (Ho * Wo_p * 3 * Cin * 2) + 2 * (Ho * Wo_p * Cout * 2)
               + Ho * Wo_p * Cout * 4 + 2 * (3 * Cin * Cout * 2))
        if _fits_vmem(est):
            return _conv3x3_s3_fused(x, w, b, act, Ho, Wo, Wo_p)

    # TODO(synk): enc0's overlapping 9-tap gather still materializes a ~2.25x patch
    # tensor in HBM; folding it needs manual overlapping-window DMA.
    return _conv3x3_im2col(x, w, b, stride, act, Ho, Wo)


# ----------------------------- fused stride-3 ConvTranspose2d -----------------------------

def _convT_s3_kernel(x_ref, w_ref, b_ref, o_ref, *, act):
    x = x_ref[...]                                     # (1, H, W_p, Cin)
    rows = x.shape[1] * x.shape[2]
    y = jnp.dot(x.reshape(rows, x.shape[3]), w_ref[0],
                preferred_element_type=jnp.float32)
    y = _apply_act(y + b_ref[...], act)
    o_ref[...] = y.reshape(o_ref.shape).astype(o_ref.dtype)


def _convT_s3_fused_canvas(x, w, b, act, W_pad):
    B, H, W, Cin = x.shape
    Cout = w.shape[1]
    if W_pad != W:
        x = jnp.pad(x, ((0, 0), (0, 0), (0, W_pad - W), (0, 0)))
    # weight slab for tap kh: columns ordered (kw, cout)
    wk = jnp.transpose(w, (2, 0, 3, 1)).reshape(3, Cin, 3 * Cout).astype(jnp.bfloat16)
    b2 = jnp.tile(b.astype(jnp.float32), 3).reshape(1, 3 * Cout)

    canvas = pl.pallas_call(
        functools.partial(_convT_s3_kernel, act=act),
        out_shape=jax.ShapeDtypeStruct((B, H, 3, W_pad, 3 * Cout), jnp.bfloat16),
        grid=(B, 3),
        in_specs=[
            pl.BlockSpec((1, H, W_pad, Cin), lambda bi, t: (bi, 0, 0, 0)),
            pl.BlockSpec((1, Cin, 3 * Cout), lambda bi, t: (t, 0, 0)),
            pl.BlockSpec((1, 3 * Cout), lambda bi, t: (0, 0)),
        ],
        out_specs=pl.BlockSpec((1, H, 1, W_pad, 3 * Cout),
                               lambda bi, t: (bi, 0, t, 0, 0)),
        compiler_params=pltpu.CompilerParams(
            dimension_semantics=("parallel", "arbitrary"),
            vmem_limit_bytes=_vmem_limit_bytes(),
        ),
    )(x, wk, b2)
    return canvas.reshape(B, 3 * H, 3 * W_pad, Cout)   # free reshape back to canvas


def conv_transpose3x3_s3(x, w, b, output_padding, act):
    """ConvTranspose2d(k=3, s=3, p=1, output_padding=op). x NHWC, w (Cin, Cout, 3, 3).

    stride == kernel => no overlap-add; bias + activation are fused in-kernel and the
    col2im regroup is expressed through the output BlockSpec (no HBM round trip)."""
    B, H, W, Cin = x.shape
    Cout = w.shape[1]
    out_h = 3 * H - 2 + output_padding
    out_w = 3 * W - 2 + output_padding
    x = x.astype(jnp.bfloat16)

    W_pad = _round_up(W, 8)
    est = (2 * (H * W_pad * Cin * 2) + 2 * (H * W_pad * 3 * Cout * 2)
           + 2 * (Cin * 3 * Cout * 2))
    if _fits_vmem(est):
        canvas = _convT_s3_fused_canvas(x, w, b, act, W_pad)[:, :, :3 * W, :]
    else:
        # TODO(synk): large-input fallback keeps the col2im regroup in XLA.
        wmat = jnp.transpose(w, (0, 2, 3, 1)).reshape(Cin, 9 * Cout)
        y = matmul_bias_act(x.reshape(B * H * W, Cin), wmat, jnp.tile(b, 9), act=act)
        canvas = (y.reshape(B, H, W, 3, 3, Cout)
                   .transpose(0, 1, 3, 2, 4, 5).reshape(B, 3 * H, 3 * W, Cout))

    if output_padding == 2:
        # The extra output row/col has no input contribution -> its value is act(bias).
        bval = _apply_act(b.astype(jnp.float32), act).astype(canvas.dtype)
        row = jnp.broadcast_to(bval, (B, 1, 3 * W, Cout))
        canvas = jnp.concatenate([canvas, row], axis=1)
        col = jnp.broadcast_to(bval, (B, 3 * H + 1, 1, Cout))
        canvas = jnp.concatenate([canvas, col], axis=2)
    return canvas[:, 1:1 + out_h, 1:1 + out_w, :]


# ----------------------------- final stride-2 ConvTranspose2d -----------------------------

def conv_transpose3x3_s2_op1(x, w, b, act):
    """ConvTranspose2d(k=3, s=2, p=1, output_padding=1) via the sub-pixel (parity)
    split: one matmul of the 4 shifted taps against a (4*Cin, 4*Cout) block weight.
    N = 4*Cout = 20, so matmul_bias_act folds it into a 128-lane-dense bf16 output."""
    B, H, W, Cin = x.shape
    Cout = w.shape[1]
    x = x.astype(jnp.bfloat16)
    xp = jnp.pad(x, ((0, 0), (0, 1), (0, 1), (0, 0)))              # op=1 border taps
    taps = [xp[:, dh:dh + H, dw:dw + W, :] for dh in (0, 1) for dw in (0, 1)]
    xin = jnp.concatenate(taps, axis=-1).reshape(B * H * W, 4 * Cin)

    # (parity p, tap d) -> kernel index k (k = p + 1 - 2d); only valid combos kept.
    kmap = {(0, 0): 1, (1, 0): 2, (1, 1): 0}
    wbig = jnp.zeros((2, 2, Cin, 2, 2, Cout), w.dtype)             # (dh,dw,cin,ph,pw,co)
    for (ph, dh), kh in kmap.items():
        for (pw, dw), kw in kmap.items():
            wbig = wbig.at[dh, dw, :, ph, pw, :].set(w[:, :, kh, kw])
    wbig = wbig.reshape(4 * Cin, 4 * Cout)

    y = matmul_bias_act(xin, wbig, jnp.tile(b, 4), act=act, out_dtype=jnp.bfloat16)
    y = y.reshape(B, H, W, 2, 2, Cout).transpose(0, 1, 3, 2, 4, 5)
    return y.reshape(B, 2 * H, 2 * W, Cout)


# ----------------------------- forward -----------------------------

def conv_autoencoder_forward(params, x_nchw):
    # NCHW -> NHWC and to bf16 right away so all glue moves 2-byte data.
    x = jnp.transpose(x_nchw, (0, 2, 3, 1)).astype(jnp.bfloat16)

    # encoder: Conv(5->32,s2) LReLU, Conv(32->64,s3) LReLU, Conv(64->128,s3) LReLU,
    #          Conv(128->256,s3) LReLU
    for i, s in enumerate([2, 3, 3, 3]):
        x = conv3x3(x, params[f"enc{i}_w"], params[f"enc{i}_b"], s, act="leaky_relu")

    # decoder: ConvT(256->128,s3,op2) LReLU, ConvT(128->64,s3,op2) LReLU,
    #          ConvT(64->32,s3,op0) LReLU, ConvT(32->5,s2,op1), Trim, Tanh
    for i, op in enumerate([2, 2, 0]):
        x = conv_transpose3x3_s3(x, params[f"dec{i}_w"], params[f"dec{i}_b"], op,
                                 act="leaky_relu")
    x = conv_transpose3x3_s2_op1(x, params["dec3_w"], params["dec3_b"], act="tanh")

    # Trim(): x[:, :, :320, :320]; Tanh is elementwise, so fusing it before the slice
    # (inside the last matmul) is mathematically identical to Trim-then-Tanh.
    x = x[:, :320, :320, :]
    return jnp.transpose(x, (0, 3, 1, 2)).astype(jnp.float32)      # NHWC -> NCHW


# ----------------------------- pure-JAX reference (self-check) -----------------------------

def reference_forward(params, x_nchw):
    x = x_nchw.astype(jnp.float32)
    for i, s in enumerate([2, 3, 3, 3]):
        w, b = params[f"enc{i}_w"], params[f"enc{i}_b"]
        x = jax.lax.conv_general_dilated(
            x, w, (s, s), [(1, 1), (1, 1)],
            dimension_numbers=("NCHW", "OIHW", "NCHW"))
        x = _apply_act(x + b[None, :, None, None], "leaky_relu")
    for i, (s, op) in enumerate([(3, 2), (3, 2), (3, 0), (2, 1)]):
        w, b = params[f"dec{i}_w"], params[f"dec{i}_b"]
        wf = jnp.transpose(w, (1, 0, 2, 3))[:, :, ::-1, ::-1]
        x = jax.lax.conv_general_dilated(
            x, wf, (1, 1), [(1, 1 + op), (1, 1 + op)], lhs_dilation=(s, s),
            dimension_numbers=("NCHW", "OIHW", "NCHW"))
        x = x + b[None, :, None, None]
        if i < 3:
            x = _apply_act(x, "leaky_relu")
    return jnp.tanh(x[:, :, :320, :320])


# ----------------------------- deterministic params -----------------------------

def init_params(key):
    ks = iter(jax.random.split(key, 16))

    def nrm(shape, scale):
        return scale * jax.random.normal(next(ks), shape, jnp.float32)

    p = {}
    for i, (ci, co) in enumerate([(5, 32), (32, 64), (64, 128), (128, 256)]):
        p[f"enc{i}_w"] = nrm((co, ci, 3, 3), 1.0 / (3.0 * ci ** 0.5))   # Conv2d layout
        p[f"enc{i}_b"] = nrm((co,), 0.02)
    for i, (ci, co) in enumerate([(256, 128), (128, 64), (64, 32), (32, 5)]):
        p[f"dec{i}_w"] = nrm((ci, co, 3, 3), 1.0 / (3.0 * ci ** 0.5))   # ConvTranspose2d layout
        p[f"dec{i}_b"] = nrm((co,), 0.02)
    return p


if __name__ == "__main__":
    key = jax.random.PRNGKey(0)
    pkey, xkey = jax.random.split(key)
    params = init_params(pkey)

    # Small demo input; 108 -> enc (54,18,6,2) -> dec (6,18,52,104); Trim(320) keeps all.
    B, H = 2, 108
    x = jax.random.uniform(xkey, (B, 5, H, H), jnp.float32)

    fwd = jax.jit(conv_autoencoder_forward)
    decoded = fwd(params, x)
    jax.block_until_ready(decoded)

    assert decoded.shape == (B, 5, 104, 104), decoded.shape
    assert bool(jnp.all(jnp.isfinite(decoded)))

    ref = jax.jit(reference_forward)(params, x)
    err = float(jnp.max(jnp.abs(decoded.astype(jnp.float32) - ref)))
    assert err < 5e-2, f"max abs error vs reference: {err}"
    print("KERNEL_OK")
</pallas_src>

<mosaic_0001>
module attributes {stable_mosaic.version = 11 : i64} {
  func.func @_matmul_bias_act_kernel(%arg0: i32, %arg1: memref<736x180xbf16, #tpu.memory_space<vmem>>, %arg2: memref<180x128xbf16, #tpu.memory_space<vmem>>, %arg3: memref<1x128xf32, #tpu.memory_space<vmem>>, %arg4: memref<736x128xbf16, #tpu.memory_space<vmem>>) attributes {dimension_semantics = [#tpu.dimension_semantics<parallel>], iteration_bounds = array<i64: 2>, scalar_prefetch = 0 : i64, scratch_operands = 0 : i64, tpu.core_type = #tpu.core_type<tc>, window_params = [{transform_indices = @transform_0, window_bounds = array<i64: 736, 180>}, {pipeline_mode = #tpu.pipeline_mode<synchronous>, transform_indices = @transform_1, window_bounds = array<i64: 180, 128>}, {pipeline_mode = #tpu.pipeline_mode<synchronous>, transform_indices = @transform_2, window_bounds = array<i64: 1, 128>}, {transform_indices = @transform_3, window_bounds = array<i64: 736, 128>}]} {
    %c0 = arith.constant 0 : index
    %c0_0 = arith.constant 0 : index
    %0 = vector.load %arg1[%c0, %c0_0] : memref<736x180xbf16, #tpu.memory_space<vmem>>, vector<736x180xbf16>
    %c0_1 = arith.constant 0 : index
    %c0_2 = arith.constant 0 : index
    %1 = vector.load %arg2[%c0_1, %c0_2] : memref<180x128xbf16, #tpu.memory_space<vmem>>, vector<180x128xbf16>
    %cst = arith.constant dense<0.000000e+00> : vector<736x128xf32>
    %2 = tpu.matmul %0, %1, %cst {dimension_numbers = #tpu.dot_dimension_numbers<[1], [0], [0], [1], [0, 0, 1, 1], [], []>} : vector<736x180xbf16>, vector<180x128xbf16>, vector<736x128xf32> -> vector<736x128xf32>
    %c0_3 = arith.constant 0 : index
    %c0_4 = arith.constant 0 : index
    %3 = vector.load %arg3[%c0_3, %c0_4] : memref<1x128xf32, #tpu.memory_space<vmem>>, vector<1x128xf32>
    %4 = vector.broadcast %3 : vector<1x128xf32> to vector<736x128xf32>
    %5 = arith.addf %2, %4 : vector<736x128xf32>
    %cst_5 = arith.constant 0.000000e+00 : f32
    %6 = vector.broadcast %cst_5 : f32 to vector<736x128xf32>
    %7 = arith.cmpf oge, %5, %6 : vector<736x128xf32>
    %cst_6 = arith.constant 2.000000e-01 : f32
    %8 = vector.broadcast %cst_6 : f32 to vector<736x128xf32>
    %9 = arith.mulf %8, %5 : vector<736x128xf32>
    %10 = arith.select %7, %5, %9 : vector<736x128xi1>, vector<736x128xf32>
    %11 = arith.truncf %10 : vector<736x128xf32> to vector<736x128xbf16>
    %c0_7 = arith.constant 0 : index
    %c0_8 = arith.constant 0 : index
    %12 = vector.load %arg4[%c0_7, %c0_8] : memref<736x128xbf16, #tpu.memory_space<vmem>>, vector<736x128xbf16>
    tpu.vector_store %arg4[%c0_7, %c0_8], %11 {strides = array<i32>} : memref<736x128xbf16, #tpu.memory_space<vmem>>, vector<736x128xbf16>,
    return
  }
  func.func @transform_0(%arg0: i32) -> (i32, i32) {
    %c0_i32 = arith.constant 0 : i32
    %c0_i32_0 = arith.constant 0 : i32
    return %arg0, %c0_i32 : i32, i32
  }
  func.func @transform_1(%arg0: i32) -> (i32, i32) {
    %c0_i32 = arith.constant 0 : i32
    %c0_i32_0 = arith.constant 0 : i32
    %c0_i32_1 = arith.constant 0 : i32
    return %c0_i32, %c0_i32_0 : i32, i32
  }
  func.func @transform_2(%arg0: i32) -> (i32, i32) {
    %c0_i32 = arith.constant 0 : i32
    %c0_i32_0 = arith.constant 0 : i32
    %c0_i32_1 = arith.constant 0 : i32
    return %c0_i32, %c0_i32_0 : i32, i32
  }
  func.func @transform_3(%arg0: i32) -> (i32, i32) {
    %c0_i32 = arith.constant 0 : i32
    %c0_i32_0 = arith.constant 0 : i32
    return %arg0, %c0_i32 : i32, i32
  }
}

module attributes {stable_mosaic.version = 11 : i64} {
  func.func @_conv_s3_kernel(%arg0: i32, %arg1: i32, %arg2: memref<1x18x1x24x96xbf16, #tpu.memory_space<vmem>>, %arg3: memref<1x96x64xbf16, #tpu.memory_space<vmem>>, %arg4: memref<1x64xf32, #tpu.memory_space<vmem>>, %arg5: memref<1x18x24x64xbf16, #tpu.memory_space<vmem>>, %arg6: memref<432x64xf32, #tpu.memory_space<vmem>>) attributes {dimension_semantics = [#tpu.dimension_semantics<parallel>, #tpu.dimension_semantics<arbitrary>], iteration_bounds = array<i64: 2, 3>, scalar_prefetch = 0 : i64, scratch_operands = 1 : i64, tpu.core_type = #tpu.core_type<tc>, window_params = [{transform_indices = @transform_0, window_bounds = array<i64: 1, 18, 1, 24, 96>}, {transform_indices = @transform_1, window_bounds = array<i64: 1, 96, 64>}, {pipeline_mode = #tpu.pipeline_mode<synchronous>, transform_indices = @transform_2, window_bounds = array<i64: 1, 64>}, {transform_indices = @transform_3, window_bounds = array<i64: 1, 18, 24, 64>}]} {
    %c0_i32 = arith.constant 0 : i32
    %0 = arith.cmpi eq, %arg1, %c0_i32 : i32
    %1 = arith.extui %0 : i1 to i32
    %c0_i32_0 = arith.constant 0 : i32
    %2 = arith.cmpi ne, %1, %c0_i32_0 : i32
    scf.if %2 {
      %cst_13 = arith.constant 0.000000e+00 : f32
      %14 = vector.broadcast %cst_13 : f32 to vector<432x64xf32>
      %c0_14 = arith.constant 0 : index
      %c0_15 = arith.constant 0 : index
      %15 = vector.load %arg6[%c0_14, %c0_15] : memref<432x64xf32, #tpu.memory_space<vmem>>, vector<432x64xf32>
      tpu.vector_store %arg6[%c0_14, %c0_15], %14 {strides = array<i32>} : memref<432x64xf32, #tpu.memory_space<vmem>>, vector<432x64xf32>,
    } else {
    }
    %c0 = arith.constant 0 : index
    %c0_1 = arith.constant 0 : index
    %c0_2 = arith.constant 0 : index
    %c0_3 = arith.constant 0 : index
    %c0_4 = arith.constant 0 : index
    %3 = vector.load %arg2[%c0, %c0_1, %c0_2, %c0_3, %c0_4] : memref<1x18x1x24x96xbf16, #tpu.memory_space<vmem>>, vector<1x18x1x24x96xbf16>
    %c0_5 = arith.constant 0 : index
    %c0_6 = arith.constant 0 : index
    %4 = vector.load %arg6[%c0_5, %c0_6] : memref<432x64xf32, #tpu.memory_space<vmem>>, vector<432x64xf32>
    %5 = vector.shape_cast %3 : vector<1x18x1x24x96xbf16> to vector<432x96xbf16>
    %c0_7 = arith.constant 0 : index
    %c0_8 = arith.constant 0 : index
    %c0_9 = arith.constant 0 : index
    %6 = vector.load %arg3[%c0_7, %c0_8, %c0_9] : memref<1x96x64xbf16, #tpu.memory_space<vmem>>, vector<1x96x64xbf16>
    %7 = vector.shape_cast %6 : vector<1x96x64xbf16> to vector<96x64xbf16>
    %cst = arith.constant dense<0.000000e+00> : vector<432x64xf32>
    %8 = tpu.matmul %5, %7, %cst {dimension_numbers = #tpu.dot_dimension_numbers<[1], [0], [0], [1], [0, 0, 1, 1], [], []>} : vector<432x96xbf16>, vector<96x64xbf16>, vector<432x64xf32> -> vector<432x64xf32>
    %9 = arith.addf %4, %8 : vector<432x64xf32>
    %c0_10 = arith.constant 0 : index
    %c0_11 = arith.constant 0 : index
    %10 = vector.load %arg6[%c0_10, %c0_11] : memref<432x64xf32, #tpu.memory_space<vmem>>, vector<432x64xf32>
    tpu.vector_store %arg6[%c0_10, %c0_11], %9 {strides = array<i32>} : memref<432x64xf32, #tpu.memory_space<vmem>>, vector<432x64xf32>,
    %c2_i32 = arith.constant 2 : i32
    %11 = arith.cmpi eq, %arg1, %c2_i32 : i32
    %12 = arith.extui %11 : i1 to i32
    %c0_i32_12 = arith.constant 0 : i32
    %13 = arith.cmpi ne, %12, %c0_i32_12 : i32
    scf.if %13 {
      %c0_13 = arith.constant 0 : index
      %c0_14 = arith.constant 0 : index
      %14 = vector.load %arg6[%c0_13, %c0_14] : memref<432x64xf32, #tpu.memory_space<vmem>>, vector<432x64xf32>
      %c0_15 = arith.constant 0 : index
      %c0_16 = arith.constant 0 : index
      %15 = vector.load %arg4[%c0_15, %c0_16] : memref<1x64xf32, #tpu.memory_space<vmem>>, vector<1x64xf32>
      %16 = vector.broadcast %15 : vector<1x64xf32> to vector<432x64xf32>
      %17 = arith.addf %14, %16 : vector<432x64xf32>
      %cst_17 = arith.constant 0.000000e+00 : f32
      %18 = vector.broadcast %cst_17 : f32 to vector<432x64xf32>
      %19 = arith.cmpf oge, %17, %18 : vector<432x64xf32>
      %cst_18 = arith.constant 2.000000e-01 : f32
      %20 = vector.broadcast %cst_18 : f32 to vector<432x64xf32>
      %21 = arith.mulf %20, %17 : vector<432x64xf32>
      %22 = arith.select %19, %17, %21 : vector<432x64xi1>, vector<432x64xf32>
      %23 = vector.shape_cast %22 : vector<432x64xf32> to vector<1x18x24x64xf32>
      %24 = arith.truncf %23 : vector<1x18x24x64xf32> to vector<1x18x24x64xbf16>
      %c0_19 = arith.constant 0 : index
      %c0_20 = arith.constant 0 : index
      %c0_21 = arith.constant 0 : index
      %c0_22 = arith.constant 0 : index
      %25 = vector.load %arg5[%c0_19, %c0_20, %c0_21, %c0_22] : memref<1x18x24x64xbf16, #tpu.memory_space<vmem>>, vector<1x18x24x64xbf16>
      tpu.vector_store %arg5[%c0_19, %c0_20, %c0_21, %c0_22], %24 {strides = array<i32>} : memref<1x18x24x64xbf16, #tpu.memory_space<vmem>>, vector<1x18x24x64xbf16>,
    } else {
    }
    return
  }
  func.func @transform_0(%arg0: i32, %arg1: i32) -> (i32, i32, i32, i32, i32) {
    %c0_i32 = arith.constant 0 : i32
    %c0_i32_0 = arith.constant 0 : i32
    %c0_i32_1 = arith.constant 0 : i32
    %c0_i32_2 = arith.constant 0 : i32
    return %arg0, %c0_i32, %arg1, %c0_i32_0, %c0_i32_1 : i32, i32, i32, i32, i32
  }
  func.func @transform_1(%arg0: i32, %arg1: i32) -> (i32, i32, i32) {
    %c0_i32 = arith.constant 0 : i32
    %c0_i32_0 = arith.constant 0 : i32
    %c0_i32_1 = arith.constant 0 : i32
    return %arg1, %c0_i32, %c0_i32_0 : i32, i32, i32
  }
  func.func @transform_2(%arg0: i32, %arg1: i32) -> (i32, i32) {
    %c0_i32 = arith.constant 0 : i32
    %c0_i32_0 = arith.constant 0 : i32
    %c0_i32_1 = arith.constant 0 : i32
    return %c0_i32, %c0_i32_0 : i32, i32
  }
  func.func @transform_3(%arg0: i32, %arg1: i32) -> (i32, i32, i32, i32) {
    %c0_i32 = arith.constant 0 : i32
    %c0_i32_0 = arith.constant 0 : i32
    %c0_i32_1 = arith.constant 0 : i32
    %c0_i32_2 = arith.constant 0 : i32
    return %arg0, %c0_i32, %c0_i32_0, %c0_i32_1 : i32, i32, i32, i32
  }
}

module attributes {stable_mosaic.version = 11 : i64} {
  func.func @_conv_s3_kernel(%arg0: i32, %arg1: i32, %arg2: memref<1x6x1x8x192xbf16, #tpu.memory_space<vmem>>, %arg3: memref<1x192x128xbf16, #tpu.memory_space<vmem>>, %arg4: memref<1x128xf32, #tpu.memory_space<vmem>>, %arg5: memref<1x6x8x128xbf16, #tpu.memory_space<vmem>>, %arg6: memref<48x128xf32, #tpu.memory_space<vmem>>) attributes {dimension_semantics = [#tpu.dimension_semantics<parallel>, #tpu.dimension_semantics<arbitrary>], iteration_bounds = array<i64: 2, 3>, scalar_prefetch = 0 : i64, scratch_operands = 1 : i64, tpu.core_type = #tpu.core_type<tc>, window_params = [{transform_indices = @transform_0, window_bounds = array<i64: 1, 6, 1, 8, 192>}, {transform_indices = @transform_1, window_bounds = array<i64: 1, 192, 128>}, {pipeline_mode = #tpu.pipeline_mode<synchronous>, transform_indices = @transform_2, window_bounds = array<i64: 1, 128>}, {transform_indices = @transform_3, window_bounds = array<i64: 1, 6, 8, 128>}]} {
    %c0_i32 = arith.constant 0 : i32
    %0 = arith.cmpi eq, %arg1, %c0_i32 : i32
    %1 = arith.extui %0 : i1 to i32
    %c0_i32_0 = arith.constant 0 : i32
    %2 = arith.cmpi ne, %1, %c0_i32_0 : i32
    scf.if %2 {
      %cst_13 = arith.constant 0.000000e+00 : f32
      %14 = vector.broadcast %cst_13 : f32 to vector<48x128xf32>
      %c0_14 = arith.constant 0 : index
      %c0_15 = arith.constant 0 : index
      %15 = vector.load %arg6[%c0_14, %c0_15] : memref<48x128xf32, #tpu.memory_space<vmem>>, vector<48x128xf32>
      tpu.vector_store %arg6[%c0_14, %c0_15], %14 {strides = array<i32>} : memref<48x128xf32, #tpu.memory_space<vmem>>, vector<48x128xf32>,
    } else {
    }
    %c0 = arith.constant 0 : index
    %c0_1 = arith.constant 0 : index
    %c0_2 = arith.constant 0 : index
    %c0_3 = arith.constant 0 : index
    %c0_4 = arith.constant 0 : index
    %3 = vector.load %arg2[%c0, %c0_1, %c0_2, %c0_3, %c0_4] : memref<1x6x1x8x192xbf16, #tpu.memory_space<vmem>>, vector<1x6x1x8x192xbf16>
    %c0_5 = arith.constant 0 : index
    %c0_6 = arith.constant 0 : index
    %4 = vector.load %arg6[%c0_5, %c0_6] : memref<48x128xf32, #tpu.memory_space<vmem>>, vector<48x128xf32>
    %5 = vector.shape_cast %3 : vector<1x6x1x8x192xbf16> to vector<48x192xbf16>
    %c0_7 = arith.constant 0 : index
    %c0_8 = arith.constant 0 : index
    %c0_9 = arith.constant 0 : index
    %6 = vector.load %arg3[%c0_7, %c0_8, %c0_9] : memref<1x192x128xbf16, #tpu.memory_space<vmem>>, vector<1x192x128xbf16>
    %7 = vector.shape_cast %6 : vector<1x192x128xbf16> to vector<192x128xbf16>
    %cst = arith.constant dense<0.000000e+00> : vector<48x128xf32>
    %8 = tpu.matmul %5, %7, %cst {dimension_numbers = #tpu.dot_dimension_numbers<[1], [0], [0], [1], [0, 0, 1, 1], [], []>} : vector<48x192xbf16>, vector<192x128xbf16>, vector<48x128xf32> -> vector<48x128xf32>
    %9 = arith.addf %4, %8 : vector<48x128xf32>
    %c0_10 = arith.constant 0 : index
    %c0_11 = arith.constant 0 : index
    %10 = vector.load %arg6[%c0_10, %c0_11] : memref<48x128xf32, #tpu.memory_space<vmem>>, vector<48x128xf32>
    tpu.vector_store %arg6[%c0_10, %c0_11], %9 {strides = array<i32>} : memref<48x128xf32, #tpu.memory_space<vmem>>, vector<48x128xf32>,
    %c2_i32 = arith.constant 2 : i32
    %11 = arith.cmpi eq, %arg1, %c2_i32 : i32
    %12 = arith.extui %11 : i1 to i32
    %c0_i32_12 = arith.constant 0 : i32
    %13 = arith.cmpi ne, %12, %c0_i32_12 : i32
    scf.if %13 {
      %c0_13 = arith.constant 0 : index
      %c0_14 = arith.constant 0 : index
      %14 = vector.load %arg6[%c0_13, %c0_14] : memref<48x128xf32, #tpu.memory_space<vmem>>, vector<48x128xf32>
      %c0_15 = arith.constant 0 : index
      %c0_16 = arith.constant 0 : index
      %15 = vector.load %arg4[%c0_15, %c0_16] : memref<1x128xf32, #tpu.memory_space<vmem>>, vector<1x128xf32>
      %16 = vector.broadcast %15 : vector<1x128xf32> to vector<48x128xf32>
      %17 = arith.addf %14, %16 : vector<48x128xf32>
      %cst_17 = arith.constant 0.000000e+00 : f32
      %18 = vector.broadcast %cst_17 : f32 to vector<48x128xf32>
      %19 = arith.cmpf oge, %17, %18 : vector<48x128xf32>
      %cst_18 = arith.constant 2.000000e-01 : f32
      %20 = vector.broadcast %cst_18 : f32 to vector<48x128xf32>
      %21 = arith.mulf %20, %17 : vector<48x128xf32>
      %22 = arith.select %19, %17, %21 : vector<48x128xi1>, vector<48x128xf32>
      %23 = vector.shape_cast %22 : vector<48x128xf32> to vector<1x6x8x128xf32>
      %24 = arith.truncf %23 : vector<1x6x8x128xf32> to vector<1x6x8x128xbf16>
      %c0_19 = arith.constant 0 : index
      %c0_20 = arith.constant 0 : index
      %c0_21 = arith.constant 0 : index
      %c0_22 = arith.constant 0 : index
      %25 = vector.load %arg5[%c0_19, %c0_20, %c0_21, %c0_22] : memref<1x6x8x128xbf16, #tpu.memory_space<vmem>>, vector<1x6x8x128xbf16>
      tpu.vector_store %arg5[%c0_19, %c0_20, %c0_21, %c0_22], %24 {strides = array<i32>} : memref<1x6x8x128xbf16, #tpu.memory_space<vmem>>, vector<1x6x8x128xbf16>,
    } else {
    }
    return
  }
  func.func @transform_0(%arg0: i32, %arg1: i32) -> (i32, i32, i32, i32, i32) {
    %c0_i32 = arith.constant 0 : i32
    %c0_i32_0 = arith.constant 0 : i32
    %c0_i32_1 = arith.constant 0 : i32
    %c0_i32_2 = arith.constant 0 : i32
    return %arg0, %c0_i32, %arg1, %c0_i32_0, %c0_i32_1 : i32, i32, i32, i32, i32
  }
  func.func @transform_1(%arg0: i32, %arg1: i32) -> (i32, i32, i32) {
    %c0_i32 = arith.constant 0 : i32
    %c0_i32_0 = arith.constant 0 : i32
    %c0_i32_1 = arith.constant 0 : i32
    return %arg1, %c0_i32, %c0_i32_0 : i32, i32, i32
  }
  func.func @transform_2(%arg0: i32, %arg1: i32) -> (i32, i32) {
    %c0_i32 = arith.constant 0 : i32
    %c0_i32_0 = arith.constant 0 : i32
    %c0_i32_1 = arith.constant 0 : i32
    return %c0_i32, %c0_i32_0 : i32, i32
  }
  func.func @transform_3(%arg0: i32, %arg1: i32) -> (i32, i32, i32, i32) {
    %c0_i32 = arith.constant 0 : i32
    %c0_i32_0 = arith.constant 0 : i32
    %c0_i32_1 = arith.constant 0 : i32
    %c0_i32_2 = arith.constant 0 : i32
    return %arg0, %c0_i32, %c0_i32_0, %c0_i32_1 : i32, i32, i32, i32
  }
}

module attributes {stable_mosaic.version = 11 : i64} {
  func.func @_conv_s3_kernel(%arg0: i32, %arg1: i32, %arg2: memref<1x2x1x8x384xbf16, #tpu.memory_space<vmem>>, %arg3: memref<1x384x256xbf16, #tpu.memory_space<vmem>>, %arg4: memref<1x256xf32, #tpu.memory_space<vmem>>, %arg5: memref<1x2x8x256xbf16, #tpu.memory_space<vmem>>, %arg6: memref<16x256xf32, #tpu.memory_space<vmem>>) attributes {dimension_semantics = [#tpu.dimension_semantics<parallel>, #tpu.dimension_semantics<arbitrary>], iteration_bounds = array<i64: 2, 3>, scalar_prefetch = 0 : i64, scratch_operands = 1 : i64, tpu.core_type = #tpu.core_type<tc>, window_params = [{transform_indices = @transform_0, window_bounds = array<i64: 1, 2, 1, 8, 384>}, {transform_indices = @transform_1, window_bounds = array<i64: 1, 384, 256>}, {pipeline_mode = #tpu.pipeline_mode<synchronous>, transform_indices = @transform_2, window_bounds = array<i64: 1, 256>}, {transform_indices = @transform_3, window_bounds = array<i64: 1, 2, 8, 256>}]} {
    %c0_i32 = arith.constant 0 : i32
    %0 = arith.cmpi eq, %arg1, %c0_i32 : i32
    %1 = arith.extui %0 : i1 to i32
    %c0_i32_0 = arith.constant 0 : i32
    %2 = arith.cmpi ne, %1, %c0_i32_0 : i32
    scf.if %2 {
      %cst_13 = arith.constant 0.000000e+00 : f32
      %14 = vector.broadcast %cst_13 : f32 to vector<16x256xf32>
      %c0_14 = arith.constant 0 : index
      %c0_15 = arith.constant 0 : index
      %15 = vector.load %arg6[%c0_14, %c0_15] : memref<16x256xf32, #tpu.memory_space<vmem>>, vector<16x256xf32>
      tpu.vector_store %arg6[%c0_14, %c0_15], %14 {strides = array<i32>} : memref<16x256xf32, #tpu.memory_space<vmem>>, vector<16x256xf32>,
    } else {
    }
    %c0 = arith.constant 0 : index
    %c0_1 = arith.constant 0 : index
    %c0_2 = arith.constant 0 : index
    %c0_3 = arith.constant 0 : index
    %c0_4 = arith.constant 0 : index
    %3 = vector.load %arg2[%c0, %c0_1, %c0_2, %c0_3, %c0_4] : memref<1x2x1x8x384xbf16, #tpu.memory_space<vmem>>, vector<1x2x1x8x384xbf16>
    %c0_5 = arith.constant 0 : index
    %c0_6 = arith.constant 0 : index
    %4 = vector.load %arg6[%c0_5, %c0_6] : memref<16x256xf32, #tpu.memory_space<vmem>>, vector<16x256xf32>
    %5 = vector.shape_cast %3 : vector<1x2x1x8x384xbf16> to vector<16x384xbf16>
    %c0_7 = arith.constant 0 : index
    %c0_8 = arith.constant 0 : index
    %c0_9 = arith.constant 0 : index
    %6 = vector.load %arg3[%c0_7, %c0_8, %c0_9] : memref<1x384x256xbf16, #tpu.memory_space<vmem>>, vector<1x384x256xbf16>
    %7 = vector.shape_cast %6 : vector<1x384x256xbf16> to vector<384x256xbf16>
    %cst = arith.constant dense<0.000000e+00> : vector<16x256xf32>
    %8 = tpu.matmul %5, %7, %cst {dimension_numbers = #tpu.dot_dimension_numbers<[1], [0], [0], [1], [0, 0, 1, 1], [], []>} : vector<16x384xbf16>, vector<384x256xbf16>, vector<16x256xf32> -> vector<16x256xf32>
    %9 = arith.addf %4, %8 : vector<16x256xf32>
    %c0_10 = arith.constant 0 : index
    %c0_11 = arith.constant 0 : index
    %10 = vector.load %arg6[%c0_10, %c0_11] : memref<16x256xf32, #tpu.memory_space<vmem>>, vector<16x256xf32>
    tpu.vector_store %arg6[%c0_10, %c0_11], %9 {strides = array<i32>} : memref<16x256xf32, #tpu.memory_space<vmem>>, vector<16x256xf32>,
    %c2_i32 = arith.constant 2 : i32
    %11 = arith.cmpi eq, %arg1, %c2_i32 : i32
    %12 = arith.extui %11 : i1 to i32
    %c0_i32_12 = arith.constant 0 : i32
    %13 = arith.cmpi ne, %12, %c0_i32_12 : i32
    scf.if %13 {
      %c0_13 = arith.constant 0 : index
      %c0_14 = arith.constant 0 : index
      %14 = vector.load %arg6[%c0_13, %c0_14] : memref<16x256xf32, #tpu.memory_space<vmem>>, vector<16x256xf32>
      %c0_15 = arith.constant 0 : index
      %c0_16 = arith.constant 0 : index
      %15 = vector.load %arg4[%c0_15, %c0_16] : memref<1x256xf32, #tpu.memory_space<vmem>>, vector<1x256xf32>
      %16 = vector.broadcast %15 : vector<1x256xf32> to vector<16x256xf32>
      %17 = arith.addf %14, %16 : vector<16x256xf32>
      %cst_17 = arith.constant 0.000000e+00 : f32
      %18 = vector.broadcast %cst_17 : f32 to vector<16x256xf32>
      %19 = arith.cmpf oge, %17, %18 : vector<16x256xf32>
      %cst_18 = arith.constant 2.000000e-01 : f32
      %20 = vector.broadcast %cst_18 : f32 to vector<16x256xf32>
      %21 = arith.mulf %20, %17 : vector<16x256xf32>
      %22 = arith.select %19, %17, %21 : vector<16x256xi1>, vector<16x256xf32>
      %23 = vector.shape_cast %22 : vector<16x256xf32> to vector<1x2x8x256xf32>
      %24 = arith.truncf %23 : vector<1x2x8x256xf32> to vector<1x2x8x256xbf16>
      %c0_19 = arith.constant 0 : index
      %c0_20 = arith.constant 0 : index
      %c0_21 = arith.constant 0 : index
      %c0_22 = arith.constant 0 : index
      %25 = vector.load %arg5[%c0_19, %c0_20, %c0_21, %c0_22] : memref<1x2x8x256xbf16, #tpu.memory_space<vmem>>, vector<1x2x8x256xbf16>
      tpu.vector_store %arg5[%c0_19, %c0_20, %c0_21, %c0_22], %24 {strides = array<i32>} : memref<1x2x8x256xbf16, #tpu.memory_space<vmem>>, vector<1x2x8x256xbf16>,
    } else {
    }
    return
  }
  func.func @transform_0(%arg0: i32, %arg1: i32) -> (i32, i32, i32, i32, i32) {
    %c0_i32 = arith.constant 0 : i32
    %c0_i32_0 = arith.constant 0 : i32
    %c0_i32_1 = arith.constant 0 : i32
    %c0_i32_2 = arith.constant 0 : i32
    return %arg0, %c0_i32, %arg1, %c0_i32_0, %c0_i32_1 : i32, i32, i32, i32, i32
  }
  func.func @transform_1(%arg0: i32, %arg1: i32) -> (i32, i32, i32) {
    %c0_i32 = arith.constant 0 : i32
    %c0_i32_0 = arith.constant 0 : i32
    %c0_i32_1 = arith.constant 0 : i32
    return %arg1, %c0_i32, %c0_i32_0 : i32, i32, i32
  }
  func.func @transform_2(%arg0: i32, %arg1: i32) -> (i32, i32) {
    %c0_i32 = arith.constant 0 : i32
    %c0_i32_0 = arith.constant 0 : i32
    %c0_i32_1 = arith.constant 0 : i32
    return %c0_i32, %c0_i32_0 : i32, i32
  }
  func.func @transform_3(%arg0: i32, %arg1: i32) -> (i32, i32, i32, i32) {
    %c0_i32 = arith.constant 0 : i32
    %c0_i32_0 = arith.constant 0 : i32
    %c0_i32_1 = arith.constant 0 : i32
    %c0_i32_2 = arith.constant 0 : i32
    return %arg0, %c0_i32, %c0_i32_0, %c0_i32_1 : i32, i32, i32, i32
  }
}

module attributes {stable_mosaic.version = 11 : i64} {
  func.func @_convT_s3_kernel(%arg0: i32, %arg1: i32, %arg2: memref<1x2x8x256xbf16, #tpu.memory_space<vmem>>, %arg3: memref<1x256x384xbf16, #tpu.memory_space<vmem>>, %arg4: memref<1x384xf32, #tpu.memory_space<vmem>>, %arg5: memref<1x2x1x8x384xbf16, #tpu.memory_space<vmem>>) attributes {dimension_semantics = [#tpu.dimension_semantics<parallel>, #tpu.dimension_semantics<arbitrary>], iteration_bounds = array<i64: 2, 3>, scalar_prefetch = 0 : i64, scratch_operands = 0 : i64, tpu.core_type = #tpu.core_type<tc>, window_params = [{transform_indices = @transform_0, window_bounds = array<i64: 1, 2, 8, 256>}, {transform_indices = @transform_1, window_bounds = array<i64: 1, 256, 384>}, {pipeline_mode = #tpu.pipeline_mode<synchronous>, transform_indices = @transform_2, window_bounds = array<i64: 1, 384>}, {transform_indices = @transform_3, window_bounds = array<i64: 1, 2, 1, 8, 384>}]} {
    %c0 = arith.constant 0 : index
    %c0_0 = arith.constant 0 : index
    %c0_1 = arith.constant 0 : index
    %c0_2 = arith.constant 0 : index
    %0 = vector.load %arg2[%c0, %c0_0, %c0_1, %c0_2] : memref<1x2x8x256xbf16, #tpu.memory_space<vmem>>, vector<1x2x8x256xbf16>
    %1 = vector.shape_cast %0 : vector<1x2x8x256xbf16> to vector<16x256xbf16>
    %c0_3 = arith.constant 0 : index
    %c0_4 = arith.constant 0 : index
    %c0_5 = arith.constant 0 : index
    %2 = vector.load %arg3[%c0_3, %c0_4, %c0_5] : memref<1x256x384xbf16, #tpu.memory_space<vmem>>, vector<1x256x384xbf16>
    %3 = vector.shape_cast %2 : vector<1x256x384xbf16> to vector<256x384xbf16>
    %cst = arith.constant dense<0.000000e+00> : vector<16x384xf32>
    %4 = tpu.matmul %1, %3, %cst {dimension_numbers = #tpu.dot_dimension_numbers<[1], [0], [0], [1], [0, 0, 1, 1], [], []>} : vector<16x256xbf16>, vector<256x384xbf16>, vector<16x384xf32> -> vector<16x384xf32>
    %c0_6 = arith.constant 0 : index
    %c0_7 = arith.constant 0 : index
    %5 = vector.load %arg4[%c0_6, %c0_7] : memref<1x384xf32, #tpu.memory_space<vmem>>, vector<1x384xf32>
    %6 = vector.broadcast %5 : vector<1x384xf32> to vector<16x384xf32>
    %7 = arith.addf %4, %6 : vector<16x384xf32>
    %cst_8 = arith.constant 0.000000e+00 : f32
    %8 = vector.broadcast %cst_8 : f32 to vector<16x384xf32>
    %9 = arith.cmpf oge, %7, %8 : vector<16x384xf32>
    %cst_9 = arith.constant 2.000000e-01 : f32
    %10 = vector.broadcast %cst_9 : f32 to vector<16x384xf32>
    %11 = arith.mulf %10, %7 : vector<16x384xf32>
    %12 = arith.select %9, %7, %11 : vector<16x384xi1>, vector<16x384xf32>
    %13 = vector.shape_cast %12 : vector<16x384xf32> to vector<1x2x1x8x384xf32>
    %14 = arith.truncf %13 : vector<1x2x1x8x384xf32> to vector<1x2x1x8x384xbf16>
    %c0_10 = arith.constant 0 : index
    %c0_11 = arith.constant 0 : index
    %c0_12 = arith.constant 0 : index
    %c0_13 = arith.constant 0 : index
    %c0_14 = arith.constant 0 : index
    %15 = vector.load %arg5[%c0_10, %c0_11, %c0_12, %c0_13, %c0_14] : memref<1x2x1x8x384xbf16, #tpu.memory_space<vmem>>, vector<1x2x1x8x384xbf16>
    tpu.vector_store %arg5[%c0_10, %c0_11, %c0_12, %c0_13, %c0_14], %14 {strides = array<i32>} : memref<1x2x1x8x384xbf16, #tpu.memory_space<vmem>>, vector<1x2x1x8x384xbf16>,
    return
  }
  func.func @transform_0(%arg0: i32, %arg1: i32) -> (i32, i32, i32, i32) {
    %c0_i32 = arith.constant 0 : i32
    %c0_i32_0 = arith.constant 0 : i32
    %c0_i32_1 = arith.constant 0 : i32
    %c0_i32_2 = arith.constant 0 : i32
    return %arg0, %c0_i32, %c0_i32_0, %c0_i32_1 : i32, i32, i32, i32
  }
  func.func @transform_1(%arg0: i32, %arg1: i32) -> (i32, i32, i32) {
    %c0_i32 = arith.constant 0 : i32
    %c0_i32_0 = arith.constant 0 : i32
    %c0_i32_1 = arith.constant 0 : i32
    return %arg1, %c0_i32, %c0_i32_0 : i32, i32, i32
  }
  func.func @transform_2(%arg0: i32, %arg1: i32) -> (i32, i32) {
    %c0_i32 = arith.constant 0 : i32
    %c0_i32_0 = arith.constant 0 : i32
    %c0_i32_1 = arith.constant 0 : i32
    return %c0_i32, %c0_i32_0 : i32, i32
  }
  func.func @transform_3(%arg0: i32, %arg1: i32) -> (i32, i32, i32, i32, i32) {
    %c0_i32 = arith.constant 0 : i32
    %c0_i32_0 = arith.constant 0 : i32
    %c0_i32_1 = arith.constant 0 : i32
    %c0_i32_2 = arith.constant 0 : i32
    return %arg0, %c0_i32, %arg1, %c0_i32_0, %c0_i32_1 : i32, i32, i32, i32, i32
  }
}

module attributes {stable_mosaic.version = 11 : i64} {
  func.func @_convT_s3_kernel(%arg0: i32, %arg1: i32, %arg2: memref<1x6x8x128xbf16, #tpu.memory_space<vmem>>, %arg3: memref<1x128x192xbf16, #tpu.memory_space<vmem>>, %arg4: memref<1x192xf32, #tpu.memory_space<vmem>>, %arg5: memref<1x6x1x8x192xbf16, #tpu.memory_space<vmem>>) attributes {dimension_semantics = [#tpu.dimension_semantics<parallel>, #tpu.dimension_semantics<arbitrary>], iteration_bounds = array<i64: 2, 3>, scalar_prefetch = 0 : i64, scratch_operands = 0 : i64, tpu.core_type = #tpu.core_type<tc>, window_params = [{transform_indices = @transform_0, window_bounds = array<i64: 1, 6, 8, 128>}, {transform_indices = @transform_1, window_bounds = array<i64: 1, 128, 192>}, {pipeline_mode = #tpu.pipeline_mode<synchronous>, transform_indices = @transform_2, window_bounds = array<i64: 1, 192>}, {transform_indices = @transform_3, window_bounds = array<i64: 1, 6, 1, 8, 192>}]} {
    %c0 = arith.constant 0 : index
    %c0_0 = arith.constant 0 : index
    %c0_1 = arith.constant 0 : index
    %c0_2 = arith.constant 0 : index
    %0 = vector.load %arg2[%c0, %c0_0, %c0_1, %c0_2] : memref<1x6x8x128xbf16, #tpu.memory_space<vmem>>, vector<1x6x8x128xbf16>
    %1 = vector.shape_cast %0 : vector<1x6x8x128xbf16> to vector<48x128xbf16>
    %c0_3 = arith.constant 0 : index
    %c0_4 = arith.constant 0 : index
    %c0_5 = arith.constant 0 : index
    %2 = vector.load %arg3[%c0_3, %c0_4, %c0_5] : memref<1x128x192xbf16, #tpu.memory_space<vmem>>, vector<1x128x192xbf16>
    %3 = vector.shape_cast %2 : vector<1x128x192xbf16> to vector<128x192xbf16>
    %cst = arith.constant dense<0.000000e+00> : vector<48x192xf32>
    %4 = tpu.matmul %1, %3, %cst {dimension_numbers = #tpu.dot_dimension_numbers<[1], [0], [0], [1], [0, 0, 1, 1], [], []>} : vector<48x128xbf16>, vector<128x192xbf16>, vector<48x192xf32> -> vector<48x192xf32>
    %c0_6 = arith.constant 0 : index
    %c0_7 = arith.constant 0 : index
    %5 = vector.load %arg4[%c0_6, %c0_7] : memref<1x192xf32, #tpu.memory_space<vmem>>, vector<1x192xf32>
    %6 = vector.broadcast %5 : vector<1x192xf32> to vector<48x192xf32>
    %7 = arith.addf %4, %6 : vector<48x192xf32>
    %cst_8 = arith.constant 0.000000e+00 : f32
    %8 = vector.broadcast %cst_8 : f32 to vector<48x192xf32>
    %9 = arith.cmpf oge, %7, %8 : vector<48x192xf32>
    %cst_9 = arith.constant 2.000000e-01 : f32
    %10 = vector.broadcast %cst_9 : f32 to vector<48x192xf32>
    %11 = arith.mulf %10, %7 : vector<48x192xf32>
    %12 = arith.select %9, %7, %11 : vector<48x192xi1>, vector<48x192xf32>
    %13 = vector.shape_cast %12 : vector<48x192xf32> to vector<1x6x1x8x192xf32>
    %14 = arith.truncf %13 : vector<1x6x1x8x192xf32> to vector<1x6x1x8x192xbf16>
    %c0_10 = arith.constant 0 : index
    %c0_11 = arith.constant 0 : index
    %c0_12 = arith.constant 0 : index
    %c0_13 = arith.constant 0 : index
    %c0_14 = arith.constant 0 : index
    %15 = vector.load %arg5[%c0_10, %c0_11, %c0_12, %c0_13, %c0_14] : memref<1x6x1x8x192xbf16, #tpu.memory_space<vmem>>, vector<1x6x1x8x192xbf16>
    tpu.vector_store %arg5[%c0_10, %c0_11, %c0_12, %c0_13, %c0_14], %14 {strides = array<i32>} : memref<1x6x1x8x192xbf16, #tpu.memory_space<vmem>>, vector<1x6x1x8x192xbf16>,
    return
  }
  func.func @transform_0(%arg0: i32, %arg1: i32) -> (i32, i32, i32, i32) {
    %c0_i32 = arith.constant 0 : i32
    %c0_i32_0 = arith.constant 0 : i32
    %c0_i32_1 = arith.constant 0 : i32
    %c0_i32_2 = arith.constant 0 : i32
    return %arg0, %c0_i32, %c0_i32_0, %c0_i32_1 : i32, i32, i32, i32
  }
  func.func @transform_1(%arg0: i32, %arg1: i32) -> (i32, i32, i32) {
    %c0_i32 = arith.constant 0 : i32
    %c0_i32_0 = arith.constant 0 : i32
    %c0_i32_1 = arith.constant 0 : i32
    return %arg1, %c0_i32, %c0_i32_0 : i32, i32, i32
  }
  func.func @transform_2(%arg0: i32, %arg1: i32) -> (i32, i32) {
    %c0_i32 = arith.constant 0 : i32
    %c0_i32_0 = arith.constant 0 : i32
    %c0_i32_1 = arith.constant 0 : i32
    return %c0_i32, %c0_i32_0 : i32, i32
  }
  func.func @transform_3(%arg0: i32, %arg1: i32) -> (i32, i32, i32, i32, i32) {
    %c0_i32 = arith.constant 0 : i32
    %c0_i32_0 = arith.constant 0 : i32
    %c0_i32_1 = arith.constant 0 : i32
    %c0_i32_2 = arith.constant 0 : i32
    return %arg0, %c0_i32, %arg1, %c0_i32_0, %c0_i32_1 : i32, i32, i32, i32, i32
  }
}

module attributes {stable_mosaic.version = 11 : i64} {
  func.func @_convT_s3_kernel(%arg0: i32, %arg1: i32, %arg2: memref<1x18x24x64xbf16, #tpu.memory_space<vmem>>, %arg3: memref<1x64x96xbf16, #tpu.memory_space<vmem>>, %arg4: memref<1x96xf32, #tpu.memory_space<vmem>>, %arg5: memref<1x18x1x24x96xbf16, #tpu.memory_space<vmem>>) attributes {dimension_semantics = [#tpu.dimension_semantics<parallel>, #tpu.dimension_semantics<arbitrary>], iteration_bounds = array<i64: 2, 3>, scalar_prefetch = 0 : i64, scratch_operands = 0 : i64, tpu.core_type = #tpu.core_type<tc>, window_params = [{transform_indices = @transform_0, window_bounds = array<i64: 1, 18, 24, 64>}, {transform_indices = @transform_1, window_bounds = array<i64: 1, 64, 96>}, {pipeline_mode = #tpu.pipeline_mode<synchronous>, transform_indices = @transform_2, window_bounds = array<i64: 1, 96>}, {transform_indices = @transform_3, window_bounds = array<i64: 1, 18, 1, 24, 96>}]} {
    %c0 = arith.constant 0 : index
    %c0_0 = arith.constant 0 : index
    %c0_1 = arith.constant 0 : index
    %c0_2 = arith.constant 0 : index
    %0 = vector.load %arg2[%c0, %c0_0, %c0_1, %c0_2] : memref<1x18x24x64xbf16, #tpu.memory_space<vmem>>, vector<1x18x24x64xbf16>
    %1 = vector.shape_cast %0 : vector<1x18x24x64xbf16> to vector<432x64xbf16>
    %c0_3 = arith.constant 0 : index
    %c0_4 = arith.constant 0 : index
    %c0_5 = arith.constant 0 : index
    %2 = vector.load %arg3[%c0_3, %c0_4, %c0_5] : memref<1x64x96xbf16, #tpu.memory_space<vmem>>, vector<1x64x96xbf16>
    %3 = vector.shape_cast %2 : vector<1x64x96xbf16> to vector<64x96xbf16>
    %cst = arith.constant dense<0.000000e+00> : vector<432x96xf32>
    %4 = tpu.matmul %1, %3, %cst {dimension_numbers = #tpu.dot_dimension_numbers<[1], [0], [0], [1], [0, 0, 1, 1], [], []>} : vector<432x64xbf16>, vector<64x96xbf16>, vector<432x96xf32> -> vector<432x96xf32>
    %c0_6 = arith.constant 0 : index
    %c0_7 = arith.constant 0 : index
    %5 = vector.load %arg4[%c0_6, %c0_7] : memref<1x96xf32, #tpu.memory_space<vmem>>, vector<1x96xf32>
    %6 = vector.broadcast %5 : vector<1x96xf32> to vector<432x96xf32>
    %7 = arith.addf %4, %6 : vector<432x96xf32>
    %cst_8 = arith.constant 0.000000e+00 : f32
    %8 = vector.broadcast %cst_8 : f32 to vector<432x96xf32>
    %9 = arith.cmpf oge, %7, %8 : vector<432x96xf32>
    %cst_9 = arith.constant 2.000000e-01 : f32
    %10 = vector.broadcast %cst_9 : f32 to vector<432x96xf32>
    %11 = arith.mulf %10, %7 : vector<432x96xf32>
    %12 = arith.select %9, %7, %11 : vector<432x96xi1>, vector<432x96xf32>
    %13 = vector.shape_cast %12 : vector<432x96xf32> to vector<1x18x1x24x96xf32>
    %14 = arith.truncf %13 : vector<1x18x1x24x96xf32> to vector<1x18x1x24x96xbf16>
    %c0_10 = arith.constant 0 : index
    %c0_11 = arith.constant 0 : index
    %c0_12 = arith.constant 0 : index
    %c0_13 = arith.constant 0 : index
    %c0_14 = arith.constant 0 : index
    %15 = vector.load %arg5[%c0_10, %c0_11, %c0_12, %c0_13, %c0_14] : memref<1x18x1x24x96xbf16, #tpu.memory_space<vmem>>, vector<1x18x1x24x96xbf16>
    tpu.vector_store %arg5[%c0_10, %c0_11, %c0_12, %c0_13, %c0_14], %14 {strides = array<i32>} : memref<1x18x1x24x96xbf16, #tpu.memory_space<vmem>>, vector<1x18x1x24x96xbf16>,
    return
  }
  func.func @transform_0(%arg0: i32, %arg1: i32) -> (i32, i32, i32, i32) {
    %c0_i32 = arith.constant 0 : i32
    %c0_i32_0 = arith.constant 0 : i32
    %c0_i32_1 = arith.constant 0 : i32
    %c0_i32_2 = arith.constant 0 : i32
    return %arg0, %c0_i32, %c0_i32_0, %c0_i32_1 : i32, i32, i32, i32
  }
  func.func @transform_1(%arg0: i32, %arg1: i32) -> (i32, i32, i32) {
    %c0_i32 = arith.constant 0 : i32
    %c0_i32_0 = arith.constant 0 : i32
    %c0_i32_1 = arith.constant 0 : i32
    return %arg1, %c0_i32, %c0_i32_0 : i32, i32, i32
  }
  func.func @transform_2(%arg0: i32, %arg1: i32) -> (i32, i32) {
    %c0_i32 = arith.constant 0 : i32
    %c0_i32_0 = arith.constant 0 : i32
    %c0_i32_1 = arith.constant 0 : i32
    return %c0_i32, %c0_i32_0 : i32, i32
  }
  func.func @transform_3(%arg0: i32, %arg1: i32) -> (i32, i32, i32, i32, i32) {
    %c0_i32 = arith.constant 0 : i32
    %c0_i32_0 = arith.constant 0 : i32
    %c0_i32_1 = arith.constant 0 : i32
    %c0_i32_2 = arith.constant 0 : i32
    return %arg0, %c0_i32, %arg1, %c0_i32_0, %c0_i32_1 : i32, i32, i32, i32, i32
  }
}

module attributes {stable_mosaic.version = 11 : i64} {
  func.func @_matmul_bias_act_kernel(%arg0: i32, %arg1: memref<688x512xbf16, #tpu.memory_space<vmem>>, %arg2: memref<512x128xbf16, #tpu.memory_space<vmem>>, %arg3: memref<1x128xf32, #tpu.memory_space<vmem>>, %arg4: memref<688x128xbf16, #tpu.memory_space<vmem>>) attributes {dimension_semantics = [#tpu.dimension_semantics<parallel>], iteration_bounds = array<i64: 2>, scalar_prefetch = 0 : i64, scratch_operands = 0 : i64, tpu.core_type = #tpu.core_type<tc>, window_params = [{transform_indices = @transform_0, window_bounds = array<i64: 688, 512>}, {pipeline_mode = #tpu.pipeline_mode<synchronous>, transform_indices = @transform_1, window_bounds = array<i64: 512, 128>}, {pipeline_mode = #tpu.pipeline_mode<synchronous>, transform_indices = @transform_2, window_bounds = array<i64: 1, 128>}, {transform_indices = @transform_3, window_bounds = array<i64: 688, 128>}]} {
    %c0 = arith.constant 0 : index
    %c0_0 = arith.constant 0 : index
    %0 = vector.load %arg1[%c0, %c0_0] : memref<688x512xbf16, #tpu.memory_space<vmem>>, vector<688x512xbf16>
    %c0_1 = arith.constant 0 : index
    %c0_2 = arith.constant 0 : index
    %1 = vector.load %arg2[%c0_1, %c0_2] : memref<512x128xbf16, #tpu.memory_space<vmem>>, vector<512x128xbf16>
    %cst = arith.constant dense<0.000000e+00> : vector<688x128xf32>
    %2 = tpu.matmul %0, %1, %cst {dimension_numbers = #tpu.dot_dimension_numbers<[1], [0], [0], [1], [0, 0, 1, 1], [], []>} : vector<688x512xbf16>, vector<512x128xbf16>, vector<688x128xf32> -> vector<688x128xf32>
    %c0_3 = arith.constant 0 : index
    %c0_4 = arith.constant 0 : index
    %3 = vector.load %arg3[%c0_3, %c0_4] : memref<1x128xf32, #tpu.memory_space<vmem>>, vector<1x128xf32>
    %4 = vector.broadcast %3 : vector<1x128xf32> to vector<688x128xf32>
    %5 = arith.addf %2, %4 : vector<688x128xf32>
    %6 = math.tanh %5 : vector<688x128xf32>
    %7 = arith.truncf %6 : vector<688x128xf32> to vector<688x128xbf16>
    %c0_5 = arith.constant 0 : index
    %c0_6 = arith.constant 0 : index
    %8 = vector.load %arg4[%c0_5, %c0_6] : memref<688x128xbf16, #tpu.memory_space<vmem>>, vector<688x128xbf16>
    tpu.vector_store %arg4[%c0_5, %c0_6], %7 {strides = array<i32>} : memref<688x128xbf16, #tpu.memory_space<vmem>>, vector<688x128xbf16>,
    return
  }
  func.func @transform_0(%arg0: i32) -> (i32, i32) {
    %c0_i32 = arith.constant 0 : i32
    %c0_i32_0 = arith.constant 0 : i32
    return %arg0, %c0_i32 : i32, i32
  }
  func.func @transform_1(%arg0: i32) -> (i32, i32) {
    %c0_i32 = arith.constant 0 : i32
    %c0_i32_0 = arith.constant 0 : i32
    %c0_i32_1 = arith.constant 0 : i32
    return %c0_i32, %c0_i32_0 : i32, i32
  }
  func.func @transform_2(%arg0: i32) -> (i32, i32) {
    %c0_i32 = arith.constant 0 : i32
    %c0_i32_0 = arith.constant 0 : i32
    %c0_i32_1 = arith.constant 0 : i32
    return %c0_i32, %c0_i32_0 : i32, i32
  }
  func.func @transform_3(%arg0: i32) -> (i32, i32) {
    %c0_i32 = arith.constant 0 : i32
    %c0_i32_0 = arith.constant 0 : i32
    return %arg0, %c0_i32 : i32, i32
  }
}

</mosaic_0001>

<bundles_post_ra>
// kernel: tile.33
= control target key start
LH: loop header
LB: loop body
LE: loop exit
PB: predicated region body
PF: predicated region fallthrough
CT: control target
= control target key end

     0   :  { %s22_s0 = inlined_call_operand.vmem [shape: f32[32], index: 0, kind: input, shape index: {}]   ;;  %s23_s1 = inlined_call_operand.vmem [shape: f32[4,32], index: 1, kind: output, shape index: {}]  }
   0x1   :  { %v4_v0 = vld [vmem:[%s22_s0] ss:$0 sm:$0xff] }
   0x2   :  { %5 = vst [vmem:[%s23_s1] sm:$0xf] %v4_v0 }

// kernel: tile.34
= control target key start
LH: loop header
LB: loop body
LE: loop exit
PB: predicated region body
PF: predicated region fallthrough
CT: control target
= control target key end

     0   :  { %vm8_vm0 = vcmask 261120   ;;  %s40_s8 = smov 32   ;;  %s41_s9 = smov 64   ;;  %vm14_vm1 = vcmask 1048320   ;;  %vm20_vm2 = vcmask 785920   ;;  %vm26_vm3 = vcmask 523520   ;;  %s58_s0 = inlined_call_operand.vmem [shape: f32[4,32], index: 0, kind: input, shape index: {}]   ;;  %s59_s1 = inlined_call_operand.vmem [shape: f32[1,128], index: 1, kind: output, shape index: {}]  }
   0x1   :  { %v5_v0 = vld [vmem:[%s58_s0] sm:$0xf]  ;;  %s39_s0 = smov 96  }
   0x2   :  { %6 = vst [vmem:[#allocation1] sm:$0xf] %v5_v0 }
   0x9   :  { %v11_v1 = vld [vmem:[#allocation1 + $0x3] sm:$0x1]   ;;  %v23_v2 = vld [vmem:[#allocation1 + $0x1] sm:$0x1]   ;;  %v7_v3 = vld [vmem:[#allocation1] sm:$0x1]  }
   0xa   :  { %12 = vrot.lane.b32.xlu0 %v11_v1, %s39_s0  ;;  %24 = vrot.lane.b32.xlu1 %v23_v2, %s40_s8  ;;  %v17_v4 = vld [vmem:[#allocation1 + $0x2] sm:$0x1]   ;;  %9 = vst.msk [vmem:[#allocation0] sm:$0x1] %vm8_vm0, %v7_v3  }
   0xe   :  { %18 = vrot.lane.b32.xlu0 %v17_v4, %s41_s9 }
  0x7c   :  { %v13_v5 = vpop.permute.xlu0 %12   ;;  %v25_v6 = vpop.permute.xlu1 %24  }
  0x7d   :  { %15 = vst.msk [vmem:[#allocation0] sm:$0x1] %vm14_vm1, %v13_v5  }
  0x80   :  { %v19_v7 = vpop.permute.xlu0 %18  }
  0x81   :  { %21 = vst.msk [vmem:[#allocation0] sm:$0x1] %vm20_vm2, %v19_v7  }
  0x82   :  { %27 = vst.msk [vmem:[#allocation0] sm:$0x1] %vm26_vm3, %v25_v6  }
  0x89   :  { %v32_v8 = vld [vmem:[#allocation0] sm:$0x1] }
  0x8a   :  { %35 = vst [vmem:[%s59_s1] sm:$0x1] %v32_v8 }

// kernel: conv_autoencoder_forward.8
= control target key start
LH: loop header
LB: loop body
LE: loop exit
PB: predicated region body
PF: predicated region fallthrough
CT: control target
= control target key end

     0   :  { %s2953_s12 = smov 0   ;;  %s3324_s0 = inlined_call_operand.vmem [shape: bf16[1472,180], index: 0, kind: input, shape index: {}]   ;;  %s3325_s1 = inlined_call_operand.vmem [shape: bf16[180,128], index: 1, kind: input, shape index: {}]   ;;  %s3326_s2 = inlined_call_operand.vmem [shape: f32[1,128], index: 2, kind: input, shape index: {}]   ;;  %s3327_s3 = inlined_call_operand.vmem [shape: bf16[1472,128], index: 3, kind: output, shape index: {}]  }
   0x1 LB: > { %s2119_s13 = sadd.s32 4294967295, %s2930_s12   ;;  %p2123_p0 = scmp.ge.s32.totalorder %s2930_s12, 1  ;;  %s2930_s12 = sphi %s2953_s12, %s13_s12  }
   0x2   : > { %p139_p1 = scmp.lt.s32.totalorder %s2930_s12, 3 }
   0x4   : > { %p140_p2 = pnand %p2123_p0, %p139_p1 }
   0x5   : > { %s164_s18 = smul.u32 (!%p140_p2), 92, %s2119_s13 }
   0x6   : > { %143 = sbr.rel (%p140_p2) target bundleno = 441 (0x1b9), region = 32 }
   0x7   : > { %p165_p3 = scmp.lt.s32.totalorder (!%p140_p2), %s164_s18, 183 }
   0xb   : > { %v2773_v0 = vld [vmem:[%s3325_s1 + $0x38] sm:$0xff]   ;;  %v2932_v1 = vmov 0   ;;  %v2774_v2 = vld [vmem:[%s3325_s1 + $0x30] sm:$0xff]   ;;  %v2775_v3 = vld [vmem:[%s3325_s1 + $0x28] sm:$0xff]   ;;  %s3329_s18 = smov (!%p165_p3, %s164_s18), 183  ;;  %vm783_vm0 = vcmask 424960  }
   0xc   : > { %926 = vmatprep.subr.bf16.mxu0 %v2932_v1  ;;  %2740 = vmatprep.subr.bf16.mxu1 %v2932_v1  ;;  %v2776_v4 = vld [vmem:[%s3325_s1 + $0x20] sm:$0xff]   ;;  %s2372_s23 = sshll.u32 %s3329_s18, 3  ;;  %v2777_v5 = vld [vmem:[%s3325_s1 + $0x18] sm:$0xff]   ;;  %v2778_v8 = vld [vmem:[%s3325_s1 + $0x10] sm:$0xff]   ;;  %vm922_vm1 = vcmask 1041408   ;;  %s2126_s20 = sshll.u32 %s3329_s18, 2 }
   0xd   : > { %927 = vmatpush1.bf16.msra.mxu0 %v2773_v0  ;;  %2752 = vmatpush1.bf16.msra.mxu1 %v2773_v0  ;;  %s2987_s26 = scalar_lea.vmem %s3324_s0, %s2372_s23  ;;  %v2779_v9 = vld [vmem:[%s3325_s1 + $0x8] sm:$0xff]   ;;  %v2780_v10 = vld [vmem:[%s3325_s1] sm:$0xff]   ;;  %v2781_v11 = vld [vmem:[%s3325_s1 + $0x58] ss:$0 sps:$4 sm:$0x33]   ;;  %s3180_s23 = scalar_lea.vmem %s3327_s3, %s2126_s20 }
   0xe   : > { %928 = vmatprep.subr.bf16.mxu0 %v2932_v1  ;;  %2741 = vmatprep.subr.bf16.mxu1 %v2932_v1  ;;  %v2787_v6 = vld [vmem:[%s2987_s26 + $0x4] ss:$8 sps:$4 sm:$0xff]   ;;  %v2790_v7 = vld [vmem:[%s2987_s26 + $0x174] ss:$8 sps:$4 sm:$0xff]   ;;  %v924_v12 = vsel %vm922_vm1, %v2781_v11, 0 }
   0xf   : > { %2232 = vmatprep.mubr.msk.bf16.mxu0 %vm783_vm0, %v2787_v6  ;;  %2255 = vmatprep.mubr.msk.bf16.mxu1 %vm783_vm0, %v2790_v7  ;;  %v2782_v13 = vld [vmem:[%s3325_s1 + $0x50] sm:$0xff]   ;;  %v2783_v14 = vld [vmem:[%s3325_s1 + $0x48] sm:$0xff]   ;;  %v2784_v15 = vld [vmem:[%s3325_s1 + $0x40] sm:$0xff]  }
  0x10   : > { %v2785_v16 = vld [vmem:[%s2987_s26] ss:$8 sps:$4 sm:$0xff]   ;;  %v2788_v17 = vld [vmem:[%s2987_s26 + $0x170] ss:$8 sps:$4 sm:$0xff]   ;;  %v2791_v18 = vld [vmem:[%s2987_s26 + $0x14] ss:$8 sps:$4 sm:$0xff]  }
  0x11   : > { %929 = vmatpush1.bf16.msra.mxu0 %v2774_v2  ;;  %2753 = vmatpush1.bf16.msra.mxu1 %v2774_v2  ;;  %v2793_v19 = vld [vmem:[%s2987_s26 + $0x184] ss:$8 sps:$4 sm:$0xff]   ;;  %v2795_v20 = vld [vmem:[%s2987_s26 + $0x10] ss:$8 sps:$4 sm:$0xff]   ;;  %v2796_v21 = vld [vmem:[%s2987_s26 + $0x180] ss:$8 sps:$4 sm:$0xff]  }
  0x12   : > { %930 = vmatprep.subr.bf16.mxu0 %v2932_v1  ;;  %2742 = vmatprep.subr.bf16.mxu1 %v2932_v1  ;;  %v2797_v22 = vld [vmem:[%s2987_s26 + $0x24] ss:$8 sps:$4 sm:$0xff]   ;;  %v2799_v23 = vld [vmem:[%s2987_s26 + $0x194] ss:$8 sps:$4 sm:$0xff]   ;;  %v2801_v24 = vld [vmem:[%s2987_s26 + $0x20] ss:$8 sps:$4 sm:$0xff]  }
  0x13   : > { %v2802_v25 = vld [vmem:[%s2987_s26 + $0x190] ss:$8 sps:$4 sm:$0xff]   ;;  %v2803_v26 = vld [vmem:[%s2987_s26 + $0x34] ss:$8 sps:$4 sm:$0xff]   ;;  %v2805_v27 = vld [vmem:[%s2987_s26 + $0x1a4] ss:$8 sps:$4 sm:$0xff]  }
  0x14   : > { %v2807_v28 = vld [vmem:[%s2987_s26 + $0x30] ss:$8 sps:$4 sm:$0xff]   ;;  %v2808_v29 = vld [vmem:[%s2987_s26 + $0x1a0] ss:$8 sps:$4 sm:$0xff]   ;;  %v2809_v30 = vld [vmem:[%s2987_s26 + $0x44] ss:$8 sps:$4 sm:$0xff]  }
  0x15   : > { %931 = vmatpush1.bf16.msra.mxu0 %v2775_v3  ;;  %2754 = vmatpush1.bf16.msra.mxu1 %v2775_v3  ;;  %v2811_v31 = vld [vmem:[%s2987_s26 + $0x1b4] ss:$8 sps:$4 sm:$0xff]   ;;  %v2813_v32 = vld [vmem:[%s2987_s26 + $0x40] ss:$8 sps:$4 sm:$0xff]   ;;  %v2814_v33 = vld [vmem:[%s2987_s26 + $0x1b0] ss:$8 sps:$4 sm:$0xff]  }
  0x16   : > { %932 = vmatprep.subr.bf16.mxu0 %v2932_v1  ;;  %2743 = vmatprep.subr.bf16.mxu1 %v2932_v1  ;;  %v2815_v34 = vld [vmem:[%s2987_s26 + $0x54] ss:$8 sps:$4 sm:$0xff]   ;;  %v2817_v35 = vld [vmem:[%s2987_s26 + $0x1c4] ss:$8 sps:$4 sm:$0xff]   ;;  %v2819_v36 = vld [vmem:[%s2987_s26 + $0x50] ss:$8 sps:$4 sm:$0xff]  }
  0x17   : > { %v2820_v37 = vld [vmem:[%s2987_s26 + $0x1c0] ss:$8 sps:$4 sm:$0xff]   ;;  %v2821_v38 = vld [vmem:[%s2987_s26 + $0x64] ss:$8 sps:$4 sm:$0xff]   ;;  %v2823_v39 = vld [vmem:[%s2987_s26 + $0x1d4] ss:$8 sps:$4 sm:$0xff]  }
  0x18   : > { %v2825_v40 = vld [vmem:[%s2987_s26 + $0x60] ss:$8 sps:$4 sm:$0xff]   ;;  %v2826_v41 = vld [vmem:[%s2987_s26 + $0x1d0] ss:$8 sps:$4 sm:$0xff]   ;;  %v2827_v42 = vld [vmem:[%s2987_s26 + $0x74] ss:$8 sps:$4 sm:$0xff]  }
  0x19   : > { %933 = vmatpush1.bf16.msra.mxu0 %v2776_v4  ;;  %2755 = vmatpush1.bf16.msra.mxu1 %v2776_v4  ;;  %v2829_v43 = vld [vmem:[%s2987_s26 + $0x1e4] ss:$8 sps:$4 sm:$0xff]   ;;  %v2831_v44 = vld [vmem:[%s2987_s26 + $0x70] ss:$8 sps:$4 sm:$0xff]   ;;  %v2832_v45 = vld [vmem:[%s2987_s26 + $0x1e0] ss:$8 sps:$4 sm:$0xff]  }
  0x1a   : > { %934 = vmatprep.subr.bf16.mxu0 %v2932_v1  ;;  %2744 = vmatprep.subr.bf16.mxu1 %v2932_v1  ;;  %v2833_v46 = vld [vmem:[%s2987_s26 + $0x84] ss:$8 sps:$4 sm:$0xff]   ;;  %v2835_v47 = vld [vmem:[%s2987_s26 + $0x1f4] ss:$8 sps:$4 sm:$0xff]   ;;  %v2837_v48 = vld [vmem:[%s2987_s26 + $0x80] ss:$8 sps:$4 sm:$0xff]  }
  0x1b   : > { %v2838_v49 = vld [vmem:[%s2987_s26 + $0x1f0] ss:$8 sps:$4 sm:$0xff]   ;;  %v2839_v50 = vld [vmem:[%s2987_s26 + $0x94] ss:$8 sps:$4 sm:$0xff]   ;;  %v2841_v51 = vld [vmem:[%s2987_s26 + $0x204] ss:$8 sps:$4 sm:$0xff]  }
  0x1c   : > { %v2843_v52 = vld [vmem:[%s2987_s26 + $0x90] ss:$8 sps:$4 sm:$0xff]   ;;  %v2844_v53 = vld [vmem:[%s2987_s26 + $0x200] ss:$8 sps:$4 sm:$0xff]   ;;  %v2845_v54 = vld [vmem:[%s2987_s26 + $0xa4] ss:$8 sps:$4 sm:$0xff]  }
  0x1d   : > { %935 = vmatpush1.bf16.msra.mxu0 %v2777_v5  ;;  %2756 = vmatpush1.bf16.msra.mxu1 %v2777_v5  ;;  %v2847_v55 = vld [vmem:[%s2987_s26 + $0x214] ss:$8 sps:$4 sm:$0xff]   ;;  %v2849_v56 = vld [vmem:[%s2987_s26 + $0xa0] ss:$8 sps:$4 sm:$0xff]   ;;  %v2850_v57 = vld [vmem:[%s2987_s26 + $0x210] ss:$8 sps:$4 sm:$0xff]  }
  0x1e   : > { %936 = vmatprep.subr.bf16.mxu0 %v2932_v1  ;;  %2745 = vmatprep.subr.bf16.mxu1 %v2932_v1  ;;  %v2851_v58 = vld [vmem:[%s2987_s26 + $0xb4] ss:$8 sps:$4 sm:$0xff]   ;;  %v2853_v59 = vld [vmem:[%s2987_s26 + $0x224] ss:$8 sps:$4 sm:$0xff]   ;;  %v2855_v60 = vld [vmem:[%s2987_s26 + $0xb0] ss:$8 sps:$4 sm:$0xff]  }
  0x1f   : > { %v2856_v61 = vld [vmem:[%s2987_s26 + $0x220] ss:$8 sps:$4 sm:$0xff]   ;;  %v2857_v62 = vld [vmem:[%s2987_s26 + $0xc4] ss:$8 sps:$4 sm:$0xff]   ;;  %v2859_v63 = vld [vmem:[%s2987_s26 + $0x234] ss:$8 sps:$4 sm:$0xff]  }
  0x20   : > { %v2861_v0 = vld [vmem:[%s2987_s26 + $0xc0] ss:$8 sps:$4 sm:$0xff]   ;;  %v2863_v2 = vld [vmem:[%s2987_s26 + $0xd4] ss:$8 sps:$4 sm:$0xff]   ;;  %v2865_v3 = vld [vmem:[%s2987_s26 + $0x244] ss:$8 sps:$4 sm:$0xff]  }
  0x21   : > { %937 = vmatpush1.bf16.msra.mxu0 %v2778_v8  ;;  %2757 = vmatpush1.bf16.msra.mxu1 %v2778_v8  ;;  %v2867_v4 = vld [vmem:[%s2987_s26 + $0xd0] ss:$8 sps:$4 sm:$0xff]   ;;  %v2868_v5 = vld [vmem:[%s2987_s26 + $0x240] ss:$8 sps:$4 sm:$0xff]   ;;  %v2869_v6 = vld [vmem:[%s2987_s26 + $0xe4] ss:$8 sps:$4 sm:$0xff]  }
  0x22   : > { %938 = vmatprep.subr.bf16.mxu0 %v2932_v1  ;;  %2746 = vmatprep.subr.bf16.mxu1 %v2932_v1  ;;  %v2871_v7 = vld [vmem:[%s2987_s26 + $0x254] ss:$8 sps:$4 sm:$0xff]   ;;  %v2873_v8 = vld [vmem:[%s2987_s26 + $0xe0] ss:$8 sps:$4 sm:$0xff]   ;;  %v2877_v11 = vld [vmem:[%s2987_s26 + $0x264] ss:$8 sps:$4 sm:$0xff]  }
  0x25   : > { %939 = vmatpush1.bf16.msra.mxu0 %v2779_v9  ;;  %2758 = vmatpush1.bf16.msra.mxu1 %v2779_v9  ;;  %v2874_v9 = vld [vmem:[%s2987_s26 + $0x250] ss:$8 sps:$4 sm:$0xff]  }
  0x26   : > { %940 = vmatprep.subr.bf16.mxu0 %v2932_v1  ;;  %2747 = vmatprep.subr.bf16.mxu1 %v2932_v1 }
  0x29   : > { %941 = vmatpush1.bf16.msra.mxu0 %v2780_v10  ;;  %2759 = vmatpush1.bf16.msra.mxu1 %v2780_v10  ;;  %v2875_v10 = vld [vmem:[%s2987_s26 + $0xf4] ss:$8 sps:$4 sm:$0xff]  }
  0x2a   : > { %950 = vmatprep.subr.bf16.mxu0 %v2932_v1  ;;  %2748 = vmatprep.subr.bf16.mxu1 %v2932_v1 }
  0x2d   : > { %951 = vmatpush2.bf16.msra.mxu0 %v924_v12  ;;  %2760 = vmatpush2.bf16.msra.mxu1 %v924_v12  ;;  %v2879_v12 = vld [vmem:[%s2987_s26 + $0xf0] ss:$8 sps:$4 sm:$0xff]  }
  0x2e   : > { %952 = vmatprep.subr.bf16.mxu0 %v2932_v1  ;;  %2749 = vmatprep.subr.bf16.mxu1 %v2932_v1 }
  0x31   : > { %953 = vmatpush2.bf16.msra.mxu0 %v2782_v13  ;;  %2761 = vmatpush2.bf16.msra.mxu1 %v2782_v13  ;;  %v2880_v13 = vld [vmem:[%s2987_s26 + $0x260] ss:$8 sps:$4 sm:$0xff]  }
  0x32   : > { %954 = vmatprep.subr.bf16.mxu0 %v2932_v1  ;;  %2750 = vmatprep.subr.bf16.mxu1 %v2932_v1 }
  0x35   : > { %955 = vmatpush2.bf16.msra.mxu0 %v2783_v14  ;;  %2762 = vmatpush2.bf16.msra.mxu1 %v2783_v14  ;;  %v2881_v14 = vld [vmem:[%s2987_s26 + $0x104] ss:$8 sps:$4 sm:$0xff]  }
  0x36   : > { %956 = vmatprep.subr.bf16.mxu0 %v2932_v1  ;;  %2751 = vmatprep.subr.bf16.mxu1 %v2932_v1  ;;  %v2862_v1 = vld [vmem:[%s2987_s26 + $0x230] ss:$8 sps:$4 sm:$0xff]  }
  0x39   : > { %957 = vmatpush2.bf16.msra.mxu0 %v2784_v15  ;;  %2763 = vmatpush2.bf16.msra.mxu1 %v2784_v15  ;;  %v2883_v15 = vld [vmem:[%s2987_s26 + $0x274] ss:$8 sps:$4 sm:$0xff]  }
  0x3c   : > { %959 = vmatmul.mubr.bf16.vlgmr.msra.gmra.mxu0 %v2785_v16  ;;  %1143 = vmatmul.mubr.bf16.vlgmr.msra.gmra.mxu1 %v2788_v17  ;;  %v2885_v16 = vld [vmem:[%s2987_s26 + $0x100] ss:$8 sps:$4 sm:$0xff]   ;;  %v2886_v17 = vld [vmem:[%s2987_s26 + $0x270] ss:$8 sps:$4 sm:$0xff]  }
  0x3d   : > { %2233 = vmatprep.mubr.msk.bf16.mxu0 %vm783_vm0, %v2791_v18  ;;  %2256 = vmatprep.mubr.msk.bf16.mxu1 %vm783_vm0, %v2793_v19  ;;  %v2887_v18 = vld [vmem:[%s2987_s26 + $0x114] ss:$8 sps:$4 sm:$0xff]   ;;  %v2889_v19 = vld [vmem:[%s2987_s26 + $0x284] ss:$8 sps:$4 sm:$0xff]  }
  0x44   : > { %967 = vmatmul.mubr.bf16.gmra.mxu0 %v2795_v20  ;;  %1151 = vmatmul.mubr.bf16.gmra.mxu1 %v2796_v21  ;;  %v2891_v20 = vld [vmem:[%s2987_s26 + $0x110] ss:$8 sps:$4 sm:$0xff]   ;;  %v2892_v21 = vld [vmem:[%s2987_s26 + $0x280] ss:$8 sps:$4 sm:$0xff]  }
  0x45   : > { %2234 = vmatprep.mubr.msk.bf16.mxu0 %vm783_vm0, %v2797_v22  ;;  %2257 = vmatprep.mubr.msk.bf16.mxu1 %vm783_vm0, %v2799_v23  ;;  %v2893_v22 = vld [vmem:[%s2987_s26 + $0x124] ss:$8 sps:$4 sm:$0xff]   ;;  %v2895_v23 = vld [vmem:[%s2987_s26 + $0x294] ss:$8 sps:$4 sm:$0xff]  }
  0x4c   : > { %975 = vmatmul.mubr.bf16.gmra.mxu0 %v2801_v24  ;;  %1159 = vmatmul.mubr.bf16.gmra.mxu1 %v2802_v25  ;;  %v2897_v24 = vld [vmem:[%s2987_s26 + $0x120] ss:$8 sps:$4 sm:$0xff]   ;;  %v2898_v25 = vld [vmem:[%s2987_s26 + $0x290] ss:$8 sps:$4 sm:$0xff]  }
  0x4d   : > { %2235 = vmatprep.mubr.msk.bf16.mxu0 %vm783_vm0, %v2803_v26  ;;  %2258 = vmatprep.mubr.msk.bf16.mxu1 %vm783_vm0, %v2805_v27  ;;  %v2899_v26 = vld [vmem:[%s2987_s26 + $0x134] ss:$8 sps:$4 sm:$0xff]   ;;  %v2901_v27 = vld [vmem:[%s2987_s26 + $0x2a4] ss:$8 sps:$4 sm:$0xff]  }
  0x54   : > { %983 = vmatmul.mubr.bf16.gmra.mxu0 %v2807_v28  ;;  %1167 = vmatmul.mubr.bf16.gmra.mxu1 %v2808_v29  ;;  %v2903_v28 = vld [vmem:[%s2987_s26 + $0x130] ss:$8 sps:$4 sm:$0xff]   ;;  %v2904_v29 = vld [vmem:[%s2987_s26 + $0x2a0] ss:$8 sps:$4 sm:$0xff]  }
  0x55   : > { %2236 = vmatprep.mubr.msk.bf16.mxu0 %vm783_vm0, %v2809_v30  ;;  %2259 = vmatprep.mubr.msk.bf16.mxu1 %vm783_vm0, %v2811_v31  ;;  %v2905_v30 = vld [vmem:[%s2987_s26 + $0x144] ss:$8 sps:$4 sm:$0xff]   ;;  %v2907_v31 = vld [vmem:[%s2987_s26 + $0x2b4] ss:$8 sps:$4 sm:$0xff]  }
  0x5c   : > { %991 = vmatmul.mubr.bf16.gmra.mxu0 %v2813_v32  ;;  %1175 = vmatmul.mubr.bf16.gmra.mxu1 %v2814_v33  ;;  %v2909_v32 = vld [vmem:[%s2987_s26 + $0x140] ss:$8 sps:$4 sm:$0xff]   ;;  %v2910_v33 = vld [vmem:[%s2987_s26 + $0x2b0] ss:$8 sps:$4 sm:$0xff]  }
  0x5d   : > { %2237 = vmatprep.mubr.msk.bf16.mxu0 %vm783_vm0, %v2815_v34  ;;  %2260 = vmatprep.mubr.msk.bf16.mxu1 %vm783_vm0, %v2817_v35  ;;  %v2911_v34 = vld [vmem:[%s2987_s26 + $0x154] ss:$8 sps:$4 sm:$0xff]   ;;  %v2913_v35 = vld [vmem:[%s2987_s26 + $0x2c4] ss:$8 sps:$4 sm:$0xff]  }
  0x64   : > { %999 = vmatmul.mubr.bf16.gmra.mxu0 %v2819_v36  ;;  %1183 = vmatmul.mubr.bf16.gmra.mxu1 %v2820_v37  ;;  %v2915_v36 = vld [vmem:[%s2987_s26 + $0x150] ss:$8 sps:$4 sm:$0xff]   ;;  %v2916_v37 = vld [vmem:[%s2987_s26 + $0x2c0] ss:$8 sps:$4 sm:$0xff]  }
  0x65   : > { %2238 = vmatprep.mubr.msk.bf16.mxu0 %vm783_vm0, %v2821_v38  ;;  %2261 = vmatprep.mubr.msk.bf16.mxu1 %vm783_vm0, %v2823_v39  ;;  %v2917_v38 = vld [vmem:[%s2987_s26 + $0x164] ss:$8 sps:$4 sm:$0xff]   ;;  %v2919_v39 = vld [vmem:[%s2987_s26 + $0x2d4] ss:$8 sps:$4 sm:$0xff]  }
  0x6c   : > { %1007 = vmatmul.mubr.bf16.gmra.mxu0 %v2825_v40  ;;  %1191 = vmatmul.mubr.bf16.gmra.mxu1 %v2826_v41  ;;  %v2921_v40 = vld [vmem:[%s2987_s26 + $0x160] ss:$8 sps:$4 sm:$0xff]   ;;  %v2922_v41 = vld [vmem:[%s2987_s26 + $0x2d0] ss:$8 sps:$4 sm:$0xff]  }
  0x6d   : > { %2239 = vmatprep.mubr.msk.bf16.mxu0 %vm783_vm0, %v2827_v42  ;;  %2262 = vmatprep.mubr.msk.bf16.mxu1 %vm783_vm0, %v2829_v43  ;;  %v3170_v42 = vld [vmem:[%s3326_s2] ss:$0 sm:$0xff] }
  0x74   : > { %1015 = vmatmul.mubr.bf16.gmra.mxu0 %v2831_v44  ;;  %1199 = vmatmul.mubr.bf16.gmra.mxu1 %v2832_v45 }
  0x75   : > { %2240 = vmatprep.mubr.msk.bf16.mxu0 %vm783_vm0, %v2833_v46  ;;  %2263 = vmatprep.mubr.msk.bf16.mxu1 %vm783_vm0, %v2835_v47 }
  0x7c   : > { %1023 = vmatmul.mubr.bf16.gmra.mxu0 %v2837_v48  ;;  %1207 = vmatmul.mubr.bf16.gmra.mxu1 %v2838_v49 }
  0x7d   : > { %2241 = vmatprep.mubr.msk.bf16.mxu0 %vm783_vm0, %v2839_v50  ;;  %2264 = vmatprep.mubr.msk.bf16.mxu1 %vm783_vm0, %v2841_v51 }
  0x84   : > { %1031 = vmatmul.mubr.bf16.gmra.mxu0 %v2843_v52  ;;  %1215 = vmatmul.mubr.bf16.gmra.mxu1 %v2844_v53 }
  0x85   : > { %2242 = vmatprep.mubr.msk.bf16.mxu0 %vm783_vm0, %v2845_v54  ;;  %2265 = vmatprep.mubr.msk.bf16.mxu1 %vm783_vm0, %v2847_v55 }
  0x8c   : > { %1039 = vmatmul.mubr.bf16.gmra.mxu0 %v2849_v56  ;;  %1223 = vmatmul.mubr.bf16.gmra.mxu1 %v2850_v57 }
  0x8d   : > { %2243 = vmatprep.mubr.msk.bf16.mxu0 %vm783_vm0, %v2851_v58  ;;  %2266 = vmatprep.mubr.msk.bf16.mxu1 %vm783_vm0, %v2853_v59 }
  0x94   : > { %1047 = vmatmul.mubr.bf16.gmra.mxu0 %v2855_v60  ;;  %1231 = vmatmul.mubr.bf16.gmra.mxu1 %v2856_v61 }
  0x95   : > { %2244 = vmatprep.mubr.msk.bf16.mxu0 %vm783_vm0, %v2857_v62  ;;  %2267 = vmatprep.mubr.msk.bf16.mxu1 %vm783_vm0, %v2859_v63 }
  0x9c   : > { %1055 = vmatmul.mubr.bf16.gmra.mxu0 %v2861_v0  ;;  %1239 = vmatmul.mubr.bf16.gmra.mxu1 %v2862_v1 }
  0x9d   : > { %2245 = vmatprep.mubr.msk.bf16.mxu0 %vm783_vm0, %v2863_v2  ;;  %2268 = vmatprep.mubr.msk.bf16.mxu1 %vm783_vm0, %v2865_v3 }
  0xa4   : > { %1063 = vmatmul.mubr.bf16.gmra.mxu0 %v2867_v4  ;;  %1247 = vmatmul.mubr.bf16.gmra.mxu1 %v2868_v5 }
  0xa5   : > { %2246 = vmatprep.mubr.msk.bf16.mxu0 %vm783_vm0, %v2869_v6  ;;  %2269 = vmatprep.mubr.msk.bf16.mxu1 %vm783_vm0, %v2871_v7 }
  0xac   : > { %1071 = vmatmul.mubr.bf16.gmra.mxu0 %v2873_v8  ;;  %1255 = vmatmul.mubr.bf16.gmra.mxu1 %v2874_v9 }
  0xad   : > { %2247 = vmatprep.mubr.msk.bf16.mxu0 %vm783_vm0, %v2875_v10  ;;  %2270 = vmatprep.mubr.msk.bf16.mxu1 %vm783_vm0, %v2877_v11 }
  0xb4   : > { %1079 = vmatmul.mubr.bf16.gmra.mxu0 %v2879_v12  ;;  %1263 = vmatmul.mubr.bf16.gmra.mxu1 %v2880_v13 }
  0xb5   : > { %2248 = vmatprep.mubr.msk.bf16.mxu0 %vm783_vm0, %v2881_v14  ;;  %2271 = vmatprep.mubr.msk.bf16.mxu1 %vm783_vm0, %v2883_v15 }
  0xbc   : > { %1087 = vmatmul.mubr.bf16.gmra.mxu0 %v2885_v16  ;;  %1271 = vmatmul.mubr.bf16.gmra.mxu1 %v2886_v17 }
  0xbd   : > { %2249 = vmatprep.mubr.msk.bf16.mxu0 %vm783_vm0, %v2887_v18  ;;  %2272 = vmatprep.mubr.msk.bf16.mxu1 %vm783_vm0, %v2889_v19 }
  0xc4   : > { %1095 = vmatmul.mubr.bf16.gmra.mxu0 %v2891_v20  ;;  %1279 = vmatmul.mubr.bf16.gmra.mxu1 %v2892_v21 }
  0xc5   : > { %2250 = vmatprep.mubr.msk.bf16.mxu0 %vm783_vm0, %v2893_v22  ;;  %2273 = vmatprep.mubr.msk.bf16.mxu1 %vm783_vm0, %v2895_v23 }
  0xcc   : > { %1103 = vmatmul.mubr.bf16.gmra.mxu0 %v2897_v24  ;;  %1287 = vmatmul.mubr.bf16.gmra.mxu1 %v2898_v25 }
  0xcd   : > { %2251 = vmatprep.mubr.msk.bf16.mxu0 %vm783_vm0, %v2899_v26  ;;  %2274 = vmatprep.mubr.msk.bf16.mxu1 %vm783_vm0, %v2901_v27 }
  0xd4   : > { %1111 = vmatmul.mubr.bf16.gmra.mxu0 %v2903_v28  ;;  %1295 = vmatmul.mubr.bf16.gmra.mxu1 %v2904_v29 }
  0xd5   : > { %2252 = vmatprep.mubr.msk.bf16.mxu0 %vm783_vm0, %v2905_v30  ;;  %2275 = vmatprep.mubr.msk.bf16.mxu1 %vm783_vm0, %v2907_v31 }
  0xdc   : > { %1119 = vmatmul.mubr.bf16.gmra.mxu0 %v2909_v32  ;;  %1303 = vmatmul.mubr.bf16.gmra.mxu1 %v2910_v33 }
  0xdd   : > { %2253 = vmatprep.mubr.msk.bf16.mxu0 %vm783_vm0, %v2911_v34  ;;  %2276 = vmatprep.mubr.msk.bf16.mxu1 %vm783_vm0, %v2913_v35 }
  0xe4   : > { %1127 = vmatmul.mubr.bf16.gmra.mxu0 %v2915_v36  ;;  %1311 = vmatmul.mubr.bf16.gmra.mxu1 %v2916_v37 }
  0xe5   : > { %2254 = vmatprep.mubr.msk.bf16.mxu0 %vm783_vm0, %v2917_v38  ;;  %2277 = vmatprep.mubr.msk.bf16.mxu1 %vm783_vm0, %v2919_v39 }
  0xec   : > { %1135 = vmatmul.mubr.bf16.gmra.mxu0 %v2921_v40  ;;  %1319 = vmatmul.mubr.bf16.gmra.mxu1 %v2922_v41 }
  0xfc   : > { %v960_v43 = vpop.f32.mrf.mxu0  ;;  %v1144_v44 = vpop.f32.mrf.mxu1 }
  0xfd   : > { %v961_v45 = vadd.f32 %v3170_v42, %v960_v43  ;;  %v1145_v46 = vadd.f32 %v3170_v42, %v1144_v44 }
  0xfe   : > { %v962_v47 = vpop.f32.mrf.mxu0  ;;  %v1146_v48 = vpop.f32.mrf.mxu1 }
  0xff   : > { %v1419_v49 = vmul.f32 0.2, %v961_v45  ;;  %v1465_v50 = vmul.f32 0.2, %v1145_v46  ;;  %vm1327_vm2 = vcmp.ge.f32.partialorder %v961_v45, 0.0  ;;  %vm1373_vm3 = vcmp.ge.f32.partialorder %v1145_v46, 0.0 }
 0x100   : > { %v963_v51 = vpop.f32.mrf.mxu0  ;;  %v1147_v52 = vpop.f32.mrf.mxu1 }
 0x101   : > { %v964_v53 = vadd.f32 %v3170_v42, %v963_v51  ;;  %v1148_v54 = vadd.f32 %v3170_v42, %v1147_v52  ;;  %v1511_v59 = vsel %vm1327_vm2, %v961_v45, %v1419_v49  ;;  %v1557_v60 = vsel %vm1373_vm3, %v1145_v46, %v1465_v50 }
 0x102   : > { %v965_v55 = vpop.f32.mrf.mxu0  ;;  %v1149_v56 = vpop.f32.mrf.mxu1 }
 0x103   : > { %vm1328_vm4 = vcmp.ge.f32.partialorder %v964_v53, 0.0  ;;  %v1420_v57 = vmul.f32 0.2, %v964_v53  ;;  %vm1374_vm5 = vcmp.ge.f32.partialorder %v1148_v54, 0.0  ;;  %v1466_v58 = vmul.f32 0.2, %v1148_v54 }
 0x104   : > { %v968_v61 = vpop.f32.mrf.mxu0  ;;  %v1152_v62 = vpop.f32.mrf.mxu1 }
 0x105   : > { %v1512_v63 = vsel %vm1328_vm4, %v964_v53, %v1420_v57  ;;  %v1558_v0 = vsel %vm1374_vm5, %v1148_v54, %v1466_v58  ;;  %v969_v1 = vadd.f32 %v3170_v42, %v968_v61  ;;  %v1153_v2 = vadd.f32 %v3170_v42, %v1152_v62 }
 0x106   : > { %v2468_v3 = vpack.c.bf16 %v1512_v63, %v1511_v59  ;;  %v2583_v4 = vpack.c.bf16 %v1558_v0, %v1557_v60  ;;  %v970_v5 = vpop.f32.mrf.mxu0  ;;  %v1154_v6 = vpop.f32.mrf.mxu1 }
 0x107   : > { %v1421_v7 = vmul.f32 0.2, %v969_v1  ;;  %v1467_v8 = vmul.f32 0.2, %v1153_v2  ;;  %vm1329_vm6 = vcmp.ge.f32.partialorder %v969_v1, 0.0  ;;  %vm1375_vm7 = vcmp.ge.f32.partialorder %v1153_v2, 0.0 }
 0x108   : > { %2469 = vst [vmem:[%s3180_s23] sm:$0xff] %v2468_v3   ;;  %2717 = vst [vmem:[%s3180_s23 + $0xb8] sm:$0xff] %v2583_v4   ;;  %v971_v9 = vpop.f32.mrf.mxu0  ;;  %v1155_v10 = vpop.f32.mrf.mxu1 }
 0x109   : > { %v972_v11 = vadd.f32 %v3170_v42, %v971_v9  ;;  %v1156_v12 = vadd.f32 %v3170_v42, %v1155_v10  ;;  %v1513_v17 = vsel %vm1329_vm6, %v969_v1, %v1421_v7  ;;  %v1559_v18 = vsel %vm1375_vm7, %v1153_v2, %v1467_v8 }
 0x10a   : > { %v973_v13 = vpop.f32.mrf.mxu0  ;;  %v1157_v14 = vpop.f32.mrf.mxu1 }
 0x10b   : > { %vm1330_vm8 = vcmp.ge.f32.partialorder %v972_v11, 0.0  ;;  %v1422_v15 = vmul.f32 0.2, %v972_v11  ;;  %vm1376_vm9 = vcmp.ge.f32.partialorder %v1156_v12, 0.0  ;;  %v1468_v16 = vmul.f32 0.2, %v1156_v12 }
 0x10c   : > { %v976_v19 = vpop.f32.mrf.mxu0  ;;  %v1160_v20 = vpop.f32.mrf.mxu1 }
 0x10d   : > { %v1514_v21 = vsel %vm1330_vm8, %v972_v11, %v1422_v15  ;;  %v1560_v22 = vsel %vm1376_vm9, %v1156_v12, %v1468_v16  ;;  %v977_v23 = vadd.f32 %v3170_v42, %v976_v19  ;;  %v1161_v24 = vadd.f32 %v3170_v42, %v1160_v20 }
 0x10e   : > { %v2473_v25 = vpack.c.bf16 %v1514_v21, %v1513_v17  ;;  %v2588_v26 = vpack.c.bf16 %v1560_v22, %v1559_v18  ;;  %v978_v27 = vpop.f32.mrf.mxu0  ;;  %v1162_v28 = vpop.f32.mrf.mxu1 }
 0x10f   : > { %v1423_v29 = vmul.f32 0.2, %v977_v23  ;;  %v1469_v30 = vmul.f32 0.2, %v1161_v24  ;;  %vm1331_vm10 = vcmp.ge.f32.partialorder %v977_v23, 0.0  ;;  %vm1377_vm11 = vcmp.ge.f32.partialorder %v1161_v24, 0.0 }
 0x110   : > { %2695 = vst [vmem:[%s3180_s23 + $0x8] sm:$0xff] %v2473_v25   ;;  %2718 = vst [vmem:[%s3180_s23 + $0xc0] sm:$0xff] %v2588_v26   ;;  %v979_v31 = vpop.f32.mrf.mxu0  ;;  %v1163_v32 = vpop.f32.mrf.mxu1 }
 0x111   : > { %v980_v33 = vadd.f32 %v3170_v42, %v979_v31  ;;  %v1164_v34 = vadd.f32 %v3170_v42, %v1163_v32  ;;  %v1515_v39 = vsel %vm1331_vm10, %v977_v23, %v1423_v29  ;;  %v1561_v40 = vsel %vm1377_vm11, %v1161_v24, %v1469_v30 }
 0x112   : > { %v981_v35 = vpop.f32.mrf.mxu0  ;;  %v1165_v36 = vpop.f32.mrf.mxu1 }
 0x113   : > { %vm1332_vm12 = vcmp.ge.f32.partialorder %v980_v33, 0.0  ;;  %v1424_v37 = vmul.f32 0.2, %v980_v33  ;;  %vm1378_vm13 = vcmp.ge.f32.partialorder %v1164_v34, 0.0  ;;  %v1470_v38 = vmul.f32 0.2, %v1164_v34 }
 0x114   : > { %v984_v41 = vpop.f32.mrf.mxu0  ;;  %v1168_v43 = vpop.f32.mrf.mxu1 }
 0x115   : > { %v1516_v44 = vsel %vm1332_vm12, %v980_v33, %v1424_v37  ;;  %v1562_v45 = vsel %vm1378_vm13, %v1164_v34, %v1470_v38  ;;  %v985_v46 = vadd.f32 %v3170_v42, %v984_v41  ;;  %v1169_v47 = vadd.f32 %v3170_v42, %v1168_v43 }
 0x116   : > { %v2478_v48 = vpack.c.bf16 %v1516_v44, %v1515_v39  ;;  %v2593_v49 = vpack.c.bf16 %v1562_v45, %v1561_v40  ;;  %v986_v50 = vpop.f32.mrf.mxu0  ;;  %v1170_v51 = vpop.f32.mrf.mxu1 }
 0x117   : > { %v1425_v52 = vmul.f32 0.2, %v985_v46  ;;  %v1471_v53 = vmul.f32 0.2, %v1169_v47  ;;  %vm1333_vm14 = vcmp.ge.f32.partialorder %v985_v46, 0.0  ;;  %vm1379_vm15 = vcmp.ge.f32.partialorder %v1169_v47, 0.0 }
 0x118   : > { %2696 = vst [vmem:[%s3180_s23 + $0x10] sm:$0xff] %v2478_v48   ;;  %2719 = vst [vmem:[%s3180_s23 + $0xc8] sm:$0xff] %v2593_v49   ;;  %v987_v54 = vpop.f32.mrf.mxu0  ;;  %v1171_v55 = vpop.f32.mrf.mxu1 }
 0x119   : > { %v988_v56 = vadd.f32 %v3170_v42, %v987_v54  ;;  %v1172_v57 = vadd.f32 %v3170_v42, %v1171_v55  ;;  %v1517_v62 = vsel %vm1333_vm14, %v985_v46, %v1425_v52  ;;  %v1563_v63 = vsel %vm1379_vm15, %v1169_v47, %v1471_v53 }
 0x11a   : > { %v989_v58 = vpop.f32.mrf.mxu0  ;;  %v1173_v59 = vpop.f32.mrf.mxu1 }
 0x11b   : > { %vm1334_vm0 = vcmp.ge.f32.partialorder %v988_v56, 0.0  ;;  %v1426_v60 = vmul.f32 0.2, %v988_v56  ;;  %vm1380_vm1 = vcmp.ge.f32.partialorder %v1172_v57, 0.0  ;;  %v1472_v61 = vmul.f32 0.2, %v1172_v57 }
 0x11c   : > { %v992_v0 = vpop.f32.mrf.mxu0  ;;  %v1176_v1 = vpop.f32.mrf.mxu1 }
 0x11d   : > { %v1518_v2 = vsel %vm1334_vm0, %v988_v56, %v1426_v60  ;;  %v1564_v3 = vsel %vm1380_vm1, %v1172_v57, %v1472_v61  ;;  %v993_v4 = vadd.f32 %v3170_v42, %v992_v0  ;;  %v1177_v5 = vadd.f32 %v3170_v42, %v1176_v1 }
 0x11e   : > { %v2483_v6 = vpack.c.bf16 %v1518_v2, %v1517_v62  ;;  %v2598_v7 = vpack.c.bf16 %v1564_v3, %v1563_v63  ;;  %v994_v8 = vpop.f32.mrf.mxu0  ;;  %v1178_v9 = vpop.f32.mrf.mxu1 }
 0x11f   : > { %v1427_v10 = vmul.f32 0.2, %v993_v4  ;;  %v1473_v11 = vmul.f32 0.2, %v1177_v5  ;;  %vm1335_vm2 = vcmp.ge.f32.partialorder %v993_v4, 0.0  ;;  %vm1381_vm3 = vcmp.ge.f32.partialorder %v1177_v5, 0.0 }
 0x120   : > { %2697 = vst [vmem:[%s3180_s23 + $0x18] sm:$0xff] %v2483_v6   ;;  %2720 = vst [vmem:[%s3180_s23 + $0xd0] sm:$0xff] %v2598_v7   ;;  %v995_v12 = vpop.f32.mrf.mxu0  ;;  %v1179_v13 = vpop.f32.mrf.mxu1 }
 0x121   : > { %v996_v14 = vadd.f32 %v3170_v42, %v995_v12  ;;  %v1180_v15 = vadd.f32 %v3170_v42, %v1179_v13  ;;  %v1519_v20 = vsel %vm1335_vm2, %v993_v4, %v1427_v10  ;;  %v1565_v21 = vsel %vm1381_vm3, %v1177_v5, %v1473_v11 }
 0x122   : > { %v997_v16 = vpop.f32.mrf.mxu0  ;;  %v1181_v17 = vpop.f32.mrf.mxu1 }
 0x123   : > { %vm1336_vm4 = vcmp.ge.f32.partialorder %v996_v14, 0.0  ;;  %v1428_v18 = vmul.f32 0.2, %v996_v14  ;;  %vm1382_vm5 = vcmp.ge.f32.partialorder %v1180_v15, 0.0  ;;  %v1474_v19 = vmul.f32 0.2, %v1180_v15 }
 0x124   : > { %v1000_v22 = vpop.f32.mrf.mxu0  ;;  %v1184_v23 = vpop.f32.mrf.mxu1 }
 0x125   : > { %v1520_v24 = vsel %vm1336_vm4, %v996_v14, %v1428_v18  ;;  %v1566_v25 = vsel %vm1382_vm5, %v1180_v15, %v1474_v19  ;;  %v1001_v26 = vadd.f32 %v3170_v42, %v1000_v22  ;;  %v1185_v27 = vadd.f32 %v3170_v42, %v1184_v23 }
 0x126   : > { %v2488_v28 = vpack.c.bf16 %v1520_v24, %v1519_v20  ;;  %v2603_v29 = vpack.c.bf16 %v1566_v25, %v1565_v21  ;;  %v1002_v30 = vpop.f32.mrf.mxu0  ;;  %v1186_v31 = vpop.f32.mrf.mxu1 }
 0x127   : > { %v1429_v32 = vmul.f32 0.2, %v1001_v26  ;;  %v1475_v33 = vmul.f32 0.2, %v1185_v27  ;;  %vm1337_vm6 = vcmp.ge.f32.partialorder %v1001_v26, 0.0  ;;  %vm1383_vm7 = vcmp.ge.f32.partialorder %v1185_v27, 0.0 }
 0x128   : > { %2698 = vst [vmem:[%s3180_s23 + $0x20] sm:$0xff] %v2488_v28   ;;  %2721 = vst [vmem:[%s3180_s23 + $0xd8] sm:$0xff] %v2603_v29   ;;  %v1003_v34 = vpop.f32.mrf.mxu0  ;;  %v1187_v35 = vpop.f32.mrf.mxu1 }
 0x129   : > { %v1004_v36 = vadd.f32 %v3170_v42, %v1003_v34  ;;  %v1188_v37 = vadd.f32 %v3170_v42, %v1187_v35  ;;  %v1521_v43 = vsel %vm1337_vm6, %v1001_v26, %v1429_v32  ;;  %v1567_v44 = vsel %vm1383_vm7, %v1185_v27, %v1475_v33 }
 0x12a   : > { %v1005_v38 = vpop.f32.mrf.mxu0  ;;  %v1189_v39 = vpop.f32.mrf.mxu1 }
 0x12b   : > { %vm1338_vm8 = vcmp.ge.f32.partialorder %v1004_v36, 0.0  ;;  %v1430_v40 = vmul.f32 0.2, %v1004_v36  ;;  %vm1384_vm9 = vcmp.ge.f32.partialorder %v1188_v37, 0.0  ;;  %v1476_v41 = vmul.f32 0.2, %v1188_v37 }
 0x12c   : > { %v1008_v45 = vpop.f32.mrf.mxu0  ;;  %v1192_v46 = vpop.f32.mrf.mxu1 }
 0x12d   : > { %v1522_v47 = vsel %vm1338_vm8, %v1004_v36, %v1430_v40  ;;  %v1568_v48 = vsel %vm1384_vm9, %v1188_v37, %v1476_v41  ;;  %v1009_v49 = vadd.f32 %v3170_v42, %v1008_v45  ;;  %v1193_v50 = vadd.f32 %v3170_v42, %v1192_v46 }
 0x12e   : > { %v2493_v51 = vpack.c.bf16 %v1522_v47, %v1521_v43  ;;  %v2608_v52 = vpack.c.bf16 %v1568_v48, %v1567_v44  ;;  %v1010_v53 = vpop.f32.mrf.mxu0  ;;  %v1194_v54 = vpop.f32.mrf.mxu1 }
 0x12f   : > { %v1431_v55 = vmul.f32 0.2, %v1009_v49  ;;  %v1477_v56 = vmul.f32 0.2, %v1193_v50  ;;  %vm1339_vm10 = vcmp.ge.f32.partialorder %v1009_v49, 0.0  ;;  %vm1385_vm11 = vcmp.ge.f32.partialorder %v1193_v50, 0.0 }
 0x130   : > { %2699 = vst [vmem:[%s3180_s23 + $0x28] sm:$0xff] %v2493_v51   ;;  %2722 = vst [vmem:[%s3180_s23 + $0xe0] sm:$0xff] %v2608_v52   ;;  %v1011_v57 = vpop.f32.mrf.mxu0  ;;  %v1195_v58 = vpop.f32.mrf.mxu1 }
 0x131   : > { %v1012_v59 = vadd.f32 %v3170_v42, %v1011_v57  ;;  %v1196_v60 = vadd.f32 %v3170_v42, %v1195_v58  ;;  %v1523_v1 = vsel %vm1339_vm10, %v1009_v49, %v1431_v55  ;;  %v1569_v2 = vsel %vm1385_vm11, %v1193_v50, %v1477_v56 }
 0x132   : > { %v1013_v61 = vpop.f32.mrf.mxu0  ;;  %v1197_v62 = vpop.f32.mrf.mxu1 }
 0x133   : > { %vm1340_vm12 = vcmp.ge.f32.partialorder %v1012_v59, 0.0  ;;  %v1432_v63 = vmul.f32 0.2, %v1012_v59  ;;  %vm1386_vm13 = vcmp.ge.f32.partialorder %v1196_v60, 0.0  ;;  %v1478_v0 = vmul.f32 0.2, %v1196_v60 }
 0x134   : > { %v1016_v3 = vpop.f32.mrf.mxu0  ;;  %v1200_v4 = vpop.f32.mrf.mxu1 }
 0x135   : > { %v1524_v5 = vsel %vm1340_vm12, %v1012_v59, %v1432_v63  ;;  %v1570_v6 = vsel %vm1386_vm13, %v1196_v60, %v1478_v0  ;;  %v1017_v7 = vadd.f32 %v3170_v42, %v1016_v3  ;;  %v1201_v8 = vadd.f32 %v3170_v42, %v1200_v4 }
 0x136   : > { %v2498_v9 = vpack.c.bf16 %v1524_v5, %v1523_v1  ;;  %v2613_v10 = vpack.c.bf16 %v1570_v6, %v1569_v2  ;;  %v1018_v11 = vpop.f32.mrf.mxu0  ;;  %v1202_v12 = vpop.f32.mrf.mxu1 }
 0x137   : > { %v1433_v13 = vmul.f32 0.2, %v1017_v7  ;;  %v1479_v14 = vmul.f32 0.2, %v1201_v8  ;;  %vm1341_vm14 = vcmp.ge.f32.partialorder %v1017_v7, 0.0  ;;  %vm1387_vm15 = vcmp.ge.f32.partialorder %v1201_v8, 0.0 }
 0x138   : > { %2700 = vst [vmem:[%s3180_s23 + $0x30] sm:$0xff] %v2498_v9   ;;  %2723 = vst [vmem:[%s3180_s23 + $0xe8] sm:$0xff] %v2613_v10   ;;  %v1019_v15 = vpop.f32.mrf.mxu0  ;;  %v1203_v16 = vpop.f32.mrf.mxu1 }
 0x139   : > { %v1020_v17 = vadd.f32 %v3170_v42, %v1019_v15  ;;  %v1204_v18 = vadd.f32 %v3170_v42, %v1203_v16  ;;  %v1525_v23 = vsel %vm1341_vm14, %v1017_v7, %v1433_v13  ;;  %v1571_v24 = vsel %vm1387_vm15, %v1201_v8, %v1479_v14 }
 0x13a   : > { %v1021_v19 = vpop.f32.mrf.mxu0  ;;  %v1205_v20 = vpop.f32.mrf.mxu1 }
 0x13b   : > { %vm1342_vm0 = vcmp.ge.f32.partialorder %v1020_v17, 0.0  ;;  %v1434_v21 = vmul.f32 0.2, %v1020_v17  ;;  %vm1388_vm1 = vcmp.ge.f32.partialorder %v1204_v18, 0.0  ;;  %v1480_v22 = vmul.f32 0.2, %v1204_v18 }
 0x13c   : > { %v1024_v25 = vpop.f32.mrf.mxu0  ;;  %v1208_v26 = vpop.f32.mrf.mxu1 }
 0x13d   : > { %v1526_v27 = vsel %vm1342_vm0, %v1020_v17, %v1434_v21  ;;  %v1572_v28 = vsel %vm1388_vm1, %v1204_v18, %v1480_v22  ;;  %v1025_v29 = vadd.f32 %v3170_v42, %v1024_v25  ;;  %v1209_v30 = vadd.f32 %v3170_v42, %v1208_v26 }
 0x13e   : > { %v2503_v31 = vpack.c.bf16 %v1526_v27, %v1525_v23  ;;  %v2618_v32 = vpack.c.bf16 %v1572_v28, %v1571_v24  ;;  %v1026_v33 = vpop.f32.mrf.mxu0  ;;  %v1210_v34 = vpop.f32.mrf.mxu1 }
 0x13f   : > { %v1435_v35 = vmul.f32 0.2, %v1025_v29  ;;  %v1481_v36 = vmul.f32 0.2, %v1209_v30  ;;  %vm1343_vm2 = vcmp.ge.f32.partialorder %v1025_v29, 0.0  ;;  %vm1389_vm3 = vcmp.ge.f32.partialorder %v1209_v30, 0.0 }
 0x140   : > { %2701 = vst [vmem:[%s3180_s23 + $0x38] sm:$0xff] %v2503_v31   ;;  %2724 = vst [vmem:[%s3180_s23 + $0xf0] sm:$0xff] %v2618_v32   ;;  %v1027_v37 = vpop.f32.mrf.mxu0  ;;  %v1211_v38 = vpop.f32.mrf.mxu1 }
 0x141   : > { %v1028_v39 = vadd.f32 %v3170_v42, %v1027_v37  ;;  %v1212_v40 = vadd.f32 %v3170_v42, %v1211_v38  ;;  %v1527_v46 = vsel %vm1343_vm2, %v1025_v29, %v1435_v35  ;;  %v1573_v47 = vsel %vm1389_vm3, %v1209_v30, %v1481_v36 }
 0x142   : > { %v1029_v41 = vpop.f32.mrf.mxu0  ;;  %v1213_v43 = vpop.f32.mrf.mxu1 }
 0x143   : > { %vm1344_vm4 = vcmp.ge.f32.partialorder %v1028_v39, 0.0  ;;  %v1436_v44 = vmul.f32 0.2, %v1028_v39  ;;  %vm1390_vm5 = vcmp.ge.f32.partialorder %v1212_v40, 0.0  ;;  %v1482_v45 = vmul.f32 0.2, %v1212_v40 }
 0x144   : > { %v1032_v48 = vpop.f32.mrf.mxu0  ;;  %v1216_v49 = vpop.f32.mrf.mxu1 }
 0x145   : > { %v1528_v50 = vsel %vm1344_vm4, %v1028_v39, %v1436_v44  ;;  %v1574_v51 = vsel %vm1390_vm5, %v1212_v40, %v1482_v45  ;;  %v1033_v52 = vadd.f32 %v3170_v42, %v1032_v48  ;;  %v1217_v53 = vadd.f32 %v3170_v42, %v1216_v49 }
 0x146   : > { %v2508_v54 = vpack.c.bf16 %v1528_v50, %v1527_v46  ;;  %v2623_v55 = vpack.c.bf16 %v1574_v51, %v1573_v47  ;;  %v1034_v56 = vpop.f32.mrf.mxu0  ;;  %v1218_v57 = vpop.f32.mrf.mxu1 }
 0x147   : > { %v1437_v58 = vmul.f32 0.2, %v1033_v52  ;;  %v1483_v59 = vmul.f32 0.2, %v1217_v53  ;;  %vm1345_vm6 = vcmp.ge.f32.partialorder %v1033_v52, 0.0  ;;  %vm1391_vm7 = vcmp.ge.f32.partialorder %v1217_v53, 0.0 }
 0x148   : > { %2702 = vst [vmem:[%s3180_s23 + $0x40] sm:$0xff] %v2508_v54   ;;  %2725 = vst [vmem:[%s3180_s23 + $0xf8] sm:$0xff] %v2623_v55   ;;  %v1035_v60 = vpop.f32.mrf.mxu0  ;;  %v1219_v61 = vpop.f32.mrf.mxu1 }
 0x149   : > { %v1036_v62 = vadd.f32 %v3170_v42, %v1035_v60  ;;  %v1220_v63 = vadd.f32 %v3170_v42, %v1219_v61  ;;  %v1529_v4 = vsel %vm1345_vm6, %v1033_v52, %v1437_v58  ;;  %v1575_v5 = vsel %vm1391_vm7, %v1217_v53, %v1483_v59 }
 0x14a   : > { %v1037_v0 = vpop.f32.mrf.mxu0  ;;  %v1221_v1 = vpop.f32.mrf.mxu1 }
 0x14b   : > { %vm1346_vm8 = vcmp.ge.f32.partialorder %v1036_v62, 0.0  ;;  %v1438_v2 = vmul.f32 0.2, %v1036_v62  ;;  %vm1392_vm9 = vcmp.ge.f32.partialorder %v1220_v63, 0.0  ;;  %v1484_v3 = vmul.f32 0.2, %v1220_v63 }
 0x14c   : > { %v1040_v6 = vpop.f32.mrf.mxu0  ;;  %v1224_v7 = vpop.f32.mrf.mxu1 }
 0x14d   : > { %v1530_v8 = vsel %vm1346_vm8, %v1036_v62, %v1438_v2  ;;  %v1576_v9 = vsel %vm1392_vm9, %v1220_v63, %v1484_v3  ;;  %v1041_v10 = vadd.f32 %v3170_v42, %v1040_v6  ;;  %v1225_v11 = vadd.f32 %v3170_v42, %v1224_v7 }
 0x14e   : > { %v2513_v12 = vpack.c.bf16 %v1530_v8, %v1529_v4  ;;  %v2628_v13 = vpack.c.bf16 %v1576_v9, %v1575_v5  ;;  %v1042_v14 = vpop.f32.mrf.mxu0  ;;  %v1226_v15 = vpop.f32.mrf.mxu1 }
 0x14f   : > { %v1439_v16 = vmul.f32 0.2, %v1041_v10  ;;  %v1485_v17 = vmul.f32 0.2, %v1225_v11  ;;  %vm1347_vm10 = vcmp.ge.f32.partialorder %v1041_v10, 0.0  ;;  %vm1393_vm11 = vcmp.ge.f32.partialorder %v1225_v11, 0.0 }
 0x150   : > { %2703 = vst [vmem:[%s3180_s23 + $0x48] sm:$0xff] %v2513_v12   ;;  %2726 = vst [vmem:[%s3180_s23 + $0x100] sm:$0xff] %v2628_v13   ;;  %v1043_v18 = vpop.f32.mrf.mxu0  ;;  %v1227_v19 = vpop.f32.mrf.mxu1 }
 0x151   : > { %v1044_v20 = vadd.f32 %v3170_v42, %v1043_v18  ;;  %v1228_v21 = vadd.f32 %v3170_v42, %v1227_v19  ;;  %v1531_v26 = vsel %vm1347_vm10, %v1041_v10, %v1439_v16  ;;  %v1577_v27 = vsel %vm1393_vm11, %v1225_v11, %v1485_v17 }
 0x152   : > { %v1045_v22 = vpop.f32.mrf.mxu0  ;;  %v1229_v23 = vpop.f32.mrf.mxu1 }
 0x153   : > { %vm1348_vm12 = vcmp.ge.f32.partialorder %v1044_v20, 0.0  ;;  %v1440_v24 = vmul.f32 0.2, %v1044_v20  ;;  %vm1394_vm13 = vcmp.ge.f32.partialorder %v1228_v21, 0.0  ;;  %v1486_v25 = vmul.f32 0.2, %v1228_v21 }
 0x154   : > { %v1048_v28 = vpop.f32.mrf.mxu0  ;;  %v1232_v29 = vpop.f32.mrf.mxu1 }
 0x155   : > { %v1532_v30 = vsel %vm1348_vm12, %v1044_v20, %v1440_v24  ;;  %v1578_v31 = vsel %vm1394_vm13, %v1228_v21, %v1486_v25  ;;  %v1049_v32 = vadd.f32 %v3170_v42, %v1048_v28  ;;  %v1233_v33 = vadd.f32 %v3170_v42, %v1232_v29 }
 0x156   : > { %v2518_v34 = vpack.c.bf16 %v1532_v30, %v1531_v26  ;;  %v2633_v35 = vpack.c.bf16 %v1578_v31, %v1577_v27  ;;  %v1050_v36 = vpop.f32.mrf.mxu0  ;;  %v1234_v37 = vpop.f32.mrf.mxu1 }
 0x157   : > { %v1441_v38 = vmul.f32 0.2, %v1049_v32  ;;  %v1487_v39 = vmul.f32 0.2, %v1233_v33  ;;  %vm1349_vm14 = vcmp.ge.f32.partialorder %v1049_v32, 0.0  ;;  %vm1395_vm15 = vcmp.ge.f32.partialorder %v1233_v33, 0.0 }
 0x158   : > { %2704 = vst [vmem:[%s3180_s23 + $0x50] sm:$0xff] %v2518_v34   ;;  %2727 = vst [vmem:[%s3180_s23 + $0x108] sm:$0xff] %v2633_v35   ;;  %v1051_v40 = vpop.f32.mrf.mxu0  ;;  %v1235_v41 = vpop.f32.mrf.mxu1 }
 0x159   : > { %v1052_v43 = vadd.f32 %v3170_v42, %v1051_v40  ;;  %v1236_v44 = vadd.f32 %v3170_v42, %v1235_v41  ;;  %v1533_v49 = vsel %vm1349_vm14, %v1049_v32, %v1441_v38  ;;  %v1579_v50 = vsel %vm1395_vm15, %v1233_v33, %v1487_v39 }
 0x15a   : > { %v1053_v45 = vpop.f32.mrf.mxu0  ;;  %v1237_v46 = vpop.f32.mrf.mxu1 }
 0x15b   : > { %vm1350_vm0 = vcmp.ge.f32.partialorder %v1052_v43, 0.0  ;;  %v1442_v47 = vmul.f32 0.2, %v1052_v43  ;;  %vm1396_vm1 = vcmp.ge.f32.partialorder %v1236_v44, 0.0  ;;  %v1488_v48 = vmul.f32 0.2, %v1236_v44 }
 0x15c   : > { %v1056_v51 = vpop.f32.mrf.mxu0  ;;  %v1240_v52 = vpop.f32.mrf.mxu1 }
 0x15d   : > { %v1534_v53 = vsel %vm1350_vm0, %v1052_v43, %v1442_v47  ;;  %v1580_v54 = vsel %vm1396_vm1, %v1236_v44, %v1488_v48  ;;  %v1057_v55 = vadd.f32 %v3170_v42, %v1056_v51  ;;  %v1241_v56 = vadd.f32 %v3170_v42, %v1240_v52 }
 0x15e   : > { %v2523_v57 = vpack.c.bf16 %v1534_v53, %v1533_v49  ;;  %v2638_v58 = vpack.c.bf16 %v1580_v54, %v1579_v50  ;;  %v1058_v59 = vpop.f32.mrf.mxu0  ;;  %v1242_v60 = vpop.f32.mrf.mxu1 }
 0x15f   : > { %v1443_v61 = vmul.f32 0.2, %v1057_v55  ;;  %v1489_v62 = vmul.f32 0.2, %v1241_v56  ;;  %vm1351_vm2 = vcmp.ge.f32.partialorder %v1057_v55, 0.0  ;;  %vm1397_vm3 = vcmp.ge.f32.partialorder %v1241_v56, 0.0 }
 0x160   : > { %2705 = vst [vmem:[%s3180_s23 + $0x58] sm:$0xff] %v2523_v57   ;;  %2728 = vst [vmem:[%s3180_s23 + $0x110] sm:$0xff] %v2638_v58   ;;  %v1059_v63 = vpop.f32.mrf.mxu0  ;;  %v1243_v0 = vpop.f32.mrf.mxu1 }
 0x161   : > { %v1060_v1 = vadd.f32 %v3170_v42, %v1059_v63  ;;  %v1244_v2 = vadd.f32 %v3170_v42, %v1243_v0  ;;  %v1535_v7 = vsel %vm1351_vm2, %v1057_v55, %v1443_v61  ;;  %v1581_v8 = vsel %vm1397_vm3, %v1241_v56, %v1489_v62 }
 0x162   : > { %v1061_v3 = vpop.f32.mrf.mxu0  ;;  %v1245_v4 = vpop.f32.mrf.mxu1 }
 0x163   : > { %vm1352_vm4 = vcmp.ge.f32.partialorder %v1060_v1, 0.0  ;;  %v1444_v5 = vmul.f32 0.2, %v1060_v1  ;;  %vm1398_vm5 = vcmp.ge.f32.partialorder %v1244_v2, 0.0  ;;  %v1490_v6 = vmul.f32 0.2, %v1244_v2 }
 0x164   : > { %v1064_v9 = vpop.f32.mrf.mxu0  ;;  %v1248_v10 = vpop.f32.mrf.mxu1 }
 0x165   : > { %v1536_v11 = vsel %vm1352_vm4, %v1060_v1, %v1444_v5  ;;  %v1582_v12 = vsel %vm1398_vm5, %v1244_v2, %v1490_v6  ;;  %v1065_v13 = vadd.f32 %v3170_v42, %v1064_v9  ;;  %v1249_v14 = vadd.f32 %v3170_v42, %v1248_v10 }
 0x166   : > { %v2528_v15 = vpack.c.bf16 %v1536_v11, %v1535_v7  ;;  %v2643_v16 = vpack.c.bf16 %v1582_v12, %v1581_v8  ;;  %v1066_v17 = vpop.f32.mrf.mxu0  ;;  %v1250_v18 = vpop.f32.mrf.mxu1 }
 0x167   : > { %v1445_v19 = vmul.f32 0.2, %v1065_v13  ;;  %v1491_v20 = vmul.f32 0.2, %v1249_v14  ;;  %vm1353_vm6 = vcmp.ge.f32.partialorder %v1065_v13, 0.0  ;;  %vm1399_vm7 = vcmp.ge.f32.partialorder %v1249_v14, 0.0 }
 0x168   : > { %2706 = vst [vmem:[%s3180_s23 + $0x60] sm:$0xff] %v2528_v15   ;;  %2729 = vst [vmem:[%s3180_s23 + $0x118] sm:$0xff] %v2643_v16   ;;  %v1067_v21 = vpop.f32.mrf.mxu0  ;;  %v1251_v22 = vpop.f32.mrf.mxu1 }
 0x169   : > { %v1068_v23 = vadd.f32 %v3170_v42, %v1067_v21  ;;  %v1252_v24 = vadd.f32 %v3170_v42, %v1251_v22  ;;  %v1537_v29 = vsel %vm1353_vm6, %v1065_v13, %v1445_v19  ;;  %v1583_v30 = vsel %vm1399_vm7, %v1249_v14, %v1491_v20 }
 0x16a   : > { %v1069_v25 = vpop.f32.mrf.mxu0  ;;  %v1253_v26 = vpop.f32.mrf.mxu1 }
 0x16b   : > { %vm1354_vm8 = vcmp.ge.f32.partialorder %v1068_v23, 0.0  ;;  %v1446_v27 = vmul.f32 0.2, %v1068_v23  ;;  %vm1400_vm9 = vcmp.ge.f32.partialorder %v1252_v24, 0.0  ;;  %v1492_v28 = vmul.f32 0.2, %v1252_v24 }
 0x16c   : > { %v1072_v31 = vpop.f32.mrf.mxu0  ;;  %v1256_v32 = vpop.f32.mrf.mxu1 }
 0x16d   : > { %v1538_v33 = vsel %vm1354_vm8, %v1068_v23, %v1446_v27  ;;  %v1584_v34 = vsel %vm1400_vm9, %v1252_v24, %v1492_v28  ;;  %v1073_v35 = vadd.f32 %v3170_v42, %v1072_v31  ;;  %v1257_v36 = vadd.f32 %v3170_v42, %v1256_v32 }
 0x16e   : > { %v2533_v37 = vpack.c.bf16 %v1538_v33, %v1537_v29  ;;  %v2648_v38 = vpack.c.bf16 %v1584_v34, %v1583_v30  ;;  %v1074_v39 = vpop.f32.mrf.mxu0  ;;  %v1258_v40 = vpop.f32.mrf.mxu1 }
 0x16f   : > { %v1447_v41 = vmul.f32 0.2, %v1073_v35  ;;  %v1493_v43 = vmul.f32 0.2, %v1257_v36  ;;  %vm1355_vm10 = vcmp.ge.f32.partialorder %v1073_v35, 0.0  ;;  %vm1401_vm11 = vcmp.ge.f32.partialorder %v1257_v36, 0.0 }
 0x170   : > { %2707 = vst [vmem:[%s3180_s23 + $0x68] sm:$0xff] %v2533_v37   ;;  %2730 = vst [vmem:[%s3180_s23 + $0x120] sm:$0xff] %v2648_v38   ;;  %v1075_v44 = vpop.f32.mrf.mxu0  ;;  %v1259_v45 = vpop.f32.mrf.mxu1 }
 0x171   : > { %v1076_v46 = vadd.f32 %v3170_v42, %v1075_v44  ;;  %v1260_v47 = vadd.f32 %v3170_v42, %v1259_v45  ;;  %v1539_v52 = vsel %vm1355_vm10, %v1073_v35, %v1447_v41  ;;  %v1585_v53 = vsel %vm1401_vm11, %v1257_v36, %v1493_v43 }
 0x172   : > { %v1077_v48 = vpop.f32.mrf.mxu0  ;;  %v1261_v49 = vpop.f32.mrf.mxu1 }
 0x173   : > { %vm1356_vm12 = vcmp.ge.f32.partialorder %v1076_v46, 0.0  ;;  %v1448_v50 = vmul.f32 0.2, %v1076_v46  ;;  %vm1402_vm13 = vcmp.ge.f32.partialorder %v1260_v47, 0.0  ;;  %v1494_v51 = vmul.f32 0.2, %v1260_v47 }
 0x174   : > { %v1080_v54 = vpop.f32.mrf.mxu0  ;;  %v1264_v55 = vpop.f32.mrf.mxu1 }
 0x175   : > { %v1540_v56 = vsel %vm1356_vm12, %v1076_v46, %v1448_v50  ;;  %v1586_v57 = vsel %vm1402_vm13, %v1260_v47, %v1494_v51  ;;  %v1081_v58 = vadd.f32 %v3170_v42, %v1080_v54  ;;  %v1265_v59 = vadd.f32 %v3170_v42, %v1264_v55 }
 0x176   : > { %v2538_v60 = vpack.c.bf16 %v1540_v56, %v1539_v52  ;;  %v2653_v61 = vpack.c.bf16 %v1586_v57, %v1585_v53  ;;  %v1082_v62 = vpop.f32.mrf.mxu0  ;;  %v1266_v63 = vpop.f32.mrf.mxu1 }
 0x177   : > { %v1449_v0 = vmul.f32 0.2, %v1081_v58  ;;  %v1495_v1 = vmul.f32 0.2, %v1265_v59  ;;  %vm1357_vm14 = vcmp.ge.f32.partialorder %v1081_v58, 0.0  ;;  %vm1403_vm15 = vcmp.ge.f32.partialorder %v1265_v59, 0.0 }
 0x178   : > { %2708 = vst [vmem:[%s3180_s23 + $0x70] sm:$0xff] %v2538_v60   ;;  %2731 = vst [vmem:[%s3180_s23 + $0x128] sm:$0xff] %v2653_v61   ;;  %v1083_v2 = vpop.f32.mrf.mxu0  ;;  %v1267_v3 = vpop.f32.mrf.mxu1 }
 0x179   : > { %v1084_v4 = vadd.f32 %v3170_v42, %v1083_v2  ;;  %v1268_v5 = vadd.f32 %v3170_v42, %v1267_v3  ;;  %v1541_v10 = vsel %vm1357_vm14, %v1081_v58, %v1449_v0  ;;  %v1587_v11 = vsel %vm1403_vm15, %v1265_v59, %v1495_v1 }
 0x17a   : > { %v1085_v6 = vpop.f32.mrf.mxu0  ;;  %v1269_v7 = vpop.f32.mrf.mxu1 }
 0x17b   : > { %vm1358_vm0 = vcmp.ge.f32.partialorder %v1084_v4, 0.0  ;;  %v1450_v8 = vmul.f32 0.2, %v1084_v4  ;;  %vm1404_vm1 = vcmp.ge.f32.partialorder %v1268_v5, 0.0  ;;  %v1496_v9 = vmul.f32 0.2, %v1268_v5 }
 0x17c   : > { %v1088_v12 = vpop.f32.mrf.mxu0  ;;  %v1272_v13 = vpop.f32.mrf.mxu1  ;;  %v3291_v7 = vld [vmem:[%s3326_s2] ss:$0 sm:$0xff] }
 0x17d   : > { %v1542_v14 = vsel %vm1358_vm0, %v1084_v4, %v1450_v8  ;;  %v1588_v15 = vsel %vm1404_vm1, %v1268_v5, %v1496_v9  ;;  %v1089_v16 = vadd.f32 %v3170_v42, %v1088_v12  ;;  %v1273_v17 = vadd.f32 %v3170_v42, %v1272_v13 }
 0x17e   : > { %v2543_v18 = vpack.c.bf16 %v1542_v14, %v1541_v10  ;;  %v2658_v19 = vpack.c.bf16 %v1588_v15, %v1587_v11  ;;  %v1090_v20 = vpop.f32.mrf.mxu0  ;;  %v1274_v21 = vpop.f32.mrf.mxu1 }
 0x17f   : > { %v1451_v22 = vmul.f32 0.2, %v1089_v16  ;;  %v1497_v23 = vmul.f32 0.2, %v1273_v17  ;;  %vm1359_vm2 = vcmp.ge.f32.partialorder %v1089_v16, 0.0  ;;  %vm1405_vm3 = vcmp.ge.f32.partialorder %v1273_v17, 0.0 }
 0x180   : > { %2709 = vst [vmem:[%s3180_s23 + $0x78] sm:$0xff] %v2543_v18   ;;  %2732 = vst [vmem:[%s3180_s23 + $0x130] sm:$0xff] %v2658_v19   ;;  %v1091_v24 = vpop.f32.mrf.mxu0  ;;  %v1275_v25 = vpop.f32.mrf.mxu1 }
 0x181   : > { %v1092_v26 = vadd.f32 %v3170_v42, %v1091_v24  ;;  %v1276_v27 = vadd.f32 %v3170_v42, %v1275_v25  ;;  %v1543_v32 = vsel %vm1359_vm2, %v1089_v16, %v1451_v22  ;;  %v1589_v33 = vsel %vm1405_vm3, %v1273_v17, %v1497_v23 }
 0x182   : > { %v1093_v28 = vpop.f32.mrf.mxu0  ;;  %v1277_v29 = vpop.f32.mrf.mxu1 }
 0x183   : > { %vm1360_vm4 = vcmp.ge.f32.partialorder %v1092_v26, 0.0  ;;  %v1452_v30 = vmul.f32 0.2, %v1092_v26  ;;  %vm1406_vm5 = vcmp.ge.f32.partialorder %v1276_v27, 0.0  ;;  %v1498_v31 = vmul.f32 0.2, %v1276_v27 }
 0x184   : > { %v1096_v34 = vpop.f32.mrf.mxu0  ;;  %v1280_v35 = vpop.f32.mrf.mxu1 }
 0x185   : > { %v1544_v36 = vsel %vm1360_vm4, %v1092_v26, %v1452_v30  ;;  %v1590_v37 = vsel %vm1406_vm5, %v1276_v27, %v1498_v31  ;;  %v1097_v38 = vadd.f32 %v3170_v42, %v1096_v34  ;;  %v1281_v39 = vadd.f32 %v3170_v42, %v1280_v35 }
 0x186   : > { %v2548_v40 = vpack.c.bf16 %v1544_v36, %v1543_v32  ;;  %v2663_v41 = vpack.c.bf16 %v1590_v37, %v1589_v33  ;;  %v1098_v43 = vpop.f32.mrf.mxu0  ;;  %v1282_v44 = vpop.f32.mrf.mxu1 }
 0x187   : > { %v1453_v45 = vmul.f32 0.2, %v1097_v38  ;;  %v1499_v46 = vmul.f32 0.2, %v1281_v39  ;;  %vm1361_vm6 = vcmp.ge.f32.partialorder %v1097_v38, 0.0  ;;  %vm1407_vm7 = vcmp.ge.f32.partialorder %v1281_v39, 0.0 }
 0x188   : > { %2710 = vst [vmem:[%s3180_s23 + $0x80] sm:$0xff] %v2548_v40   ;;  %2733 = vst [vmem:[%s3180_s23 + $0x138] sm:$0xff] %v2663_v41   ;;  %v1099_v47 = vpop.f32.mrf.mxu0  ;;  %v1283_v48 = vpop.f32.mrf.mxu1 }
 0x189   : > { %v1100_v49 = vadd.f32 %v3170_v42, %v1099_v47  ;;  %v1284_v50 = vadd.f32 %v3170_v42, %v1283_v48  ;;  %v1545_v55 = vsel %vm1361_vm6, %v1097_v38, %v1453_v45  ;;  %v1591_v56 = vsel %vm1407_vm7, %v1281_v39, %v1499_v46 }
 0x18a   : > { %v1101_v51 = vpop.f32.mrf.mxu0  ;;  %v1285_v52 = vpop.f32.mrf.mxu1 }
 0x18b   : > { %vm1362_vm8 = vcmp.ge.f32.partialorder %v1100_v49, 0.0  ;;  %v1454_v53 = vmul.f32 0.2, %v1100_v49  ;;  %vm1408_vm9 = vcmp.ge.f32.partialorder %v1284_v50, 0.0  ;;  %v1500_v54 = vmul.f32 0.2, %v1284_v50 }
 0x18c   : > { %v1104_v57 = vpop.f32.mrf.mxu0  ;;  %v1288_v58 = vpop.f32.mrf.mxu1 }
 0x18d   : > { %v1546_v59 = vsel %vm1362_vm8, %v1100_v49, %v1454_v53  ;;  %v1592_v60 = vsel %vm1408_vm9, %v1284_v50, %v1500_v54  ;;  %v1105_v61 = vadd.f32 %v3170_v42, %v1104_v57  ;;  %v1289_v62 = vadd.f32 %v3170_v42, %v1288_v58 }
 0x18e   : > { %v2553_v63 = vpack.c.bf16 %v1546_v59, %v1545_v55  ;;  %v2668_v0 = vpack.c.bf16 %v1592_v60, %v1591_v56  ;;  %v1106_v1 = vpop.f32.mrf.mxu0  ;;  %v1290_v2 = vpop.f32.mrf.mxu1 }
 0x18f   : > { %v1455_v3 = vmul.f32 0.2, %v1105_v61  ;;  %v1501_v4 = vmul.f32 0.2, %v1289_v62  ;;  %vm1363_vm10 = vcmp.ge.f32.partialorder %v1105_v61, 0.0  ;;  %vm1409_vm11 = vcmp.ge.f32.partialorder %v1289_v62, 0.0 }
 0x190   : > { %2711 = vst [vmem:[%s3180_s23 + $0x88] sm:$0xff] %v2553_v63   ;;  %2734 = vst [vmem:[%s3180_s23 + $0x140] sm:$0xff] %v2668_v0   ;;  %v1107_v5 = vpop.f32.mrf.mxu0  ;;  %v1291_v6 = vpop.f32.mrf.mxu1 }
 0x191   : > { %v1108_v8 = vadd.f32 %v3291_v7, %v1107_v5  ;;  %v1292_v42 = vadd.f32 %v3291_v7, %v1291_v6  ;;  %v1547_v13 = vsel %vm1363_vm10, %v1105_v61, %v1455_v3  ;;  %v1593_v14 = vsel %vm1409_vm11, %v1289_v62, %v1501_v4 }
 0x192   : > { %v1109_v9 = vpop.f32.mrf.mxu0  ;;  %v1293_v10 = vpop.f32.mrf.mxu1 }
 0x193   : > { %vm1364_vm12 = vcmp.ge.f32.partialorder %v1108_v8, 0.0  ;;  %v1456_v11 = vmul.f32 0.2, %v1108_v8  ;;  %vm1410_vm13 = vcmp.ge.f32.partialorder %v1292_v42, 0.0  ;;  %v1502_v12 = vmul.f32 0.2, %v1292_v42 }
 0x194   : > { %v1112_v15 = vpop.f32.mrf.mxu0  ;;  %v1296_v16 = vpop.f32.mrf.mxu1 }
 0x195   : > { %v1548_v17 = vsel %vm1364_vm12, %v1108_v8, %v1456_v11  ;;  %v1594_v18 = vsel %vm1410_vm13, %v1292_v42, %v1502_v12  ;;  %v1113_v19 = vadd.f32 %v3291_v7, %v1112_v15  ;;  %v1297_v20 = vadd.f32 %v3291_v7, %v1296_v16 }
 0x196   : > { %v2558_v21 = vpack.c.bf16 %v1548_v17, %v1547_v13  ;;  %v2673_v22 = vpack.c.bf16 %v1594_v18, %v1593_v14  ;;  %v1114_v23 = vpop.f32.mrf.mxu0  ;;  %v1298_v24 = vpop.f32.mrf.mxu1 }
 0x197   : > { %v1457_v25 = vmul.f32 0.2, %v1113_v19  ;;  %v1503_v26 = vmul.f32 0.2, %v1297_v20  ;;  %vm1365_vm14 = vcmp.ge.f32.partialorder %v1113_v19, 0.0  ;;  %vm1411_vm15 = vcmp.ge.f32.partialorder %v1297_v20, 0.0 }
 0x198   : > { %2712 = vst [vmem:[%s3180_s23 + $0x90] sm:$0xff] %v2558_v21   ;;  %2735 = vst [vmem:[%s3180_s23 + $0x148] sm:$0xff] %v2673_v22   ;;  %v1115_v27 = vpop.f32.mrf.mxu0  ;;  %v1299_v28 = vpop.f32.mrf.mxu1 }
 0x199   : > { %v1116_v29 = vadd.f32 %v3291_v7, %v1115_v27  ;;  %v1300_v30 = vadd.f32 %v3291_v7, %v1299_v28  ;;  %v1549_v35 = vsel %vm1365_vm14, %v1113_v19, %v1457_v25  ;;  %v1595_v36 = vsel %vm1411_vm15, %v1297_v20, %v1503_v26 }
 0x19a   : > { %v1117_v31 = vpop.f32.mrf.mxu0  ;;  %v1301_v32 = vpop.f32.mrf.mxu1 }
 0x19b   : > { %vm1366_vm0 = vcmp.ge.f32.partialorder %v1116_v29, 0.0  ;;  %v1458_v33 = vmul.f32 0.2, %v1116_v29  ;;  %vm1412_vm1 = vcmp.ge.f32.partialorder %v1300_v30, 0.0  ;;  %v1504_v34 = vmul.f32 0.2, %v1300_v30 }
 0x19c   : > { %v1120_v37 = vpop.f32.mrf.mxu0  ;;  %v1304_v38 = vpop.f32.mrf.mxu1 }
 0x19d   : > { %v1550_v39 = vsel %vm1366_vm0, %v1116_v29, %v1458_v33  ;;  %v1596_v40 = vsel %vm1412_vm1, %v1300_v30, %v1504_v34  ;;  %v1121_v41 = vadd.f32 %v3291_v7, %v1120_v37  ;;  %v1305_v43 = vadd.f32 %v3291_v7, %v1304_v38 }
 0x19e   : > { %v2563_v44 = vpack.c.bf16 %v1550_v39, %v1549_v35  ;;  %v2678_v45 = vpack.c.bf16 %v1596_v40, %v1595_v36  ;;  %v1122_v46 = vpop.f32.mrf.mxu0  ;;  %v1306_v47 = vpop.f32.mrf.mxu1 }
 0x19f   : > { %v1459_v48 = vmul.f32 0.2, %v1121_v41  ;;  %v1505_v49 = vmul.f32 0.2, %v1305_v43  ;;  %vm1367_vm2 = vcmp.ge.f32.partialorder %v1121_v41, 0.0  ;;  %vm1413_vm3 = vcmp.ge.f32.partialorder %v1305_v43, 0.0 }
 0x1a0   : > { %2713 = vst [vmem:[%s3180_s23 + $0x98] sm:$0xff] %v2563_v44   ;;  %2736 = vst [vmem:[%s3180_s23 + $0x150] sm:$0xff] %v2678_v45   ;;  %v1123_v50 = vpop.f32.mrf.mxu0  ;;  %v1307_v51 = vpop.f32.mrf.mxu1 }
 0x1a1   : > { %v1124_v52 = vadd.f32 %v3291_v7, %v1123_v50  ;;  %v1308_v53 = vadd.f32 %v3291_v7, %v1307_v51  ;;  %v1551_v58 = vsel %vm1367_vm2, %v1121_v41, %v1459_v48  ;;  %v1597_v59 = vsel %vm1413_vm3, %v1305_v43, %v1505_v49 }
 0x1a2   : > { %v1125_v54 = vpop.f32.mrf.mxu0  ;;  %v1309_v55 = vpop.f32.mrf.mxu1 }
 0x1a3   : > { %vm1368_vm4 = vcmp.ge.f32.partialorder %v1124_v52, 0.0  ;;  %v1460_v56 = vmul.f32 0.2, %v1124_v52  ;;  %vm1414_vm5 = vcmp.ge.f32.partialorder %v1308_v53, 0.0  ;;  %v1506_v57 = vmul.f32 0.2, %v1308_v53 }
 0x1a4   : > { %v1128_v60 = vpop.f32.mrf.mxu0  ;;  %v1312_v61 = vpop.f32.mrf.mxu1 }
 0x1a5   : > { %v1552_v62 = vsel %vm1368_vm4, %v1124_v52, %v1460_v56  ;;  %v1598_v63 = vsel %vm1414_vm5, %v1308_v53, %v1506_v57  ;;  %v1129_v0 = vadd.f32 %v3291_v7, %v1128_v60  ;;  %v1313_v1 = vadd.f32 %v3291_v7, %v1312_v61 }
 0x1a6   : > { %v2568_v2 = vpack.c.bf16 %v1552_v62, %v1551_v58  ;;  %v2683_v3 = vpack.c.bf16 %v1598_v63, %v1597_v59  ;;  %v1130_v4 = vpop.f32.mrf.mxu0  ;;  %v1314_v5 = vpop.f32.mrf.mxu1 }
 0x1a7   : > { %v1461_v6 = vmul.f32 0.2, %v1129_v0  ;;  %v1507_v8 = vmul.f32 0.2, %v1313_v1  ;;  %vm1369_vm6 = vcmp.ge.f32.partialorder %v1129_v0, 0.0  ;;  %vm1415_vm7 = vcmp.ge.f32.partialorder %v1313_v1, 0.0 }
 0x1a8   : > { %2714 = vst [vmem:[%s3180_s23 + $0xa0] sm:$0xff] %v2568_v2   ;;  %2737 = vst [vmem:[%s3180_s23 + $0x158] sm:$0xff] %v2683_v3   ;;  %v1131_v42 = vpop.f32.mrf.mxu0  ;;  %v1315_v9 = vpop.f32.mrf.mxu1 }
 0x1a9   : > { %v1132_v10 = vadd.f32 %v3291_v7, %v1131_v42  ;;  %v1316_v11 = vadd.f32 %v3291_v7, %v1315_v9  ;;  %v1553_v16 = vsel %vm1369_vm6, %v1129_v0, %v1461_v6  ;;  %v1599_v17 = vsel %vm1415_vm7, %v1313_v1, %v1507_v8 }
 0x1aa   : > { %v1133_v12 = vpop.f32.mrf.mxu0  ;;  %v1317_v13 = vpop.f32.mrf.mxu1 }
 0x1ab   : > { %vm1370_vm8 = vcmp.ge.f32.partialorder %v1132_v10, 0.0  ;;  %v1462_v14 = vmul.f32 0.2, %v1132_v10  ;;  %vm1416_vm9 = vcmp.ge.f32.partialorder %v1316_v11, 0.0  ;;  %v1508_v15 = vmul.f32 0.2, %v1316_v11 }
 0x1ac   : > { %v1136_v18 = vpop.f32.mrf.mxu0  ;;  %v1320_v19 = vpop.f32.mrf.mxu1 }
 0x1ad   : > { %v1554_v20 = vsel %vm1370_vm8, %v1132_v10, %v1462_v14  ;;  %v1600_v21 = vsel %vm1416_vm9, %v1316_v11, %v1508_v15  ;;  %v1137_v22 = vadd.f32 %v3291_v7, %v1136_v18  ;;  %v1321_v23 = vadd.f32 %v3291_v7, %v1320_v19 }
 0x1ae   : > { %v2573_v24 = vpack.c.bf16 %v1554_v20, %v1553_v16  ;;  %v2688_v25 = vpack.c.bf16 %v1600_v21, %v1599_v17  ;;  %v1138_v26 = vpop.f32.mrf.mxu0  ;;  %v1322_v27 = vpop.f32.mrf.mxu1 }
 0x1af   : > { %v1463_v30 = vmul.f32 0.2, %v1137_v22  ;;  %v1509_v31 = vmul.f32 0.2, %v1321_v23  ;;  %vm1371_vm10 = vcmp.ge.f32.partialorder %v1137_v22, 0.0  ;;  %vm1417_vm11 = vcmp.ge.f32.partialorder %v1321_v23, 0.0 }
 0x1b0   : > { %2715 = vst [vmem:[%s3180_s23 + $0xa8] sm:$0xff] %v2573_v24   ;;  %2738 = vst [vmem:[%s3180_s23 + $0x160] sm:$0xff] %v2688_v25   ;;  %v1139_v28 = vpop.f32.mrf.mxu0  ;;  %v1323_v29 = vpop.f32.mrf.mxu1 }
 0x1b1   : > { %v1140_v32 = vadd.f32 %v3291_v7, %v1139_v28  ;;  %v1324_v33 = vadd.f32 %v3291_v7, %v1323_v29  ;;  %v1555_v38 = vsel %vm1371_vm10, %v1137_v22, %v1463_v30  ;;  %v1601_v39 = vsel %vm1417_vm11, %v1321_v23, %v1509_v31 }
 0x1b2   : > { %v1141_v34 = vpop.f32.mrf.mxu0  ;;  %v1325_v35 = vpop.f32.mrf.mxu1 }
 0x1b3   : > { %vm1372_vm12 = vcmp.ge.f32.partialorder %v1140_v32, 0.0  ;;  %v1464_v36 = vmul.f32 0.2, %v1140_v32  ;;  %vm1418_vm13 = vcmp.ge.f32.partialorder %v1324_v33, 0.0  ;;  %v1510_v37 = vmul.f32 0.2, %v1324_v33 }
 0x1b5   : > { %v1556_v40 = vsel %vm1372_vm12, %v1140_v32, %v1464_v36  ;;  %v1602_v41 = vsel %vm1418_vm13, %v1324_v33, %v1510_v37 }
 0x1b6   : > { %v2578_v43 = vpack.c.bf16 %v1556_v40, %v1555_v38  ;;  %v2693_v44 = vpack.c.bf16 %v1602_v41, %v1601_v39 }
 0x1b8   : > { %2716 = vst [vmem:[%s3180_s23 + $0xb0] sm:$0xff] %v2578_v43   ;;  %2739 = vst [vmem:[%s3180_s23 + $0x168] sm:$0xff] %v2693_v44  }
 0x1b9 PF: > { %s13_s12 = sadd.s32 1, %s2930_s12  }
 0x1ba   : > { %p10_p4 = scmp.ge.s32.totalorder %s13_s12, 4  }
 0x1bc   :  { %12 = sbr.rel (!%p10_p4) target bundleno = 1 (0x1), region = 62 }

// kernel: conv_autoencoder_forward.9
= control target key start
LH: loop header
LB: loop body
LE: loop exit
PB: predicated region body
PF: predicated region fallthrough
CT: control target
= control target key end

     0   :  { %s2434_s12 = smov 0   ;;  %s2436_s13 = smov 0   ;;  %s3014_s0 = inlined_call_operand.vmem [shape: bf16[2,18,3,24,96], index: 0, kind: input, shape index: {}]   ;;  %s3015_s1 = inlined_call_operand.vmem [shape: bf16[3,96,64], index: 1, kind: input, shape index: {}]   ;;  %s3016_s2 = inlined_call_operand.vmem [shape: f32[1,64], index: 2, kind: input, shape index: {}]   ;;  %s3017_s3 = inlined_call_operand.vmem [shape: bf16[2,18,24,64], index: 3, kind: output, shape index: {}]  }
   0x1   :  { %s2438_s14 = smov 0   ;;  %s2440_s15 = smov 0  }
   0x2   :  { %s2442_s16 = smov 0   ;;  %s2444_s17 = smov 0  }
   0x3   :  { %s2446_s18 = smov 0  }
   0x4 LB: > { %s22_s19 = sadd.s32 1, %s2401_s16  ;;  %s25_s20 = sadd.s32 1, %s2405_s17  ;;  %s2409_s18 = sphi %s2446_s18, %s13_s18   ;;  %s2405_s17 = sphi %s2444_s17, %s3023_s17   ;;  %s2401_s16 = sphi %s2442_s16, %s3022_s16   ;;  %s2397_s15 = sphi %s2440_s15, %s3021_s15   ;;  %s2393_s14 = sphi %s2438_s14, %s3020_s14   ;;  %s2389_s13 = sphi %s2436_s13, %s3019_s13   ;;  %s2385_s12 = sphi %s2434_s12, %s3018_s12  }
   0x5   : > { %p23_p0 = scmp.ge.s32.totalorder %s22_s19, 3  ;;  %p41_p1 = scmp.ne.s32.totalorder %s2389_s13, %s2385_s12 }
   0x6   : > { %p42_p2 = scmp.eq.s32.totalorder %s2409_s18, 0  ;;  %s34_s24 = sadd.s32 1, %s2389_s13 }
   0x7   : > { %s3025_s19 = smov (%p23_p0, %s22_s19), 0  ;;  %s3027_s20 = smov (!%p23_p0, %s25_s20), %s2405_s17 }
   0x8   : > { %p43_p3 = por %p42_p2, %p41_p1  ;;  %p27_p4 = scmp.ge.s32.totalorder %s3027_s20, 2 }
   0x9   : > { %s30_s21 = ssub.s32 %s2401_s16, %s3025_s19  ;;  %p1914_p6 = scmp.ge.s32.totalorder %s2409_s18, 6 }
   0xa   : > { %s3029_s20 = smov (%p27_p4, %s3027_s20), 0 }
   0xb   : > { %s29_s22 = ssub.s32 %s2405_s17, %s3029_s20  ;;  %143 = sbr.rel (%p1914_p6) target bundleno = 43 (0x2b), region = 20 }
   0xc   : > { %s31_s23 = sor.u32 %s30_s21, %s29_s22 }
   0xd   : > { %p32_p5 = scmp.eq.s32.totalorder %s31_s23, 0 }
   0xf   : > { %s2485_s25 = scalar_select %p32_p5, %s2389_s13, %s34_s24  }
  0x10   : > { %146 = sbr.rel (!%p43_p3) target bundleno = 43 (0x2b), region = 24  ;;  %s148_s26 = sand.u32 (%p43_p3), 1, %s2389_s13  }
  0x11   : > { %s2258_s27 = smul.u32 (%p43_p3), 3, %s2401_s16 }
  0x12   : > { %s2257_s28 = smul.u32 (%p43_p3), 216, %s148_s26 }
  0x13   : > { %s2259_s29 = smul.u32 (%p43_p3), 162, %s2405_s17 }
  0x14   : > { %s2499_s8 = scalar_lea.vmem (%p43_p3), [#allocation3], %s2257_s28 }
  0x15   : > { %s153_s30 = sadd.s32 %s2259_s29, %s2258_s27 }
  0x16   : > { %s1915_s4 = sshll.u32 %s153_s30, 2 }
  0x17   : > { %s2494_s7 = scalar_lea.vmem %s3014_s0, %s1915_s4 }
  0x18   : > { %v172_v0 = vld [vmem:[%s2494_s7] sm:$0xff]   ;;  %v176_v1 = vld [vmem:[%s2494_s7 + $0x8] sm:$0xf]  ;;  %v182_v3 = vld [vmem:[%s2494_s7 + $0x2c] sm:$0xf] }
  0x19   : > { %v178_v2 = vld [vmem:[%s2494_s7 + $0x24] sm:$0xff]   ;;  %173 = vst [vmem:[%s2499_s8] sm:$0xff] %v172_v0   ;;  %177 = vst [vmem:[%s2499_s8 + $0x8] sm:$0xf] %v176_v1  ;;  %v188_v5 = vld [vmem:[%s2494_s7 + $0x50] sm:$0xf] }
  0x1a   : > { %179 = vst [vmem:[%s2499_s8 + $0xc] sm:$0xff] %v178_v2   ;;  %v184_v4 = vld [vmem:[%s2494_s7 + $0x48] sm:$0xff]   ;;  %183 = vst [vmem:[%s2499_s8 + $0x14] sm:$0xf] %v182_v3  ;;  %v194_v7 = vld [vmem:[%s2494_s7 + $0x74] sm:$0xf] }
  0x1b   : > { %185 = vst [vmem:[%s2499_s8 + $0x18] sm:$0xff] %v184_v4   ;;  %189 = vst [vmem:[%s2499_s8 + $0x20] sm:$0xf] %v188_v5  ;;  %v190_v6 = vld [vmem:[%s2494_s7 + $0x6c] sm:$0xff]   ;;  %v200_v9 = vld [vmem:[%s2494_s7 + $0x98] sm:$0xf] }
  0x1c   : > { %v196_v8 = vld [vmem:[%s2494_s7 + $0x90] sm:$0xff]   ;;  %191 = vst [vmem:[%s2499_s8 + $0x24] sm:$0xff] %v190_v6   ;;  %195 = vst [vmem:[%s2499_s8 + $0x2c] sm:$0xf] %v194_v7  ;;  %v206_v11 = vld [vmem:[%s2494_s7 + $0xbc] sm:$0xf] }
  0x1d   : > { %197 = vst [vmem:[%s2499_s8 + $0x30] sm:$0xff] %v196_v8   ;;  %v202_v10 = vld [vmem:[%s2494_s7 + $0xb4] sm:$0xff]   ;;  %201 = vst [vmem:[%s2499_s8 + $0x38] sm:$0xf] %v200_v9  ;;  %v212_v13 = vld [vmem:[%s2494_s7 + $0xe0] sm:$0xf] }
  0x1e   : > { %203 = vst [vmem:[%s2499_s8 + $0x3c] sm:$0xff] %v202_v10   ;;  %207 = vst [vmem:[%s2499_s8 + $0x44] sm:$0xf] %v206_v11  ;;  %v208_v12 = vld [vmem:[%s2494_s7 + $0xd8] sm:$0xff]   ;;  %v218_v15 = vld [vmem:[%s2494_s7 + $0x104] sm:$0xf] }
  0x1f   : > { %v214_v14 = vld [vmem:[%s2494_s7 + $0xfc] sm:$0xff]   ;;  %209 = vst [vmem:[%s2499_s8 + $0x48] sm:$0xff] %v208_v12   ;;  %213 = vst [vmem:[%s2499_s8 + $0x50] sm:$0xf] %v212_v13  ;;  %v224_v17 = vld [vmem:[%s2494_s7 + $0x128] sm:$0xf] }
  0x20   : > { %215 = vst [vmem:[%s2499_s8 + $0x54] sm:$0xff] %v214_v14   ;;  %v220_v16 = vld [vmem:[%s2494_s7 + $0x120] sm:$0xff]   ;;  %219 = vst [vmem:[%s2499_s8 + $0x5c] sm:$0xf] %v218_v15  ;;  %v230_v19 = vld [vmem:[%s2494_s7 + $0x14c] sm:$0xf] }
  0x21   : > { %221 = vst [vmem:[%s2499_s8 + $0x60] sm:$0xff] %v220_v16   ;;  %225 = vst [vmem:[%s2499_s8 + $0x68] sm:$0xf] %v224_v17  ;;  %v226_v18 = vld [vmem:[%s2494_s7 + $0x144] sm:$0xff]   ;;  %v236_v21 = vld [vmem:[%s2494_s7 + $0x170] sm:$0xf] }
  0x22   : > { %v232_v20 = vld [vmem:[%s2494_s7 + $0x168] sm:$0xff]   ;;  %227 = vst [vmem:[%s2499_s8 + $0x6c] sm:$0xff] %v226_v18   ;;  %231 = vst [vmem:[%s2499_s8 + $0x74] sm:$0xf] %v230_v19  ;;  %v242_v23 = vld [vmem:[%s2494_s7 + $0x194] sm:$0xf] }
  0x23   : > { %233 = vst [vmem:[%s2499_s8 + $0x78] sm:$0xff] %v232_v20   ;;  %v238_v22 = vld [vmem:[%s2494_s7 + $0x18c] sm:$0xff]   ;;  %237 = vst [vmem:[%s2499_s8 + $0x80] sm:$0xf] %v236_v21  ;;  %v248_v25 = vld [vmem:[%s2494_s7 + $0x1b8] sm:$0xf] }
  0x24   : > { %239 = vst [vmem:[%s2499_s8 + $0x84] sm:$0xff] %v238_v22   ;;  %243 = vst [vmem:[%s2499_s8 + $0x8c] sm:$0xf] %v242_v23  ;;  %v244_v24 = vld [vmem:[%s2494_s7 + $0x1b0] sm:$0xff]   ;;  %v254_v27 = vld [vmem:[%s2494_s7 + $0x1dc] sm:$0xf] }
  0x25   : > { %v250_v26 = vld [vmem:[%s2494_s7 + $0x1d4] sm:$0xff]   ;;  %245 = vst [vmem:[%s2499_s8 + $0x90] sm:$0xff] %v244_v24   ;;  %249 = vst [vmem:[%s2499_s8 + $0x98] sm:$0xf] %v248_v25  ;;  %v260_v29 = vld [vmem:[%s2494_s7 + $0x200] sm:$0xf] }
  0x26   : > { %251 = vst [vmem:[%s2499_s8 + $0x9c] sm:$0xff] %v250_v26   ;;  %v256_v28 = vld [vmem:[%s2494_s7 + $0x1f8] sm:$0xff]   ;;  %255 = vst [vmem:[%s2499_s8 + $0xa4] sm:$0xf] %v254_v27  ;;  %v266_v31 = vld [vmem:[%s2494_s7 + $0x224] sm:$0xf] }
  0x27   : > { %257 = vst [vmem:[%s2499_s8 + $0xa8] sm:$0xff] %v256_v28   ;;  %261 = vst [vmem:[%s2499_s8 + $0xb0] sm:$0xf] %v260_v29  ;;  %v262_v30 = vld [vmem:[%s2494_s7 + $0x21c] sm:$0xff]   ;;  %v272_v33 = vld [vmem:[%s2494_s7 + $0x248] sm:$0xf] }
  0x28   : > { %v268_v32 = vld [vmem:[%s2494_s7 + $0x240] sm:$0xff]   ;;  %263 = vst [vmem:[%s2499_s8 + $0xb4] sm:$0xff] %v262_v30   ;;  %267 = vst [vmem:[%s2499_s8 + $0xbc] sm:$0xf] %v266_v31  ;;  %v278_v35 = vld [vmem:[%s2494_s7 + $0x26c] sm:$0xf] }
  0x29   : > { %269 = vst [vmem:[%s2499_s8 + $0xc0] sm:$0xff] %v268_v32   ;;  %v274_v34 = vld [vmem:[%s2494_s7 + $0x264] sm:$0xff]   ;;  %273 = vst [vmem:[%s2499_s8 + $0xc8] sm:$0xf] %v272_v33 }
  0x2a   : > { %275 = vst [vmem:[%s2499_s8 + $0xcc] sm:$0xff] %v274_v34   ;;  %279 = vst [vmem:[%s2499_s8 + $0xd4] sm:$0xf] %v278_v35 }
  0x2b PF: > { %p1916_p7 = scmp.ge.s32.totalorder %s2409_s18, 1  ;;  %p418_p8 = scmp.lt.s32.totalorder %s2409_s18, 7 }
  0x2d   : > { %p419_p9 = pnand %p1916_p7, %p418_p8 }
  0x2e   : > { %s425_s9 = sand.u32 (!%p419_p9), 1, %s2385_s12   ;;  %p453_p10 = scmp.lt.s32.totalorder (!%p419_p9), %s2393_s14, 2 }
  0x2f   : > { %422 = sbr.rel (%p419_p9) target bundleno = 490 (0x1ea), region = 69  ;;  %p458_p11 = scmp.lt.s32.totalorder (!%p419_p9), %s2397_s15, 1 }
  0x30   : > { %s2260_s10 = smul.u32 (!%p419_p9), 216, %s425_s9  ;;  %p1919_p12 = scmp.ne.s32.totalorder (!%p419_p9), %s2393_s14, 0 }
  0x32   : > { %s2587_s30 = scalar_lea.vmem (!%p419_p9), [#allocation3], %s2260_s10 }
  0x34   : > { %s454_s11 = scalar_select %p453_p10, %s2393_s14, 2 }
  0x35   : > { %s3031_s15 = smov (!%p458_p11, %s2397_s15), 1  ;;  %467 = sbr.rel (%p1919_p12) target bundleno = 86 (0x56), region = 77 }
  0x36   : > { %s2261_s21 = smul.u32 48, %s454_s11 }
  0x37   : > { %s2262_s26 = smul.u32 216, %s3031_s15 }
  0x38   : > { %s2580_s24 = scalar_lea.vmem %s3015_s1, %s2261_s21 }
  0x39   : > { %s2585_s29 = scalar_lea.vmem %s3017_s3, %s2262_s26 }
  0x3a   : > { %vm468_vm0 = vcmask 523264   ;;  %v2411_v36 = vmov 0.0  }
  0x3b   : > { %469 = vst.msk [vmem:[#allocation2] sm:$0xff] %vm468_vm0, %v2411_v36  ;;  %470 = vst.msk [vmem:[#allocation2 + $0x8] sm:$0xff] %vm468_vm0, %v2411_v36 }
  0x3c   : > { %471 = vst.msk [vmem:[#allocation2 + $0x10] sm:$0xff] %vm468_vm0, %v2411_v36  ;;  %472 = vst.msk [vmem:[#allocation2 + $0x18] sm:$0xff] %vm468_vm0, %v2411_v36 }
  0x3d   : > { %473 = vst.msk [vmem:[#allocation2 + $0x20] sm:$0xff] %vm468_vm0, %v2411_v36  ;;  %474 = vst.msk [vmem:[#allocation2 + $0x28] sm:$0xff] %vm468_vm0, %v2411_v36 }
  0x3e   : > { %475 = vst.msk [vmem:[#allocation2 + $0x30] sm:$0xff] %vm468_vm0, %v2411_v36  ;;  %476 = vst.msk [vmem:[#allocation2 + $0x38] sm:$0xff] %vm468_vm0, %v2411_v36 }
  0x3f   : > { %477 = vst.msk [vmem:[#allocation2 + $0x40] sm:$0xff] %vm468_vm0, %v2411_v36  ;;  %478 = vst.msk [vmem:[#allocation2 + $0x48] sm:$0xff] %vm468_vm0, %v2411_v36 }
  0x40   : > { %479 = vst.msk [vmem:[#allocation2 + $0x50] sm:$0xff] %vm468_vm0, %v2411_v36  ;;  %480 = vst.msk [vmem:[#allocation2 + $0x58] sm:$0xff] %vm468_vm0, %v2411_v36 }
  0x41   : > { %481 = vst.msk [vmem:[#allocation2 + $0x60] sm:$0xff] %vm468_vm0, %v2411_v36  ;;  %482 = vst.msk [vmem:[#allocation2 + $0x68] sm:$0xff] %vm468_vm0, %v2411_v36 }
  0x42   : > { %483 = vst.msk [vmem:[#allocation2 + $0x70] sm:$0xff] %vm468_vm0, %v2411_v36  ;;  %484 = vst.msk [vmem:[#allocation2 + $0x78] sm:$0xff] %vm468_vm0, %v2411_v36 }
  0x43   : > { %485 = vst.msk [vmem:[#allocation2 + $0x80] sm:$0xff] %vm468_vm0, %v2411_v36  ;;  %486 = vst.msk [vmem:[#allocation2 + $0x88] sm:$0xff] %vm468_vm0, %v2411_v36 }
  0x44   : > { %487 = vst.msk [vmem:[#allocation2 + $0x90] sm:$0xff] %vm468_vm0, %v2411_v36  ;;  %488 = vst.msk [vmem:[#allocation2 + $0x98] sm:$0xff] %vm468_vm0, %v2411_v36 }
  0x45   : > { %489 = vst.msk [vmem:[#allocation2 + $0xa0] sm:$0xff] %vm468_vm0, %v2411_v36  ;;  %490 = vst.msk [vmem:[#allocation2 + $0xa8] sm:$0xff] %vm468_vm0, %v2411_v36 }
  0x46   : > { %491 = vst.msk [vmem:[#allocation2 + $0xb0] sm:$0xff] %vm468_vm0, %v2411_v36  ;;  %492 = vst.msk [vmem:[#allocation2 + $0xb8] sm:$0xff] %vm468_vm0, %v2411_v36 }
  0x47   : > { %493 = vst.msk [vmem:[#allocation2 + $0xc0] sm:$0xff] %vm468_vm0, %v2411_v36  ;;  %494 = vst.msk [vmem:[#allocation2 + $0xc8] sm:$0xff] %vm468_vm0, %v2411_v36 }
  0x48   : > { %495 = vst.msk [vmem:[#allocation2 + $0xd0] sm:$0xff] %vm468_vm0, %v2411_v36  ;;  %496 = vst.msk [vmem:[#allocation2 + $0xd8] sm:$0xff] %vm468_vm0, %v2411_v36 }
  0x49   : > { %497 = vst.msk [vmem:[#allocation2 + $0xe0] sm:$0xff] %vm468_vm0, %v2411_v36  ;;  %498 = vst.msk [vmem:[#allocation2 + $0xe8] sm:$0xff] %vm468_vm0, %v2411_v36 }
  0x4a   : > { %499 = vst.msk [vmem:[#allocation2 + $0xf0] sm:$0xff] %vm468_vm0, %v2411_v36  ;;  %500 = vst.msk [vmem:[#allocation2 + $0xf8] sm:$0xff] %vm468_vm0, %v2411_v36 }
  0x4b   : > { %501 = vst.msk [vmem:[#allocation2 + $0x100] sm:$0xff] %vm468_vm0, %v2411_v36  ;;  %502 = vst.msk [vmem:[#allocation2 + $0x108] sm:$0xff] %vm468_vm0, %v2411_v36 }
  0x4c   : > { %503 = vst.msk [vmem:[#allocation2 + $0x110] sm:$0xff] %vm468_vm0, %v2411_v36  ;;  %504 = vst.msk [vmem:[#allocation2 + $0x118] sm:$0xff] %vm468_vm0, %v2411_v36 }
  0x4d   : > { %505 = vst.msk [vmem:[#allocation2 + $0x120] sm:$0xff] %vm468_vm0, %v2411_v36  ;;  %506 = vst.msk [vmem:[#allocation2 + $0x128] sm:$0xff] %vm468_vm0, %v2411_v36 }
  0x4e   : > { %507 = vst.msk [vmem:[#allocation2 + $0x130] sm:$0xff] %vm468_vm0, %v2411_v36  ;;  %508 = vst.msk [vmem:[#allocation2 + $0x138] sm:$0xff] %vm468_vm0, %v2411_v36 }
  0x4f   : > { %509 = vst.msk [vmem:[#allocation2 + $0x140] sm:$0xff] %vm468_vm0, %v2411_v36  ;;  %510 = vst.msk [vmem:[#allocation2 + $0x148] sm:$0xff] %vm468_vm0, %v2411_v36 }
  0x50   : > { %511 = vst.msk [vmem:[#allocation2 + $0x150] sm:$0xff] %vm468_vm0, %v2411_v36  ;;  %512 = vst.msk [vmem:[#allocation2 + $0x158] sm:$0xff] %vm468_vm0, %v2411_v36 }
  0x51   : > { %513 = vst.msk [vmem:[#allocation2 + $0x160] sm:$0xff] %vm468_vm0, %v2411_v36  ;;  %514 = vst.msk [vmem:[#allocation2 + $0x168] sm:$0xff] %vm468_vm0, %v2411_v36 }
  0x52   : > { %515 = vst.msk [vmem:[#allocation2 + $0x170] sm:$0xff] %vm468_vm0, %v2411_v36  ;;  %516 = vst.msk [vmem:[#allocation2 + $0x178] sm:$0xff] %vm468_vm0, %v2411_v36 }
  0x53   : > { %517 = vst.msk [vmem:[#allocation2 + $0x180] sm:$0xff] %vm468_vm0, %v2411_v36  ;;  %518 = vst.msk [vmem:[#allocation2 + $0x188] sm:$0xff] %vm468_vm0, %v2411_v36 }
  0x54   : > { %519 = vst.msk [vmem:[#allocation2 + $0x190] sm:$0xff] %vm468_vm0, %v2411_v36  ;;  %520 = vst.msk [vmem:[#allocation2 + $0x198] sm:$0xff] %vm468_vm0, %v2411_v36 }
  0x55   : > { %521 = vst.msk [vmem:[#allocation2 + $0x1a0] sm:$0xff] %vm468_vm0, %v2411_v36  ;;  %522 = vst.msk [vmem:[#allocation2 + $0x1a8] sm:$0xff] %vm468_vm0, %v2411_v36 }
  0x56 PF: > { %v2322_v37 = vld [vmem:[%s2580_s24 + $0x28] sm:$0xff]   ;;  %v2412_v38 = vmov 0.0   ;;  %v2323_v39 = vld [vmem:[%s2580_s24 + $0x20] sm:$0xff]   ;;  %vm2413_vm1 = vmmov 0   ;;  %v2324_v40 = vld [vmem:[%s2580_s24 + $0x18] sm:$0xff]   ;;  %vm814_vm2 = vcmask 785408  }
  0x57   : > { %2125 = vmatprep.subr.bf16.mxu0 %v2412_v38  ;;  %2245 = vmatprep.subr.bf16.mxu1 %v2412_v38  ;;  %v2325_v41 = vld [vmem:[%s2580_s24 + $0x10] sm:$0xff]   ;;  %v2326_v42 = vld [vmem:[%s2580_s24 + $0x8] sm:$0xff]   ;;  %v2327_v43 = vld [vmem:[%s2580_s24] sm:$0xff]   ;;  %vm1199_vm3 = vcmask 523264   ;;  %p1980_p13 = scmp.ne.s32.totalorder %s2393_s14, 2 }
  0x58   : > { %2126 = vmatpush3.bf16.msra.mxu0 %v2322_v37  ;;  %2251 = vmatpush3.bf16.msra.mxu1 %v2322_v37  ;;  %v2328_v44 = vld [vmem:[%s2587_s30] sm:$0xff]   ;;  %v2329_v45 = vld [vmem:[%s2587_s30 + $0x70] sm:$0xff]   ;;  %v2330_v46 = vld [vmem:[%s2587_s30 + $0x8] sm:$0xff]  }
  0x59   : > { %2127 = vmatprep.subr.bf16.mxu0 %v2412_v38  ;;  %2246 = vmatprep.subr.bf16.mxu1 %v2412_v38  ;;  %v2331_v47 = vld [vmem:[%s2587_s30 + $0x78] sm:$0xff]   ;;  %v2332_v48 = vld [vmem:[%s2587_s30 + $0x10] sm:$0xff]   ;;  %v2333_v49 = vld [vmem:[%s2587_s30 + $0x80] sm:$0xff]  }
  0x5a   : > { %2137 = vmatprep.mubr.msk.bf16.mxu0 %vm2413_vm1, %v2412_v38  ;;  %2193 = vmatprep.mubr.msk.bf16.mxu1 %vm2413_vm1, %v2412_v38  ;;  %v2334_v50 = vld [vmem:[%s2587_s30 + $0x18] sm:$0xff]   ;;  %v2335_v51 = vld [vmem:[%s2587_s30 + $0x88] sm:$0xff]   ;;  %v2336_v52 = vld [vmem:[%s2587_s30 + $0x20] sm:$0xff]  }
  0x5b   : > { %v2337_v53 = vld [vmem:[%s2587_s30 + $0x90] sm:$0xff]   ;;  %v2338_v54 = vld [vmem:[%s2587_s30 + $0x28] sm:$0xff]   ;;  %v2339_v55 = vld [vmem:[%s2587_s30 + $0x98] sm:$0xff]  }
  0x5c   : > { %2128 = vmatpush3.bf16.msra.mxu0 %v2323_v39  ;;  %2252 = vmatpush3.bf16.msra.mxu1 %v2323_v39  ;;  %v2340_v56 = vld [vmem:[%s2587_s30 + $0x30] sm:$0xff]   ;;  %v2341_v57 = vld [vmem:[%s2587_s30 + $0xa0] sm:$0xff]   ;;  %v2342_v58 = vld [vmem:[%s2587_s30 + $0x38] sm:$0xff]  }
  0x5d   : > { %2129 = vmatprep.subr.bf16.mxu0 %v2412_v38  ;;  %2247 = vmatprep.subr.bf16.mxu1 %v2412_v38  ;;  %v2343_v59 = vld [vmem:[%s2587_s30 + $0xa8] sm:$0xff]   ;;  %v2344_v60 = vld [vmem:[%s2587_s30 + $0x40] sm:$0xff]   ;;  %v2345_v61 = vld [vmem:[%s2587_s30 + $0xb0] sm:$0xff]  }
  0x5e   : > { %v2346_v62 = vld [vmem:[%s2587_s30 + $0x48] sm:$0xff]   ;;  %v2347_v63 = vld [vmem:[%s2587_s30 + $0xb8] sm:$0xff]   ;;  %v2348_v0 = vld [vmem:[%s2587_s30 + $0x50] sm:$0xff]  }
  0x5f   : > { %v2349_v1 = vld [vmem:[%s2587_s30 + $0xc0] sm:$0xff]   ;;  %v2350_v2 = vld [vmem:[%s2587_s30 + $0x58] sm:$0xff]   ;;  %v2351_v3 = vld [vmem:[%s2587_s30 + $0xc8] sm:$0xff]  }
  0x60   : > { %2130 = vmatpush3.bf16.msra.mxu0 %v2324_v40  ;;  %2253 = vmatpush3.bf16.msra.mxu1 %v2324_v40  ;;  %v2352_v4 = vld [vmem:[%s2587_s30 + $0x60] sm:$0xff]   ;;  %v2353_v5 = vld [vmem:[%s2587_s30 + $0xd0] sm:$0xff]   ;;  %v2354_v6 = vld [vmem:[%s2587_s30 + $0x68] sm:$0xff]  }
  0x61   : > { %2131 = vmatprep.subr.bf16.mxu0 %v2412_v38  ;;  %2248 = vmatprep.subr.bf16.mxu1 %v2412_v38  ;;  %v577_v7 = vld [vmem:[#allocation2] sm:$0xff]  ;;  %v578_v14 = vld [vmem:[#allocation2 + $0x8] sm:$0xff]  ;;  %v579_v22 = vld [vmem:[#allocation2 + $0x10] sm:$0xff] }
  0x62   : > { %v605_v8 = vld [vmem:[#allocation2 + $0xe0] sm:$0xff]  ;;  %v606_v16 = vld [vmem:[#allocation2 + $0xe8] sm:$0xff]  ;;  %v607_v24 = vld [vmem:[#allocation2 + $0xf0] sm:$0xff] }
  0x63   : > { %v580_v30 = vld [vmem:[#allocation2 + $0x18] sm:$0xff]  ;;  %v609_v40 = vld [vmem:[#allocation2 + $0x100] sm:$0xff] }
  0x64   : > { %2132 = vmatpush3.bf16.msra.mxu0 %v2325_v41  ;;  %2254 = vmatpush3.bf16.msra.mxu1 %v2325_v41  ;;  %v608_v32 = vld [vmem:[#allocation2 + $0xf8] sm:$0xff] }
  0x65   : > { %2133 = vmatprep.subr.bf16.mxu0 %v2412_v38  ;;  %2249 = vmatprep.subr.bf16.mxu1 %v2412_v38 }
  0x68   : > { %2134 = vmatpush3.bf16.msra.mxu0 %v2326_v42  ;;  %2255 = vmatpush3.bf16.msra.mxu1 %v2326_v42 }
  0x69   : > { %2135 = vmatprep.subr.bf16.mxu0 %v2412_v38  ;;  %2250 = vmatprep.subr.bf16.mxu1 %v2412_v38 }
  0x6c   : > { %2136 = vmatpush3.bf16.msra.mxu0 %v2327_v43  ;;  %2256 = vmatpush3.bf16.msra.mxu1 %v2327_v43 }
  0x6f   : > { %2138 = vmatmul.mubr.msk.bf16.vlgmr.msra.gmra.mxu0 %vm814_vm2, %v2328_v44  ;;  %2194 = vmatmul.mubr.msk.bf16.vlgmr.msra.gmra.mxu1 %vm814_vm2, %v2329_v45 }
  0x70   : > { %2141 = vmatprep.mubr.msk.bf16.mxu0 %vm2413_vm1, %v2412_v38  ;;  %2197 = vmatprep.mubr.msk.bf16.mxu1 %vm2413_vm1, %v2412_v38 }
  0x77   : > { %2142 = vmatmul.mubr.msk.bf16.gmra.mxu0 %vm814_vm2, %v2330_v46  ;;  %2198 = vmatmul.mubr.msk.bf16.gmra.mxu1 %vm814_vm2, %v2331_v47  ;;  %v582_v46 = vld [vmem:[#allocation2 + $0x28] sm:$0xff] }
  0x78   : > { %2145 = vmatprep.mubr.msk.bf16.mxu0 %vm2413_vm1, %v2412_v38  ;;  %2201 = vmatprep.mubr.msk.bf16.mxu1 %vm2413_vm1, %v2412_v38 }
  0x7f   : > { %2146 = vmatmul.mubr.msk.bf16.gmra.mxu0 %vm814_vm2, %v2332_v48  ;;  %2202 = vmatmul.mubr.msk.bf16.gmra.mxu1 %vm814_vm2, %v2333_v49  ;;  %v610_v48 = vld [vmem:[#allocation2 + $0x108] sm:$0xff] }
  0x80   : > { %2149 = vmatprep.mubr.msk.bf16.mxu0 %vm2413_vm1, %v2412_v38  ;;  %2205 = vmatprep.mubr.msk.bf16.mxu1 %vm2413_vm1, %v2412_v38 }
  0x87   : > { %2150 = vmatmul.mubr.msk.bf16.gmra.mxu0 %vm814_vm2, %v2334_v50  ;;  %2206 = vmatmul.mubr.msk.bf16.gmra.mxu1 %vm814_vm2, %v2335_v51 }
  0x88   : > { %2153 = vmatprep.mubr.msk.bf16.mxu0 %vm2413_vm1, %v2412_v38  ;;  %2209 = vmatprep.mubr.msk.bf16.mxu1 %vm2413_vm1, %v2412_v38 }
  0x8f   : > { %2154 = vmatmul.mubr.msk.bf16.gmra.mxu0 %vm814_vm2, %v2336_v52  ;;  %2210 = vmatmul.mubr.msk.bf16.gmra.mxu1 %vm814_vm2, %v2337_v53 }
  0x90   : > { %2157 = vmatprep.mubr.msk.bf16.mxu0 %vm2413_vm1, %v2412_v38  ;;  %2213 = vmatprep.mubr.msk.bf16.mxu1 %vm2413_vm1, %v2412_v38 }
  0x97   : > { %2158 = vmatmul.mubr.msk.bf16.gmra.mxu0 %vm814_vm2, %v2338_v54  ;;  %2214 = vmatmul.mubr.msk.bf16.gmra.mxu1 %vm814_vm2, %v2339_v55  ;;  %v583_v54 = vld [vmem:[#allocation2 + $0x30] sm:$0xff] }
  0x98   : > { %2161 = vmatprep.mubr.msk.bf16.mxu0 %vm2413_vm1, %v2412_v38  ;;  %2217 = vmatprep.mubr.msk.bf16.mxu1 %vm2413_vm1, %v2412_v38 }
  0x9f   : > { %2162 = vmatmul.mubr.msk.bf16.gmra.mxu0 %vm814_vm2, %v2340_v56  ;;  %2218 = vmatmul.mubr.msk.bf16.gmra.mxu1 %vm814_vm2, %v2341_v57  ;;  %v611_v56 = vld [vmem:[#allocation2 + $0x110] sm:$0xff] }
  0xa0   : > { %2165 = vmatprep.mubr.msk.bf16.mxu0 %vm2413_vm1, %v2412_v38  ;;  %2221 = vmatprep.mubr.msk.bf16.mxu1 %vm2413_vm1, %v2412_v38 }
  0xa7   : > { %2166 = vmatmul.mubr.msk.bf16.gmra.mxu0 %vm814_vm2, %v2342_v58  ;;  %2222 = vmatmul.mubr.msk.bf16.gmra.mxu1 %vm814_vm2, %v2343_v59 }
  0xa8   : > { %2169 = vmatprep.mubr.msk.bf16.mxu0 %vm2413_vm1, %v2412_v38  ;;  %2225 = vmatprep.mubr.msk.bf16.mxu1 %vm2413_vm1, %v2412_v38 }
  0xaf   : > { %2170 = vmatmul.mubr.msk.bf16.gmra.mxu0 %vm814_vm2, %v2344_v60  ;;  %2226 = vmatmul.mubr.msk.bf16.gmra.mxu1 %vm814_vm2, %v2345_v61 }
  0xb0   : > { %2173 = vmatprep.mubr.msk.bf16.mxu0 %vm2413_vm1, %v2412_v38  ;;  %2229 = vmatprep.mubr.msk.bf16.mxu1 %vm2413_vm1, %v2412_v38 }
  0xb7   : > { %2174 = vmatmul.mubr.msk.bf16.gmra.mxu0 %vm814_vm2, %v2346_v62  ;;  %2230 = vmatmul.mubr.msk.bf16.gmra.mxu1 %vm814_vm2, %v2347_v63  ;;  %v584_v62 = vld [vmem:[#allocation2 + $0x38] sm:$0xff] }
  0xb8   : > { %2177 = vmatprep.mubr.msk.bf16.mxu0 %vm2413_vm1, %v2412_v38  ;;  %2233 = vmatprep.mubr.msk.bf16.mxu1 %vm2413_vm1, %v2412_v38 }
  0xbf   : > { %2178 = vmatmul.mubr.msk.bf16.gmra.mxu0 %vm814_vm2, %v2348_v0  ;;  %2234 = vmatmul.mubr.msk.bf16.gmra.mxu1 %vm814_vm2, %v2349_v1  ;;  %v612_v0 = vld [vmem:[#allocation2 + $0x118] sm:$0xff] }
  0xc0   : > { %2181 = vmatprep.mubr.msk.bf16.mxu0 %vm2413_vm1, %v2412_v38  ;;  %2237 = vmatprep.mubr.msk.bf16.mxu1 %vm2413_vm1, %v2412_v38 }
  0xc7   : > { %2182 = vmatmul.mubr.msk.bf16.gmra.mxu0 %vm814_vm2, %v2350_v2  ;;  %2238 = vmatmul.mubr.msk.bf16.gmra.mxu1 %vm814_vm2, %v2351_v3 }
  0xc8   : > { %2185 = vmatprep.mubr.msk.bf16.mxu0 %vm2413_vm1, %v2412_v38  ;;  %2241 = vmatprep.mubr.msk.bf16.mxu1 %vm2413_vm1, %v2412_v38 }
  0xcf   : > { %2186 = vmatmul.mubr.msk.bf16.gmra.mxu0 %vm814_vm2, %v2352_v4  ;;  %2242 = vmatmul.mubr.msk.bf16.gmra.mxu1 %vm814_vm2, %v2353_v5 }
  0xd0   : > { %2189 = vmatprep.mubr.msk.bf16.mxu0 %vm2413_vm1, %v2412_v38  ;;  %v581_v38 = vld [vmem:[#allocation2 + $0x20] sm:$0xff] }
  0xd7   : > { %2190 = vmatmul.mubr.msk.bf16.gmra.mxu0 %vm814_vm2, %v2354_v6  ;;  %v585_v6 = vld [vmem:[#allocation2 + $0x40] sm:$0xff] }
 0x12f   : > { %v930_v9 = vpop.f32.mrf.mxu0  ;;  %v1042_v10 = vpop.f32.mrf.mxu1 }
 0x130   : > { %v1145_v11 = vadd.f32 %v930_v9, %v577_v7  ;;  %v1173_v12 = vadd.f32 %v1042_v10, %v605_v8  ;;  %v613_v8 = vld [vmem:[#allocation2 + $0x120] sm:$0xff] }
 0x131   : > { %v2139_v13 = vpop.f32.mrf.mxu0  ;;  %v2195_v15 = vpop.f32.mrf.mxu1 }
 0x132   : > { %1200 = vst.msk [vmem:[#allocation2] sm:$0xff] %vm1199_vm3, %v1145_v11  ;;  %1228 = vst.msk [vmem:[#allocation2 + $0xe0] sm:$0xff] %vm1199_vm3, %v1173_v12 }
 0x133   : > { %v933_v17 = vpop.f32.mrf.mxu0  ;;  %v1045_v18 = vpop.f32.mrf.mxu1 }
 0x134   : > { %v1146_v19 = vadd.f32 %v933_v17, %v578_v14  ;;  %v1174_v20 = vadd.f32 %v1045_v18, %v606_v16  ;;  %v586_v14 = vld [vmem:[#allocation2 + $0x48] sm:$0xff] }
 0x135   : > { %v2140_v21 = vpop.f32.mrf.mxu0  ;;  %v2196_v23 = vpop.f32.mrf.mxu1  ;;  %v614_v16 = vld [vmem:[#allocation2 + $0x128] sm:$0xff] }
 0x136   : > { %1201 = vst.msk [vmem:[#allocation2 + $0x8] sm:$0xff] %vm1199_vm3, %v1146_v19  ;;  %1229 = vst.msk [vmem:[#allocation2 + $0xe8] sm:$0xff] %vm1199_vm3, %v1174_v20 }
 0x137   : > { %v938_v25 = vpop.f32.mrf.mxu0  ;;  %v1050_v26 = vpop.f32.mrf.mxu1 }
 0x138   : > { %v1147_v27 = vadd.f32 %v938_v25, %v579_v22  ;;  %v1175_v28 = vadd.f32 %v1050_v26, %v607_v24  ;;  %v587_v22 = vld [vmem:[#allocation2 + $0x50] sm:$0xff] }
 0x139   : > { %v2143_v29 = vpop.f32.mrf.mxu0  ;;  %v2199_v31 = vpop.f32.mrf.mxu1  ;;  %v615_v24 = vld [vmem:[#allocation2 + $0x130] sm:$0xff] }
 0x13a   : > { %1202 = vst.msk [vmem:[#allocation2 + $0x10] sm:$0xff] %vm1199_vm3, %v1147_v27  ;;  %1230 = vst.msk [vmem:[#allocation2 + $0xf0] sm:$0xff] %vm1199_vm3, %v1175_v28 }
 0x13b   : > { %v941_v33 = vpop.f32.mrf.mxu0  ;;  %v1053_v34 = vpop.f32.mrf.mxu1 }
 0x13c   : > { %v1148_v35 = vadd.f32 %v941_v33, %v580_v30  ;;  %v1176_v36 = vadd.f32 %v1053_v34, %v608_v32  ;;  %v588_v30 = vld [vmem:[#allocation2 + $0x58] sm:$0xff] }
 0x13d   : > { %v2144_v37 = vpop.f32.mrf.mxu0  ;;  %v2200_v39 = vpop.f32.mrf.mxu1  ;;  %v616_v32 = vld [vmem:[#allocation2 + $0x138] sm:$0xff] }
 0x13e   : > { %1203 = vst.msk [vmem:[#allocation2 + $0x18] sm:$0xff] %vm1199_vm3, %v1148_v35  ;;  %1231 = vst.msk [vmem:[#allocation2 + $0xf8] sm:$0xff] %vm1199_vm3, %v1176_v36 }
 0x13f   : > { %v946_v41 = vpop.f32.mrf.mxu0  ;;  %v1058_v42 = vpop.f32.mrf.mxu1 }
 0x140   : > { %v1149_v43 = vadd.f32 %v946_v41, %v581_v38  ;;  %v1177_v44 = vadd.f32 %v1058_v42, %v609_v40  ;;  %v589_v38 = vld [vmem:[#allocation2 + $0x60] sm:$0xff] }
 0x141   : > { %v2147_v45 = vpop.f32.mrf.mxu0  ;;  %v2203_v47 = vpop.f32.mrf.mxu1  ;;  %v617_v40 = vld [vmem:[#allocation2 + $0x140] sm:$0xff] }
 0x142   : > { %1204 = vst.msk [vmem:[#allocation2 + $0x20] sm:$0xff] %vm1199_vm3, %v1149_v43  ;;  %1232 = vst.msk [vmem:[#allocation2 + $0x100] sm:$0xff] %vm1199_vm3, %v1177_v44 }
 0x143   : > { %v949_v49 = vpop.f32.mrf.mxu0  ;;  %v1061_v50 = vpop.f32.mrf.mxu1 }
 0x144   : > { %v1150_v51 = vadd.f32 %v949_v49, %v582_v46  ;;  %v1178_v52 = vadd.f32 %v1061_v50, %v610_v48  ;;  %v590_v46 = vld [vmem:[#allocation2 + $0x68] sm:$0xff] }
 0x145   : > { %v2148_v53 = vpop.f32.mrf.mxu0  ;;  %v2204_v55 = vpop.f32.mrf.mxu1  ;;  %v618_v48 = vld [vmem:[#allocation2 + $0x148] sm:$0xff] }
 0x146   : > { %1205 = vst.msk [vmem:[#allocation2 + $0x28] sm:$0xff] %vm1199_vm3, %v1150_v51  ;;  %1233 = vst.msk [vmem:[#allocation2 + $0x108] sm:$0xff] %vm1199_vm3, %v1178_v52 }
 0x147   : > { %v954_v57 = vpop.f32.mrf.mxu0  ;;  %v1066_v58 = vpop.f32.mrf.mxu1 }
 0x148   : > { %v1151_v59 = vadd.f32 %v954_v57, %v583_v54  ;;  %v1179_v60 = vadd.f32 %v1066_v58, %v611_v56  ;;  %v591_v54 = vld [vmem:[#allocation2 + $0x70] sm:$0xff] }
 0x149   : > { %v2151_v61 = vpop.f32.mrf.mxu0  ;;  %v2207_v63 = vpop.f32.mrf.mxu1  ;;  %v619_v56 = vld [vmem:[#allocation2 + $0x150] sm:$0xff] }
 0x14a   : > { %1206 = vst.msk [vmem:[#allocation2 + $0x30] sm:$0xff] %vm1199_vm3, %v1151_v59  ;;  %1234 = vst.msk [vmem:[#allocation2 + $0x110] sm:$0xff] %vm1199_vm3, %v1179_v60 }
 0x14b   : > { %v957_v1 = vpop.f32.mrf.mxu0  ;;  %v1069_v2 = vpop.f32.mrf.mxu1 }
 0x14c   : > { %v1152_v3 = vadd.f32 %v957_v1, %v584_v62  ;;  %v1180_v4 = vadd.f32 %v1069_v2, %v612_v0  ;;  %v592_v62 = vld [vmem:[#allocation2 + $0x78] sm:$0xff] }
 0x14d   : > { %v2152_v5 = vpop.f32.mrf.mxu0  ;;  %v2208_v7 = vpop.f32.mrf.mxu1  ;;  %v620_v0 = vld [vmem:[#allocation2 + $0x158] sm:$0xff] }
 0x14e   : > { %1207 = vst.msk [vmem:[#allocation2 + $0x38] sm:$0xff] %vm1199_vm3, %v1152_v3  ;;  %1235 = vst.msk [vmem:[#allocation2 + $0x118] sm:$0xff] %vm1199_vm3, %v1180_v4 }
 0x14f   : > { %v962_v9 = vpop.f32.mrf.mxu0  ;;  %v1074_v10 = vpop.f32.mrf.mxu1 }
 0x150   : > { %v1153_v11 = vadd.f32 %v962_v9, %v585_v6  ;;  %v1181_v12 = vadd.f32 %v1074_v10, %v613_v8  ;;  %v593_v6 = vld [vmem:[#allocation2 + $0x80] sm:$0xff] }
 0x151   : > { %v2155_v13 = vpop.f32.mrf.mxu0  ;;  %v2211_v15 = vpop.f32.mrf.mxu1  ;;  %v621_v8 = vld [vmem:[#allocation2 + $0x160] sm:$0xff] }
 0x152   : > { %1208 = vst.msk [vmem:[#allocation2 + $0x40] sm:$0xff] %vm1199_vm3, %v1153_v11  ;;  %1236 = vst.msk [vmem:[#allocation2 + $0x120] sm:$0xff] %vm1199_vm3, %v1181_v12 }
 0x153   : > { %v965_v17 = vpop.f32.mrf.mxu0  ;;  %v1077_v18 = vpop.f32.mrf.mxu1 }
 0x154   : > { %v1154_v19 = vadd.f32 %v965_v17, %v586_v14  ;;  %v1182_v20 = vadd.f32 %v1077_v18, %v614_v16  ;;  %v594_v14 = vld [vmem:[#allocation2 + $0x88] sm:$0xff] }
 0x155   : > { %v2156_v21 = vpop.f32.mrf.mxu0  ;;  %v2212_v23 = vpop.f32.mrf.mxu1  ;;  %v622_v16 = vld [vmem:[#allocation2 + $0x168] sm:$0xff] }
 0x156   : > { %1209 = vst.msk [vmem:[#allocation2 + $0x48] sm:$0xff] %vm1199_vm3, %v1154_v19  ;;  %1237 = vst.msk [vmem:[#allocation2 + $0x128] sm:$0xff] %vm1199_vm3, %v1182_v20 }
 0x157   : > { %v970_v25 = vpop.f32.mrf.mxu0  ;;  %v1082_v26 = vpop.f32.mrf.mxu1 }
 0x158   : > { %v1155_v27 = vadd.f32 %v970_v25, %v587_v22  ;;  %v1183_v28 = vadd.f32 %v1082_v26, %v615_v24  ;;  %v595_v22 = vld [vmem:[#allocation2 + $0x90] sm:$0xff] }
 0x159   : > { %v2159_v29 = vpop.f32.mrf.mxu0  ;;  %v2215_v31 = vpop.f32.mrf.mxu1  ;;  %v623_v24 = vld [vmem:[#allocation2 + $0x170] sm:$0xff] }
 0x15a   : > { %1210 = vst.msk [vmem:[#allocation2 + $0x50] sm:$0xff] %vm1199_vm3, %v1155_v27  ;;  %1238 = vst.msk [vmem:[#allocation2 + $0x130] sm:$0xff] %vm1199_vm3, %v1183_v28 }
 0x15b   : > { %v973_v33 = vpop.f32.mrf.mxu0  ;;  %v1085_v34 = vpop.f32.mrf.mxu1 }
 0x15c   : > { %v1156_v35 = vadd.f32 %v973_v33, %v588_v30  ;;  %v1184_v36 = vadd.f32 %v1085_v34, %v616_v32  ;;  %v596_v30 = vld [vmem:[#allocation2 + $0x98] sm:$0xff] }
 0x15d   : > { %v2160_v37 = vpop.f32.mrf.mxu0  ;;  %v2216_v39 = vpop.f32.mrf.mxu1  ;;  %v624_v32 = vld [vmem:[#allocation2 + $0x178] sm:$0xff] }
 0x15e   : > { %1211 = vst.msk [vmem:[#allocation2 + $0x58] sm:$0xff] %vm1199_vm3, %v1156_v35  ;;  %1239 = vst.msk [vmem:[#allocation2 + $0x138] sm:$0xff] %vm1199_vm3, %v1184_v36 }
 0x15f   : > { %v978_v41 = vpop.f32.mrf.mxu0  ;;  %v1090_v42 = vpop.f32.mrf.mxu1 }
 0x160   : > { %v1157_v43 = vadd.f32 %v978_v41, %v589_v38  ;;  %v1185_v44 = vadd.f32 %v1090_v42, %v617_v40  ;;  %v597_v38 = vld [vmem:[#allocation2 + $0xa0] sm:$0xff] }
 0x161   : > { %v2163_v45 = vpop.f32.mrf.mxu0  ;;  %v2219_v47 = vpop.f32.mrf.mxu1  ;;  %v625_v40 = vld [vmem:[#allocation2 + $0x180] sm:$0xff] }
 0x162   : > { %1212 = vst.msk [vmem:[#allocation2 + $0x60] sm:$0xff] %vm1199_vm3, %v1157_v43  ;;  %1240 = vst.msk [vmem:[#allocation2 + $0x140] sm:$0xff] %vm1199_vm3, %v1185_v44 }
 0x163   : > { %v981_v49 = vpop.f32.mrf.mxu0  ;;  %v1093_v50 = vpop.f32.mrf.mxu1 }
 0x164   : > { %v1158_v51 = vadd.f32 %v981_v49, %v590_v46  ;;  %v1186_v52 = vadd.f32 %v1093_v50, %v618_v48  ;;  %v598_v46 = vld [vmem:[#allocation2 + $0xa8] sm:$0xff] }
 0x165   : > { %v2164_v53 = vpop.f32.mrf.mxu0  ;;  %v2220_v55 = vpop.f32.mrf.mxu1  ;;  %v626_v48 = vld [vmem:[#allocation2 + $0x188] sm:$0xff] }
 0x166   : > { %1213 = vst.msk [vmem:[#allocation2 + $0x68] sm:$0xff] %vm1199_vm3, %v1158_v51  ;;  %1241 = vst.msk [vmem:[#allocation2 + $0x148] sm:$0xff] %vm1199_vm3, %v1186_v52 }
 0x167   : > { %v986_v57 = vpop.f32.mrf.mxu0  ;;  %v1098_v58 = vpop.f32.mrf.mxu1 }
 0x168   : > { %v1159_v59 = vadd.f32 %v986_v57, %v591_v54  ;;  %v1187_v60 = vadd.f32 %v1098_v58, %v619_v56  ;;  %v599_v54 = vld [vmem:[#allocation2 + $0xb0] sm:$0xff] }
 0x169   : > { %v2167_v61 = vpop.f32.mrf.mxu0  ;;  %v2223_v63 = vpop.f32.mrf.mxu1  ;;  %v627_v56 = vld [vmem:[#allocation2 + $0x190] sm:$0xff] }
 0x16a   : > { %1214 = vst.msk [vmem:[#allocation2 + $0x70] sm:$0xff] %vm1199_vm3, %v1159_v59  ;;  %1242 = vst.msk [vmem:[#allocation2 + $0x150] sm:$0xff] %vm1199_vm3, %v1187_v60 }
 0x16b   : > { %v989_v1 = vpop.f32.mrf.mxu0  ;;  %v1101_v2 = vpop.f32.mrf.mxu1 }
 0x16c   : > { %v1160_v3 = vadd.f32 %v989_v1, %v592_v62  ;;  %v1188_v4 = vadd.f32 %v1101_v2, %v620_v0  ;;  %v600_v62 = vld [vmem:[#allocation2 + $0xb8] sm:$0xff] }
 0x16d   : > { %v2168_v5 = vpop.f32.mrf.mxu0  ;;  %v2224_v7 = vpop.f32.mrf.mxu1  ;;  %v628_v0 = vld [vmem:[#allocation2 + $0x198] sm:$0xff] }
 0x16e   : > { %1215 = vst.msk [vmem:[#allocation2 + $0x78] sm:$0xff] %vm1199_vm3, %v1160_v3  ;;  %1243 = vst.msk [vmem:[#allocation2 + $0x158] sm:$0xff] %vm1199_vm3, %v1188_v4 }
 0x16f   : > { %v994_v9 = vpop.f32.mrf.mxu0  ;;  %v1106_v10 = vpop.f32.mrf.mxu1 }
 0x170   : > { %v1161_v11 = vadd.f32 %v994_v9, %v593_v6  ;;  %v1189_v12 = vadd.f32 %v1106_v10, %v621_v8  ;;  %v601_v6 = vld [vmem:[#allocation2 + $0xc0] sm:$0xff] }
 0x171   : > { %v2171_v13 = vpop.f32.mrf.mxu0  ;;  %v2227_v15 = vpop.f32.mrf.mxu1  ;;  %v629_v8 = vld [vmem:[#allocation2 + $0x1a0] sm:$0xff] }
 0x172   : > { %1216 = vst.msk [vmem:[#allocation2 + $0x80] sm:$0xff] %vm1199_vm3, %v1161_v11  ;;  %1244 = vst.msk [vmem:[#allocation2 + $0x160] sm:$0xff] %vm1199_vm3, %v1189_v12 }
 0x173   : > { %v997_v17 = vpop.f32.mrf.mxu0  ;;  %v1109_v18 = vpop.f32.mrf.mxu1 }
 0x174   : > { %v1162_v19 = vadd.f32 %v997_v17, %v594_v14  ;;  %v1190_v20 = vadd.f32 %v1109_v18, %v622_v16  ;;  %v602_v14 = vld [vmem:[#allocation2 + $0xc8] sm:$0xff] }
 0x175   : > { %v2172_v21 = vpop.f32.mrf.mxu0  ;;  %v2228_v23 = vpop.f32.mrf.mxu1  ;;  %v630_v16 = vld [vmem:[#allocation2 + $0x1a8] sm:$0xff] }
 0x176   : > { %1217 = vst.msk [vmem:[#allocation2 + $0x88] sm:$0xff] %vm1199_vm3, %v1162_v19  ;;  %1245 = vst.msk [vmem:[#allocation2 + $0x168] sm:$0xff] %vm1199_vm3, %v1190_v20 }
 0x177   : > { %v1002_v25 = vpop.f32.mrf.mxu0  ;;  %v1114_v26 = vpop.f32.mrf.mxu1 }
 0x178   : > { %v1163_v27 = vadd.f32 %v1002_v25, %v595_v22  ;;  %v1191_v28 = vadd.f32 %v1114_v26, %v623_v24  ;;  %v603_v22 = vld [vmem:[#allocation2 + $0xd0] sm:$0xff] }
 0x179   : > { %v2175_v29 = vpop.f32.mrf.mxu0  ;;  %v2231_v31 = vpop.f32.mrf.mxu1 }
 0x17a   : > { %1218 = vst.msk [vmem:[#allocation2 + $0x90] sm:$0xff] %vm1199_vm3, %v1163_v27  ;;  %1246 = vst.msk [vmem:[#allocation2 + $0x170] sm:$0xff] %vm1199_vm3, %v1191_v28  ;;  %v604_v27 = vld [vmem:[#allocation2 + $0xd8] sm:$0xff] }
 0x17b   : > { %v1005_v33 = vpop.f32.mrf.mxu0  ;;  %v1117_v34 = vpop.f32.mrf.mxu1 }
 0x17c   : > { %v1164_v35 = vadd.f32 %v1005_v33, %v596_v30  ;;  %v1192_v36 = vadd.f32 %v1117_v34, %v624_v32 }
 0x17d   : > { %v2176_v37 = vpop.f32.mrf.mxu0  ;;  %v2232_v39 = vpop.f32.mrf.mxu1 }
 0x17e   : > { %1219 = vst.msk [vmem:[#allocation2 + $0x98] sm:$0xff] %vm1199_vm3, %v1164_v35  ;;  %1247 = vst.msk [vmem:[#allocation2 + $0x178] sm:$0xff] %vm1199_vm3, %v1192_v36 }
 0x17f   : > { %v1010_v41 = vpop.f32.mrf.mxu0  ;;  %v1122_v42 = vpop.f32.mrf.mxu1 }
 0x180   : > { %v1165_v43 = vadd.f32 %v1010_v41, %v597_v38  ;;  %v1193_v44 = vadd.f32 %v1122_v42, %v625_v40 }
 0x181   : > { %v2179_v45 = vpop.f32.mrf.mxu0  ;;  %v2235_v47 = vpop.f32.mrf.mxu1 }
 0x182   : > { %1220 = vst.msk [vmem:[#allocation2 + $0xa0] sm:$0xff] %vm1199_vm3, %v1165_v43  ;;  %1248 = vst.msk [vmem:[#allocation2 + $0x180] sm:$0xff] %vm1199_vm3, %v1193_v44 }
 0x183   : > { %v1013_v49 = vpop.f32.mrf.mxu0  ;;  %v1125_v50 = vpop.f32.mrf.mxu1 }
 0x184   : > { %v1166_v51 = vadd.f32 %v1013_v49, %v598_v46  ;;  %v1194_v52 = vadd.f32 %v1125_v50, %v626_v48 }
 0x185   : > { %v2180_v53 = vpop.f32.mrf.mxu0  ;;  %v2236_v55 = vpop.f32.mrf.mxu1 }
 0x186   : > { %1221 = vst.msk [vmem:[#allocation2 + $0xa8] sm:$0xff] %vm1199_vm3, %v1166_v51  ;;  %1249 = vst.msk [vmem:[#allocation2 + $0x188] sm:$0xff] %vm1199_vm3, %v1194_v52 }
 0x187   : > { %v1018_v57 = vpop.f32.mrf.mxu0  ;;  %v1130_v58 = vpop.f32.mrf.mxu1 }
 0x188   : > { %v1167_v59 = vadd.f32 %v1018_v57, %v599_v54  ;;  %v1195_v60 = vadd.f32 %v1130_v58, %v627_v56 }
 0x189   : > { %v2183_v61 = vpop.f32.mrf.mxu0  ;;  %v2239_v63 = vpop.f32.mrf.mxu1 }
 0x18a   : > { %1222 = vst.msk [vmem:[#allocation2 + $0xb0] sm:$0xff] %vm1199_vm3, %v1167_v59  ;;  %1250 = vst.msk [vmem:[#allocation2 + $0x190] sm:$0xff] %vm1199_vm3, %v1195_v60 }
 0x18b   : > { %v1021_v1 = vpop.f32.mrf.mxu0  ;;  %v1133_v2 = vpop.f32.mrf.mxu1 }
 0x18c   : > { %v1168_v3 = vadd.f32 %v1021_v1, %v600_v62  ;;  %v1196_v4 = vadd.f32 %v1133_v2, %v628_v0 }
 0x18d   : > { %v2184_v5 = vpop.f32.mrf.mxu0  ;;  %v2240_v7 = vpop.f32.mrf.mxu1 }
 0x18e   : > { %1223 = vst.msk [vmem:[#allocation2 + $0xb8] sm:$0xff] %vm1199_vm3, %v1168_v3  ;;  %1251 = vst.msk [vmem:[#allocation2 + $0x198] sm:$0xff] %vm1199_vm3, %v1196_v4 }
 0x18f   : > { %v1026_v9 = vpop.f32.mrf.mxu0  ;;  %v1138_v10 = vpop.f32.mrf.mxu1 }
 0x190   : > { %v1169_v11 = vadd.f32 %v1026_v9, %v601_v6  ;;  %v1197_v12 = vadd.f32 %v1138_v10, %v629_v8 }
 0x191   : > { %v2187_v13 = vpop.f32.mrf.mxu0  ;;  %v2243_v15 = vpop.f32.mrf.mxu1 }
 0x192   : > { %1224 = vst.msk [vmem:[#allocation2 + $0xc0] sm:$0xff] %vm1199_vm3, %v1169_v11  ;;  %1252 = vst.msk [vmem:[#allocation2 + $0x1a0] sm:$0xff] %vm1199_vm3, %v1197_v12 }
 0x193   : > { %v1029_v17 = vpop.f32.mrf.mxu0  ;;  %v1141_v18 = vpop.f32.mrf.mxu1 }
 0x194   : > { %v1170_v19 = vadd.f32 %v1029_v17, %v602_v14  ;;  %v1198_v20 = vadd.f32 %v1141_v18, %v630_v16 }
 0x195   : > { %v2188_v21 = vpop.f32.mrf.mxu0  ;;  %v2244_v23 = vpop.f32.mrf.mxu1 }
 0x196   : > { %1225 = vst.msk [vmem:[#allocation2 + $0xc8] sm:$0xff] %vm1199_vm3, %v1170_v19  ;;  %1253 = vst.msk [vmem:[#allocation2 + $0x1a8] sm:$0xff] %vm1199_vm3, %v1198_v20 }
 0x197   : > { %v1034_v24 = vpop.f32.mrf.mxu0 }
 0x198   : > { %v1171_v25 = vadd.f32 %v1034_v24, %v603_v22 }
 0x199   : > { %v2191_v26 = vpop.f32.mrf.mxu0 }
 0x19a   : > { %1226 = vst.msk [vmem:[#allocation2 + $0xd0] sm:$0xff] %vm1199_vm3, %v1171_v25  ;;  %1257 = sbr.rel (%p1980_p13) target bundleno = 490 (0x1ea), region = 81 }
 0x19b   : > { %v1037_v28 = vpop.f32.mrf.mxu0 }
 0x19c   : > { %v1172_v29 = vadd.f32 %v1037_v28, %v604_v27 }
 0x19d   : > { %v2192_v30 = vpop.f32.mrf.mxu0 }
 0x19e   : > { %1227 = vst.msk [vmem:[#allocation2 + $0xd8] sm:$0xff] %vm1199_vm3, %v1172_v29 }
 0x19f   : > { %v1258_v31 = vld [vmem:[#allocation2] sm:$0xff]  ;;  %v1259_v33 = vld [vmem:[#allocation2 + $0x8] sm:$0xff]  ;;  %v1260_v36 = vld [vmem:[#allocation2 + $0x10] sm:$0xff]  ;;  %vm1769_vm4 = vcmask 519168  }
 0x1a0   : > { %v2828_v32 = vld [vmem:[%s3016_s2] ss:$0 sm:$0xff]  ;;  %v1261_v37 = vld [vmem:[#allocation2 + $0x18] sm:$0xff]  ;;  %v1263_v42 = vld [vmem:[#allocation2 + $0x28] sm:$0xff] }
 0x1a1   : > { %v1319_v34 = vadd.f32 %v2828_v32, %v1258_v31  ;;  %v1320_v35 = vadd.f32 %v2828_v32, %v1259_v33  ;;  %v1262_v38 = vld [vmem:[#allocation2 + $0x20] sm:$0xff]  ;;  %v1321_v39 = vadd.f32 %v2828_v32, %v1260_v36  ;;  %v1322_v40 = vadd.f32 %v2828_v32, %v1261_v37  ;;  %v1264_v50 = vld [vmem:[#allocation2 + $0x30] sm:$0xff]  ;;  %v1265_v51 = vld [vmem:[#allocation2 + $0x38] sm:$0xff] }
 0x1a2   : > { %v1323_v41 = vadd.f32 %v2828_v32, %v1262_v38  ;;  %v1266_v52 = vld [vmem:[#allocation2 + $0x40] sm:$0xff]  ;;  %v1267_v57 = vld [vmem:[#allocation2 + $0x48] sm:$0xff]  ;;  %v1268_v58 = vld [vmem:[#allocation2 + $0x50] sm:$0xff]  ;;  %v1324_v62 = vadd.f32 %v2828_v32, %v1263_v42  ;;  %v1325_v0 = vadd.f32 %v2828_v32, %v1264_v50  ;;  %v1326_v1 = vadd.f32 %v2828_v32, %v1265_v51 }
 0x1a3   : > { %vm1373_vm5 = vcmp.ge.f32.partialorder %v1319_v34, 0.0  ;;  %v1427_v43 = vmul.f32 0.2, %v1319_v34  ;;  %vm1374_vm6 = vcmp.ge.f32.partialorder %v1320_v35, 0.0  ;;  %v1428_v44 = vmul.f32 0.2, %v1320_v35 }
 0x1a4   : > { %vm1375_vm7 = vcmp.ge.f32.partialorder %v1321_v39, 0.0  ;;  %v1429_v45 = vmul.f32 0.2, %v1321_v39  ;;  %vm1376_vm8 = vcmp.ge.f32.partialorder %v1322_v40, 0.0  ;;  %v1430_v46 = vmul.f32 0.2, %v1322_v40 }
 0x1a5   : > { %v1481_v47 = vsel %vm1373_vm5, %v1319_v34, %v1427_v43  ;;  %v1482_v48 = vsel %vm1374_vm6, %v1320_v35, %v1428_v44  ;;  %vm1377_vm9 = vcmp.ge.f32.partialorder %v1323_v41, 0.0  ;;  %v1431_v49 = vmul.f32 0.2, %v1323_v41  ;;  %v1269_v10 = vld [vmem:[#allocation2 + $0x58] sm:$0xff]  ;;  %v1270_v15 = vld [vmem:[#allocation2 + $0x60] sm:$0xff]  ;;  %v1271_v16 = vld [vmem:[#allocation2 + $0x68] sm:$0xff] }
 0x1a6   : > { %v2038_v53 = vpack.c.bf16 %v1481_v47, %v1481_v47  ;;  %v2039_v54 = vpack.c.bf16 %v1482_v48, %v1482_v48  ;;  %v1483_v55 = vsel %vm1375_vm7, %v1321_v39, %v1429_v45  ;;  %v1484_v56 = vsel %vm1376_vm8, %v1322_v40, %v1430_v46  ;;  %v1272_v17 = vld [vmem:[#allocation2 + $0x70] sm:$0xff]  ;;  %v1273_v21 = vld [vmem:[#allocation2 + $0x78] sm:$0xff]  ;;  %v1274_v36 = vld [vmem:[#allocation2 + $0x80] sm:$0xff] }
 0x1a7   : > { %v2040_v59 = vpack.c.bf16 %v1483_v55, %v1483_v55  ;;  %v2041_v60 = vpack.c.bf16 %v1484_v56, %v1484_v56  ;;  %v1485_v61 = vsel %vm1377_vm9, %v1323_v41, %v1431_v49  ;;  %v1327_v2 = vadd.f32 %v2828_v32, %v1266_v52  ;;  %v1275_v40 = vld [vmem:[#allocation2 + $0x88] sm:$0xff]  ;;  %v1276_v44 = vld [vmem:[#allocation2 + $0x90] sm:$0xff]  ;;  %v1277_v49 = vld [vmem:[#allocation2 + $0x98] sm:$0xff] }
 0x1a8   : > { %1770 = vst.msk [vmem:[%s2585_s29] sm:$0xf] %vm1769_vm4, %v2038_v53  ;;  %1771 = vst.msk [vmem:[%s2585_s29 + $0x4] sm:$0xf] %vm1769_vm4, %v2039_v54  ;;  %v2042_v63 = vpack.c.bf16 %v1485_v61, %v1485_v61  ;;  %vm1378_vm10 = vcmp.ge.f32.partialorder %v1324_v62, 0.0  ;;  %v1328_v4 = vadd.f32 %v2828_v32, %v1267_v57  ;;  %v1329_v5 = vadd.f32 %v2828_v32, %v1268_v58  ;;  %v1278_v50 = vld [vmem:[#allocation2 + $0xa0] sm:$0xff] }
 0x1a9   : > { %1772 = vst.msk [vmem:[%s2585_s29 + $0x8] sm:$0xf] %vm1769_vm4, %v2040_v59  ;;  %1773 = vst.msk [vmem:[%s2585_s29 + $0xc] sm:$0xf] %vm1769_vm4, %v2041_v60  ;;  %v1432_v3 = vmul.f32 0.2, %v1324_v62  ;;  %v1330_v25 = vadd.f32 %v2828_v32, %v1269_v10  ;;  %v1331_v27 = vadd.f32 %v2828_v32, %v1270_v15  ;;  %v1332_v28 = vadd.f32 %v2828_v32, %v1271_v16 }
 0x1aa   : > { %1774 = vst.msk [vmem:[%s2585_s29 + $0x10] sm:$0xf] %vm1769_vm4, %v2042_v63  ;;  %vm1379_vm11 = vcmp.ge.f32.partialorder %v1325_v0, 0.0  ;;  %v1433_v6 = vmul.f32 0.2, %v1325_v0  ;;  %vm1380_vm12 = vcmp.ge.f32.partialorder %v1326_v1, 0.0  ;;  %v1333_v29 = vadd.f32 %v2828_v32, %v1272_v17 }
 0x1ab   : > { %v1434_v7 = vmul.f32 0.2, %v1326_v1  ;;  %v1486_v8 = vsel %vm1378_vm10, %v1324_v62, %v1432_v3  ;;  %vm1381_vm13 = vcmp.ge.f32.partialorder %v1327_v2, 0.0  ;;  %v1435_v9 = vmul.f32 0.2, %v1327_v2  ;;  %v1279_v55 = vld [vmem:[#allocation2 + $0xa8] sm:$0xff] }
 0x1ac   : > { %vm1382_vm14 = vcmp.ge.f32.partialorder %v1328_v4, 0.0  ;;  %v2043_v11 = vpack.c.bf16 %v1486_v8, %v1486_v8  ;;  %v1487_v12 = vsel %vm1379_vm11, %v1325_v0, %v1433_v6  ;;  %v1436_v14 = vmul.f32 0.2, %v1328_v4  ;;  %v1283_v10 = vld [vmem:[#allocation2 + $0xc8] sm:$0xff] }
 0x1ad   : > { %v1488_v13 = vsel %vm1380_vm12, %v1326_v1, %v1434_v7  ;;  %v2044_v18 = vpack.c.bf16 %v1487_v12, %v1487_v12  ;;  %v1489_v20 = vsel %vm1381_vm13, %v1327_v2, %v1435_v9  ;;  %vm1383_vm15 = vcmp.ge.f32.partialorder %v1329_v5, 0.0  ;;  %v1282_v9 = vld [vmem:[#allocation2 + $0xc0] sm:$0xff] }
 0x1ae   : > { %v2045_v19 = vpack.c.bf16 %v1488_v13, %v1488_v13  ;;  %1775 = vst.msk [vmem:[%s2585_s29 + $0x14] sm:$0xf] %vm1769_vm4, %v2043_v11  ;;  %v2046_v22 = vpack.c.bf16 %v1489_v20, %v1489_v20  ;;  %v1490_v23 = vsel %vm1382_vm14, %v1328_v4, %v1436_v14  ;;  %v1437_v24 = vmul.f32 0.2, %v1329_v5  ;;  %v1280_v4 = vld [vmem:[#allocation2 + $0xb0] sm:$0xff] }
 0x1af   : > { %1776 = vst.msk [vmem:[%s2585_s29 + $0x18] sm:$0xf] %vm1769_vm4, %v2044_v18  ;;  %v2047_v26 = vpack.c.bf16 %v1490_v23, %v1490_v23  ;;  %vm1384_vm0 = vcmp.ge.f32.partialorder %v1330_v25, 0.0  ;;  %v1438_v31 = vmul.f32 0.2, %v1330_v25  ;;  %v1334_v33 = vadd.f32 %v2828_v32, %v1273_v21  ;;  %v1285_v23 = vld [vmem:[#allocation2 + $0xd8] sm:$0xff] }
 0x1b0   : > { %1777 = vst.msk [vmem:[%s2585_s29 + $0x1c] sm:$0xf] %vm1769_vm4, %v2045_v19  ;;  %1778 = vst.msk [vmem:[%s2585_s29 + $0x20] sm:$0xf] %vm1769_vm4, %v2046_v22  ;;  %v1491_v30 = vsel %vm1383_vm15, %v1329_v5, %v1437_v24  ;;  %vm1385_vm1 = vcmp.ge.f32.partialorder %v1331_v27, 0.0  ;;  %vm1386_vm2 = vcmp.ge.f32.partialorder %v1332_v28, 0.0  ;;  %v1335_v48 = vadd.f32 %v2828_v32, %v1274_v36 }
 0x1b1   : > { %1779 = vst.msk [vmem:[%s2585_s29 + $0x24] sm:$0xf] %vm1769_vm4, %v2047_v26  ;;  %v2048_v34 = vpack.c.bf16 %v1491_v30, %v1491_v30  ;;  %v1439_v35 = vmul.f32 0.2, %v1331_v27  ;;  %v1492_v37 = vsel %vm1384_vm0, %v1330_v25, %v1438_v31  ;;  %v1440_v38 = vmul.f32 0.2, %v1332_v28 }
 0x1b2   : > { %vm1387_vm3 = vcmp.ge.f32.partialorder %v1333_v29, 0.0  ;;  %v1441_v39 = vmul.f32 0.2, %v1333_v29  ;;  %v2049_v41 = vpack.c.bf16 %v1492_v37, %v1492_v37  ;;  %vm1388_vm5 = vcmp.ge.f32.partialorder %v1334_v33, 0.0  ;;  %v1281_v5 = vld [vmem:[#allocation2 + $0xb8] sm:$0xff]  ;;  %v1284_v22 = vld [vmem:[#allocation2 + $0xd0] sm:$0xff] }
 0x1b3   : > { %1780 = vst.msk [vmem:[%s2585_s29 + $0x28] sm:$0xf] %vm1769_vm4, %v2048_v34  ;;  %v1493_v42 = vsel %vm1385_vm1, %v1331_v27, %v1439_v35  ;;  %v1442_v43 = vmul.f32 0.2, %v1334_v33  ;;  %v1494_v46 = vsel %vm1386_vm2, %v1332_v28, %v1440_v38  ;;  %v1336_v54 = vadd.f32 %v2828_v32, %v1275_v40  ;;  %v1286_v26 = vld [vmem:[#allocation2 + $0xe0] sm:$0xff]  ;;  %v1287_v38 = vld [vmem:[#allocation2 + $0xe8] sm:$0xff] }
 0x1b4   : > { %v2050_v45 = vpack.c.bf16 %v1493_v42, %v1493_v42  ;;  %v1495_v47 = vsel %vm1387_vm3, %v1333_v29, %v1441_v39  ;;  %1781 = vst.msk [vmem:[%s2585_s29 + $0x2c] sm:$0xf] %vm1769_vm4, %v2049_v41  ;;  %v2051_v51 = vpack.c.bf16 %v1494_v46, %v1494_v46  ;;  %vm1389_vm6 = vcmp.ge.f32.partialorder %v1335_v48, 0.0  ;;  %v1288_v39 = vld [vmem:[#allocation2 + $0xf0] sm:$0xff] }
 0x1b5   : > { %v2052_v52 = vpack.c.bf16 %v1495_v47, %v1495_v47  ;;  %v1496_v53 = vsel %vm1388_vm5, %v1334_v33, %v1442_v43  ;;  %v1443_v57 = vmul.f32 0.2, %v1335_v48  ;;  %v1337_v58 = vadd.f32 %v2828_v32, %v1276_v44  ;;  %v1289_v43 = vld [vmem:[#allocation2 + $0xf8] sm:$0xff]  ;;  %v1290_v44 = vld [vmem:[#allocation2 + $0x100] sm:$0xff] }
 0x1b6   : > { %1782 = vst.msk [vmem:[%s2585_s29 + $0x30] sm:$0xf] %vm1769_vm4, %v2050_v45  ;;  %v2053_v56 = vpack.c.bf16 %v1496_v53, %v1496_v53  ;;  %1783 = vst.msk [vmem:[%s2585_s29 + $0x34] sm:$0xf] %vm1769_vm4, %v2051_v51  ;;  %vm1390_vm7 = vcmp.ge.f32.partialorder %v1336_v54, 0.0  ;;  %v1338_v60 = vadd.f32 %v2828_v32, %v1277_v49  ;;  %v1339_v61 = vadd.f32 %v2828_v32, %v1278_v50 }
 0x1b7   : > { %1784 = vst.msk [vmem:[%s2585_s29 + $0x38] sm:$0xf] %vm1769_vm4, %v2052_v52  ;;  %v1444_v59 = vmul.f32 0.2, %v1336_v54  ;;  %v1497_v62 = vsel %vm1389_vm6, %v1335_v48, %v1443_v57  ;;  %vm1391_vm8 = vcmp.ge.f32.partialorder %v1337_v58, 0.0  ;;  %v1340_v0 = vadd.f32 %v2828_v32, %v1279_v55 }
 0x1b8   : > { %1785 = vst.msk [vmem:[%s2585_s29 + $0x3c] sm:$0xf] %vm1769_vm4, %v2053_v56  ;;  %v1445_v63 = vmul.f32 0.2, %v1337_v58  ;;  %v2054_v1 = vpack.c.bf16 %v1497_v62, %v1497_v62  ;;  %vm1392_vm9 = vcmp.ge.f32.partialorder %v1338_v60, 0.0  ;;  %vm1393_vm10 = vcmp.ge.f32.partialorder %v1339_v61, 0.0 }
 0x1b9   : > { %v1498_v2 = vsel %vm1390_vm7, %v1336_v54, %v1444_v59  ;;  %v1446_v3 = vmul.f32 0.2, %v1338_v60  ;;  %v1447_v8 = vmul.f32 0.2, %v1339_v61  ;;  %vm1394_vm11 = vcmp.ge.f32.partialorder %v1340_v0, 0.0  ;;  %v1292_v59 = vld [vmem:[#allocation2 + $0x110] sm:$0xff] }
 0x1ba   : > { %v2055_v6 = vpack.c.bf16 %v1498_v2, %v1498_v2  ;;  %v1499_v7 = vsel %vm1391_vm8, %v1337_v58, %v1445_v63  ;;  %1786 = vst.msk [vmem:[%s2585_s29 + $0x40] sm:$0xf] %vm1769_vm4, %v2054_v1  ;;  %v1448_v13 = vmul.f32 0.2, %v1340_v0  ;;  %v1341_v16 = vadd.f32 %v2828_v32, %v1280_v4  ;;  %v1291_v58 = vld [vmem:[#allocation2 + $0x108] sm:$0xff] }
 0x1bb   : > { %v2056_v11 = vpack.c.bf16 %v1499_v7, %v1499_v7  ;;  %v1500_v12 = vsel %vm1392_vm9, %v1338_v60, %v1446_v3  ;;  %v1501_v15 = vsel %vm1393_vm10, %v1339_v61, %v1447_v8  ;;  %v1342_v17 = vadd.f32 %v2828_v32, %v1281_v5  ;;  %v1293_v5 = vld [vmem:[#allocation2 + $0x118] sm:$0xff] }
 0x1bc   : > { %1787 = vst.msk [vmem:[%s2585_s29 + $0x44] sm:$0xf] %vm1769_vm4, %v2055_v6  ;;  %v2057_v14 = vpack.c.bf16 %v1500_v12, %v1500_v12  ;;  %v2058_v18 = vpack.c.bf16 %v1501_v15, %v1501_v15  ;;  %v1502_v19 = vsel %vm1394_vm11, %v1340_v0, %v1448_v13  ;;  %v1343_v20 = vadd.f32 %v2828_v32, %v1282_v9  ;;  %v1294_v6 = vld [vmem:[#allocation2 + $0x120] sm:$0xff]  ;;  %v1296_v12 = vld [vmem:[#allocation2 + $0x130] sm:$0xff]  ;;  %v1297_v13 = vld [vmem:[#allocation2 + $0x138] sm:$0xff] }
 0x1bd   : > { %1788 = vst.msk [vmem:[%s2585_s29 + $0x48] sm:$0xf] %vm1769_vm4, %v2056_v11  ;;  %v1344_v21 = vadd.f32 %v2828_v32, %v1283_v10  ;;  %v2059_v24 = vpack.c.bf16 %v1502_v19, %v1502_v19  ;;  %vm1395_vm12 = vcmp.ge.f32.partialorder %v1341_v16, 0.0  ;;  %v1449_v25 = vmul.f32 0.2, %v1341_v16  ;;  %v1295_v11 = vld [vmem:[#allocation2 + $0x128] sm:$0xff] }
 0x1be   : > { %1789 = vst.msk [vmem:[%s2585_s29 + $0x4c] sm:$0xf] %vm1769_vm4, %v2057_v14  ;;  %vm1396_vm13 = vcmp.ge.f32.partialorder %v1342_v17, 0.0  ;;  %1790 = vst.msk [vmem:[%s2585_s29 + $0x50] sm:$0xf] %vm1769_vm4, %v2058_v18  ;;  %vm1397_vm14 = vcmp.ge.f32.partialorder %v1343_v20, 0.0  ;;  %v1345_v31 = vadd.f32 %v2828_v32, %v1284_v22  ;;  %v1346_v33 = vadd.f32 %v2828_v32, %v1285_v23 }
 0x1bf   : > { %v1450_v27 = vmul.f32 0.2, %v1342_v17  ;;  %v1451_v28 = vmul.f32 0.2, %v1343_v20  ;;  %vm1398_vm15 = vcmp.ge.f32.partialorder %v1344_v21, 0.0  ;;  %v1503_v29 = vsel %vm1395_vm12, %v1341_v16, %v1449_v25 }
 0x1c0   : > { %1791 = vst.msk [vmem:[%s2585_s29 + $0x54] sm:$0xf] %vm1769_vm4, %v2059_v24  ;;  %v1452_v30 = vmul.f32 0.2, %v1344_v21  ;;  %v2060_v34 = vpack.c.bf16 %v1503_v29, %v1503_v29  ;;  %v1347_v37 = vadd.f32 %v2828_v32, %v1286_v26  ;;  %vm1399_vm0 = vcmp.ge.f32.partialorder %v1345_v31, 0.0  ;;  %v1298_v29 = vld [vmem:[#allocation2 + $0x140] sm:$0xff] }
 0x1c1   : > { %v1504_v35 = vsel %vm1396_vm13, %v1342_v17, %v1450_v27  ;;  %v1505_v36 = vsel %vm1397_vm14, %v1343_v20, %v1451_v28  ;;  %v1453_v46 = vmul.f32 0.2, %v1345_v31  ;;  %vm1400_vm1 = vcmp.ge.f32.partialorder %v1346_v33, 0.0 }
 0x1c2   : > { %v2061_v40 = vpack.c.bf16 %v1504_v35, %v1504_v35  ;;  %v2062_v41 = vpack.c.bf16 %v1505_v36, %v1505_v36  ;;  %v1506_v42 = vsel %vm1398_vm15, %v1344_v21, %v1452_v30  ;;  %1792 = vst.msk [vmem:[%s2585_s29 + $0x58] sm:$0xf] %vm1769_vm4, %v2060_v34  ;;  %v1454_v47 = vmul.f32 0.2, %v1346_v33  ;;  %v1299_v34 = vld [vmem:[#allocation2 + $0x148] sm:$0xff] }
 0x1c3   : > { %v2063_v45 = vpack.c.bf16 %v1506_v42, %v1506_v42  ;;  %vm1401_vm2 = vcmp.ge.f32.partialorder %v1347_v37, 0.0  ;;  %v1455_v48 = vmul.f32 0.2, %v1347_v37  ;;  %v1348_v49 = vadd.f32 %v2828_v32, %v1287_v38  ;;  %v1300_v38 = vld [vmem:[#allocation2 + $0x150] sm:$0xff] }
 0x1c4   : > { %1793 = vst.msk [vmem:[%s2585_s29 + $0x5c] sm:$0xf] %vm1769_vm4, %v2061_v40  ;;  %1794 = vst.msk [vmem:[%s2585_s29 + $0x60] sm:$0xf] %vm1769_vm4, %v2062_v41  ;;  %v1349_v50 = vadd.f32 %v2828_v32, %v1288_v39  ;;  %v1507_v51 = vsel %vm1399_vm0, %v1345_v31, %v1453_v46  ;;  %v1508_v52 = vsel %vm1400_vm1, %v1346_v33, %v1454_v47 }
 0x1c5   : > { %1795 = vst.msk [vmem:[%s2585_s29 + $0x64] sm:$0xf] %vm1769_vm4, %v2063_v45  ;;  %v1350_v53 = vadd.f32 %v2828_v32, %v1289_v43  ;;  %v1351_v54 = vadd.f32 %v2828_v32, %v1290_v44  ;;  %v2064_v55 = vpack.c.bf16 %v1507_v51, %v1507_v51  ;;  %v2065_v56 = vpack.c.bf16 %v1508_v52, %v1508_v52  ;;  %v1301_v43 = vld [vmem:[#allocation2 + $0x158] sm:$0xff]  ;;  %v1302_v44 = vld [vmem:[#allocation2 + $0x160] sm:$0xff] }
 0x1c6   : > { %v1509_v57 = vsel %vm1401_vm2, %v1347_v37, %v1455_v48  ;;  %vm1402_vm3 = vcmp.ge.f32.partialorder %v1348_v49, 0.0  ;;  %v1456_v61 = vmul.f32 0.2, %v1348_v49  ;;  %vm1403_vm5 = vcmp.ge.f32.partialorder %v1349_v50, 0.0 }
 0x1c7   : > { %v2066_v60 = vpack.c.bf16 %v1509_v57, %v1509_v57  ;;  %v1457_v62 = vmul.f32 0.2, %v1349_v50  ;;  %1796 = vst.msk [vmem:[%s2585_s29 + $0x68] sm:$0xf] %vm1769_vm4, %v2064_v55  ;;  %1797 = vst.msk [vmem:[%s2585_s29 + $0x6c] sm:$0xf] %vm1769_vm4, %v2065_v56  ;;  %v1352_v3 = vadd.f32 %v2828_v32, %v1291_v58  ;;  %v1353_v4 = vadd.f32 %v2828_v32, %v1292_v59 }
 0x1c8   : > { %vm1404_vm6 = vcmp.ge.f32.partialorder %v1350_v53, 0.0  ;;  %v1458_v63 = vmul.f32 0.2, %v1350_v53  ;;  %vm1405_vm7 = vcmp.ge.f32.partialorder %v1351_v54, 0.0  ;;  %v1459_v0 = vmul.f32 0.2, %v1351_v54 }
 0x1c9   : > { %1798 = vst.msk [vmem:[%s2585_s29 + $0x70] sm:$0xf] %vm1769_vm4, %v2066_v60  ;;  %v1510_v1 = vsel %vm1402_vm3, %v1348_v49, %v1456_v61  ;;  %v1511_v2 = vsel %vm1403_vm5, %v1349_v50, %v1457_v62  ;;  %vm1406_vm8 = vcmp.ge.f32.partialorder %v1352_v3, 0.0  ;;  %v1460_v16 = vmul.f32 0.2, %v1352_v3  ;;  %v1303_v49 = vld [vmem:[#allocation2 + $0x168] sm:$0xff] }
 0x1ca   : > { %v2067_v7 = vpack.c.bf16 %v1510_v1, %v1510_v1  ;;  %v2068_v8 = vpack.c.bf16 %v1511_v2, %v1511_v2  ;;  %v1512_v9 = vsel %vm1404_vm6, %v1350_v53, %v1458_v63  ;;  %v1513_v10 = vsel %vm1405_vm7, %v1351_v54, %v1459_v0  ;;  %v1304_v62 = vld [vmem:[#allocation2 + $0x170] sm:$0xff]  ;;  %v1305_v63 = vld [vmem:[#allocation2 + $0x178] sm:$0xff] }
 0x1cb   : > { %v2069_v14 = vpack.c.bf16 %v1512_v9, %v1512_v9  ;;  %v2070_v15 = vpack.c.bf16 %v1513_v10, %v1513_v10  ;;  %vm1407_vm9 = vcmp.ge.f32.partialorder %v1353_v4, 0.0  ;;  %v1461_v17 = vmul.f32 0.2, %v1353_v4 }
 0x1cc   : > { %1799 = vst.msk [vmem:[%s2585_s29 + $0x74] sm:$0xf] %vm1769_vm4, %v2067_v7  ;;  %1800 = vst.msk [vmem:[%s2585_s29 + $0x78] sm:$0xf] %vm1769_vm4, %v2068_v8  ;;  %v1354_v18 = vadd.f32 %v2828_v32, %v1293_v5  ;;  %v1355_v19 = vadd.f32 %v2828_v32, %v1294_v6  ;;  %v1514_v20 = vsel %vm1406_vm8, %v1352_v3, %v1460_v16  ;;  %v1306_v3 = vld [vmem:[#allocation2 + $0x180] sm:$0xff]  ;;  %v1308_v16 = vld [vmem:[#allocation2 + $0x190] sm:$0xff] }
 0x1cd   : > { %1801 = vst.msk [vmem:[%s2585_s29 + $0x7c] sm:$0xf] %vm1769_vm4, %v2069_v14  ;;  %1802 = vst.msk [vmem:[%s2585_s29 + $0x80] sm:$0xf] %vm1769_vm4, %v2070_v15  ;;  %v1356_v21 = vadd.f32 %v2828_v32, %v1295_v11  ;;  %v1357_v22 = vadd.f32 %v2828_v32, %v1296_v12  ;;  %v1358_v23 = vadd.f32 %v2828_v32, %v1297_v13 }
 0x1ce   : > { %v2071_v24 = vpack.c.bf16 %v1514_v20, %v1514_v20  ;;  %v1515_v25 = vsel %vm1407_vm9, %v1353_v4, %v1461_v17  ;;  %vm1408_vm10 = vcmp.ge.f32.partialorder %v1354_v18, 0.0  ;;  %v1462_v26 = vmul.f32 0.2, %v1354_v18  ;;  %v1307_v4 = vld [vmem:[#allocation2 + $0x188] sm:$0xff]  ;;  %v1309_v17 = vld [vmem:[#allocation2 + $0x198] sm:$0xff]  ;;  %v1310_v20 = vld [vmem:[#allocation2 + $0x1a0] sm:$0xff] }
 0x1cf   : > { %v2072_v27 = vpack.c.bf16 %v1515_v25, %v1515_v25  ;;  %vm1409_vm11 = vcmp.ge.f32.partialorder %v1355_v19, 0.0  ;;  %v1463_v28 = vmul.f32 0.2, %v1355_v19  ;;  %vm1410_vm12 = vcmp.ge.f32.partialorder %v1356_v21, 0.0 }
 0x1d0   : > { %1803 = vst.msk [vmem:[%s2585_s29 + $0x84] sm:$0xf] %vm1769_vm4, %v2071_v24  ;;  %v1516_v30 = vsel %vm1408_vm10, %v1354_v18, %v1462_v26  ;;  %v1464_v31 = vmul.f32 0.2, %v1356_v21  ;;  %vm1411_vm13 = vcmp.ge.f32.partialorder %v1357_v22, 0.0  ;;  %vm1412_vm14 = vcmp.ge.f32.partialorder %v1358_v23, 0.0 }
 0x1d1   : > { %v1465_v33 = vmul.f32 0.2, %v1357_v22  ;;  %1804 = vst.msk [vmem:[%s2585_s29 + $0x88] sm:$0xf] %vm1769_vm4, %v2072_v27  ;;  %v2073_v35 = vpack.c.bf16 %v1516_v30, %v1516_v30  ;;  %v1517_v36 = vsel %vm1409_vm11, %v1355_v19, %v1463_v28  ;;  %v1466_v37 = vmul.f32 0.2, %v1358_v23 }
 0x1d2   : > { %v2074_v39 = vpack.c.bf16 %v1517_v36, %v1517_v36  ;;  %v1518_v40 = vsel %vm1410_vm12, %v1356_v21, %v1464_v31  ;;  %v1359_v42 = vadd.f32 %v2828_v32, %v1298_v29  ;;  %v1360_v48 = vadd.f32 %v2828_v32, %v1299_v34  ;;  %v1311_v31 = vld [vmem:[#allocation2 + $0x1a8] sm:$0xff] }
 0x1d3   : > { %v1519_v41 = vsel %vm1411_vm13, %v1357_v22, %v1465_v33  ;;  %1805 = vst.msk [vmem:[%s2585_s29 + $0x8c] sm:$0xf] %vm1769_vm4, %v2073_v35  ;;  %v2075_v45 = vpack.c.bf16 %v1518_v40, %v1518_v40  ;;  %v1520_v47 = vsel %vm1412_vm14, %v1358_v23, %v1466_v37  ;;  %v1361_v52 = vadd.f32 %v2828_v32, %v1300_v38 }
 0x1d4   : > { %v2076_v46 = vpack.c.bf16 %v1519_v41, %v1519_v41  ;;  %1806 = vst.msk [vmem:[%s2585_s29 + $0x90] sm:$0xf] %vm1769_vm4, %v2074_v39  ;;  %v2077_v50 = vpack.c.bf16 %v1520_v47, %v1520_v47  ;;  %vm1413_vm15 = vcmp.ge.f32.partialorder %v1359_v42, 0.0  ;;  %v1467_v51 = vmul.f32 0.2, %v1359_v42 }
 0x1d5   : > { %1807 = vst.msk [vmem:[%s2585_s29 + $0x94] sm:$0xf] %vm1769_vm4, %v2075_v45  ;;  %vm1414_vm0 = vcmp.ge.f32.partialorder %v1360_v48, 0.0  ;;  %v1468_v53 = vmul.f32 0.2, %v1360_v48  ;;  %v1362_v54 = vadd.f32 %v2828_v32, %v1301_v43  ;;  %v1363_v55 = vadd.f32 %v2828_v32, %v1302_v44 }
 0x1d6   : > { %1808 = vst.msk [vmem:[%s2585_s29 + $0x98] sm:$0xf] %vm1769_vm4, %v2076_v46  ;;  %1809 = vst.msk [vmem:[%s2585_s29 + $0x9c] sm:$0xf] %vm1769_vm4, %v2077_v50  ;;  %v1521_v56 = vsel %vm1413_vm15, %v1359_v42, %v1467_v51  ;;  %vm1415_vm1 = vcmp.ge.f32.partialorder %v1361_v52, 0.0  ;;  %v1364_v58 = vadd.f32 %v2828_v32, %v1303_v49  ;;  %v1365_v10 = vadd.f32 %v2828_v32, %v1304_v62 }
 0x1d7   : > { %v1469_v57 = vmul.f32 0.2, %v1361_v52  ;;  %v2078_v59 = vpack.c.bf16 %v1521_v56, %v1521_v56  ;;  %v1522_v60 = vsel %vm1414_vm0, %v1360_v48, %v1468_v53  ;;  %vm1416_vm2 = vcmp.ge.f32.partialorder %v1362_v54, 0.0 }
 0x1d8   : > { %v1470_v61 = vmul.f32 0.2, %v1362_v54  ;;  %v2079_v0 = vpack.c.bf16 %v1522_v60, %v1522_v60  ;;  %vm1417_vm3 = vcmp.ge.f32.partialorder %v1363_v55, 0.0  ;;  %v1471_v2 = vmul.f32 0.2, %v1363_v55 }
 0x1d9   : > { %v1523_v1 = vsel %vm1415_vm1, %v1361_v52, %v1469_v57  ;;  %1810 = vst.msk [vmem:[%s2585_s29 + $0xa0] sm:$0xf] %vm1769_vm4, %v2078_v59  ;;  %vm1418_vm5 = vcmp.ge.f32.partialorder %v1364_v58, 0.0  ;;  %v1472_v7 = vmul.f32 0.2, %v1364_v58  ;;  %v1366_v11 = vadd.f32 %v2828_v32, %v1305_v63 }
 0x1da   : > { %v2080_v5 = vpack.c.bf16 %v1523_v1, %v1523_v1  ;;  %v1524_v6 = vsel %vm1416_vm2, %v1362_v54, %v1470_v61  ;;  %1811 = vst.msk [vmem:[%s2585_s29 + $0xa4] sm:$0xf] %vm1769_vm4, %v2079_v0  ;;  %v1525_v9 = vsel %vm1417_vm3, %v1363_v55, %v1471_v2  ;;  %v1367_v14 = vadd.f32 %v2828_v32, %v1306_v3 }
 0x1db   : > { %v2081_v8 = vpack.c.bf16 %v1524_v6, %v1524_v6  ;;  %v2082_v12 = vpack.c.bf16 %v1525_v9, %v1525_v9  ;;  %v1526_v13 = vsel %vm1418_vm5, %v1364_v58, %v1472_v7  ;;  %v1368_v15 = vadd.f32 %v2828_v32, %v1307_v4 }
 0x1dc   : > { %1812 = vst.msk [vmem:[%s2585_s29 + $0xa8] sm:$0xf] %vm1769_vm4, %v2080_v5  ;;  %v2083_v18 = vpack.c.bf16 %v1526_v13, %v1526_v13  ;;  %vm1419_vm6 = vcmp.ge.f32.partialorder %v1365_v10, 0.0  ;;  %v1473_v19 = vmul.f32 0.2, %v1365_v10  ;;  %vm1420_vm7 = vcmp.ge.f32.partialorder %v1366_v11, 0.0 }
 0x1dd   : > { %1813 = vst.msk [vmem:[%s2585_s29 + $0xac] sm:$0xf] %vm1769_vm4, %v2081_v8  ;;  %1814 = vst.msk [vmem:[%s2585_s29 + $0xb0] sm:$0xf] %vm1769_vm4, %v2082_v12  ;;  %v1474_v21 = vmul.f32 0.2, %v1366_v11  ;;  %v1369_v25 = vadd.f32 %v2828_v32, %v1308_v16  ;;  %v1370_v26 = vadd.f32 %v2828_v32, %v1309_v17  ;;  %v1371_v30 = vadd.f32 %v2828_v32, %v1310_v20 }
 0x1de   : > { %vm1421_vm8 = vcmp.ge.f32.partialorder %v1367_v14, 0.0  ;;  %v1475_v22 = vmul.f32 0.2, %v1367_v14  ;;  %vm1422_vm9 = vcmp.ge.f32.partialorder %v1368_v15, 0.0  ;;  %1815 = vst.msk [vmem:[%s2585_s29 + $0xb4] sm:$0xf] %vm1769_vm4, %v2083_v18  ;;  %v1527_v23 = vsel %vm1419_vm6, %v1365_v10, %v1473_v19 }
 0x1df   : > { %v1476_v24 = vmul.f32 0.2, %v1368_v15  ;;  %v2084_v27 = vpack.c.bf16 %v1527_v23, %v1527_v23  ;;  %v1528_v28 = vsel %vm1420_vm7, %v1366_v11, %v1474_v21  ;;  %vm1423_vm10 = vcmp.ge.f32.partialorder %v1369_v25, 0.0 }
 0x1e0   : > { %v1529_v29 = vsel %vm1421_vm8, %v1367_v14, %v1475_v22  ;;  %v2085_v33 = vpack.c.bf16 %v1528_v28, %v1528_v28  ;;  %v1477_v37 = vmul.f32 0.2, %v1369_v25  ;;  %vm1424_vm11 = vcmp.ge.f32.partialorder %v1370_v26, 0.0 }
 0x1e1   : > { %v2086_v34 = vpack.c.bf16 %v1529_v29, %v1529_v29  ;;  %v1530_v35 = vsel %vm1422_vm9, %v1368_v15, %v1476_v24  ;;  %1816 = vst.msk [vmem:[%s2585_s29 + $0xb8] sm:$0xf] %vm1769_vm4, %v2084_v27  ;;  %v1478_v38 = vmul.f32 0.2, %v1370_v26  ;;  %vm1425_vm12 = vcmp.ge.f32.partialorder %v1371_v30, 0.0 }
 0x1e2   : > { %v2087_v36 = vpack.c.bf16 %v1530_v35, %v1530_v35  ;;  %1817 = vst.msk [vmem:[%s2585_s29 + $0xbc] sm:$0xf] %vm1769_vm4, %v2085_v33  ;;  %v1479_v39 = vmul.f32 0.2, %v1371_v30  ;;  %v1372_v40 = vadd.f32 %v2828_v32, %v1311_v31  ;;  %v1531_v41 = vsel %vm1423_vm10, %v1369_v25, %v1477_v37 }
 0x1e3   : > { %1818 = vst.msk [vmem:[%s2585_s29 + $0xc0] sm:$0xf] %vm1769_vm4, %v2086_v34  ;;  %v1532_v42 = vsel %vm1424_vm11, %v1370_v26, %v1478_v38  ;;  %v2088_v43 = vpack.c.bf16 %v1531_v41, %v1531_v41 }
 0x1e4   : > { %1819 = vst.msk [vmem:[%s2585_s29 + $0xc4] sm:$0xf] %vm1769_vm4, %v2087_v36  ;;  %v2089_v44 = vpack.c.bf16 %v1532_v42, %v1532_v42  ;;  %v1533_v45 = vsel %vm1425_vm12, %v1371_v30, %v1479_v39  ;;  %vm1426_vm13 = vcmp.ge.f32.partialorder %v1372_v40, 0.0  ;;  %v1480_v47 = vmul.f32 0.2, %v1372_v40 }
 0x1e5   : > { %v2090_v46 = vpack.c.bf16 %v1533_v45, %v1533_v45  ;;  %1820 = vst.msk [vmem:[%s2585_s29 + $0xc8] sm:$0xf] %vm1769_vm4, %v2088_v43 }
 0x1e6   : > { %1821 = vst.msk [vmem:[%s2585_s29 + $0xcc] sm:$0xf] %vm1769_vm4, %v2089_v44  ;;  %v1534_v48 = vsel %vm1426_vm13, %v1372_v40, %v1480_v47 }
 0x1e7   : > { %1822 = vst.msk [vmem:[%s2585_s29 + $0xd0] sm:$0xf] %vm1769_vm4, %v2090_v46  ;;  %v2091_v49 = vpack.c.bf16 %v1534_v48, %v1534_v48 }
 0x1e9   : > { %1823 = vst.msk [vmem:[%s2585_s29 + $0xd4] sm:$0xf] %vm1769_vm4, %v2091_v49 }
 0x1ea PF: > { %s13_s18 = sadd.s32 1, %s2409_s18   ;;  %s3018_s12 = smov %s2389_s13 }
 0x1eb   : > { %p10_p0 = scmp.ge.s32.totalorder %s13_s18, 8   ;;  %s3019_s13 = smov %s2485_s25 }
 0x1ec   : > { %s3020_s14 = smov %s2401_s16  ;;  %s3021_s15 = smov %s2405_s17 }
 0x1ed   : > { %s3022_s16 = smov %s3025_s19  ;;  %s3023_s17 = smov %s3029_s20 }
 0x1ee   :  { %12 = sbr.rel (!%p10_p0) target bundleno = 4 (0x4), region = 119 }

// kernel: conv_autoencoder_forward.10
= control target key start
LH: loop header
LB: loop body
LE: loop exit
PB: predicated region body
PF: predicated region fallthrough
CT: control target
= control target key end

     0   :  { %s866_s12 = smov 0   ;;  %s868_s13 = smov 0   ;;  %s995_s0 = inlined_call_operand.vmem [shape: bf16[2,6,3,8,192], index: 0, kind: input, shape index: {}]   ;;  %s996_s1 = inlined_call_operand.vmem [shape: bf16[3,192,128], index: 1, kind: input, shape index: {}]   ;;  %s997_s2 = inlined_call_operand.vmem [shape: f32[1,128], index: 2, kind: input, shape index: {}]   ;;  %s998_s3 = inlined_call_operand.vmem [shape: bf16[2,6,8,128], index: 3, kind: output, shape index: {}]  }
   0x1   :  { %s870_s14 = smov 0   ;;  %s872_s15 = smov 0  }
   0x2   :  { %s874_s16 = smov 0   ;;  %s876_s17 = smov 0  }
   0x3   :  { %s878_s18 = smov 0  }
   0x4 LB: > { %s22_s19 = sadd.s32 1, %s834_s16  ;;  %s25_s20 = sadd.s32 1, %s838_s17  ;;  %s842_s18 = sphi %s878_s18, %s13_s18   ;;  %s838_s17 = sphi %s876_s17, %s1004_s17   ;;  %s834_s16 = sphi %s874_s16, %s1003_s16   ;;  %s830_s15 = sphi %s872_s15, %s1002_s15   ;;  %s826_s14 = sphi %s870_s14, %s1001_s14   ;;  %s822_s13 = sphi %s868_s13, %s1000_s13   ;;  %s818_s12 = sphi %s866_s12, %s999_s12  }
   0x5   : > { %p23_p0 = scmp.ge.s32.totalorder %s22_s19, 3  ;;  %p41_p1 = scmp.ne.s32.totalorder %s822_s13, %s818_s12 }
   0x6   : > { %p42_p2 = scmp.eq.s32.totalorder %s842_s18, 0  ;;  %s34_s24 = sadd.s32 1, %s822_s13 }
   0x7   : > { %s1006_s19 = smov (%p23_p0, %s22_s19), 0  ;;  %s1008_s20 = smov (!%p23_p0, %s25_s20), %s838_s17 }
   0x8   : > { %p43_p3 = por %p42_p2, %p41_p1  ;;  %p27_p4 = scmp.ge.s32.totalorder %s1008_s20, 2 }
   0x9   : > { %s30_s21 = ssub.s32 %s834_s16, %s1006_s19  ;;  %p631_p6 = scmp.ge.s32.totalorder %s842_s18, 6 }
   0xa   : > { %s1010_s20 = smov (%p27_p4, %s1008_s20), 0 }
   0xb   : > { %s29_s22 = ssub.s32 %s838_s17, %s1010_s20  ;;  %143 = sbr.rel (%p631_p6) target bundleno = 27 (0x1b), region = 20 }
   0xc   : > { %s31_s23 = sor.u32 %s30_s21, %s29_s22 }
   0xd   : > { %p32_p5 = scmp.eq.s32.totalorder %s31_s23, 0 }
   0xf   : > { %s917_s25 = scalar_select %p32_p5, %s822_s13, %s34_s24  }
  0x10   : > { %146 = sbr.rel (!%p43_p3) target bundleno = 27 (0x1b), region = 24  ;;  %s148_s26 = sand.u32 (%p43_p3), 1, %s822_s13  }
  0x11   : > { %s704_s27 = smul.u32 (%p43_p3), 48, %s148_s26  ;;  %s632_s28 = sshll.u32 (%p43_p3), %s834_s16, 1 }
  0x12   : > { %s705_s29 = smul.u32 (%p43_p3), 36, %s838_s17 }
  0x13   : > { %s150_s8 = scalar_lea.vmem (%p43_p3), [#allocation3], %s704_s27 }
  0x14   : > { %s153_s30 = sadd.s32 (%p43_p3), %s705_s29, %s632_s28 }
  0x15   : > { %s633_s4 = sshll.u32 %s153_s30, 2 }
  0x16   : > { %s155_s7 = scalar_lea.vmem %s995_s0, %s633_s4 }
  0x17   : > { %v194_v0 = vld [vmem:[%s155_s7] sm:$0xff]  ;;  %v196_v1 = vld [vmem:[%s155_s7 + $0x18] sm:$0xff]  ;;  %v198_v2 = vld [vmem:[%s155_s7 + $0x30] sm:$0xff] }
  0x18   : > { %195 = vst [vmem:[%s150_s8] sm:$0xff] %v194_v0  ;;  %197 = vst [vmem:[%s150_s8 + $0x8] sm:$0xff] %v196_v1  ;;  %v200_v3 = vld [vmem:[%s155_s7 + $0x48] sm:$0xff]  ;;  %v202_v4 = vld [vmem:[%s155_s7 + $0x60] sm:$0xff] }
  0x19   : > { %199 = vst [vmem:[%s150_s8 + $0x10] sm:$0xff] %v198_v2  ;;  %v204_v5 = vld [vmem:[%s155_s7 + $0x78] sm:$0xff]  ;;  %201 = vst [vmem:[%s150_s8 + $0x18] sm:$0xff] %v200_v3 }
  0x1a   : > { %203 = vst [vmem:[%s150_s8 + $0x20] sm:$0xff] %v202_v4  ;;  %205 = vst [vmem:[%s150_s8 + $0x28] sm:$0xff] %v204_v5 }
  0x1b PF: > { %p634_p7 = scmp.ge.s32.totalorder %s842_s18, 1  ;;  %p218_p8 = scmp.lt.s32.totalorder %s842_s18, 7 }
  0x1d   : > { %p219_p9 = pnand %p634_p7, %p218_p8 }
  0x1e   : > { %s225_s9 = sand.u32 (!%p219_p9), 1, %s818_s12   ;;  %p253_p10 = scmp.lt.s32.totalorder (!%p219_p9), %s826_s14, 2 }
  0x1f   : > { %222 = sbr.rel (%p219_p9) target bundleno = 318 (0x13e), region = 66  ;;  %p258_p11 = scmp.lt.s32.totalorder (!%p219_p9), %s830_s15, 1 }
  0x20   : > { %s706_s10 = smul.u32 (!%p219_p9), 48, %s225_s9  ;;  %p637_p12 = scmp.ne.s32.totalorder (!%p219_p9), %s826_s14, 0 }
  0x22   : > { %s943_s30 = scalar_lea.vmem (!%p219_p9), [#allocation3], %s706_s10 }
  0x24   : > { %s254_s11 = scalar_select %p253_p10, %s826_s14, 2 }
  0x25   : > { %s1012_s15 = smov (!%p258_p11, %s830_s15), 1  ;;  %267 = sbr.rel (%p637_p12) target bundleno = 46 (0x2e), region = 74 }
  0x26   : > { %s707_s21 = smul.u32 96, %s254_s11 }
  0x27   : > { %s708_s26 = smul.u32 24, %s1012_s15 }
  0x28   : > { %s936_s24 = scalar_lea.vmem %s996_s1, %s707_s21 }
  0x29   : > { %s941_s29 = scalar_lea.vmem %s998_s3, %s708_s26 }
  0x2a   : > { %v844_v6 = vmov 0.0  }
  0x2b   : > { %268 = vst [vmem:[#allocation2 + $0x28] sm:$0xff] %v844_v6  ;;  %269 = vst [vmem:[#allocation2 + $0x10] sm:$0xff] %v844_v6 }
  0x2c   : > { %270 = vst [vmem:[#allocation2 + $0x8] sm:$0xff] %v844_v6  ;;  %271 = vst [vmem:[#allocation2] sm:$0xff] %v844_v6 }
  0x2d   : > { %272 = vst [vmem:[#allocation2 + $0x18] sm:$0xff] %v844_v6  ;;  %273 = vst [vmem:[#allocation2 + $0x20] sm:$0xff] %v844_v6 }
  0x2e PF: > { %v767_v7 = vld [vmem:[%s936_s24 + $0x38] sm:$0xff]   ;;  %v845_v8 = vmov 0   ;;  %v768_v9 = vld [vmem:[%s936_s24 + $0x30] sm:$0xff]   ;;  %v769_v10 = vld [vmem:[%s936_s24 + $0x28] sm:$0xff]   ;;  %vm409_vm0 = vcmask 523264   ;;  %p659_p13 = scmp.ne.s32.totalorder %s826_s14, 2 }
  0x2f   : > { %680 = vmatprep.subr.bf16.mxu1 %v845_v8  ;;  %419 = vmatprep.subr.bf16.mxu0 %v845_v8  ;;  %v770_v11 = vld [vmem:[%s936_s24 + $0x20] sm:$0xff]   ;;  %v771_v13 = vld [vmem:[%s936_s24 + $0x18] sm:$0xff]   ;;  %v772_v15 = vld [vmem:[%s936_s24 + $0x10] sm:$0xff]  }
  0x30   : > { %692 = vmatpush1.bf16.msra.mxu1 %v767_v7  ;;  %420 = vmatpush1.bf16.msra.mxu0 %v767_v7  ;;  %v781_v12 = vld [vmem:[%s943_s30 + $0x14] ss:$8 sps:$4 sm:$0xff]   ;;  %v784_v14 = vld [vmem:[%s943_s30 + $0x4] ss:$8 sps:$4 sm:$0xff]   ;;  %v779_v22 = vld [vmem:[%s943_s30 + $0x10] ss:$8 sps:$4 sm:$0xff]  }
  0x31   : > { %681 = vmatprep.subr.bf16.mxu1 %v845_v8  ;;  %421 = vmatprep.subr.bf16.mxu0 %v845_v8  ;;  %v773_v16 = vld [vmem:[%s936_s24 + $0x8] sm:$0xff]   ;;  %v774_v17 = vld [vmem:[%s936_s24] sm:$0xff]   ;;  %v775_v18 = vld [vmem:[%s936_s24 + $0x58] sm:$0xff]  }
  0x32   : > { %657 = vmatprep.mubr.msk.bf16.mxu1 %vm409_vm0, %v781_v12  ;;  %656 = vmatprep.mubr.msk.bf16.mxu0 %vm409_vm0, %v784_v14  ;;  %v776_v19 = vld [vmem:[%s936_s24 + $0x50] sm:$0xff]   ;;  %v777_v20 = vld [vmem:[%s936_s24 + $0x48] sm:$0xff]   ;;  %v778_v21 = vld [vmem:[%s936_s24 + $0x40] sm:$0xff]  }
  0x33   : > { %v782_v23 = vld [vmem:[%s943_s30] ss:$8 sps:$4 sm:$0xff]   ;;  %v785_v24 = vld [vmem:[%s943_s30 + $0x24] ss:$8 sps:$4 sm:$0xff]  }
  0x34   : > { %693 = vmatpush1.bf16.msra.mxu1 %v768_v9  ;;  %422 = vmatpush1.bf16.msra.mxu0 %v768_v9  ;;  %v787_v25 = vld [vmem:[%s943_s30 + $0x20] ss:$8 sps:$4 sm:$0xff]  }
  0x35   : > { %682 = vmatprep.subr.bf16.mxu1 %v845_v8  ;;  %423 = vmatprep.subr.bf16.mxu0 %v845_v8  ;;  %v282_v26 = vld [vmem:[#allocation2 + $0x8] sm:$0xff]  ;;  %v283_v34 = vld [vmem:[#allocation2] sm:$0xff]  ;;  %v281_v35 = vld [vmem:[#allocation2 + $0x10] sm:$0xff] }
  0x36   : > { %v280_v27 = vld [vmem:[#allocation2 + $0x28] sm:$0xff]  ;;  %v284_v42 = vld [vmem:[#allocation2 + $0x18] sm:$0xff]  ;;  %v285_v46 = vld [vmem:[#allocation2 + $0x20] sm:$0xff] }
  0x38   : > { %694 = vmatpush1.bf16.msra.mxu1 %v769_v10  ;;  %424 = vmatpush1.bf16.msra.mxu0 %v769_v10 }
  0x39   : > { %683 = vmatprep.subr.bf16.mxu1 %v845_v8  ;;  %425 = vmatprep.subr.bf16.mxu0 %v845_v8 }
  0x3c   : > { %695 = vmatpush1.bf16.msra.mxu1 %v770_v11  ;;  %426 = vmatpush1.bf16.msra.mxu0 %v770_v11 }
  0x3d   : > { %684 = vmatprep.subr.bf16.mxu1 %v845_v8  ;;  %427 = vmatprep.subr.bf16.mxu0 %v845_v8 }
  0x40   : > { %696 = vmatpush1.bf16.msra.mxu1 %v771_v13  ;;  %428 = vmatpush1.bf16.msra.mxu0 %v771_v13 }
  0x41   : > { %685 = vmatprep.subr.bf16.mxu1 %v845_v8  ;;  %429 = vmatprep.subr.bf16.mxu0 %v845_v8 }
  0x44   : > { %697 = vmatpush1.bf16.msra.mxu1 %v772_v15  ;;  %430 = vmatpush1.bf16.msra.mxu0 %v772_v15 }
  0x45   : > { %686 = vmatprep.subr.bf16.mxu1 %v845_v8  ;;  %431 = vmatprep.subr.bf16.mxu0 %v845_v8 }
  0x48   : > { %698 = vmatpush1.bf16.msra.mxu1 %v773_v16  ;;  %432 = vmatpush1.bf16.msra.mxu0 %v773_v16 }
  0x49   : > { %687 = vmatprep.subr.bf16.mxu1 %v845_v8  ;;  %433 = vmatprep.subr.bf16.mxu0 %v845_v8 }
  0x4c   : > { %699 = vmatpush1.bf16.msra.mxu1 %v774_v17  ;;  %434 = vmatpush1.bf16.msra.mxu0 %v774_v17 }
  0x4d   : > { %688 = vmatprep.subr.bf16.mxu1 %v845_v8  ;;  %443 = vmatprep.subr.bf16.mxu0 %v845_v8 }
  0x50   : > { %700 = vmatpush2.bf16.msra.mxu1 %v775_v18  ;;  %444 = vmatpush2.bf16.msra.mxu0 %v775_v18 }
  0x51   : > { %689 = vmatprep.subr.bf16.mxu1 %v845_v8  ;;  %445 = vmatprep.subr.bf16.mxu0 %v845_v8 }
  0x54   : > { %701 = vmatpush2.bf16.msra.mxu1 %v776_v19  ;;  %446 = vmatpush2.bf16.msra.mxu0 %v776_v19 }
  0x55   : > { %690 = vmatprep.subr.bf16.mxu1 %v845_v8  ;;  %447 = vmatprep.subr.bf16.mxu0 %v845_v8 }
  0x58   : > { %702 = vmatpush2.bf16.msra.mxu1 %v777_v20  ;;  %448 = vmatpush2.bf16.msra.mxu0 %v777_v20 }
  0x59   : > { %691 = vmatprep.subr.bf16.mxu1 %v845_v8  ;;  %449 = vmatprep.subr.bf16.mxu0 %v845_v8 }
  0x5c   : > { %703 = vmatpush2.bf16.msra.mxu1 %v778_v21  ;;  %450 = vmatpush2.bf16.msra.mxu0 %v778_v21 }
  0x5f   : > { %460 = vmatmul.mubr.bf16.vlgmr.msra.gmra.mxu1 %v779_v22  ;;  %452 = vmatmul.mubr.bf16.vlgmr.msra.gmra.mxu0 %v782_v23 }
  0x60   : > { %658 = vmatprep.mubr.msk.bf16.mxu1 %vm409_vm0, %v785_v24 }
  0x67   : > { %468 = vmatmul.mubr.bf16.gmra.mxu1 %v787_v25 }
 0x11f   : > { %v461_v28 = vpop.f32.mrf.mxu1  ;;  %v453_v29 = vpop.f32.mrf.mxu0 }
 0x120   : > { %v478_v30 = vadd.f32 %v461_v28, %v282_v26  ;;  %v476_v31 = vadd.f32 %v453_v29, %v280_v27 }
 0x121   : > { %v463_v32 = vpop.f32.mrf.mxu1  ;;  %v455_v33 = vpop.f32.mrf.mxu0 }
 0x122   : > { %484 = vst [vmem:[#allocation2 + $0x8] sm:$0xff] %v478_v30  ;;  %482 = vst [vmem:[#allocation2 + $0x28] sm:$0xff] %v476_v31 }
 0x123   : > { %v464_v36 = vpop.f32.mrf.mxu1  ;;  %v456_v37 = vpop.f32.mrf.mxu0 }
 0x124   : > { %v479_v38 = vadd.f32 %v464_v36, %v283_v34  ;;  %v477_v39 = vadd.f32 %v456_v37, %v281_v35 }
 0x125   : > { %v466_v40 = vpop.f32.mrf.mxu1  ;;  %v458_v41 = vpop.f32.mrf.mxu0 }
 0x126   : > { %485 = vst [vmem:[#allocation2] sm:$0xff] %v479_v38  ;;  %483 = vst [vmem:[#allocation2 + $0x10] sm:$0xff] %v477_v39 }
 0x127   : > { %v469_v43 = vpop.f32.mrf.mxu1 }
 0x128   : > { %v480_v44 = vadd.f32 %v469_v43, %v284_v42 }
 0x129   : > { %v471_v45 = vpop.f32.mrf.mxu1 }
 0x12a   : > { %486 = vst [vmem:[#allocation2 + $0x18] sm:$0xff] %v480_v44  ;;  %491 = sbr.rel (%p659_p13) target bundleno = 318 (0x13e), region = 78 }
 0x12b   : > { %v472_v47 = vpop.f32.mrf.mxu1 }
 0x12c   : > { %v481_v48 = vadd.f32 %v472_v47, %v285_v46 }
 0x12d   : > { %v474_v49 = vpop.f32.mrf.mxu1 }
 0x12e   : > { %487 = vst [vmem:[#allocation2 + $0x20] sm:$0xff] %v481_v48 }
 0x12f   : > { %v492_v50 = vld [vmem:[#allocation2 + $0x28] sm:$0xff]  ;;  %v493_v51 = vld [vmem:[#allocation2 + $0x10] sm:$0xff]  ;;  %v660_v52 = vld [vmem:[%s997_s2] ss:$0 sm:$0xff] }
 0x130   : > { %v505_v53 = vadd.f32 %v660_v52, %v492_v50  ;;  %v506_v54 = vadd.f32 %v660_v52, %v493_v51  ;;  %v494_v55 = vld [vmem:[#allocation2 + $0x8] sm:$0xff]  ;;  %v495_v56 = vld [vmem:[#allocation2] sm:$0xff] }
 0x131   : > { %v496_v57 = vld [vmem:[#allocation2 + $0x18] sm:$0xff]  ;;  %v507_v58 = vadd.f32 %v660_v52, %v494_v55  ;;  %v508_v59 = vadd.f32 %v660_v52, %v495_v56 }
 0x132   : > { %v509_v61 = vadd.f32 %v660_v52, %v496_v57  ;;  %vm511_vm1 = vcmp.ge.f32.partialorder %v505_v53, 0.0  ;;  %vm512_vm2 = vcmp.ge.f32.partialorder %v506_v54, 0.0  ;;  %v517_v62 = vmul.f32 0.2, %v505_v53 }
 0x133   : > { %v518_v63 = vmul.f32 0.2, %v506_v54  ;;  %vm513_vm3 = vcmp.ge.f32.partialorder %v507_v58, 0.0  ;;  %vm514_vm4 = vcmp.ge.f32.partialorder %v508_v59, 0.0  ;;  %v519_v0 = vmul.f32 0.2, %v507_v58 }
 0x134   : > { %v520_v1 = vmul.f32 0.2, %v508_v59  ;;  %v523_v2 = vsel %vm511_vm1, %v505_v53, %v517_v62  ;;  %vm515_vm5 = vcmp.ge.f32.partialorder %v509_v61, 0.0  ;;  %v521_v8 = vmul.f32 0.2, %v509_v61 }
 0x135   : > { %v497_v60 = vld [vmem:[#allocation2 + $0x20] sm:$0xff]  ;;  %v524_v3 = vsel %vm512_vm2, %v506_v54, %v518_v63  ;;  %v525_v6 = vsel %vm513_vm3, %v507_v58, %v519_v0 }
 0x136   : > { %v510_v4 = vadd.f32 %v660_v52, %v497_v60  ;;  %v666_v5 = vpack.c.bf16 %v524_v3, %v523_v2  ;;  %v526_v7 = vsel %vm514_vm4, %v508_v59, %v520_v1  ;;  %v527_v11 = vsel %vm515_vm5, %v509_v61, %v521_v8 }
 0x137   : > { %v671_v9 = vpack.c.bf16 %v526_v7, %v525_v6 }
 0x138   : > { %vm516_vm6 = vcmp.ge.f32.partialorder %v510_v4, 0.0  ;;  %v522_v10 = vmul.f32 0.2, %v510_v4  ;;  %667 = vst [vmem:[%s941_s29] sm:$0xff] %v666_v5  }
 0x139   : > { %678 = vst [vmem:[%s941_s29 + $0x8] sm:$0xff] %v671_v9  }
 0x13a   : > { %v528_v12 = vsel %vm516_vm6, %v510_v4, %v522_v10 }
 0x13b   : > { %v676_v13 = vpack.c.bf16 %v528_v12, %v527_v11 }
 0x13d   : > { %679 = vst [vmem:[%s941_s29 + $0x10] sm:$0xff] %v676_v13  }
 0x13e PF: > { %s13_s18 = sadd.s32 1, %s842_s18   ;;  %s999_s12 = smov %s822_s13 }
 0x13f   : > { %p10_p0 = scmp.ge.s32.totalorder %s13_s18, 8   ;;  %s1000_s13 = smov %s917_s25 }
 0x140   : > { %s1001_s14 = smov %s834_s16  ;;  %s1002_s15 = smov %s838_s17 }
 0x141   : > { %s1003_s16 = smov %s1006_s19  ;;  %s1004_s17 = smov %s1010_s20 }
 0x142   :  { %12 = sbr.rel (!%p10_p0) target bundleno = 4 (0x4), region = 116 }

// kernel: conv_autoencoder_forward.11
= control target key start
LH: loop header
LB: loop body
LE: loop exit
PB: predicated region body
PF: predicated region fallthrough
CT: control target
= control target key end

     0   :  { %s1093_s12 = smov 0   ;;  %s1095_s13 = smov 0   ;;  %s1251_s0 = inlined_call_operand.vmem [shape: bf16[2,2,3,8,384], index: 0, kind: input, shape index: {}]   ;;  %s1252_s1 = inlined_call_operand.vmem [shape: bf16[3,384,256], index: 1, kind: input, shape index: {}]   ;;  %s1253_s2 = inlined_call_operand.vmem [shape: f32[1,256], index: 2, kind: input, shape index: {}]   ;;  %s1254_s3 = inlined_call_operand.vmem [shape: bf16[2,2,8,256], index: 3, kind: output, shape index: {}]  }
   0x1   :  { %s1097_s14 = smov 0   ;;  %s1099_s15 = smov 0  }
   0x2   :  { %s1101_s16 = smov 0   ;;  %s1103_s17 = smov 0  }
   0x3   :  { %s1105_s18 = smov 0  }
   0x4 LB: > { %s22_s19 = sadd.s32 1, %s1061_s16  ;;  %s25_s20 = sadd.s32 1, %s1065_s17  ;;  %s1069_s18 = sphi %s1105_s18, %s13_s18   ;;  %s1065_s17 = sphi %s1103_s17, %s1260_s17   ;;  %s1061_s16 = sphi %s1101_s16, %s1259_s16   ;;  %s1057_s15 = sphi %s1099_s15, %s1258_s15   ;;  %s1053_s14 = sphi %s1097_s14, %s1257_s14   ;;  %s1049_s13 = sphi %s1095_s13, %s1256_s13   ;;  %s1045_s12 = sphi %s1093_s12, %s1255_s12  }
   0x5   : > { %p23_p0 = scmp.ge.s32.totalorder %s22_s19, 3  ;;  %p41_p1 = scmp.ne.s32.totalorder %s1049_s13, %s1045_s12 }
   0x6   : > { %p42_p2 = scmp.eq.s32.totalorder %s1069_s18, 0  ;;  %s34_s24 = sadd.s32 1, %s1049_s13 }
   0x7   : > { %s1262_s19 = smov (%p23_p0, %s22_s19), 0  ;;  %s1264_s20 = smov (!%p23_p0, %s25_s20), %s1065_s17 }
   0x8   : > { %p43_p3 = por %p42_p2, %p41_p1  ;;  %p27_p4 = scmp.ge.s32.totalorder %s1264_s20, 2 }
   0x9   : > { %s30_s21 = ssub.s32 %s1061_s16, %s1262_s19  ;;  %p806_p6 = scmp.ge.s32.totalorder %s1069_s18, 6 }
   0xa   : > { %s1266_s20 = smov (%p27_p4, %s1264_s20), 0 }
   0xb   : > { %s29_s22 = ssub.s32 %s1065_s17, %s1266_s20  ;;  %143 = sbr.rel (%p806_p6) target bundleno = 27 (0x1b), region = 20 }
   0xc   : > { %s31_s23 = sor.u32 %s30_s21, %s29_s22 }
   0xd   : > { %p32_p5 = scmp.eq.s32.totalorder %s31_s23, 0 }
   0xf   : > { %s1144_s25 = scalar_select %p32_p5, %s1049_s13, %s34_s24  }
  0x10   : > { %146 = sbr.rel (!%p43_p3) target bundleno = 27 (0x1b), region = 24  ;;  %s148_s26 = sand.u32 (%p43_p3), 1, %s1049_s13  }
  0x11   : > { %s877_s27 = smul.u32 (%p43_p3), 3, %s1061_s16 }
  0x12   : > { %s876_s28 = smul.u32 (%p43_p3), 24, %s148_s26 }
  0x13   : > { %s878_s29 = smul.u32 (%p43_p3), 18, %s1065_s17 }
  0x14   : > { %s150_s8 = scalar_lea.vmem (%p43_p3), [#allocation3], %s876_s28 }
  0x15   : > { %s153_s30 = sadd.s32 %s878_s29, %s877_s27 }
  0x16   : > { %s807_s4 = sshll.u32 %s153_s30, 2 }
  0x17   : > { %s155_s7 = scalar_lea.vmem %s1251_s0, %s807_s4 }
  0x18   : > { %v170_v0 = vld [vmem:[%s155_s7] sm:$0xff]  ;;  %v808_v2 = vld [vmem:[%s155_s7 + $0x8] sm:$0xf]  ;;  %v810_v3 = vld [vmem:[%s155_s7 + $0x2c] sm:$0xf] }
  0x19   : > { %v172_v1 = vld [vmem:[%s155_s7 + $0x24] sm:$0xff]  ;;  %171 = vst [vmem:[%s150_s8] sm:$0xff] %v170_v0  ;;  %809 = vst [vmem:[%s150_s8 + $0x8] sm:$0xf] %v808_v2 }
  0x1a   : > { %173 = vst [vmem:[%s150_s8 + $0xc] sm:$0xff] %v172_v1  ;;  %811 = vst [vmem:[%s150_s8 + $0x14] sm:$0xf] %v810_v3 }
  0x1b PF: > { %p812_p7 = scmp.ge.s32.totalorder %s1069_s18, 1  ;;  %p198_p8 = scmp.lt.s32.totalorder %s1069_s18, 7 }
  0x1d   : > { %p199_p9 = pnand %p812_p7, %p198_p8 }
  0x1e   : > { %s205_s9 = sand.u32 (!%p199_p9), 1, %s1045_s12   ;;  %p233_p10 = scmp.lt.s32.totalorder (!%p199_p9), %s1053_s14, 2 }
  0x1f   : > { %202 = sbr.rel (%p199_p9) target bundleno = 331 (0x14b), region = 54  ;;  %p238_p11 = scmp.lt.s32.totalorder (!%p199_p9), %s1057_s15, 1 }
  0x20   : > { %s879_s10 = smul.u32 (!%p199_p9), 24, %s205_s9  ;;  %p816_p12 = scmp.ne.s32.totalorder (!%p199_p9), %s1053_s14, 0 }
  0x22   : > { %s1170_s30 = scalar_lea.vmem (!%p199_p9), [#allocation3], %s879_s10 }
  0x24   : > { %s234_s11 = scalar_select %p233_p10, %s1053_s14, 2 }
  0x25   : > { %s1268_s15 = smov (!%p238_p11, %s1057_s15), 1  ;;  %247 = sbr.rel (%p816_p12) target bundleno = 45 (0x2d), region = 62 }
  0x26   : > { %s880_s21 = smul.u32 384, %s234_s11  ;;  %s873_s26 = sshll.u32 %s1268_s15, 4 }
  0x27   : > { %s1168_s29 = scalar_lea.vmem %s1254_s3, %s873_s26 }
  0x28   : > { %s1163_s24 = scalar_lea.vmem %s1252_s1, %s880_s21 }
  0x2a   : > { %v1071_v4 = vmov 0.0  }
  0x2b   : > { %248 = vst [vmem:[#allocation2 + $0x10] sm:$0xff] %v1071_v4  ;;  %249 = vst [vmem:[#allocation2] sm:$0xff] %v1071_v4 }
  0x2c   : > { %250 = vst [vmem:[#allocation2 + $0x18] sm:$0xff] %v1071_v4  ;;  %251 = vst [vmem:[#allocation2 + $0x8] sm:$0xff] %v1071_v4 }
  0x2d PF: > { %v939_v5 = vld [vmem:[%s1163_s24 + $0x74] ss:$8 sps:$4 sm:$0xff]   ;;  %v941_v6 = vld [vmem:[%s1163_s24 + $0x70] ss:$8 sps:$4 sm:$0xff]   ;;  %v1072_v7 = vmov 0   ;;  %p868_p13 = scmp.ne.s32.totalorder %s1053_s14, 2 }
  0x2e   : > { %639 = vmatprep.mubr.bf16.mxu1 %v1072_v7  ;;  %564 = vmatprep.subr.bf16.mxu0 %v939_v5  ;;  %v942_v8 = vld [vmem:[%s1163_s24 + $0x64] ss:$8 sps:$4 sm:$0xff]   ;;  %v944_v9 = vld [vmem:[%s1163_s24 + $0x60] ss:$8 sps:$4 sm:$0xff]   ;;  %v945_v10 = vld [vmem:[%s1163_s24 + $0x54] ss:$8 sps:$4 sm:$0xff]  }
  0x2f   : > { %565 = vmatpush1.bf16.msra.mxu0 %v941_v6  ;;  %v947_v11 = vld [vmem:[%s1163_s24 + $0x50] ss:$8 sps:$4 sm:$0xff]   ;;  %v948_v12 = vld [vmem:[%s1163_s24 + $0x44] ss:$8 sps:$4 sm:$0xff]   ;;  %v960_v13 = vld [vmem:[%s1163_s24 + $0x174] ss:$8 sps:$4 sm:$0xff]  }
  0x30   : > { %566 = vmatprep.subr.bf16.mxu0 %v942_v8  ;;  %v962_v14 = vld [vmem:[%s1163_s24 + $0x170] ss:$8 sps:$4 sm:$0xff]   ;;  %v950_v15 = vld [vmem:[%s1163_s24 + $0x40] ss:$8 sps:$4 sm:$0xff]   ;;  %v951_v16 = vld [vmem:[%s1163_s24 + $0x34] ss:$8 sps:$4 sm:$0xff]   ;;  %607 = vmatprep.subr.bf16.mxu1 %v960_v13 }
  0x31   : > { %v966_v17 = vld [vmem:[%s1163_s24 + $0x164] ss:$8 sps:$4 sm:$0xff]   ;;  %608 = vmatpush1.bf16.msra.mxu1 %v962_v14  ;;  %v968_v18 = vld [vmem:[%s1163_s24 + $0x160] ss:$8 sps:$4 sm:$0xff]   ;;  %v953_v19 = vld [vmem:[%s1163_s24 + $0x30] ss:$8 sps:$4 sm:$0xff]  }
  0x32   : > { %609 = vmatprep.subr.bf16.mxu1 %v966_v17  ;;  %v972_v20 = vld [vmem:[%s1163_s24 + $0x154] ss:$8 sps:$4 sm:$0xff]   ;;  %v954_v21 = vld [vmem:[%s1163_s24 + $0x24] ss:$8 sps:$4 sm:$0xff]   ;;  %v974_v22 = vld [vmem:[%s1163_s24 + $0x150] ss:$8 sps:$4 sm:$0xff]  }
  0x33   : > { %567 = vmatpush1.bf16.msra.mxu0 %v944_v9  ;;  %v978_v23 = vld [vmem:[%s1163_s24 + $0x144] ss:$8 sps:$4 sm:$0xff]   ;;  %v956_v24 = vld [vmem:[%s1163_s24 + $0x20] ss:$8 sps:$4 sm:$0xff]   ;;  %v957_v25 = vld [vmem:[%s1163_s24 + $0x14] ss:$8 sps:$4 sm:$0xff]  }
  0x34   : > { %568 = vmatprep.subr.bf16.mxu0 %v945_v10  ;;  %v980_v26 = vld [vmem:[%s1163_s24 + $0x140] ss:$8 sps:$4 sm:$0xff]   ;;  %v984_v27 = vld [vmem:[%s1163_s24 + $0x134] ss:$8 sps:$4 sm:$0xff]   ;;  %v959_v28 = vld [vmem:[%s1163_s24 + $0x10] ss:$8 sps:$4 sm:$0xff]  }
  0x35   : > { %610 = vmatpush1.bf16.msra.mxu1 %v968_v18  ;;  %v963_v29 = vld [vmem:[%s1163_s24 + $0x4] ss:$8 sps:$4 sm:$0xff]   ;;  %v986_v30 = vld [vmem:[%s1163_s24 + $0x130] ss:$8 sps:$4 sm:$0xff]   ;;  %v965_v32 = vld [vmem:[%s1163_s24] ss:$8 sps:$4 sm:$0xff]  }
  0x36   : > { %611 = vmatprep.subr.bf16.mxu1 %v972_v20  ;;  %v990_v31 = vld [vmem:[%s1163_s24 + $0x124] ss:$8 sps:$4 sm:$0xff]   ;;  %v969_v33 = vld [vmem:[%s1163_s24 + $0xf4] ss:$8 sps:$4 sm:$0xff]   ;;  %v992_v34 = vld [vmem:[%s1163_s24 + $0x120] ss:$8 sps:$4 sm:$0xff]  }
  0x37   : > { %569 = vmatpush1.bf16.msra.mxu0 %v947_v11  ;;  %v996_v35 = vld [vmem:[%s1163_s24 + $0x114] ss:$8 sps:$4 sm:$0xff]   ;;  %v971_v36 = vld [vmem:[%s1163_s24 + $0xf0] ss:$8 sps:$4 sm:$0xff]   ;;  %v975_v37 = vld [vmem:[%s1163_s24 + $0xe4] ss:$8 sps:$4 sm:$0xff]  }
  0x38   : > { %570 = vmatprep.subr.bf16.mxu0 %v948_v12  ;;  %v998_v38 = vld [vmem:[%s1163_s24 + $0x110] ss:$8 sps:$4 sm:$0xff]   ;;  %v1002_v39 = vld [vmem:[%s1163_s24 + $0x104] ss:$8 sps:$4 sm:$0xff]   ;;  %v977_v41 = vld [vmem:[%s1163_s24 + $0xe0] ss:$8 sps:$4 sm:$0xff]  }
  0x39   : > { %612 = vmatpush1.bf16.msra.mxu1 %v974_v22  ;;  %v1014_v40 = vld [vmem:[%s1170_s30 + $0x4] ss:$12 sps:$4 sm:$0xff]   ;;  %v1008_v46 = vld [vmem:[%s1170_s30 + $0x8] ss:$12 sps:$4 sm:$0xff]   ;;  %v1012_v56 = vld [vmem:[%s1170_s30] ss:$12 sps:$4 sm:$0xff]  }
  0x3a   : > { %613 = vmatprep.subr.bf16.mxu1 %v978_v23  ;;  %v981_v42 = vld [vmem:[%s1163_s24 + $0xd4] ss:$8 sps:$4 sm:$0xff]   ;;  %596 = vmatprep.mubr.bf16.mxu0 %v1014_v40  ;;  %v1004_v43 = vld [vmem:[%s1163_s24 + $0x100] ss:$8 sps:$4 sm:$0xff]   ;;  %v983_v44 = vld [vmem:[%s1163_s24 + $0xd0] ss:$8 sps:$4 sm:$0xff]  }
  0x3b   : > { %571 = vmatpush1.bf16.msra.mxu0 %v950_v15  ;;  %v987_v45 = vld [vmem:[%s1163_s24 + $0xc4] ss:$8 sps:$4 sm:$0xff]   ;;  %v989_v47 = vld [vmem:[%s1163_s24 + $0xc0] ss:$8 sps:$4 sm:$0xff]   ;;  %v993_v48 = vld [vmem:[%s1163_s24 + $0xb4] ss:$8 sps:$4 sm:$0xff]  }
  0x3c   : > { %572 = vmatprep.subr.bf16.mxu0 %v951_v16  ;;  %v995_v49 = vld [vmem:[%s1163_s24 + $0xb0] ss:$8 sps:$4 sm:$0xff]   ;;  %v999_v50 = vld [vmem:[%s1163_s24 + $0xa4] ss:$8 sps:$4 sm:$0xff]   ;;  %v1001_v51 = vld [vmem:[%s1163_s24 + $0xa0] ss:$8 sps:$4 sm:$0xff]  }
  0x3d   : > { %614 = vmatpush1.bf16.msra.mxu1 %v980_v26  ;;  %v1005_v52 = vld [vmem:[%s1163_s24 + $0x94] ss:$8 sps:$4 sm:$0xff]   ;;  %v1007_v53 = vld [vmem:[%s1163_s24 + $0x90] ss:$8 sps:$4 sm:$0xff]   ;;  %v1009_v54 = vld [vmem:[%s1163_s24 + $0x84] ss:$8 sps:$4 sm:$0xff]  }
  0x3e   : > { %615 = vmatprep.subr.bf16.mxu1 %v984_v27  ;;  %v1011_v55 = vld [vmem:[%s1163_s24 + $0x80] ss:$8 sps:$4 sm:$0xff]   ;;  %v256_v59 = vld [vmem:[#allocation2 + $0x10] sm:$0xff]  ;;  %v258_v3 = vld [vmem:[#allocation2 + $0x18] sm:$0xff] }
  0x3f   : > { %573 = vmatpush1.bf16.msra.mxu0 %v953_v19  ;;  %v257_v63 = vld [vmem:[#allocation2] sm:$0xff]  ;;  %v259_v8 = vld [vmem:[#allocation2 + $0x8] sm:$0xff] }
  0x40   : > { %574 = vmatprep.subr.bf16.mxu0 %v954_v21 }
  0x41   : > { %616 = vmatpush1.bf16.msra.mxu1 %v986_v30 }
  0x42   : > { %617 = vmatprep.subr.bf16.mxu1 %v990_v31 }
  0x43   : > { %575 = vmatpush1.bf16.msra.mxu0 %v956_v24 }
  0x44   : > { %576 = vmatprep.subr.bf16.mxu0 %v957_v25 }
  0x45   : > { %618 = vmatpush1.bf16.msra.mxu1 %v992_v34 }
  0x46   : > { %619 = vmatprep.subr.bf16.mxu1 %v996_v35 }
  0x47   : > { %577 = vmatpush1.bf16.msra.mxu0 %v959_v28 }
  0x48   : > { %578 = vmatprep.subr.bf16.mxu0 %v963_v29 }
  0x49   : > { %620 = vmatpush1.bf16.msra.mxu1 %v998_v38 }
  0x4a   : > { %621 = vmatprep.subr.bf16.mxu1 %v1002_v39 }
  0x4b   : > { %579 = vmatpush1.bf16.msra.mxu0 %v965_v32 }
  0x4c   : > { %580 = vmatprep.subr.bf16.mxu0 %v969_v33 }
  0x4d   : > { %622 = vmatpush1.bf16.msra.mxu1 %v1004_v43 }
  0x4f   : > { %581 = vmatpush2.bf16.msra.mxu0 %v971_v36 }
  0x50   : > { %582 = vmatprep.subr.bf16.mxu0 %v975_v37  ;;  %640 = vmatmul.mubr.bf16.vlgmr.msra.gmra.mxu1 %v1008_v46 }
  0x53   : > { %583 = vmatpush2.bf16.msra.mxu0 %v977_v41 }
  0x54   : > { %584 = vmatprep.subr.bf16.mxu0 %v981_v42 }
  0x57   : > { %585 = vmatpush2.bf16.msra.mxu0 %v983_v44 }
  0x58   : > { %586 = vmatprep.subr.bf16.mxu0 %v987_v45 }
  0x5b   : > { %587 = vmatpush2.bf16.msra.mxu0 %v989_v47 }
  0x5c   : > { %588 = vmatprep.subr.bf16.mxu0 %v993_v48 }
  0x5f   : > { %589 = vmatpush2.bf16.msra.mxu0 %v995_v49 }
  0x60   : > { %590 = vmatprep.subr.bf16.mxu0 %v999_v50 }
  0x63   : > { %591 = vmatpush2.bf16.msra.mxu0 %v1001_v51 }
  0x64   : > { %592 = vmatprep.subr.bf16.mxu0 %v1005_v52 }
  0x67   : > { %593 = vmatpush2.bf16.msra.mxu0 %v1007_v53 }
  0x68   : > { %594 = vmatprep.subr.bf16.mxu0 %v1009_v54 }
  0x6b   : > { %595 = vmatpush2.bf16.msra.mxu0 %v1011_v55 }
  0x6e   : > { %597 = vmatmul.mubr.bf16.vlgmr.msra.gmra.mxu0 %v1012_v56 }
 0x110   : > { %v641_v57 = vpop.f32.mrf.mxu1 }
 0x112   : > { %v643_v58 = vpop.f32.mrf.mxu1 }
 0x114   : > { %v645_v62 = vpop.f32.mrf.mxu1 }
 0x116   : > { %v647_v7 = vpop.f32.mrf.mxu1 }
 0x12e   : > { %v598_v60 = vpop.f32.mrf.mxu0 }
 0x12f   : > { %v642_v61 = vadd.f32 %v641_v57, %v598_v60 }
 0x130   : > { %v600_v0 = vpop.f32.mrf.mxu0 }
 0x131   : > { %v650_v1 = vadd.f32 %v642_v61, %v256_v59  ;;  %v644_v2 = vadd.f32 %v643_v58, %v600_v0 }
 0x132   : > { %v602_v4 = vpop.f32.mrf.mxu0 }
 0x133   : > { %654 = vst [vmem:[#allocation2 + $0x10] sm:$0xff] %v650_v1  ;;  %v651_v5 = vadd.f32 %v644_v2, %v257_v63  ;;  %v646_v6 = vadd.f32 %v645_v62, %v602_v4 }
 0x134   : > { %v604_v9 = vpop.f32.mrf.mxu0 }
 0x135   : > { %655 = vst [vmem:[#allocation2] sm:$0xff] %v651_v5  ;;  %v652_v10 = vadd.f32 %v646_v6, %v258_v3  ;;  %v648_v11 = vadd.f32 %v647_v7, %v604_v9  ;;  %661 = sbr.rel (%p868_p13) target bundleno = 331 (0x14b), region = 66 }
 0x137   : > { %656 = vst [vmem:[#allocation2 + $0x18] sm:$0xff] %v652_v10  ;;  %v653_v12 = vadd.f32 %v648_v11, %v259_v8 }
 0x139   : > { %657 = vst [vmem:[#allocation2 + $0x8] sm:$0xff] %v653_v12 }
 0x13a   : > { %v668_v13 = vlaneseq  ;;  %v666_v15 = vld [vmem:[%s1253_s2] sm:$0x3]  ;;  %v662_v16 = vld [vmem:[#allocation2 + $0x10] sm:$0xff] }
 0x13c   : > { %v669_v14 = vshrl.u32 %v668_v13, 7  ;;  %v663_v19 = vld [vmem:[#allocation2] sm:$0xff] }
 0x13e   : > { %v670_v17 = vsub.s32 0, %v669_v14  ;;  %v674_v18 = vsub.s32 1, %v669_v14  ;;  %v664_v20 = vld [vmem:[#allocation2 + $0x18] sm:$0xff] }
 0x140   : > { %v665_v21 = vld [vmem:[#allocation2 + $0x8] sm:$0xff]  ;;  %v671_v22 = vrot.slane %v666_v15, %v670_v17  ;;  %v675_v23 = vrot.slane %v666_v15, %v674_v18 }
 0x142   : > { %v678_v24 = vadd.f32 %v671_v22, %v662_v16  ;;  %v679_v25 = vadd.f32 %v675_v23, %v663_v19  ;;  %v680_v26 = vadd.f32 %v671_v22, %v664_v20  ;;  %v681_v27 = vadd.f32 %v675_v23, %v665_v21 }
 0x144   : > { %vm682_vm0 = vcmp.ge.f32.partialorder %v678_v24, 0.0  ;;  %vm683_vm1 = vcmp.ge.f32.partialorder %v679_v25, 0.0  ;;  %v686_v28 = vmul.f32 0.2, %v678_v24  ;;  %v687_v29 = vmul.f32 0.2, %v679_v25 }
 0x145   : > { %vm684_vm2 = vcmp.ge.f32.partialorder %v680_v26, 0.0  ;;  %vm685_vm3 = vcmp.ge.f32.partialorder %v681_v27, 0.0  ;;  %v688_v30 = vmul.f32 0.2, %v680_v26  ;;  %v689_v31 = vmul.f32 0.2, %v681_v27 }
 0x146   : > { %v690_v32 = vsel %vm682_vm0, %v678_v24, %v686_v28  ;;  %v691_v33 = vsel %vm683_vm1, %v679_v25, %v687_v29 }
 0x147   : > { %v874_v34 = vpack.c.bf16 %v691_v33, %v690_v32  ;;  %v692_v35 = vsel %vm684_vm2, %v680_v26, %v688_v30  ;;  %v693_v36 = vsel %vm685_vm3, %v681_v27, %v689_v31 }
 0x148   : > { %v875_v37 = vpack.c.bf16 %v693_v36, %v692_v35 }
 0x149   : > { %710 = vst [vmem:[%s1168_s29] sm:$0xff] %v874_v34 }
 0x14a   : > { %711 = vst [vmem:[%s1168_s29 + $0x8] sm:$0xff] %v875_v37 }
 0x14b PF: > { %s13_s18 = sadd.s32 1, %s1069_s18   ;;  %s1255_s12 = smov %s1049_s13 }
 0x14c   : > { %p10_p0 = scmp.ge.s32.totalorder %s13_s18, 8   ;;  %s1256_s13 = smov %s1144_s25 }
 0x14d   : > { %s1257_s14 = smov %s1061_s16  ;;  %s1258_s15 = smov %s1065_s17 }
 0x14e   : > { %s1259_s16 = smov %s1262_s19  ;;  %s1260_s17 = smov %s1266_s20 }
 0x14f   :  { %12 = sbr.rel (!%p10_p0) target bundleno = 4 (0x4), region = 110 }

// kernel: conv_autoencoder_forward.12
= control target key start
LH: loop header
LB: loop body
LE: loop exit
PB: predicated region body
PF: predicated region fallthrough
CT: control target
= control target key end

     0   :  { %s1106_s12 = smov 0   ;;  %s1108_s13 = smov 0   ;;  %s1267_s0 = inlined_call_operand.vmem [shape: bf16[2,2,8,256], index: 0, kind: input, shape index: {}]   ;;  %s1268_s1 = inlined_call_operand.vmem [shape: bf16[3,256,384], index: 1, kind: input, shape index: {}]   ;;  %s1269_s2 = inlined_call_operand.vmem [shape: f32[1,384], index: 2, kind: input, shape index: {}]   ;;  %s1270_s3 = inlined_call_operand.vmem [shape: bf16[2,2,3,8,384], index: 3, kind: output, shape index: {}]  }
   0x1   :  { %s1110_s14 = smov 0   ;;  %s1112_s15 = smov 0  }
   0x2   :  { %s1114_s16 = smov 0   ;;  %s1116_s17 = smov 0  }
   0x3   :  { %s1118_s18 = smov 0  }
   0x4 LB: > { %s22_s19 = sadd.s32 1, %s1076_s16  ;;  %s25_s20 = sadd.s32 1, %s1080_s17  ;;  %s1084_s18 = sphi %s1118_s18, %s13_s18   ;;  %s1080_s17 = sphi %s1116_s17, %s1277_s17   ;;  %s1076_s16 = sphi %s1114_s16, %s1276_s16   ;;  %s1072_s15 = sphi %s1112_s15, %s1275_s15   ;;  %s1068_s14 = sphi %s1110_s14, %s1274_s14   ;;  %s1064_s13 = sphi %s1108_s13, %s1273_s13   ;;  %s1060_s12 = sphi %s1106_s12, %s1272_s12  }
   0x5   : > { %p23_p0 = scmp.ge.s32.totalorder %s22_s19, 3  ;;  %s807_s21 = sadd.s32 4294967295, %s1084_s18  }
   0x6   : > { %p117_p1 = scmp.ne.s32.totalorder %s1064_s13, %s1060_s12  ;;  %p118_p2 = scmp.eq.s32.totalorder %s807_s21, 5 }
   0x7   : > { %s1279_s19 = smov (%p23_p0, %s22_s19), 0  ;;  %s1281_s20 = smov (!%p23_p0, %s25_s20), %s1080_s17 }
   0x8   : > { %s103_s22 = ssub.s32 %s1076_s16, %s1279_s19  ;;  %p27_p3 = scmp.ge.s32.totalorder %s1281_s20, 2 }
   0x9   : > { %p811_p4 = scmp.ge.s32.totalorder %s1084_s18, 1  ;;  %p1152_p5 = por %p118_p2, %p117_p1 }
   0xa   : > { %p161_p6 = scmp.lt.s32.totalorder %s1084_s18, 7  ;;  %s1283_s20 = smov (%p27_p3, %s1281_s20), 0 }
   0xb   : > { %s102_s24 = ssub.s32 %s1080_s17, %s1283_s20  ;;  %s107_s26 = sadd.s32 1, %s1064_s13 }
   0xc   : > { %p162_p7 = pnand %p811_p4, %p161_p6  ;;  %s104_s25 = sor.u32 %s103_s22, %s102_s24 }
   0xd   : > { %p105_p8 = scmp.eq.s32.totalorder %s104_s25, 0  ;;  %p194_p9 = scmp.lt.s32.totalorder (!%p162_p7), %s1068_s14, 2 }
   0xe   : > { %165 = sbr.rel (%p162_p7) target bundleno = 304 (0x130), region = 32  ;;  %p189_p10 = scmp.lt.s32.totalorder (!%p162_p7), %s1072_s15, 1 }
   0xf   : > { %s1163_s27 = scalar_select %p105_p8, %s1064_s13, %s107_s26  }
  0x10   : > { %s186_s22 = sand.u32 (!%p162_p7), 1, %s1060_s12  }
  0x11   : > { %s903_s24 = smul.u32 (!%p162_p7), 24, %s186_s22 }
  0x13   : > { %s195_s28 = scalar_select %p194_p9, %s1068_s14, 2  ;;  %v268_v50 = vlaneseq  ;;  %v266_v53 = vld [vmem:[%s1269_s2] sm:$0x7] }
  0x14   : > { %s190_s6 = scalar_select %p189_p10, %s1072_s15, 1 }
  0x15   : > { %s904_s29 = smul.u32 384, %s195_s28  ;;  %v269_v51 = vshrl.u32 %v268_v50, 7  ;;  %s1229_s25 = scalar_lea.vmem [#allocation2], %s903_s24 }
  0x16   : > { %s876_s7 = sshll.u32 %s190_s6, 4  ;;  %s905_s12 = smul.u32 (%p1152_p5), 3, %s1068_s14 }
  0x17   : > { %s1170_s5 = scalar_lea.vmem %s1268_s1, %s904_s29  ;;  %s193_s10 = scalar_lea.vmem %s1267_s0, %s876_s7  ;;  %v278_v52 = vsub.s32 2, %v269_v51 }
  0x18   : > { %v963_v0 = vld [vmem:[%s1170_s5 + $0xac] ss:$12 sps:$4 sm:$0xff]   ;;  %v965_v1 = vld [vmem:[%s1170_s5 + $0xa8] ss:$12 sps:$4 sm:$0xff]   ;;  %v968_v3 = vld [vmem:[%s1170_s5 + $0x90] ss:$12 sps:$4 sm:$0xff]  }
  0x19   : > { %549 = vmatprep.subr.bf16.mxu0 %v963_v0  ;;  %v966_v2 = vld [vmem:[%s1170_s5 + $0x94] ss:$12 sps:$4 sm:$0xff]   ;;  %v969_v4 = vld [vmem:[%s1170_s5 + $0x7c] ss:$12 sps:$4 sm:$0xff]   ;;  %v971_v5 = vld [vmem:[%s1170_s5 + $0x78] ss:$12 sps:$4 sm:$0xff]   ;;  %v279_v55 = vrot.slane %v266_v53, %v278_v52 }
  0x1a   : > { %550 = vmatpush1.bf16.msra.mxu0 %v965_v1  ;;  %v972_v6 = vld [vmem:[%s1170_s5 + $0x64] ss:$12 sps:$4 sm:$0xff]   ;;  %v974_v9 = vld [vmem:[%s1170_s5 + $0x60] ss:$12 sps:$4 sm:$0xff]   ;;  %v977_v13 = vld [vmem:[%s1170_s5 + $0x48] ss:$12 sps:$4 sm:$0xff]  }
  0x1b   : > { %551 = vmatprep.subr.bf16.mxu0 %v966_v2  ;;  %v981_v7 = vld [vmem:[%s1170_s5 + $0x170] ss:$12 sps:$4 sm:$0xff]   ;;  %v975_v10 = vld [vmem:[%s1170_s5 + $0x4c] ss:$12 sps:$4 sm:$0xff]   ;;  %v978_v14 = vld [vmem:[%s1170_s5 + $0x34] ss:$12 sps:$4 sm:$0xff]  }
  0x1c   : > { %v982_v8 = vld [vmem:[%s1170_s5 + $0xb0] ss:$12 sps:$4 sm:$0xff]   ;;  %881 = vmatprep.subr.bf16.mxu1 %v981_v7  ;;  %v986_v11 = vld [vmem:[%s1170_s5 + $0x158] ss:$12 sps:$4 sm:$0xff]   ;;  %v991_v15 = vld [vmem:[%s1170_s5 + $0x140] ss:$12 sps:$4 sm:$0xff]  }
  0x1d   : > { %882 = vmatpush3.bf16.msra.mxu1 %v982_v8  ;;  %v987_v12 = vld [vmem:[%s1170_s5 + $0x98] ss:$12 sps:$4 sm:$0xff]   ;;  %v992_v16 = vld [vmem:[%s1170_s5 + $0x80] ss:$12 sps:$4 sm:$0xff]   ;;  %v980_v17 = vld [vmem:[%s1170_s5 + $0x30] ss:$12 sps:$4 sm:$0xff]  }
  0x1e   : > { %552 = vmatpush1.bf16.msra.mxu0 %v968_v3  ;;  %883 = vmatprep.subr.bf16.mxu1 %v986_v11  ;;  %v996_v18 = vld [vmem:[%s1170_s5 + $0x128] ss:$12 sps:$4 sm:$0xff]   ;;  %v985_v21 = vld [vmem:[%s1170_s5 + $0x18] ss:$12 sps:$4 sm:$0xff]   ;;  %v1001_v22 = vld [vmem:[%s1170_s5 + $0x110] ss:$12 sps:$4 sm:$0xff]  }
  0x1f   : > { %553 = vmatprep.subr.bf16.mxu0 %v969_v4  ;;  %v997_v19 = vld [vmem:[%s1170_s5 + $0x68] ss:$12 sps:$4 sm:$0xff]   ;;  %v1002_v23 = vld [vmem:[%s1170_s5 + $0x50] ss:$12 sps:$4 sm:$0xff]   ;;  %v1006_v25 = vld [vmem:[%s1170_s5 + $0xf8] ss:$12 sps:$4 sm:$0xff]  }
  0x20   : > { %v983_v20 = vld [vmem:[%s1170_s5 + $0x1c] ss:$12 sps:$4 sm:$0xff]   ;;  %v988_v24 = vld [vmem:[%s1170_s5 + $0x4] ss:$12 sps:$4 sm:$0xff]   ;;  %v990_v26 = vld [vmem:[%s1170_s5] ss:$12 sps:$4 sm:$0xff]  }
  0x21   : > { %884 = vmatpush3.bf16.msra.mxu1 %v987_v12  ;;  %v993_v27 = vld [vmem:[%s1170_s5 + $0x16c] ss:$12 sps:$4 sm:$0xff]   ;;  %v995_v30 = vld [vmem:[%s1170_s5 + $0x168] ss:$12 sps:$4 sm:$0xff]   ;;  %v1000_v34 = vld [vmem:[%s1170_s5 + $0x150] ss:$12 sps:$4 sm:$0xff]  }
  0x22   : > { %554 = vmatpush1.bf16.msra.mxu0 %v971_v5  ;;  %885 = vmatprep.subr.bf16.mxu1 %v991_v15  ;;  %v1007_v28 = vld [vmem:[%s1170_s5 + $0x38] ss:$12 sps:$4 sm:$0xff]   ;;  %v1011_v29 = vld [vmem:[%s1170_s5 + $0xe0] ss:$12 sps:$4 sm:$0xff]   ;;  %v1016_v33 = vld [vmem:[%s1170_s5 + $0xc8] ss:$12 sps:$4 sm:$0xff]  }
  0x23   : > { %555 = vmatprep.subr.bf16.mxu0 %v972_v6  ;;  %v998_v31 = vld [vmem:[%s1170_s5 + $0x154] ss:$12 sps:$4 sm:$0xff]   ;;  %v1023_v36 = vld [vmem:[%s193_s10 + $0x4] ss:$8 sps:$4 sm:$0xff]   ;;  %v1003_v37 = vld [vmem:[%s1170_s5 + $0x13c] ss:$12 sps:$4 sm:$0xff]  }
  0x24   : > { %v1012_v32 = vld [vmem:[%s1170_s5 + $0x20] ss:$12 sps:$4 sm:$0xff]   ;;  %v1017_v35 = vld [vmem:[%s1170_s5 + $0x8] ss:$12 sps:$4 sm:$0xff]   ;;  %624 = vmatprep.mubr.bf16.mxu1 %v1023_v36  ;;  %581 = vmatprep.mubr.bf16.mxu0 %v1023_v36  ;;  %v1005_v39 = vld [vmem:[%s1170_s5 + $0x138] ss:$12 sps:$4 sm:$0xff]  }
  0x25   : > { %886 = vmatpush3.bf16.msra.mxu1 %v992_v16  ;;  %v1021_v38 = vld [vmem:[%s193_s10] ss:$8 sps:$4 sm:$0xff]   ;;  %v1008_v40 = vld [vmem:[%s1170_s5 + $0x124] ss:$12 sps:$4 sm:$0xff]   ;;  %v1013_v42 = vld [vmem:[%s1170_s5 + $0x10c] ss:$12 sps:$4 sm:$0xff]  }
  0x26   : > { %556 = vmatpush1.bf16.msra.mxu0 %v974_v9  ;;  %887 = vmatprep.subr.bf16.mxu1 %v996_v18  ;;  %v1010_v41 = vld [vmem:[%s1170_s5 + $0x120] ss:$12 sps:$4 sm:$0xff]   ;;  %v1015_v43 = vld [vmem:[%s1170_s5 + $0x108] ss:$12 sps:$4 sm:$0xff]   ;;  %v1020_v45 = vld [vmem:[%s1170_s5 + $0xf0] ss:$12 sps:$4 sm:$0xff]  }
  0x27   : > { %557 = vmatprep.subr.bf16.mxu0 %v975_v10  ;;  %v1018_v44 = vld [vmem:[%s1170_s5 + $0xf4] ss:$12 sps:$4 sm:$0xff]   ;;  %v1024_v46 = vld [vmem:[%s1170_s5 + $0xdc] ss:$12 sps:$4 sm:$0xff]   ;;  %v1026_v47 = vld [vmem:[%s1170_s5 + $0xd8] ss:$12 sps:$4 sm:$0xff]  }
  0x28   : > { %v1027_v48 = vld [vmem:[%s1170_s5 + $0xc4] ss:$12 sps:$4 sm:$0xff]   ;;  %v1029_v49 = vld [vmem:[%s1170_s5 + $0xc0] ss:$12 sps:$4 sm:$0xff]   ;;  %v270_v5 = vsub.s32 0, %v269_v51  ;;  %v274_v6 = vsub.s32 1, %v269_v51 }
  0x29   : > { %888 = vmatpush3.bf16.msra.mxu1 %v997_v19  ;;  %s906_s26 = smul.u32 (%p1152_p5), 18, %s1072_s15 }
  0x2a   : > { %558 = vmatpush1.bf16.msra.mxu0 %v977_v13  ;;  %889 = vmatprep.subr.bf16.mxu1 %v1001_v22  ;;  %v271_v7 = vrot.slane %v266_v53, %v270_v5  ;;  %v275_v8 = vrot.slane %v266_v53, %v274_v6 }
  0x2b   : > { %559 = vmatprep.subr.bf16.mxu0 %v978_v14  ;;  %s690_s28 = sadd.s32 (%p1152_p5), %s906_s26, %s905_s12 }
  0x2c   : > { %s869_s29 = sshll.u32 (%p1152_p5), %s690_s28, 2 }
  0x2d   : > { %890 = vmatpush3.bf16.msra.mxu1 %v1002_v23  ;;  %s692_s5 = scalar_lea.vmem (%p1152_p5), %s1270_s3, %s869_s29 }
  0x2e   : > { %560 = vmatpush1.bf16.msra.mxu0 %v980_v17  ;;  %891 = vmatprep.subr.bf16.mxu1 %v1006_v25 }
  0x2f   : > { %561 = vmatprep.subr.bf16.mxu0 %v983_v20 }
  0x31   : > { %892 = vmatpush3.bf16.msra.mxu1 %v1007_v28 }
  0x32   : > { %562 = vmatpush1.bf16.msra.mxu0 %v985_v21  ;;  %893 = vmatprep.subr.bf16.mxu1 %v1011_v29 }
  0x33   : > { %563 = vmatprep.subr.bf16.mxu0 %v988_v24 }
  0x35   : > { %894 = vmatpush3.bf16.msra.mxu1 %v1012_v32 }
  0x36   : > { %564 = vmatpush1.bf16.msra.mxu0 %v990_v26  ;;  %895 = vmatprep.subr.bf16.mxu1 %v1016_v33 }
  0x37   : > { %565 = vmatprep.subr.bf16.mxu0 %v993_v27 }
  0x39   : > { %896 = vmatpush3.bf16.msra.mxu1 %v1017_v35 }
  0x3a   : > { %566 = vmatpush2.bf16.msra.mxu0 %v995_v30 }
  0x3b   : > { %567 = vmatprep.subr.bf16.mxu0 %v998_v31 }
  0x3c   : > { %625 = vmatmul.mubr.bf16.vlgmr.msra.gmra.mxu1 %v1021_v38 }
  0x3e   : > { %568 = vmatpush2.bf16.msra.mxu0 %v1000_v34 }
  0x3f   : > { %569 = vmatprep.subr.bf16.mxu0 %v1003_v37 }
  0x42   : > { %570 = vmatpush2.bf16.msra.mxu0 %v1005_v39 }
  0x43   : > { %571 = vmatprep.subr.bf16.mxu0 %v1008_v40 }
  0x46   : > { %572 = vmatpush2.bf16.msra.mxu0 %v1010_v41 }
  0x47   : > { %573 = vmatprep.subr.bf16.mxu0 %v1013_v42 }
  0x4a   : > { %574 = vmatpush2.bf16.msra.mxu0 %v1015_v43 }
  0x4b   : > { %575 = vmatprep.subr.bf16.mxu0 %v1018_v44 }
  0x4e   : > { %576 = vmatpush2.bf16.msra.mxu0 %v1020_v45 }
  0x4f   : > { %577 = vmatprep.subr.bf16.mxu0 %v1024_v46 }
  0x52   : > { %578 = vmatpush2.bf16.msra.mxu0 %v1026_v47 }
  0x53   : > { %579 = vmatprep.subr.bf16.mxu0 %v1027_v48 }
  0x56   : > { %580 = vmatpush2.bf16.msra.mxu0 %v1029_v49 }
  0x59   : > { %582 = vmatmul.mubr.bf16.vlgmr.msra.gmra.mxu0 %v1021_v38 }
  0xfc   : > { %v897_v54 = vpop.f32.mrf.mxu1 }
  0xfe   : > { %v898_v56 = vpop.f32.mrf.mxu1 }
  0xff   : > { %v899_v57 = vadd.f32 %v898_v56, %v897_v54 }
 0x100   : > { %v900_v58 = vpop.f32.mrf.mxu1 }
 0x101   : > { %v627_v59 = vadd.f32 %v899_v57, %v279_v55 }
 0x102   : > { %v901_v60 = vpop.f32.mrf.mxu1 }
 0x103   : > { %vm635_vm0 = vcmp.ge.f32.partialorder %v627_v59, 0.0  ;;  %v641_v61 = vmul.f32 0.2, %v627_v59  ;;  %v902_v62 = vadd.f32 %v901_v60, %v900_v58 }
 0x105   : > { %v647_v63 = vsel %vm635_vm0, %v627_v59, %v641_v61  ;;  %v630_v0 = vadd.f32 %v902_v62, %v279_v55 }
 0x106   : > { %v878_v1 = vpack.c.bf16 %v647_v63, %v647_v63 }
 0x107   : > { %vm638_vm1 = vcmp.ge.f32.partialorder %v630_v0, 0.0  ;;  %v644_v2 = vmul.f32 0.2, %v630_v0 }
 0x108   : > { %678 = vst [vmem:[%s1229_s25 + $0x8] sm:$0xf] %v878_v1 }
 0x109   : > { %v650_v3 = vsel %vm638_vm1, %v630_v0, %v644_v2 }
 0x10a   : > { %v880_v4 = vpack.c.bf16 %v650_v3, %v650_v3 }
 0x10c   : > { %680 = vst [vmem:[%s1229_s25 + $0x14] sm:$0xf] %v880_v4 }
 0x10f   : > { %v870_v29 = vld [vmem:[%s1229_s25 + $0x8] sm:$0xf] (%p1152_p5) }
 0x110   : > { %871 = vst [vmem:[%s692_s5 + $0x8] sm:$0xf] (%p1152_p5), %v870_v29 }
 0x113   : > { %v872_v30 = vld [vmem:[%s1229_s25 + $0x14] sm:$0xf] (%p1152_p5) }
 0x114   : > { %873 = vst [vmem:[%s692_s5 + $0x2c] sm:$0xf] (%p1152_p5), %v872_v30 }
 0x119   : > { %v583_v9 = vpop.f32.mrf.mxu0 }
 0x11a   : > { %v584_v10 = vadd.f32 %v583_v9, %v271_v7 }
 0x11b   : > { %v585_v11 = vpop.f32.mrf.mxu0 }
 0x11c   : > { %v639_v12 = vmul.f32 0.2, %v584_v10  ;;  %v586_v13 = vadd.f32 %v585_v11, %v275_v8  ;;  %vm633_vm2 = vcmp.ge.f32.partialorder %v584_v10, 0.0 }
 0x11d   : > { %v587_v14 = vpop.f32.mrf.mxu0 }
 0x11e   : > { %vm634_vm3 = vcmp.ge.f32.partialorder %v586_v13, 0.0  ;;  %v640_v15 = vmul.f32 0.2, %v586_v13  ;;  %v588_v16 = vadd.f32 %v587_v14, %v271_v7  ;;  %v645_v18 = vsel %vm633_vm2, %v584_v10, %v639_v12 }
 0x11f   : > { %v589_v17 = vpop.f32.mrf.mxu0 }
 0x120   : > { %v646_v19 = vsel %vm634_vm3, %v586_v13, %v640_v15  ;;  %v642_v20 = vmul.f32 0.2, %v588_v16  ;;  %v590_v21 = vadd.f32 %v589_v17, %v275_v8  ;;  %vm636_vm4 = vcmp.ge.f32.partialorder %v588_v16, 0.0 }
 0x121   : > { %v877_v22 = vpack.c.bf16 %v646_v19, %v645_v18 }
 0x122   : > { %vm637_vm5 = vcmp.ge.f32.partialorder %v590_v21, 0.0  ;;  %v643_v23 = vmul.f32 0.2, %v590_v21  ;;  %v648_v24 = vsel %vm636_vm4, %v588_v16, %v642_v20 }
 0x123   : > { %677 = vst [vmem:[%s1229_s25] sm:$0xff] %v877_v22  ;;  %687 = sbr.rel (!%p1152_p5) target bundleno = 304 (0x130), region = 36 }
 0x124   : > { %v649_v25 = vsel %vm637_vm5, %v590_v21, %v643_v23 }
 0x125   : > { %v879_v26 = vpack.c.bf16 %v649_v25, %v648_v24 }
 0x127   : > { %679 = vst [vmem:[%s1229_s25 + $0xc] sm:$0xff] %v879_v26 }
 0x12a   : > { %v707_v27 = vld [vmem:[%s1229_s25] sm:$0xff] }
 0x12b   : > { %708 = vst [vmem:[%s692_s5] sm:$0xff] %v707_v27 }
 0x12e   : > { %v709_v28 = vld [vmem:[%s1229_s25 + $0xc] sm:$0xff] }
 0x12f   : > { %710 = vst [vmem:[%s692_s5 + $0x24] sm:$0xff] %v709_v28 }
 0x130 PF: > { %s13_s18 = sadd.s32 1, %s1084_s18   ;;  %s1272_s12 = smov %s1064_s13 }
 0x131   : > { %p10_p11 = scmp.ge.s32.totalorder %s13_s18, 8   ;;  %s1273_s13 = smov %s1163_s27 }
 0x132   : > { %s1274_s14 = smov %s1076_s16  ;;  %s1275_s15 = smov %s1080_s17 }
 0x133   : > { %s1276_s16 = smov %s1279_s19  ;;  %s1277_s17 = smov %s1283_s20 }
 0x134   :  { %12 = sbr.rel (!%p10_p11) target bundleno = 4 (0x4), region = 97 }

// kernel: tile.43
= control target key start
LH: loop header
LB: loop body
LE: loop exit
PB: predicated region body
PF: predicated region fallthrough
CT: control target
= control target key end

     0   :  { %s22_s0 = inlined_call_operand.vmem [shape: f32[64], index: 0, kind: input, shape index: {}]   ;;  %s23_s1 = inlined_call_operand.vmem [shape: f32[3,64], index: 1, kind: output, shape index: {}]  }
   0x1   :  { %v4_v0 = vld [vmem:[%s22_s0] ss:$0 sm:$0xff] }
   0x2   :  { %5 = vst [vmem:[%s23_s1] sm:$0xf] %v4_v0 }

// kernel: tile.44
= control target key start
LH: loop header
LB: loop body
LE: loop exit
PB: predicated region body
PF: predicated region fallthrough
CT: control target
= control target key end

     0   :  { %vm9_vm0 = vcmask 523264   ;;  %s33_s8 = smov 64   ;;  %vm15_vm1 = vcmask 1048064   ;;  %s53_s0 = inlined_call_operand.vmem [shape: f32[3,64], index: 0, kind: input, shape index: {}]   ;;  %s54_s1 = inlined_call_operand.vmem [shape: f32[1,192], index: 1, kind: output, shape index: {}]  }
   0x1   :  { %v5_v0 = vld [vmem:[%s53_s0] sm:$0xf]  ;;  %s7_s0 = smov 3 }
   0x2   :  { %6 = vst [vmem:[#allocation1] sm:$0xf] %v5_v0 }
   0x9   :  { %v12_v1 = vld [vmem:[#allocation1 + $0x1] sm:$0x1]   ;;  %v8_v2 = vld [vmem:[#allocation1] ss:$2 sm:%s7_s0]  }
   0xa   :  { %13 = vrot.lane.b32.xlu0 %v12_v1, %s33_s8  ;;  %10 = vst.msk [vmem:[#allocation0] ss:$8 sm:$0x3] %vm9_vm0, %v8_v2  }
  0x11   :  { %v26_v3 = vld [vmem:[#allocation0 + $0x8] sm:$0x1] }
  0x12   :  { %31 = vst [vmem:[%s54_s1 + $0x1] sm:$0x1] %v26_v3 }
  0x7c   :  { %v14_v4 = vpop.permute.xlu0 %13  }
  0x7d   :  { %16 = vst.msk [vmem:[#allocation0] sm:$0x1] %vm15_vm1, %v14_v4  }
  0x84   :  { %v21_v5 = vld [vmem:[#allocation0] sm:$0x1] }
  0x85   :  { %24 = vst [vmem:[%s54_s1] sm:$0x1] %v21_v5 }

// kernel: conv_autoencoder_forward.13
= control target key start
LH: loop header
LB: loop body
LE: loop exit
PB: predicated region body
PF: predicated region fallthrough
CT: control target
= control target key end

     0   :  { %s854_s12 = smov 0   ;;  %s856_s13 = smov 0   ;;  %s1029_s0 = inlined_call_operand.vmem [shape: bf16[2,6,8,128], index: 0, kind: input, shape index: {}]   ;;  %s1030_s1 = inlined_call_operand.vmem [shape: bf16[3,128,192], index: 1, kind: input, shape index: {}]   ;;  %s1031_s2 = inlined_call_operand.vmem [shape: f32[1,192], index: 2, kind: input, shape index: {}]   ;;  %s1032_s3 = inlined_call_operand.vmem [shape: bf16[2,6,3,8,192], index: 3, kind: output, shape index: {}]  }
   0x1   :  { %s858_s14 = smov 0   ;;  %s860_s15 = smov 0  }
   0x2   :  { %s862_s16 = smov 0   ;;  %s864_s17 = smov 0  }
   0x3   :  { %s866_s18 = smov 0  }
   0x4 LB: > { %s22_s19 = sadd.s32 1, %s823_s16  ;;  %s25_s20 = sadd.s32 1, %s827_s17  ;;  %s831_s18 = sphi %s866_s18, %s13_s18   ;;  %s827_s17 = sphi %s864_s17, %s1041_s17   ;;  %s823_s16 = sphi %s862_s16, %s1040_s16   ;;  %s819_s15 = sphi %s860_s15, %s1039_s15   ;;  %s815_s14 = sphi %s858_s14, %s1038_s14   ;;  %s811_s13 = sphi %s856_s13, %s1037_s13   ;;  %s807_s12 = sphi %s854_s12, %s1036_s12  }
   0x5   : > { %p23_p0 = scmp.ge.s32.totalorder %s22_s19, 3  ;;  %s630_s21 = sadd.s32 4294967295, %s831_s18  }
   0x6   : > { %p117_p1 = scmp.ne.s32.totalorder %s811_s13, %s807_s12  ;;  %p118_p2 = scmp.eq.s32.totalorder %s630_s21, 5 }
   0x7   : > { %s1043_s19 = smov (%p23_p0, %s22_s19), 0  ;;  %s1045_s20 = smov (!%p23_p0, %s25_s20), %s827_s17 }
   0x8   : > { %s103_s22 = ssub.s32 %s823_s16, %s1043_s19  ;;  %p27_p3 = scmp.ge.s32.totalorder %s1045_s20, 2 }
   0x9   : > { %p634_p4 = scmp.ge.s32.totalorder %s831_s18, 1  ;;  %p900_p5 = por %p118_p2, %p117_p1 }
   0xa   : > { %p161_p6 = scmp.lt.s32.totalorder %s831_s18, 7  ;;  %s1047_s20 = smov (%p27_p3, %s1045_s20), 0 }
   0xb   : > { %s102_s24 = ssub.s32 %s827_s17, %s1047_s20  ;;  %s107_s26 = sadd.s32 1, %s811_s13 }
   0xc   : > { %p162_p7 = pnand %p634_p4, %p161_p6  ;;  %s104_s25 = sor.u32 %s103_s22, %s102_s24 }
   0xd   : > { %p105_p8 = scmp.eq.s32.totalorder %s104_s25, 0  ;;  %p194_p9 = scmp.lt.s32.totalorder (!%p162_p7), %s815_s14, 2 }
   0xe   : > { %165 = sbr.rel (%p162_p7) target bundleno = 279 (0x117), region = 32  ;;  %p189_p10 = scmp.lt.s32.totalorder (!%p162_p7), %s819_s15, 1 }
   0xf   : > { %s911_s27 = scalar_select %p105_p8, %s811_s13, %s107_s26  }
  0x10   : > { %s186_s22 = sand.u32 (!%p162_p7), 1, %s807_s12  }
  0x11   : > { %s956_s24 = smul.u32 (!%p162_p7), 48, %s186_s22 }
  0x13   : > { %v833_v0 = vmov 0   ;;  %s195_s28 = scalar_select %p194_p9, %s815_s14, 2  ;;  %v224_v20 = vlaneseq  ;;  %v222_v23 = vld [vmem:[%s1031_s2] sm:$0x3]  ;;  %vm479_vm2 = vcmask 1043456   ;;  %vm480_vm3 = vcmask 523268  }
  0x14   : > { %364 = vmatprep.mubr.bf16.mxu0 %v833_v0  ;;  %374 = vmatprep.mubr.bf16.mxu1 %v833_v0  ;;  %s190_s6 = scalar_select %p189_p10, %s819_s15, 1  ;;  %vm964_vm7 = vmor %vm480_vm3, %vm479_vm2 }
  0x15   : > { %s667_s29 = sshll.u32 %s195_s28, 7  ;;  %v225_v21 = vshrl.u32 %v224_v20, 7  ;;  %s971_s12 = scalar_lea.vmem [#allocation2], %s956_s24 }
  0x16   : > { %s919_s5 = scalar_lea.vmem %s1030_s1, %s667_s29  ;;  %s691_s7 = smul.u32 24, %s190_s6 }
  0x17   : > { %v750_v1 = vld [vmem:[%s919_s5 + $0x74] ss:$8 sps:$4 sm:$0xff]   ;;  %v752_v2 = vld [vmem:[%s919_s5 + $0x70] ss:$8 sps:$4 sm:$0xff]   ;;  %v753_v3 = vld [vmem:[%s919_s5 + $0x64] ss:$8 sps:$4 sm:$0xff]  }
  0x18   : > { %332 = vmatprep.subr.bf16.mxu0 %v750_v1  ;;  %674 = vmatprep.subr.bf16.mxu1 %v750_v1  ;;  %v755_v4 = vld [vmem:[%s919_s5 + $0x60] ss:$8 sps:$4 sm:$0xff]   ;;  %v756_v5 = vld [vmem:[%s919_s5 + $0x54] ss:$8 sps:$4 sm:$0xff]   ;;  %v758_v6 = vld [vmem:[%s919_s5 + $0x50] ss:$8 sps:$4 sm:$0xff]   ;;  %s932_s10 = scalar_lea.vmem %s1029_s0, %s691_s7 }
  0x19   : > { %333 = vmatpush1.bf16.msra.mxu0 %v752_v2  ;;  %682 = vmatpush1.bf16.msra.mxu1 %v752_v2  ;;  %v759_v7 = vld [vmem:[%s919_s5 + $0x44] ss:$8 sps:$4 sm:$0xff]   ;;  %v761_v8 = vld [vmem:[%s919_s5 + $0x40] ss:$8 sps:$4 sm:$0xff]   ;;  %v762_v9 = vld [vmem:[%s919_s5 + $0x34] ss:$8 sps:$4 sm:$0xff]  }
  0x1a   : > { %334 = vmatprep.subr.bf16.mxu0 %v753_v3  ;;  %675 = vmatprep.subr.bf16.mxu1 %v753_v3  ;;  %v764_v10 = vld [vmem:[%s919_s5 + $0x30] ss:$8 sps:$4 sm:$0xff]   ;;  %v765_v11 = vld [vmem:[%s919_s5 + $0x24] ss:$8 sps:$4 sm:$0xff]   ;;  %v767_v12 = vld [vmem:[%s919_s5 + $0x20] ss:$8 sps:$4 sm:$0xff]  }
  0x1b   : > { %v768_v13 = vld [vmem:[%s919_s5 + $0x14] ss:$8 sps:$4 sm:$0xff]   ;;  %v770_v14 = vld [vmem:[%s919_s5 + $0x10] ss:$8 sps:$4 sm:$0xff]   ;;  %v771_v15 = vld [vmem:[%s919_s5 + $0x4] ss:$8 sps:$4 sm:$0xff]  }
  0x1c   : > { %v773_v16 = vld [vmem:[%s919_s5] ss:$8 sps:$4 sm:$0xff]   ;;  %v776_v19 = vld [vmem:[%s932_s10 + $0x10] sm:$0xff]   ;;  %v226_v22 = vsub.s32 0, %v225_v21  ;;  %v230_v24 = vsub.s32 1, %v225_v21  ;;  %s663_s25 = sshll.u32 (%p900_p5), %s815_s14, 1 }
  0x1d   : > { %335 = vmatpush1.bf16.msra.mxu0 %v755_v4  ;;  %683 = vmatpush1.bf16.msra.mxu1 %v755_v4  ;;  %v774_v17 = vld [vmem:[%s932_s10] sm:$0xff]   ;;  %v775_v18 = vld [vmem:[%s932_s10 + $0x8] sm:$0xff]   ;;  %s692_s26 = smul.u32 (%p900_p5), 36, %s819_s15 }
  0x1e   : > { %336 = vmatprep.subr.bf16.mxu0 %v756_v5  ;;  %676 = vmatprep.subr.bf16.mxu1 %v756_v5  ;;  %v949_v25 = vrot.slane %v222_v23, %v226_v22  ;;  %v951_v28 = vrot.slane %v222_v23, %v230_v24 }
  0x1f   : > { %s497_s28 = sadd.s32 (%p900_p5), %s692_s26, %s663_s25 }
  0x20   : > { %s664_s29 = sshll.u32 (%p900_p5), %s497_s28, 2 }
  0x21   : > { %337 = vmatpush1.bf16.msra.mxu0 %v758_v6  ;;  %684 = vmatpush1.bf16.msra.mxu1 %v758_v6  ;;  %s499_s4 = scalar_lea.vmem (%p900_p5), %s1032_s3, %s664_s29 }
  0x22   : > { %338 = vmatprep.subr.bf16.mxu0 %v759_v7  ;;  %677 = vmatprep.subr.bf16.mxu1 %v759_v7 }
  0x25   : > { %339 = vmatpush1.bf16.msra.mxu0 %v761_v8  ;;  %685 = vmatpush1.bf16.msra.mxu1 %v761_v8 }
  0x26   : > { %340 = vmatprep.subr.bf16.mxu0 %v762_v9  ;;  %678 = vmatprep.subr.bf16.mxu1 %v762_v9 }
  0x29   : > { %341 = vmatpush1.bf16.msra.mxu0 %v764_v10  ;;  %686 = vmatpush1.bf16.msra.mxu1 %v764_v10 }
  0x2a   : > { %342 = vmatprep.subr.bf16.mxu0 %v765_v11  ;;  %679 = vmatprep.subr.bf16.mxu1 %v765_v11 }
  0x2d   : > { %343 = vmatpush1.bf16.msra.mxu0 %v767_v12  ;;  %687 = vmatpush1.bf16.msra.mxu1 %v767_v12 }
  0x2e   : > { %344 = vmatprep.subr.bf16.mxu0 %v768_v13  ;;  %680 = vmatprep.subr.bf16.mxu1 %v768_v13 }
  0x31   : > { %345 = vmatpush1.bf16.msra.mxu0 %v770_v14  ;;  %688 = vmatpush1.bf16.msra.mxu1 %v770_v14 }
  0x32   : > { %346 = vmatprep.subr.bf16.mxu0 %v771_v15  ;;  %681 = vmatprep.subr.bf16.mxu1 %v771_v15 }
  0x35   : > { %347 = vmatpush1.bf16.msra.mxu0 %v773_v16  ;;  %689 = vmatpush1.bf16.msra.mxu1 %v773_v16 }
  0x38   : > { %365 = vmatmul.mubr.bf16.vlgmr.msra.gmra.mxu0 %v774_v17  ;;  %375 = vmatmul.mubr.bf16.vlgmr.msra.gmra.mxu1 %v775_v18 }
  0x39   : > { %384 = vmatprep.mubr.bf16.mxu1 %v833_v0 }
  0x40   : > { %385 = vmatmul.mubr.bf16.gmra.mxu1 %v776_v19 }
  0xf8   : > { %v366_v26 = vpop.f32.mrf.mxu0  ;;  %v376_v27 = vpop.f32.mrf.mxu1 }
  0xf9   : > { %v367_v29 = vadd.f32 %v366_v26, %v949_v25  ;;  %v377_v30 = vadd.f32 %v376_v27, %v949_v25 }
  0xfa   : > { %v368_v31 = vpop.f32.mrf.mxu0  ;;  %v378_v32 = vpop.f32.mrf.mxu1 }
  0xfb   : > { %vm395_vm0 = vcmp.ge.f32.partialorder %v367_v29, 0.0  ;;  %v407_v33 = vmul.f32 0.2, %v367_v29  ;;  %v411_v34 = vmul.f32 0.2, %v377_v30  ;;  %vm399_vm1 = vcmp.ge.f32.partialorder %v377_v30, 0.0 }
  0xfc   : > { %v369_v35 = vadd.f32 %v368_v31, %v951_v28  ;;  %v379_v36 = vadd.f32 %v378_v32, %v951_v28  ;;  %v370_v37 = vpop.f32.mrf.mxu0  ;;  %v380_v38 = vpop.f32.mrf.mxu1 }
  0xfd   : > { %v419_v39 = vsel %vm395_vm0, %v367_v29, %v407_v33  ;;  %v371_v40 = vadd.f32 %v370_v37, %v949_v25  ;;  %v381_v41 = vadd.f32 %v380_v38, %v949_v25  ;;  %v423_v46 = vsel %vm399_vm1, %v377_v30, %v411_v34 }
  0xfe   : > { %vm396_vm4 = vcmp.ge.f32.partialorder %v369_v35, 0.0  ;;  %v408_v42 = vmul.f32 0.2, %v369_v35  ;;  %vm400_vm5 = vcmp.ge.f32.partialorder %v379_v36, 0.0  ;;  %v412_v43 = vmul.f32 0.2, %v379_v36  ;;  %v372_v44 = vpop.f32.mrf.mxu0  ;;  %v382_v45 = vpop.f32.mrf.mxu1 }
  0xff   : > { %vm397_vm6 = vcmp.ge.f32.partialorder %v371_v40, 0.0  ;;  %v409_v47 = vmul.f32 0.2, %v371_v40  ;;  %v413_v48 = vmul.f32 0.2, %v381_v41  ;;  %v373_v52 = vadd.f32 %v372_v44, %v951_v28 }
 0x100   : > { %v420_v49 = vsel %vm396_vm4, %v369_v35, %v408_v42  ;;  %v424_v51 = vsel %vm400_vm5, %v379_v36, %v412_v43  ;;  %v383_v53 = vadd.f32 %v382_v45, %v951_v28  ;;  %v386_v54 = vpop.f32.mrf.mxu1  ;;  %vm401_vm8 = vcmp.ge.f32.partialorder %v381_v41, 0.0 }
 0x101   : > { %v668_v55 = vpack.c.bf16 %v420_v49, %v419_v39  ;;  %v670_v56 = vpack.c.bf16 %v424_v51, %v423_v46  ;;  %v421_v57 = vsel %vm397_vm6, %v371_v40, %v409_v47  ;;  %vm398_vm9 = vcmp.ge.f32.partialorder %v373_v52, 0.0 }
 0x102   : > { %v410_v58 = vmul.f32 0.2, %v373_v52  ;;  %vm402_vm10 = vcmp.ge.f32.partialorder %v383_v53, 0.0  ;;  %v414_v59 = vmul.f32 0.2, %v383_v53  ;;  %v388_v60 = vpop.f32.mrf.mxu1  ;;  %v387_v61 = vadd.f32 %v386_v54, %v949_v25 }
 0x103   : > { %482 = vst.msk [vmem:[%s971_s12] sm:$0xff] %vm964_vm7, %v668_v55  ;;  %484 = vst.msk [vmem:[%s971_s12 + $0x10] sm:$0xff] %vm964_vm7, %v670_v56  ;;  %v389_v62 = vadd.f32 %v388_v60, %v951_v28  ;;  %v425_v63 = vsel %vm401_vm8, %v381_v41, %v413_v48 }
 0x104   : > { %v422_v0 = vsel %vm398_vm9, %v373_v52, %v410_v58  ;;  %v426_v1 = vsel %vm402_vm10, %v383_v53, %v414_v59  ;;  %v390_v2 = vpop.f32.mrf.mxu1  ;;  %vm403_vm11 = vcmp.ge.f32.partialorder %v387_v61, 0.0  ;;  %v415_v5 = vmul.f32 0.2, %v387_v61 }
 0x105   : > { %v669_v3 = vpack.c.bf16 %v422_v0, %v421_v57  ;;  %v671_v4 = vpack.c.bf16 %v426_v1, %v425_v63  ;;  %vm404_vm12 = vcmp.ge.f32.partialorder %v389_v62, 0.0  ;;  %v416_v6 = vmul.f32 0.2, %v389_v62 }
 0x106   : > { %v391_v7 = vadd.f32 %v390_v2, %v949_v25  ;;  %v392_v8 = vpop.f32.mrf.mxu1  ;;  %v427_v10 = vsel %vm403_vm11, %v387_v61, %v415_v5 }
 0x107   : > { %483 = vst.msk [vmem:[%s971_s12 + $0x8] sm:$0xff] %vm964_vm7, %v669_v3  ;;  %485 = vst.msk [vmem:[%s971_s12 + $0x18] sm:$0xff] %vm964_vm7, %v671_v4  ;;  %v393_v9 = vadd.f32 %v392_v8, %v951_v28  ;;  %v428_v11 = vsel %vm404_vm12, %v389_v62, %v416_v6 }
 0x108   : > { %vm405_vm13 = vcmp.ge.f32.partialorder %v391_v7, 0.0  ;;  %v417_v12 = vmul.f32 0.2, %v391_v7  ;;  %v672_v13 = vpack.c.bf16 %v428_v11, %v427_v10 }
 0x109   : > { %vm406_vm14 = vcmp.ge.f32.partialorder %v393_v9, 0.0  ;;  %v418_v14 = vmul.f32 0.2, %v393_v9 }
 0x10a   : > { %486 = vst.msk [vmem:[%s971_s12 + $0x20] sm:$0xff] %vm964_vm7, %v672_v13  ;;  %v429_v15 = vsel %vm405_vm13, %v391_v7, %v417_v12  ;;  %494 = sbr.rel (!%p900_p5) target bundleno = 279 (0x117), region = 36  ;;  %v538_v18 = vld [vmem:[%s971_s12] sm:$0xff] (%p900_p5)  ;;  %v542_v20 = vld [vmem:[%s971_s12 + $0x10] sm:$0xff] (%p900_p5) }
 0x10b   : > { %v430_v16 = vsel %vm406_vm14, %v393_v9, %v418_v14  ;;  %539 = vst [vmem:[%s499_s4] sm:$0xff] (%p900_p5), %v538_v18  ;;  %543 = vst [vmem:[%s499_s4 + $0x30] sm:$0xff] (%p900_p5), %v542_v20 }
 0x10c   : > { %v673_v17 = vpack.c.bf16 %v430_v16, %v429_v15 }
 0x10e   : > { %487 = vst.msk [vmem:[%s971_s12 + $0x28] sm:$0xff] %vm964_vm7, %v673_v17  ;;  %v540_v19 = vld [vmem:[%s971_s12 + $0x8] sm:$0xff] (%p900_p5)  ;;  %v544_v21 = vld [vmem:[%s971_s12 + $0x18] sm:$0xff] (%p900_p5) }
 0x10f   : > { %541 = vst [vmem:[%s499_s4 + $0x18] sm:$0xff] %v540_v19  ;;  %545 = vst [vmem:[%s499_s4 + $0x48] sm:$0xff] %v544_v21 }
 0x111   : > { %v546_v22 = vld [vmem:[%s971_s12 + $0x20] sm:$0xff] }
 0x112   : > { %547 = vst [vmem:[%s499_s4 + $0x60] sm:$0xff] %v546_v22 }
 0x115   : > { %v548_v23 = vld [vmem:[%s971_s12 + $0x28] sm:$0xff] }
 0x116   : > { %549 = vst [vmem:[%s499_s4 + $0x78] sm:$0xff] %v548_v23 }
 0x117 PF: > { %s13_s18 = sadd.s32 1, %s831_s18   ;;  %s1036_s12 = smov %s811_s13 }
 0x118   : > { %p10_p11 = scmp.ge.s32.totalorder %s13_s18, 8   ;;  %s1037_s13 = smov %s911_s27 }
 0x119   : > { %s1038_s14 = smov %s823_s16  ;;  %s1039_s15 = smov %s827_s17 }
 0x11a   : > { %s1040_s16 = smov %s1043_s19  ;;  %s1041_s17 = smov %s1047_s20 }
 0x11b   :  { %12 = sbr.rel (!%p10_p11) target bundleno = 4 (0x4), region = 103 }

// kernel: tile.48
= control target key start
LH: loop header
LB: loop body
LE: loop exit
PB: predicated region body
PF: predicated region fallthrough
CT: control target
= control target key end

     0   :  { %s22_s0 = inlined_call_operand.vmem [shape: f32[32], index: 0, kind: input, shape index: {}]   ;;  %s23_s1 = inlined_call_operand.vmem [shape: f32[3,32], index: 1, kind: output, shape index: {}]  }
   0x1   :  { %v4_v0 = vld [vmem:[%s22_s0] ss:$0 sm:$0xff] }
   0x2   :  { %5 = vst [vmem:[%s23_s1] sm:$0xf] %v4_v0 }

// kernel: tile.49
= control target key start
LH: loop header
LB: loop body
LE: loop exit
PB: predicated region body
PF: predicated region fallthrough
CT: control target
= control target key end

     0   :  { %vm8_vm0 = vcmask 261120   ;;  %s33_s8 = smov 32   ;;  %vm14_vm1 = vcmask 785920   ;;  %vm20_vm2 = vcmask 523520   ;;  %s50_s0 = inlined_call_operand.vmem [shape: f32[3,32], index: 0, kind: input, shape index: {}]   ;;  %s51_s1 = inlined_call_operand.vmem [shape: f32[1,96], index: 1, kind: output, shape index: {}]  }
   0x1   :  { %v5_v0 = vld [vmem:[%s50_s0] sm:$0xf]  ;;  %s32_s0 = smov 64  }
   0x2   :  { %6 = vst [vmem:[#allocation1] sm:$0xf] %v5_v0 }
   0x9   :  { %v11_v1 = vld [vmem:[#allocation1 + $0x2] sm:$0x1]   ;;  %v7_v2 = vld [vmem:[#allocation1] sm:$0x1]   ;;  %v17_v3 = vld [vmem:[#allocation1 + $0x1] sm:$0x1]  }
   0xa   :  { %12 = vrot.lane.b32.xlu0 %v11_v1, %s32_s0  ;;  %9 = vst.msk [vmem:[#allocation0] sm:$0x1] %vm8_vm0, %v7_v2  }
   0xe   :  { %18 = vrot.lane.b32.xlu0 %v17_v3, %s33_s8 }
  0x7c   :  { %v13_v4 = vpop.permute.xlu0 %12  }
  0x7d   :  { %15 = vst.msk [vmem:[#allocation0] sm:$0x1] %vm14_vm1, %v13_v4  }
  0x80   :  { %v19_v5 = vpop.permute.xlu0 %18  }
  0x81   :  { %21 = vst.msk [vmem:[#allocation0] sm:$0x1] %vm20_vm2, %v19_v5  }
  0x88   :  { %v26_v6 = vld [vmem:[#allocation0] sm:$0x1] }
  0x89   :  { %29 = vst [vmem:[%s51_s1] sm:$0x1] %v26_v6 }

// kernel: conv_autoencoder_forward.14
= control target key start
LH: loop header
LB: loop body
LE: loop exit
PB: predicated region body
PF: predicated region fallthrough
CT: control target
= control target key end

     0   :  { %s2057_s12 = smov 0   ;;  %s2059_s13 = smov 0   ;;  %s2516_s0 = inlined_call_operand.vmem [shape: bf16[2,18,24,64], index: 0, kind: input, shape index: {}]   ;;  %s2517_s1 = inlined_call_operand.vmem [shape: bf16[3,64,96], index: 1, kind: input, shape index: {}]   ;;  %s2518_s2 = inlined_call_operand.vmem [shape: f32[1,96], index: 2, kind: input, shape index: {}]   ;;  %s2519_s3 = inlined_call_operand.vmem [shape: bf16[2,18,3,24,96], index: 3, kind: output, shape index: {}]  }
   0x1   :  { %s2061_s14 = smov 0   ;;  %s2063_s15 = smov 0  }
   0x2   :  { %s2065_s16 = smov 0   ;;  %s2067_s17 = smov 0  }
   0x3   :  { %s2069_s18 = smov 0  }
   0x4 LB: > { %s22_s19 = sadd.s32 1, %s2025_s16  ;;  %s25_s20 = sadd.s32 1, %s2029_s17  ;;  %s2033_s18 = sphi %s2069_s18, %s13_s18   ;;  %s2029_s17 = sphi %s2067_s17, %s2526_s17   ;;  %s2025_s16 = sphi %s2065_s16, %s2525_s16   ;;  %s2021_s15 = sphi %s2063_s15, %s2524_s15   ;;  %s2017_s14 = sphi %s2061_s14, %s2523_s14   ;;  %s2013_s13 = sphi %s2059_s13, %s2522_s13   ;;  %s2009_s12 = sphi %s2057_s12, %s2521_s12  }
   0x5   : > { %p23_p0 = scmp.ge.s32.totalorder %s22_s19, 3  ;;  %s1552_s21 = sadd.s32 4294967295, %s2033_s18  }
   0x6   : > { %p117_p1 = scmp.ne.s32.totalorder %s2013_s13, %s2009_s12  ;;  %p118_p2 = scmp.eq.s32.totalorder %s1552_s21, 5 }
   0x7   : > { %s2528_s19 = smov (%p23_p0, %s22_s19), 0  ;;  %s2530_s20 = smov (!%p23_p0, %s25_s20), %s2029_s17 }
   0x8   : > { %s103_s22 = ssub.s32 %s2025_s16, %s2528_s19  ;;  %p27_p3 = scmp.ge.s32.totalorder %s2530_s20, 2 }
   0x9   : > { %p1556_p4 = scmp.ge.s32.totalorder %s2033_s18, 1  ;;  %p2103_p5 = por %p118_p2, %p117_p1 }
   0xa   : > { %p161_p6 = scmp.lt.s32.totalorder %s2033_s18, 7  ;;  %s2532_s20 = smov (%p27_p3, %s2530_s20), 0 }
   0xb   : > { %s102_s24 = ssub.s32 %s2029_s17, %s2532_s20  ;;  %s107_s26 = sadd.s32 1, %s2013_s13 }
   0xc   : > { %p162_p7 = pnand %p1556_p4, %p161_p6  ;;  %s104_s25 = sor.u32 %s103_s22, %s102_s24 }
   0xd   : > { %p105_p8 = scmp.eq.s32.totalorder %s104_s25, 0  ;;  %p194_p9 = scmp.lt.s32.totalorder (!%p162_p7), %s2017_s14, 2 }
   0xe   : > { %165 = sbr.rel (%p162_p7) target bundleno = 356 (0x164), region = 32  ;;  %p189_p10 = scmp.lt.s32.totalorder (!%p162_p7), %s2021_s15, 1 }
   0xf   : > { %s2114_s27 = scalar_select %p105_p8, %s2013_s13, %s107_s26  }
  0x10   : > { %s186_s11 = sand.u32 (!%p162_p7), 1, %s2009_s12  }
  0x11   : > { %s1886_s24 = smul.u32 (!%p162_p7), 216, %s186_s11 }
  0x13   : > { %v2035_v0 = vmov 0.0   ;;  %s195_s28 = scalar_select %p194_p9, %s2017_s14, 2  ;;  %vm2036_vm0 = vmmov 0   ;;  %vm428_vm1 = vcmask 523264   ;;  %v2248_v32 = vld [vmem:[%s2518_s2] ss:$0 sm:$0xff] }
  0x14   : > { %1762 = vmatprep.subr.bf16.mxu0 %v2035_v0  ;;  %1878 = vmatprep.subr.bf16.mxu1 %v2035_v0  ;;  %s190_s29 = scalar_select %p189_p10, %s2021_s15, 1  ;;  %vm1155_vm4 = vcmask 781312  }
  0x15   : > { %1770 = vmatprep.mubr.msk.bf16.mxu0 %vm2036_vm0, %v2035_v0  ;;  %1826 = vmatprep.mubr.msk.bf16.mxu1 %vm2036_vm0, %v2035_v0  ;;  %s1676_s30 = sshll.u32 %s195_s28, 5  ;;  %s2254_s12 = scalar_lea.vmem [#allocation2], %s1886_s24 }
  0x16   : > { %s198_s6 = scalar_lea.vmem %s2517_s1, %s1676_s30  ;;  %s1887_s7 = smul.u32 216, %s190_s29 }
  0x17   : > { %v1948_v1 = vld [vmem:[%s198_s6 + $0x18] sm:$0xff]   ;;  %v1949_v2 = vld [vmem:[%s198_s6 + $0x10] sm:$0xff]   ;;  %v1950_v3 = vld [vmem:[%s198_s6 + $0x8] sm:$0xff]   ;;  %s1888_s25 = smul.u32 (%p2103_p5), 3, %s2017_s14 }
  0x18   : > { %1763 = vmatpush3.bf16.msra.mxu0 %v1948_v1  ;;  %1882 = vmatpush3.bf16.msra.mxu1 %v1948_v1  ;;  %s2134_s10 = scalar_lea.vmem %s2516_s0, %s1887_s7  ;;  %v1951_v4 = vld [vmem:[%s198_s6] sm:$0xff]   ;;  %s1889_s26 = smul.u32 (%p2103_p5), 162, %s2021_s15 }
  0x19   : > { %1764 = vmatprep.subr.bf16.mxu0 %v2035_v0  ;;  %1879 = vmatprep.subr.bf16.mxu1 %v2035_v0  ;;  %v1952_v5 = vld [vmem:[%s2134_s10] sm:$0xff]   ;;  %v1953_v6 = vld [vmem:[%s2134_s10 + $0x70] sm:$0xff]   ;;  %v1954_v7 = vld [vmem:[%s2134_s10 + $0x8] sm:$0xff]  }
  0x1a   : > { %v1955_v8 = vld [vmem:[%s2134_s10 + $0x78] sm:$0xff]   ;;  %v1956_v9 = vld [vmem:[%s2134_s10 + $0x10] sm:$0xff]   ;;  %v1957_v10 = vld [vmem:[%s2134_s10 + $0x80] sm:$0xff]   ;;  %s1219_s23 = sadd.s32 (%p2103_p5), %s1889_s26, %s1888_s25 }
  0x1b   : > { %v1958_v11 = vld [vmem:[%s2134_s10 + $0x18] sm:$0xff]   ;;  %v1959_v12 = vld [vmem:[%s2134_s10 + $0x88] sm:$0xff]   ;;  %v1960_v13 = vld [vmem:[%s2134_s10 + $0x20] sm:$0xff]   ;;  %s1673_s14 = sshll.u32 (%p2103_p5), %s1219_s23, 2 }
  0x1c   : > { %1765 = vmatpush3.bf16.msra.mxu0 %v1949_v2  ;;  %1883 = vmatpush3.bf16.msra.mxu1 %v1949_v2  ;;  %v1961_v14 = vld [vmem:[%s2134_s10 + $0x90] sm:$0xff]   ;;  %v1962_v15 = vld [vmem:[%s2134_s10 + $0x28] sm:$0xff]   ;;  %v1963_v16 = vld [vmem:[%s2134_s10 + $0x98] sm:$0xff]   ;;  %s2436_s29 = scalar_lea.vmem (%p2103_p5), %s2519_s3, %s1673_s14 }
  0x1d   : > { %1766 = vmatprep.subr.bf16.mxu0 %v2035_v0  ;;  %1880 = vmatprep.subr.bf16.mxu1 %v2035_v0  ;;  %v1964_v17 = vld [vmem:[%s2134_s10 + $0x30] sm:$0xff]   ;;  %v1965_v18 = vld [vmem:[%s2134_s10 + $0xa0] sm:$0xff]   ;;  %v1966_v19 = vld [vmem:[%s2134_s10 + $0x38] sm:$0xff]  }
  0x1e   : > { %v1967_v20 = vld [vmem:[%s2134_s10 + $0xa8] sm:$0xff]   ;;  %v1968_v21 = vld [vmem:[%s2134_s10 + $0x40] sm:$0xff]   ;;  %v1969_v22 = vld [vmem:[%s2134_s10 + $0xb0] sm:$0xff]  }
  0x1f   : > { %v1970_v23 = vld [vmem:[%s2134_s10 + $0x48] sm:$0xff]   ;;  %v1971_v24 = vld [vmem:[%s2134_s10 + $0xb8] sm:$0xff]   ;;  %v1972_v25 = vld [vmem:[%s2134_s10 + $0x50] sm:$0xff]  }
  0x20   : > { %1767 = vmatpush3.bf16.msra.mxu0 %v1950_v3  ;;  %1884 = vmatpush3.bf16.msra.mxu1 %v1950_v3  ;;  %v1973_v26 = vld [vmem:[%s2134_s10 + $0xc0] sm:$0xff]   ;;  %v1974_v27 = vld [vmem:[%s2134_s10 + $0x58] sm:$0xff]   ;;  %v1975_v28 = vld [vmem:[%s2134_s10 + $0xc8] sm:$0xff]  }
  0x21   : > { %1768 = vmatprep.subr.bf16.mxu0 %v2035_v0  ;;  %1881 = vmatprep.subr.bf16.mxu1 %v2035_v0  ;;  %v1976_v29 = vld [vmem:[%s2134_s10 + $0x60] sm:$0xff]   ;;  %v1977_v30 = vld [vmem:[%s2134_s10 + $0xd0] sm:$0xff]   ;;  %v1978_v31 = vld [vmem:[%s2134_s10 + $0x68] sm:$0xff]  }
  0x24   : > { %1769 = vmatpush3.bf16.msra.mxu0 %v1951_v4  ;;  %1885 = vmatpush3.bf16.msra.mxu1 %v1951_v4 }
  0x27   : > { %1771 = vmatmul.mubr.msk.bf16.vlgmr.msra.gmra.mxu0 %vm428_vm1, %v1952_v5  ;;  %1827 = vmatmul.mubr.msk.bf16.vlgmr.msra.gmra.mxu1 %vm428_vm1, %v1953_v6 }
  0x28   : > { %1774 = vmatprep.mubr.msk.bf16.mxu0 %vm2036_vm0, %v2035_v0  ;;  %1830 = vmatprep.mubr.msk.bf16.mxu1 %vm2036_vm0, %v2035_v0 }
  0x2f   : > { %1775 = vmatmul.mubr.msk.bf16.gmra.mxu0 %vm428_vm1, %v1954_v7  ;;  %1831 = vmatmul.mubr.msk.bf16.gmra.mxu1 %vm428_vm1, %v1955_v8 }
  0x30   : > { %1778 = vmatprep.mubr.msk.bf16.mxu0 %vm2036_vm0, %v2035_v0  ;;  %1834 = vmatprep.mubr.msk.bf16.mxu1 %vm2036_vm0, %v2035_v0 }
  0x37   : > { %1779 = vmatmul.mubr.msk.bf16.gmra.mxu0 %vm428_vm1, %v1956_v9  ;;  %1835 = vmatmul.mubr.msk.bf16.gmra.mxu1 %vm428_vm1, %v1957_v10 }
  0x38   : > { %1782 = vmatprep.mubr.msk.bf16.mxu0 %vm2036_vm0, %v2035_v0  ;;  %1838 = vmatprep.mubr.msk.bf16.mxu1 %vm2036_vm0, %v2035_v0 }
  0x3f   : > { %1783 = vmatmul.mubr.msk.bf16.gmra.mxu0 %vm428_vm1, %v1958_v11  ;;  %1839 = vmatmul.mubr.msk.bf16.gmra.mxu1 %vm428_vm1, %v1959_v12 }
  0x40   : > { %1786 = vmatprep.mubr.msk.bf16.mxu0 %vm2036_vm0, %v2035_v0  ;;  %1842 = vmatprep.mubr.msk.bf16.mxu1 %vm2036_vm0, %v2035_v0 }
  0x47   : > { %1787 = vmatmul.mubr.msk.bf16.gmra.mxu0 %vm428_vm1, %v1960_v13  ;;  %1843 = vmatmul.mubr.msk.bf16.gmra.mxu1 %vm428_vm1, %v1961_v14 }
  0x48   : > { %1790 = vmatprep.mubr.msk.bf16.mxu0 %vm2036_vm0, %v2035_v0  ;;  %1846 = vmatprep.mubr.msk.bf16.mxu1 %vm2036_vm0, %v2035_v0 }
  0x4f   : > { %1791 = vmatmul.mubr.msk.bf16.gmra.mxu0 %vm428_vm1, %v1962_v15  ;;  %1847 = vmatmul.mubr.msk.bf16.gmra.mxu1 %vm428_vm1, %v1963_v16 }
  0x50   : > { %1794 = vmatprep.mubr.msk.bf16.mxu0 %vm2036_vm0, %v2035_v0  ;;  %1850 = vmatprep.mubr.msk.bf16.mxu1 %vm2036_vm0, %v2035_v0 }
  0x57   : > { %1795 = vmatmul.mubr.msk.bf16.gmra.mxu0 %vm428_vm1, %v1964_v17  ;;  %1851 = vmatmul.mubr.msk.bf16.gmra.mxu1 %vm428_vm1, %v1965_v18 }
  0x58   : > { %1798 = vmatprep.mubr.msk.bf16.mxu0 %vm2036_vm0, %v2035_v0  ;;  %1854 = vmatprep.mubr.msk.bf16.mxu1 %vm2036_vm0, %v2035_v0 }
  0x5f   : > { %1799 = vmatmul.mubr.msk.bf16.gmra.mxu0 %vm428_vm1, %v1966_v19  ;;  %1855 = vmatmul.mubr.msk.bf16.gmra.mxu1 %vm428_vm1, %v1967_v20 }
  0x60   : > { %1802 = vmatprep.mubr.msk.bf16.mxu0 %vm2036_vm0, %v2035_v0  ;;  %1858 = vmatprep.mubr.msk.bf16.mxu1 %vm2036_vm0, %v2035_v0 }
  0x67   : > { %1803 = vmatmul.mubr.msk.bf16.gmra.mxu0 %vm428_vm1, %v1968_v21  ;;  %1859 = vmatmul.mubr.msk.bf16.gmra.mxu1 %vm428_vm1, %v1969_v22 }
  0x68   : > { %1806 = vmatprep.mubr.msk.bf16.mxu0 %vm2036_vm0, %v2035_v0  ;;  %1862 = vmatprep.mubr.msk.bf16.mxu1 %vm2036_vm0, %v2035_v0 }
  0x6f   : > { %1807 = vmatmul.mubr.msk.bf16.gmra.mxu0 %vm428_vm1, %v1970_v23  ;;  %1863 = vmatmul.mubr.msk.bf16.gmra.mxu1 %vm428_vm1, %v1971_v24 }
  0x70   : > { %1810 = vmatprep.mubr.msk.bf16.mxu0 %vm2036_vm0, %v2035_v0  ;;  %1866 = vmatprep.mubr.msk.bf16.mxu1 %vm2036_vm0, %v2035_v0 }
  0x77   : > { %1811 = vmatmul.mubr.msk.bf16.gmra.mxu0 %vm428_vm1, %v1972_v25  ;;  %1867 = vmatmul.mubr.msk.bf16.gmra.mxu1 %vm428_vm1, %v1973_v26 }
  0x78   : > { %1814 = vmatprep.mubr.msk.bf16.mxu0 %vm2036_vm0, %v2035_v0  ;;  %1870 = vmatprep.mubr.msk.bf16.mxu1 %vm2036_vm0, %v2035_v0 }
  0x7f   : > { %1815 = vmatmul.mubr.msk.bf16.gmra.mxu0 %vm428_vm1, %v1974_v27  ;;  %1871 = vmatmul.mubr.msk.bf16.gmra.mxu1 %vm428_vm1, %v1975_v28 }
  0x80   : > { %1818 = vmatprep.mubr.msk.bf16.mxu0 %vm2036_vm0, %v2035_v0  ;;  %1874 = vmatprep.mubr.msk.bf16.mxu1 %vm2036_vm0, %v2035_v0 }
  0x87   : > { %1819 = vmatmul.mubr.msk.bf16.gmra.mxu0 %vm428_vm1, %v1976_v29  ;;  %1875 = vmatmul.mubr.msk.bf16.gmra.mxu1 %vm428_vm1, %v1977_v30 }
  0x88   : > { %1822 = vmatprep.mubr.msk.bf16.mxu0 %vm2036_vm0, %v2035_v0 }
  0x8f   : > { %1823 = vmatmul.mubr.msk.bf16.gmra.mxu0 %vm428_vm1, %v1978_v31 }
  0xe7   : > { %v544_v33 = vpop.f32.mrf.mxu0  ;;  %v656_v34 = vpop.f32.mrf.mxu1 }
  0xe8   : > { %v545_v35 = vadd.f32 %v2248_v32, %v544_v33  ;;  %v657_v36 = vadd.f32 %v2248_v32, %v656_v34 }
  0xe9   : > { %v1772_v37 = vpop.f32.mrf.mxu0  ;;  %v1828_v38 = vpop.f32.mrf.mxu1 }
  0xea   : > { %vm759_vm2 = vcmp.ge.f32.partialorder %v545_v35, 0.0  ;;  %v813_v39 = vmul.f32 0.2, %v545_v35  ;;  %vm787_vm3 = vcmp.ge.f32.partialorder %v657_v36, 0.0  ;;  %v841_v40 = vmul.f32 0.2, %v657_v36 }
  0xeb   : > { %v547_v41 = vpop.f32.mrf.mxu0  ;;  %v659_v42 = vpop.f32.mrf.mxu1 }
  0xec   : > { %v867_v43 = vsel %vm759_vm2, %v545_v35, %v813_v39  ;;  %v895_v44 = vsel %vm787_vm3, %v657_v36, %v841_v40  ;;  %v548_v45 = vadd.f32 %v2248_v32, %v547_v41  ;;  %v660_v46 = vadd.f32 %v2248_v32, %v659_v42 }
  0xed   : > { %v1677_v47 = vpack.c.bf16 %v867_v43, %v867_v43  ;;  %v1705_v48 = vpack.c.bf16 %v895_v44, %v895_v44  ;;  %v1773_v49 = vpop.f32.mrf.mxu0  ;;  %v1829_v50 = vpop.f32.mrf.mxu1 }
  0xee   : > { %vm760_vm5 = vcmp.ge.f32.partialorder %v548_v45, 0.0  ;;  %v814_v51 = vmul.f32 0.2, %v548_v45  ;;  %vm788_vm6 = vcmp.ge.f32.partialorder %v660_v46, 0.0  ;;  %v842_v52 = vmul.f32 0.2, %v660_v46 }
  0xef   : > { %1156 = vst.msk [vmem:[%s2254_s12] sm:$0xf] %vm1155_vm4, %v1677_v47  ;;  %1184 = vst.msk [vmem:[%s2254_s12 + $0x70] sm:$0xf] %vm1155_vm4, %v1705_v48  ;;  %v552_v53 = vpop.f32.mrf.mxu0  ;;  %v664_v54 = vpop.f32.mrf.mxu1 }
  0xf0   : > { %v868_v55 = vsel %vm760_vm5, %v548_v45, %v814_v51  ;;  %v896_v56 = vsel %vm788_vm6, %v660_v46, %v842_v52  ;;  %v553_v57 = vadd.f32 %v2248_v32, %v552_v53  ;;  %v665_v58 = vadd.f32 %v2248_v32, %v664_v54 }
  0xf1   : > { %v1678_v59 = vpack.c.bf16 %v868_v55, %v868_v55  ;;  %v1706_v60 = vpack.c.bf16 %v896_v56, %v896_v56  ;;  %v1776_v61 = vpop.f32.mrf.mxu0  ;;  %v1832_v62 = vpop.f32.mrf.mxu1 }
  0xf2   : > { %vm761_vm7 = vcmp.ge.f32.partialorder %v553_v57, 0.0  ;;  %v815_v63 = vmul.f32 0.2, %v553_v57  ;;  %vm789_vm8 = vcmp.ge.f32.partialorder %v665_v58, 0.0  ;;  %v843_v0 = vmul.f32 0.2, %v665_v58 }
  0xf3   : > { %1157 = vst.msk [vmem:[%s2254_s12 + $0x4] sm:$0xf] %vm1155_vm4, %v1678_v59  ;;  %1185 = vst.msk [vmem:[%s2254_s12 + $0x74] sm:$0xf] %vm1155_vm4, %v1706_v60  ;;  %v555_v1 = vpop.f32.mrf.mxu0  ;;  %v667_v2 = vpop.f32.mrf.mxu1 }
  0xf4   : > { %v869_v3 = vsel %vm761_vm7, %v553_v57, %v815_v63  ;;  %v897_v4 = vsel %vm789_vm8, %v665_v58, %v843_v0  ;;  %v556_v5 = vadd.f32 %v2248_v32, %v555_v1  ;;  %v668_v6 = vadd.f32 %v2248_v32, %v667_v2 }
  0xf5   : > { %v1679_v7 = vpack.c.bf16 %v869_v3, %v869_v3  ;;  %v1707_v8 = vpack.c.bf16 %v897_v4, %v897_v4  ;;  %v1777_v9 = vpop.f32.mrf.mxu0  ;;  %v1833_v10 = vpop.f32.mrf.mxu1 }
  0xf6   : > { %vm762_vm9 = vcmp.ge.f32.partialorder %v556_v5, 0.0  ;;  %v816_v11 = vmul.f32 0.2, %v556_v5  ;;  %vm790_vm10 = vcmp.ge.f32.partialorder %v668_v6, 0.0  ;;  %v844_v12 = vmul.f32 0.2, %v668_v6 }
  0xf7   : > { %1158 = vst.msk [vmem:[%s2254_s12 + $0x8] sm:$0xf] %vm1155_vm4, %v1679_v7  ;;  %1186 = vst.msk [vmem:[%s2254_s12 + $0x78] sm:$0xf] %vm1155_vm4, %v1707_v8  ;;  %v560_v13 = vpop.f32.mrf.mxu0  ;;  %v672_v14 = vpop.f32.mrf.mxu1 }
  0xf8   : > { %v870_v15 = vsel %vm762_vm9, %v556_v5, %v816_v11  ;;  %v898_v16 = vsel %vm790_vm10, %v668_v6, %v844_v12  ;;  %v561_v17 = vadd.f32 %v2248_v32, %v560_v13  ;;  %v673_v18 = vadd.f32 %v2248_v32, %v672_v14 }
  0xf9   : > { %v1680_v19 = vpack.c.bf16 %v870_v15, %v870_v15  ;;  %v1708_v20 = vpack.c.bf16 %v898_v16, %v898_v16  ;;  %v1780_v21 = vpop.f32.mrf.mxu0  ;;  %v1836_v22 = vpop.f32.mrf.mxu1 }
  0xfa   : > { %vm763_vm11 = vcmp.ge.f32.partialorder %v561_v17, 0.0  ;;  %v817_v23 = vmul.f32 0.2, %v561_v17  ;;  %vm791_vm12 = vcmp.ge.f32.partialorder %v673_v18, 0.0  ;;  %v845_v24 = vmul.f32 0.2, %v673_v18 }
  0xfb   : > { %1159 = vst.msk [vmem:[%s2254_s12 + $0xc] sm:$0xf] %vm1155_vm4, %v1680_v19  ;;  %1187 = vst.msk [vmem:[%s2254_s12 + $0x7c] sm:$0xf] %vm1155_vm4, %v1708_v20  ;;  %v563_v25 = vpop.f32.mrf.mxu0  ;;  %v675_v26 = vpop.f32.mrf.mxu1 }
  0xfc   : > { %v871_v27 = vsel %vm763_vm11, %v561_v17, %v817_v23  ;;  %v899_v28 = vsel %vm791_vm12, %v673_v18, %v845_v24  ;;  %v564_v29 = vadd.f32 %v2248_v32, %v563_v25  ;;  %v676_v30 = vadd.f32 %v2248_v32, %v675_v26 }
  0xfd   : > { %v1681_v31 = vpack.c.bf16 %v871_v27, %v871_v27  ;;  %v1709_v33 = vpack.c.bf16 %v899_v28, %v899_v28  ;;  %v1781_v34 = vpop.f32.mrf.mxu0  ;;  %v1837_v35 = vpop.f32.mrf.mxu1 }
  0xfe   : > { %vm764_vm13 = vcmp.ge.f32.partialorder %v564_v29, 0.0  ;;  %v818_v36 = vmul.f32 0.2, %v564_v29  ;;  %vm792_vm14 = vcmp.ge.f32.partialorder %v676_v30, 0.0  ;;  %v846_v37 = vmul.f32 0.2, %v676_v30 }
  0xff   : > { %1160 = vst.msk [vmem:[%s2254_s12 + $0x10] sm:$0xf] %vm1155_vm4, %v1681_v31  ;;  %1188 = vst.msk [vmem:[%s2254_s12 + $0x80] sm:$0xf] %vm1155_vm4, %v1709_v33  ;;  %v568_v38 = vpop.f32.mrf.mxu0  ;;  %v680_v39 = vpop.f32.mrf.mxu1 }
 0x100   : > { %v872_v40 = vsel %vm764_vm13, %v564_v29, %v818_v36  ;;  %v900_v41 = vsel %vm792_vm14, %v676_v30, %v846_v37  ;;  %v569_v42 = vadd.f32 %v2248_v32, %v568_v38  ;;  %v681_v43 = vadd.f32 %v2248_v32, %v680_v39 }
 0x101   : > { %v1682_v44 = vpack.c.bf16 %v872_v40, %v872_v40  ;;  %v1710_v45 = vpack.c.bf16 %v900_v41, %v900_v41  ;;  %v1784_v46 = vpop.f32.mrf.mxu0  ;;  %v1840_v47 = vpop.f32.mrf.mxu1 }
 0x102   : > { %vm765_vm15 = vcmp.ge.f32.partialorder %v569_v42, 0.0  ;;  %v819_v48 = vmul.f32 0.2, %v569_v42  ;;  %vm793_vm0 = vcmp.ge.f32.partialorder %v681_v43, 0.0  ;;  %v847_v49 = vmul.f32 0.2, %v681_v43 }
 0x103   : > { %1161 = vst.msk [vmem:[%s2254_s12 + $0x14] sm:$0xf] %vm1155_vm4, %v1682_v44  ;;  %1189 = vst.msk [vmem:[%s2254_s12 + $0x84] sm:$0xf] %vm1155_vm4, %v1710_v45  ;;  %v571_v50 = vpop.f32.mrf.mxu0  ;;  %v683_v51 = vpop.f32.mrf.mxu1 }
 0x104   : > { %v873_v52 = vsel %vm765_vm15, %v569_v42, %v819_v48  ;;  %v901_v53 = vsel %vm793_vm0, %v681_v43, %v847_v49  ;;  %v572_v54 = vadd.f32 %v2248_v32, %v571_v50  ;;  %v684_v55 = vadd.f32 %v2248_v32, %v683_v51 }
 0x105   : > { %v1683_v56 = vpack.c.bf16 %v873_v52, %v873_v52  ;;  %v1711_v57 = vpack.c.bf16 %v901_v53, %v901_v53  ;;  %v1785_v58 = vpop.f32.mrf.mxu0  ;;  %v1841_v59 = vpop.f32.mrf.mxu1 }
 0x106   : > { %vm766_vm1 = vcmp.ge.f32.partialorder %v572_v54, 0.0  ;;  %v820_v60 = vmul.f32 0.2, %v572_v54  ;;  %vm794_vm2 = vcmp.ge.f32.partialorder %v684_v55, 0.0  ;;  %v848_v61 = vmul.f32 0.2, %v684_v55 }
 0x107   : > { %1162 = vst.msk [vmem:[%s2254_s12 + $0x18] sm:$0xf] %vm1155_vm4, %v1683_v56  ;;  %1190 = vst.msk [vmem:[%s2254_s12 + $0x88] sm:$0xf] %vm1155_vm4, %v1711_v57  ;;  %v576_v62 = vpop.f32.mrf.mxu0  ;;  %v688_v63 = vpop.f32.mrf.mxu1 }
 0x108   : > { %v874_v0 = vsel %vm766_vm1, %v572_v54, %v820_v60  ;;  %v902_v1 = vsel %vm794_vm2, %v684_v55, %v848_v61  ;;  %v577_v2 = vadd.f32 %v2248_v32, %v576_v62  ;;  %v689_v3 = vadd.f32 %v2248_v32, %v688_v63 }
 0x109   : > { %v1684_v4 = vpack.c.bf16 %v874_v0, %v874_v0  ;;  %v1712_v5 = vpack.c.bf16 %v902_v1, %v902_v1  ;;  %v1788_v6 = vpop.f32.mrf.mxu0  ;;  %v1844_v7 = vpop.f32.mrf.mxu1 }
 0x10a   : > { %vm767_vm3 = vcmp.ge.f32.partialorder %v577_v2, 0.0  ;;  %v821_v8 = vmul.f32 0.2, %v577_v2  ;;  %vm795_vm5 = vcmp.ge.f32.partialorder %v689_v3, 0.0  ;;  %v849_v9 = vmul.f32 0.2, %v689_v3 }
 0x10b   : > { %1163 = vst.msk [vmem:[%s2254_s12 + $0x1c] sm:$0xf] %vm1155_vm4, %v1684_v4  ;;  %1191 = vst.msk [vmem:[%s2254_s12 + $0x8c] sm:$0xf] %vm1155_vm4, %v1712_v5  ;;  %v579_v10 = vpop.f32.mrf.mxu0  ;;  %v691_v11 = vpop.f32.mrf.mxu1 }
 0x10c   : > { %v875_v12 = vsel %vm767_vm3, %v577_v2, %v821_v8  ;;  %v903_v13 = vsel %vm795_vm5, %v689_v3, %v849_v9  ;;  %v580_v14 = vadd.f32 %v2248_v32, %v579_v10  ;;  %v692_v15 = vadd.f32 %v2248_v32, %v691_v11 }
 0x10d   : > { %v1685_v16 = vpack.c.bf16 %v875_v12, %v875_v12  ;;  %v1713_v17 = vpack.c.bf16 %v903_v13, %v903_v13  ;;  %v1789_v18 = vpop.f32.mrf.mxu0  ;;  %v1845_v19 = vpop.f32.mrf.mxu1 }
 0x10e   : > { %vm768_vm6 = vcmp.ge.f32.partialorder %v580_v14, 0.0  ;;  %v822_v20 = vmul.f32 0.2, %v580_v14  ;;  %vm796_vm7 = vcmp.ge.f32.partialorder %v692_v15, 0.0  ;;  %v850_v21 = vmul.f32 0.2, %v692_v15 }
 0x10f   : > { %1164 = vst.msk [vmem:[%s2254_s12 + $0x20] sm:$0xf] %vm1155_vm4, %v1685_v16  ;;  %1192 = vst.msk [vmem:[%s2254_s12 + $0x90] sm:$0xf] %vm1155_vm4, %v1713_v17  ;;  %v584_v22 = vpop.f32.mrf.mxu0  ;;  %v696_v23 = vpop.f32.mrf.mxu1 }
 0x110   : > { %v876_v24 = vsel %vm768_vm6, %v580_v14, %v822_v20  ;;  %v904_v25 = vsel %vm796_vm7, %v692_v15, %v850_v21  ;;  %v585_v26 = vadd.f32 %v2248_v32, %v584_v22  ;;  %v697_v27 = vadd.f32 %v2248_v32, %v696_v23 }
 0x111   : > { %v1686_v28 = vpack.c.bf16 %v876_v24, %v876_v24  ;;  %v1714_v29 = vpack.c.bf16 %v904_v25, %v904_v25  ;;  %v1792_v30 = vpop.f32.mrf.mxu0  ;;  %v1848_v31 = vpop.f32.mrf.mxu1 }
 0x112   : > { %vm769_vm8 = vcmp.ge.f32.partialorder %v585_v26, 0.0  ;;  %v823_v33 = vmul.f32 0.2, %v585_v26  ;;  %vm797_vm9 = vcmp.ge.f32.partialorder %v697_v27, 0.0  ;;  %v851_v34 = vmul.f32 0.2, %v697_v27 }
 0x113   : > { %1165 = vst.msk [vmem:[%s2254_s12 + $0x24] sm:$0xf] %vm1155_vm4, %v1686_v28  ;;  %1193 = vst.msk [vmem:[%s2254_s12 + $0x94] sm:$0xf] %vm1155_vm4, %v1714_v29  ;;  %v587_v35 = vpop.f32.mrf.mxu0  ;;  %v699_v36 = vpop.f32.mrf.mxu1 }
 0x114   : > { %v877_v37 = vsel %vm769_vm8, %v585_v26, %v823_v33  ;;  %v905_v38 = vsel %vm797_vm9, %v697_v27, %v851_v34  ;;  %v588_v39 = vadd.f32 %v2248_v32, %v587_v35  ;;  %v700_v40 = vadd.f32 %v2248_v32, %v699_v36 }
 0x115   : > { %v1687_v41 = vpack.c.bf16 %v877_v37, %v877_v37  ;;  %v1715_v42 = vpack.c.bf16 %v905_v38, %v905_v38  ;;  %v1793_v43 = vpop.f32.mrf.mxu0  ;;  %v1849_v44 = vpop.f32.mrf.mxu1 }
 0x116   : > { %vm770_vm10 = vcmp.ge.f32.partialorder %v588_v39, 0.0  ;;  %v824_v45 = vmul.f32 0.2, %v588_v39  ;;  %vm798_vm11 = vcmp.ge.f32.partialorder %v700_v40, 0.0  ;;  %v852_v46 = vmul.f32 0.2, %v700_v40 }
 0x117   : > { %1166 = vst.msk [vmem:[%s2254_s12 + $0x28] sm:$0xf] %vm1155_vm4, %v1687_v41  ;;  %1194 = vst.msk [vmem:[%s2254_s12 + $0x98] sm:$0xf] %vm1155_vm4, %v1715_v42  ;;  %v592_v47 = vpop.f32.mrf.mxu0  ;;  %v704_v48 = vpop.f32.mrf.mxu1 }
 0x118   : > { %v878_v49 = vsel %vm770_vm10, %v588_v39, %v824_v45  ;;  %v906_v50 = vsel %vm798_vm11, %v700_v40, %v852_v46  ;;  %v593_v51 = vadd.f32 %v2248_v32, %v592_v47  ;;  %v705_v52 = vadd.f32 %v2248_v32, %v704_v48 }
 0x119   : > { %v1688_v53 = vpack.c.bf16 %v878_v49, %v878_v49  ;;  %v1716_v54 = vpack.c.bf16 %v906_v50, %v906_v50  ;;  %v1796_v55 = vpop.f32.mrf.mxu0  ;;  %v1852_v56 = vpop.f32.mrf.mxu1 }
 0x11a   : > { %vm771_vm12 = vcmp.ge.f32.partialorder %v593_v51, 0.0  ;;  %v825_v57 = vmul.f32 0.2, %v593_v51  ;;  %vm799_vm13 = vcmp.ge.f32.partialorder %v705_v52, 0.0  ;;  %v853_v58 = vmul.f32 0.2, %v705_v52 }
 0x11b   : > { %1167 = vst.msk [vmem:[%s2254_s12 + $0x2c] sm:$0xf] %vm1155_vm4, %v1688_v53  ;;  %1195 = vst.msk [vmem:[%s2254_s12 + $0x9c] sm:$0xf] %vm1155_vm4, %v1716_v54  ;;  %v595_v59 = vpop.f32.mrf.mxu0  ;;  %v707_v60 = vpop.f32.mrf.mxu1 }
 0x11c   : > { %v879_v61 = vsel %vm771_vm12, %v593_v51, %v825_v57  ;;  %v907_v62 = vsel %vm799_vm13, %v705_v52, %v853_v58  ;;  %v596_v63 = vadd.f32 %v2248_v32, %v595_v59  ;;  %v708_v0 = vadd.f32 %v2248_v32, %v707_v60 }
 0x11d   : > { %v1689_v1 = vpack.c.bf16 %v879_v61, %v879_v61  ;;  %v1717_v2 = vpack.c.bf16 %v907_v62, %v907_v62  ;;  %v1797_v3 = vpop.f32.mrf.mxu0  ;;  %v1853_v4 = vpop.f32.mrf.mxu1 }
 0x11e   : > { %vm772_vm14 = vcmp.ge.f32.partialorder %v596_v63, 0.0  ;;  %v826_v5 = vmul.f32 0.2, %v596_v63  ;;  %vm800_vm15 = vcmp.ge.f32.partialorder %v708_v0, 0.0  ;;  %v854_v6 = vmul.f32 0.2, %v708_v0 }
 0x11f   : > { %1168 = vst.msk [vmem:[%s2254_s12 + $0x30] sm:$0xf] %vm1155_vm4, %v1689_v1  ;;  %1196 = vst.msk [vmem:[%s2254_s12 + $0xa0] sm:$0xf] %vm1155_vm4, %v1717_v2  ;;  %v600_v7 = vpop.f32.mrf.mxu0  ;;  %v712_v8 = vpop.f32.mrf.mxu1 }
 0x120   : > { %v880_v9 = vsel %vm772_vm14, %v596_v63, %v826_v5  ;;  %v908_v10 = vsel %vm800_vm15, %v708_v0, %v854_v6  ;;  %v601_v11 = vadd.f32 %v2248_v32, %v600_v7  ;;  %v713_v12 = vadd.f32 %v2248_v32, %v712_v8 }
 0x121   : > { %v1690_v13 = vpack.c.bf16 %v880_v9, %v880_v9  ;;  %v1718_v14 = vpack.c.bf16 %v908_v10, %v908_v10  ;;  %v1800_v15 = vpop.f32.mrf.mxu0  ;;  %v1856_v16 = vpop.f32.mrf.mxu1 }
 0x122   : > { %vm773_vm0 = vcmp.ge.f32.partialorder %v601_v11, 0.0  ;;  %v827_v17 = vmul.f32 0.2, %v601_v11  ;;  %vm801_vm1 = vcmp.ge.f32.partialorder %v713_v12, 0.0  ;;  %v855_v18 = vmul.f32 0.2, %v713_v12 }
 0x123   : > { %1169 = vst.msk [vmem:[%s2254_s12 + $0x34] sm:$0xf] %vm1155_vm4, %v1690_v13  ;;  %1197 = vst.msk [vmem:[%s2254_s12 + $0xa4] sm:$0xf] %vm1155_vm4, %v1718_v14  ;;  %v603_v19 = vpop.f32.mrf.mxu0  ;;  %v715_v20 = vpop.f32.mrf.mxu1 }
 0x124   : > { %v881_v21 = vsel %vm773_vm0, %v601_v11, %v827_v17  ;;  %v909_v22 = vsel %vm801_vm1, %v713_v12, %v855_v18  ;;  %v604_v23 = vadd.f32 %v2248_v32, %v603_v19  ;;  %v716_v24 = vadd.f32 %v2248_v32, %v715_v20 }
 0x125   : > { %v1691_v25 = vpack.c.bf16 %v881_v21, %v881_v21  ;;  %v1719_v26 = vpack.c.bf16 %v909_v22, %v909_v22  ;;  %v1801_v27 = vpop.f32.mrf.mxu0  ;;  %v1857_v28 = vpop.f32.mrf.mxu1 }
 0x126   : > { %vm774_vm2 = vcmp.ge.f32.partialorder %v604_v23, 0.0  ;;  %v828_v29 = vmul.f32 0.2, %v604_v23  ;;  %vm802_vm3 = vcmp.ge.f32.partialorder %v716_v24, 0.0  ;;  %v856_v30 = vmul.f32 0.2, %v716_v24 }
 0x127   : > { %1170 = vst.msk [vmem:[%s2254_s12 + $0x38] sm:$0xf] %vm1155_vm4, %v1691_v25  ;;  %1198 = vst.msk [vmem:[%s2254_s12 + $0xa8] sm:$0xf] %vm1155_vm4, %v1719_v26  ;;  %v608_v31 = vpop.f32.mrf.mxu0  ;;  %v720_v33 = vpop.f32.mrf.mxu1 }
 0x128   : > { %v882_v34 = vsel %vm774_vm2, %v604_v23, %v828_v29  ;;  %v910_v35 = vsel %vm802_vm3, %v716_v24, %v856_v30  ;;  %v609_v36 = vadd.f32 %v2248_v32, %v608_v31  ;;  %v721_v37 = vadd.f32 %v2248_v32, %v720_v33 }
 0x129   : > { %v1692_v38 = vpack.c.bf16 %v882_v34, %v882_v34  ;;  %v1720_v39 = vpack.c.bf16 %v910_v35, %v910_v35  ;;  %v1804_v40 = vpop.f32.mrf.mxu0  ;;  %v1860_v41 = vpop.f32.mrf.mxu1 }
 0x12a   : > { %vm775_vm5 = vcmp.ge.f32.partialorder %v609_v36, 0.0  ;;  %v829_v42 = vmul.f32 0.2, %v609_v36  ;;  %vm803_vm6 = vcmp.ge.f32.partialorder %v721_v37, 0.0  ;;  %v857_v43 = vmul.f32 0.2, %v721_v37 }
 0x12b   : > { %1171 = vst.msk [vmem:[%s2254_s12 + $0x3c] sm:$0xf] %vm1155_vm4, %v1692_v38  ;;  %1199 = vst.msk [vmem:[%s2254_s12 + $0xac] sm:$0xf] %vm1155_vm4, %v1720_v39  ;;  %v611_v44 = vpop.f32.mrf.mxu0  ;;  %v723_v45 = vpop.f32.mrf.mxu1 }
 0x12c   : > { %v883_v46 = vsel %vm775_vm5, %v609_v36, %v829_v42  ;;  %v911_v47 = vsel %vm803_vm6, %v721_v37, %v857_v43  ;;  %v612_v48 = vadd.f32 %v2248_v32, %v611_v44  ;;  %v724_v49 = vadd.f32 %v2248_v32, %v723_v45 }
 0x12d   : > { %v1693_v50 = vpack.c.bf16 %v883_v46, %v883_v46  ;;  %v1721_v51 = vpack.c.bf16 %v911_v47, %v911_v47  ;;  %v1805_v52 = vpop.f32.mrf.mxu0  ;;  %v1861_v53 = vpop.f32.mrf.mxu1 }
 0x12e   : > { %vm776_vm7 = vcmp.ge.f32.partialorder %v612_v48, 0.0  ;;  %v830_v54 = vmul.f32 0.2, %v612_v48  ;;  %vm804_vm8 = vcmp.ge.f32.partialorder %v724_v49, 0.0  ;;  %v858_v55 = vmul.f32 0.2, %v724_v49 }
 0x12f   : > { %1172 = vst.msk [vmem:[%s2254_s12 + $0x40] sm:$0xf] %vm1155_vm4, %v1693_v50  ;;  %1200 = vst.msk [vmem:[%s2254_s12 + $0xb0] sm:$0xf] %vm1155_vm4, %v1721_v51  ;;  %v616_v56 = vpop.f32.mrf.mxu0  ;;  %v728_v57 = vpop.f32.mrf.mxu1 }
 0x130   : > { %v884_v58 = vsel %vm776_vm7, %v612_v48, %v830_v54  ;;  %v912_v59 = vsel %vm804_vm8, %v724_v49, %v858_v55  ;;  %v617_v60 = vadd.f32 %v2248_v32, %v616_v56  ;;  %v729_v61 = vadd.f32 %v2248_v32, %v728_v57 }
 0x131   : > { %v1694_v62 = vpack.c.bf16 %v884_v58, %v884_v58  ;;  %v1722_v63 = vpack.c.bf16 %v912_v59, %v912_v59  ;;  %v1808_v0 = vpop.f32.mrf.mxu0  ;;  %v1864_v1 = vpop.f32.mrf.mxu1 }
 0x132   : > { %vm777_vm9 = vcmp.ge.f32.partialorder %v617_v60, 0.0  ;;  %v831_v2 = vmul.f32 0.2, %v617_v60  ;;  %vm805_vm10 = vcmp.ge.f32.partialorder %v729_v61, 0.0  ;;  %v859_v3 = vmul.f32 0.2, %v729_v61 }
 0x133   : > { %1173 = vst.msk [vmem:[%s2254_s12 + $0x44] sm:$0xf] %vm1155_vm4, %v1694_v62  ;;  %1201 = vst.msk [vmem:[%s2254_s12 + $0xb4] sm:$0xf] %vm1155_vm4, %v1722_v63  ;;  %v619_v4 = vpop.f32.mrf.mxu0  ;;  %v731_v5 = vpop.f32.mrf.mxu1 }
 0x134   : > { %v885_v6 = vsel %vm777_vm9, %v617_v60, %v831_v2  ;;  %v913_v7 = vsel %vm805_vm10, %v729_v61, %v859_v3  ;;  %v620_v8 = vadd.f32 %v2248_v32, %v619_v4  ;;  %v732_v9 = vadd.f32 %v2248_v32, %v731_v5 }
 0x135   : > { %v1695_v10 = vpack.c.bf16 %v885_v6, %v885_v6  ;;  %v1723_v11 = vpack.c.bf16 %v913_v7, %v913_v7  ;;  %v1809_v12 = vpop.f32.mrf.mxu0  ;;  %v1865_v13 = vpop.f32.mrf.mxu1 }
 0x136   : > { %vm778_vm11 = vcmp.ge.f32.partialorder %v620_v8, 0.0  ;;  %v832_v14 = vmul.f32 0.2, %v620_v8  ;;  %vm806_vm12 = vcmp.ge.f32.partialorder %v732_v9, 0.0  ;;  %v860_v15 = vmul.f32 0.2, %v732_v9 }
 0x137   : > { %1174 = vst.msk [vmem:[%s2254_s12 + $0x48] sm:$0xf] %vm1155_vm4, %v1695_v10  ;;  %1202 = vst.msk [vmem:[%s2254_s12 + $0xb8] sm:$0xf] %vm1155_vm4, %v1723_v11  ;;  %v624_v16 = vpop.f32.mrf.mxu0  ;;  %v736_v17 = vpop.f32.mrf.mxu1 }
 0x138   : > { %v886_v18 = vsel %vm778_vm11, %v620_v8, %v832_v14  ;;  %v914_v19 = vsel %vm806_vm12, %v732_v9, %v860_v15  ;;  %v625_v20 = vadd.f32 %v2248_v32, %v624_v16  ;;  %v737_v21 = vadd.f32 %v2248_v32, %v736_v17 }
 0x139   : > { %v1696_v22 = vpack.c.bf16 %v886_v18, %v886_v18  ;;  %v1724_v23 = vpack.c.bf16 %v914_v19, %v914_v19  ;;  %v1812_v24 = vpop.f32.mrf.mxu0  ;;  %v1868_v25 = vpop.f32.mrf.mxu1 }
 0x13a   : > { %vm779_vm13 = vcmp.ge.f32.partialorder %v625_v20, 0.0  ;;  %v833_v26 = vmul.f32 0.2, %v625_v20  ;;  %vm807_vm14 = vcmp.ge.f32.partialorder %v737_v21, 0.0  ;;  %v861_v27 = vmul.f32 0.2, %v737_v21 }
 0x13b   : > { %1175 = vst.msk [vmem:[%s2254_s12 + $0x4c] sm:$0xf] %vm1155_vm4, %v1696_v22  ;;  %1203 = vst.msk [vmem:[%s2254_s12 + $0xbc] sm:$0xf] %vm1155_vm4, %v1724_v23  ;;  %v627_v28 = vpop.f32.mrf.mxu0  ;;  %v739_v29 = vpop.f32.mrf.mxu1 }
 0x13c   : > { %v887_v30 = vsel %vm779_vm13, %v625_v20, %v833_v26  ;;  %v915_v31 = vsel %vm807_vm14, %v737_v21, %v861_v27  ;;  %v628_v33 = vadd.f32 %v2248_v32, %v627_v28  ;;  %v740_v34 = vadd.f32 %v2248_v32, %v739_v29 }
 0x13d   : > { %v1697_v35 = vpack.c.bf16 %v887_v30, %v887_v30  ;;  %v1725_v36 = vpack.c.bf16 %v915_v31, %v915_v31  ;;  %v1813_v37 = vpop.f32.mrf.mxu0  ;;  %v1869_v38 = vpop.f32.mrf.mxu1 }
 0x13e   : > { %vm780_vm15 = vcmp.ge.f32.partialorder %v628_v33, 0.0  ;;  %v834_v39 = vmul.f32 0.2, %v628_v33  ;;  %vm808_vm0 = vcmp.ge.f32.partialorder %v740_v34, 0.0  ;;  %v862_v40 = vmul.f32 0.2, %v740_v34 }
 0x13f   : > { %1176 = vst.msk [vmem:[%s2254_s12 + $0x50] sm:$0xf] %vm1155_vm4, %v1697_v35  ;;  %1204 = vst.msk [vmem:[%s2254_s12 + $0xc0] sm:$0xf] %vm1155_vm4, %v1725_v36  ;;  %v632_v41 = vpop.f32.mrf.mxu0  ;;  %v744_v42 = vpop.f32.mrf.mxu1 }
 0x140   : > { %v888_v43 = vsel %vm780_vm15, %v628_v33, %v834_v39  ;;  %v916_v44 = vsel %vm808_vm0, %v740_v34, %v862_v40  ;;  %v633_v45 = vadd.f32 %v2248_v32, %v632_v41  ;;  %v745_v46 = vadd.f32 %v2248_v32, %v744_v42  ;;  %v1242_v42 = vld [vmem:[%s2254_s12 + $0x8] sm:$0xf] (%p2103_p5) }
 0x141   : > { %v1698_v47 = vpack.c.bf16 %v888_v43, %v888_v43  ;;  %v1726_v48 = vpack.c.bf16 %v916_v44, %v916_v44  ;;  %v1816_v49 = vpop.f32.mrf.mxu0  ;;  %v1872_v50 = vpop.f32.mrf.mxu1  ;;  %v1244_v43 = vld [vmem:[%s2254_s12 + $0xc] sm:$0xff] (%p2103_p5)   ;;  %v1248_v44 = vld [vmem:[%s2254_s12 + $0x14] sm:$0xf] (%p2103_p5)  ;;  %1243 = vst [vmem:[%s2436_s29 + $0x8] sm:$0xf] (%p2103_p5), %v1242_v42 }
 0x142   : > { %vm781_vm1 = vcmp.ge.f32.partialorder %v633_v45, 0.0  ;;  %v835_v51 = vmul.f32 0.2, %v633_v45  ;;  %vm809_vm2 = vcmp.ge.f32.partialorder %v745_v46, 0.0  ;;  %v863_v52 = vmul.f32 0.2, %v745_v46 }
 0x143   : > { %1177 = vst.msk [vmem:[%s2254_s12 + $0x54] sm:$0xf] %vm1155_vm4, %v1698_v47  ;;  %1205 = vst.msk [vmem:[%s2254_s12 + $0xc4] sm:$0xf] %vm1155_vm4, %v1726_v48  ;;  %v635_v53 = vpop.f32.mrf.mxu0  ;;  %v747_v54 = vpop.f32.mrf.mxu1  ;;  %v1256_v47 = vld [vmem:[%s2254_s12 + $0x24] sm:$0xff] (%p2103_p5)   ;;  %v1262_v49 = vld [vmem:[%s2254_s12 + $0x30] sm:$0xff] (%p2103_p5)  }
 0x144   : > { %v889_v55 = vsel %vm781_vm1, %v633_v45, %v835_v51  ;;  %v917_v56 = vsel %vm809_vm2, %v745_v46, %v863_v52  ;;  %v636_v57 = vadd.f32 %v2248_v32, %v635_v53  ;;  %v748_v58 = vadd.f32 %v2248_v32, %v747_v54  ;;  %v1250_v45 = vld [vmem:[%s2254_s12 + $0x18] sm:$0xff] (%p2103_p5)   ;;  %v1254_v46 = vld [vmem:[%s2254_s12 + $0x20] sm:$0xf] (%p2103_p5)  ;;  %v1260_v48 = vld [vmem:[%s2254_s12 + $0x2c] sm:$0xf] (%p2103_p5)  ;;  %1245 = vst [vmem:[%s2436_s29 + $0x24] sm:$0xff] (%p2103_p5), %v1244_v43  }
 0x145   : > { %v1699_v59 = vpack.c.bf16 %v889_v55, %v889_v55  ;;  %v1727_v60 = vpack.c.bf16 %v917_v56, %v917_v56  ;;  %v1817_v61 = vpop.f32.mrf.mxu0  ;;  %v1873_v62 = vpop.f32.mrf.mxu1  ;;  %v1266_v50 = vld [vmem:[%s2254_s12 + $0x38] sm:$0xf] (%p2103_p5)  ;;  %v1268_v51 = vld [vmem:[%s2254_s12 + $0x3c] sm:$0xff] (%p2103_p5)   ;;  %v1272_v52 = vld [vmem:[%s2254_s12 + $0x44] sm:$0xf] (%p2103_p5)  ;;  %1251 = vst [vmem:[%s2436_s29 + $0x48] sm:$0xff] (%p2103_p5), %v1250_v45  }
 0x146   : > { %vm782_vm3 = vcmp.ge.f32.partialorder %v636_v57, 0.0  ;;  %v836_v63 = vmul.f32 0.2, %v636_v57  ;;  %vm810_vm5 = vcmp.ge.f32.partialorder %v748_v58, 0.0  ;;  %v864_v0 = vmul.f32 0.2, %v748_v58 }
 0x147   : > { %1178 = vst.msk [vmem:[%s2254_s12 + $0x58] sm:$0xf] %vm1155_vm4, %v1699_v59  ;;  %1206 = vst.msk [vmem:[%s2254_s12 + $0xc8] sm:$0xf] %vm1155_vm4, %v1727_v60  ;;  %v640_v1 = vpop.f32.mrf.mxu0  ;;  %v752_v2 = vpop.f32.mrf.mxu1  ;;  %v1274_v53 = vld [vmem:[%s2254_s12 + $0x48] sm:$0xff] (%p2103_p5)   ;;  %v1298_v61 = vld [vmem:[%s2254_s12 + $0x78] sm:$0xff] (%p2103_p5)  }
 0x148   : > { %v890_v3 = vsel %vm782_vm3, %v636_v57, %v836_v63  ;;  %v918_v4 = vsel %vm810_vm5, %v748_v58, %v864_v0  ;;  %v641_v5 = vadd.f32 %v2248_v32, %v640_v1  ;;  %v753_v6 = vadd.f32 %v2248_v32, %v752_v2  ;;  %v1278_v54 = vld [vmem:[%s2254_s12 + $0x50] sm:$0xf] (%p2103_p5)  ;;  %1249 = vst [vmem:[%s2436_s29 + $0x2c] sm:$0xf] (%p2103_p5), %v1248_v44  ;;  %v1296_v60 = vld [vmem:[%s2254_s12 + $0x74] sm:$0xf] (%p2103_p5) }
 0x149   : > { %v1700_v7 = vpack.c.bf16 %v890_v3, %v890_v3  ;;  %v1728_v8 = vpack.c.bf16 %v918_v4, %v918_v4  ;;  %v1820_v9 = vpop.f32.mrf.mxu0  ;;  %v1876_v10 = vpop.f32.mrf.mxu1  ;;  %1255 = vst [vmem:[%s2436_s29 + $0x50] sm:$0xf] (%p2103_p5), %v1254_v46  ;;  %1257 = vst [vmem:[%s2436_s29 + $0x6c] sm:$0xff] (%p2103_p5), %v1256_v47   ;;  %v1302_v62 = vld [vmem:[%s2254_s12 + $0x80] sm:$0xf] (%p2103_p5)  ;;  %v1304_v63 = vld [vmem:[%s2254_s12 + $0x84] sm:$0xff] (%p2103_p5)  }
 0x14a   : > { %vm783_vm6 = vcmp.ge.f32.partialorder %v641_v5, 0.0  ;;  %v837_v11 = vmul.f32 0.2, %v641_v5  ;;  %vm811_vm7 = vcmp.ge.f32.partialorder %v753_v6, 0.0  ;;  %v865_v12 = vmul.f32 0.2, %v753_v6 }
 0x14b   : > { %1179 = vst.msk [vmem:[%s2254_s12 + $0x5c] sm:$0xf] %vm1155_vm4, %v1700_v7  ;;  %1207 = vst.msk [vmem:[%s2254_s12 + $0xcc] sm:$0xf] %vm1155_vm4, %v1728_v8  ;;  %v643_v13 = vpop.f32.mrf.mxu0  ;;  %v755_v14 = vpop.f32.mrf.mxu1  ;;  %v1308_v0 = vld [vmem:[%s2254_s12 + $0x8c] sm:$0xf] (%p2103_p5) }
 0x14c   : > { %v891_v15 = vsel %vm783_vm6, %v641_v5, %v837_v11  ;;  %v919_v16 = vsel %vm811_vm7, %v753_v6, %v865_v12  ;;  %v644_v17 = vadd.f32 %v2248_v32, %v643_v13  ;;  %v756_v18 = vadd.f32 %v2248_v32, %v755_v14  ;;  %1261 = vst [vmem:[%s2436_s29 + $0x74] sm:$0xf] (%p2103_p5), %v1260_v48  ;;  %v1310_v1 = vld [vmem:[%s2254_s12 + $0x90] sm:$0xff] (%p2103_p5)   ;;  %v1314_v2 = vld [vmem:[%s2254_s12 + $0x98] sm:$0xf] (%p2103_p5)  ;;  %v1316_v3 = vld [vmem:[%s2254_s12 + $0x9c] sm:$0xff] (%p2103_p5)  }
 0x14d   : > { %v1701_v19 = vpack.c.bf16 %v891_v15, %v891_v15  ;;  %v1729_v20 = vpack.c.bf16 %v919_v16, %v919_v16  ;;  %v1821_v21 = vpop.f32.mrf.mxu0  ;;  %v1877_v22 = vpop.f32.mrf.mxu1  ;;  %1263 = vst [vmem:[%s2436_s29 + $0x90] sm:$0xff] (%p2103_p5), %v1262_v49   ;;  %1267 = vst [vmem:[%s2436_s29 + $0x98] sm:$0xf] (%p2103_p5), %v1266_v50  ;;  %v1320_v4 = vld [vmem:[%s2254_s12 + $0xa4] sm:$0xf] (%p2103_p5)  ;;  %v1322_v5 = vld [vmem:[%s2254_s12 + $0xa8] sm:$0xff] (%p2103_p5)  }
 0x14e   : > { %vm784_vm8 = vcmp.ge.f32.partialorder %v644_v17, 0.0  ;;  %v838_v23 = vmul.f32 0.2, %v644_v17  ;;  %vm812_vm9 = vcmp.ge.f32.partialorder %v756_v18, 0.0  ;;  %v866_v24 = vmul.f32 0.2, %v756_v18 }
 0x14f   : > { %1180 = vst.msk [vmem:[%s2254_s12 + $0x60] sm:$0xf] %vm1155_vm4, %v1701_v19  ;;  %1208 = vst.msk [vmem:[%s2254_s12 + $0xd0] sm:$0xf] %vm1155_vm4, %v1729_v20  ;;  %v648_v25 = vpop.f32.mrf.mxu0  ;;  %v1280_v55 = vld [vmem:[%s2254_s12 + $0x54] sm:$0xff] (%p2103_p5)   ;;  %v1334_v9 = vld [vmem:[%s2254_s12 + $0xc0] sm:$0xff] (%p2103_p5)  }
 0x150   : > { %v892_v26 = vsel %vm784_vm8, %v644_v17, %v838_v23  ;;  %v920_v27 = vsel %vm812_vm9, %v756_v18, %v866_v24  ;;  %v649_v28 = vadd.f32 %v2248_v32, %v648_v25  ;;  %1269 = vst [vmem:[%s2436_s29 + $0xb4] sm:$0xff] (%p2103_p5), %v1268_v51   ;;  %1273 = vst [vmem:[%s2436_s29 + $0xbc] sm:$0xf] (%p2103_p5), %v1272_v52  ;;  %v1326_v6 = vld [vmem:[%s2254_s12 + $0xb0] sm:$0xf] (%p2103_p5)  ;;  %v1328_v7 = vld [vmem:[%s2254_s12 + $0xb4] sm:$0xff] (%p2103_p5)  }
 0x151   : > { %v1702_v29 = vpack.c.bf16 %v892_v26, %v892_v26  ;;  %v1730_v30 = vpack.c.bf16 %v920_v27, %v920_v27  ;;  %v1824_v31 = vpop.f32.mrf.mxu0  ;;  %1275 = vst [vmem:[%s2436_s29 + $0xd8] sm:$0xff] (%p2103_p5), %v1274_v53   ;;  %1279 = vst [vmem:[%s2436_s29 + $0xe0] sm:$0xf] (%p2103_p5), %v1278_v54  ;;  %v1332_v8 = vld [vmem:[%s2254_s12 + $0xbc] sm:$0xf] (%p2103_p5) }
 0x152   : > { %vm785_vm10 = vcmp.ge.f32.partialorder %v649_v28, 0.0  ;;  %v839_v33 = vmul.f32 0.2, %v649_v28  ;;  %v1284_v56 = vld [vmem:[%s2254_s12 + $0x5c] sm:$0xf] (%p2103_p5)  ;;  %1281 = vst [vmem:[%s2436_s29 + $0xfc] sm:$0xff] (%p2103_p5), %v1280_v55  }
 0x153   : > { %1181 = vst.msk [vmem:[%s2254_s12 + $0x64] sm:$0xf] %vm1155_vm4, %v1702_v29  ;;  %1209 = vst.msk [vmem:[%s2254_s12 + $0xd4] sm:$0xf] %vm1155_vm4, %v1730_v30  ;;  %v651_v34 = vpop.f32.mrf.mxu0  ;;  %v1338_v10 = vld [vmem:[%s2254_s12 + $0xc8] sm:$0xf] (%p2103_p5) }
 0x154   : > { %v893_v35 = vsel %vm785_vm10, %v649_v28, %v839_v33  ;;  %v652_v36 = vadd.f32 %v2248_v32, %v651_v34  ;;  %v1238_v32 = vld [vmem:[%s2254_s12] sm:$0xff] (%p2103_p5)   ;;  %1285 = vst [vmem:[%s2436_s29 + $0x104] sm:$0xf] (%p2103_p5), %v1284_v56  ;;  %1297 = vst [vmem:[%s2436_s29 + $0x14c] sm:$0xf] (%p2103_p5), %v1296_v60 }
 0x155   : > { %v1703_v37 = vpack.c.bf16 %v893_v35, %v893_v35  ;;  %v1825_v38 = vpop.f32.mrf.mxu0  ;;  %1239 = vst [vmem:[%s2436_s29] sm:$0xff] (%p2103_p5), %v1238_v32   ;;  %1299 = vst [vmem:[%s2436_s29 + $0x168] sm:$0xff] (%p2103_p5), %v1298_v61  }
 0x156   : > { %vm786_vm11 = vcmp.ge.f32.partialorder %v652_v36, 0.0  ;;  %v840_v39 = vmul.f32 0.2, %v652_v36  ;;  %1303 = vst [vmem:[%s2436_s29 + $0x170] sm:$0xf] (%p2103_p5), %v1302_v62  ;;  %1305 = vst [vmem:[%s2436_s29 + $0x18c] sm:$0xff] (%p2103_p5), %v1304_v63  }
 0x157   : > { %1182 = vst.msk [vmem:[%s2254_s12 + $0x68] sm:$0xf] %vm1155_vm4, %v1703_v37  ;;  %1216 = sbr.rel (!%p2103_p5) target bundleno = 356 (0x164), region = 36  ;;  %1309 = vst [vmem:[%s2436_s29 + $0x194] sm:$0xf] (%p2103_p5), %v1308_v0  ;;  %v1340_v11 = vld [vmem:[%s2254_s12 + $0xcc] sm:$0xff] (%p2103_p5)  }
 0x158   : > { %v894_v40 = vsel %vm786_vm11, %v652_v36, %v840_v39  ;;  %1311 = vst [vmem:[%s2436_s29 + $0x1b0] sm:$0xff] (%p2103_p5), %v1310_v1   ;;  %1315 = vst [vmem:[%s2436_s29 + $0x1b8] sm:$0xf] (%p2103_p5), %v1314_v2 }
 0x159   : > { %v1704_v41 = vpack.c.bf16 %v894_v40, %v894_v40  ;;  %1317 = vst [vmem:[%s2436_s29 + $0x1d4] sm:$0xff] (%p2103_p5), %v1316_v3   ;;  %1321 = vst [vmem:[%s2436_s29 + $0x1dc] sm:$0xf] (%p2103_p5), %v1320_v4 }
 0x15a   : > { %v1286_v57 = vld [vmem:[%s2254_s12 + $0x60] sm:$0xff] (%p2103_p5)   ;;  %1323 = vst [vmem:[%s2436_s29 + $0x1f8] sm:$0xff] (%p2103_p5), %v1322_v5   ;;  %1327 = vst [vmem:[%s2436_s29 + $0x200] sm:$0xf] (%p2103_p5), %v1326_v6  ;;  %v1344_v12 = vld [vmem:[%s2254_s12 + $0xd4] sm:$0xf] (%p2103_p5) }
 0x15b   : > { %1183 = vst.msk [vmem:[%s2254_s12 + $0x6c] sm:$0xf] %vm1155_vm4, %v1704_v41  ;;  %1287 = vst [vmem:[%s2436_s29 + $0x120] sm:$0xff] (%p2103_p5), %v1286_v57  }
 0x15c   : > { %1329 = vst [vmem:[%s2436_s29 + $0x21c] sm:$0xff] %v1328_v7   ;;  %1333 = vst [vmem:[%s2436_s29 + $0x224] sm:$0xf] %v1332_v8 }
 0x15d   : > { %1335 = vst [vmem:[%s2436_s29 + $0x240] sm:$0xff] %v1334_v9   ;;  %1339 = vst [vmem:[%s2436_s29 + $0x248] sm:$0xf] %v1338_v10 }
 0x15e   : > { %v1290_v58 = vld [vmem:[%s2254_s12 + $0x68] sm:$0xf]  ;;  %1341 = vst [vmem:[%s2436_s29 + $0x264] sm:$0xff] %v1340_v11   ;;  %1345 = vst [vmem:[%s2436_s29 + $0x26c] sm:$0xf] %v1344_v12 }
 0x15f   : > { %1291 = vst [vmem:[%s2436_s29 + $0x128] sm:$0xf] %v1290_v58 }
 0x162   : > { %v1292_v59 = vld [vmem:[%s2254_s12 + $0x6c] sm:$0xff]  }
 0x163   : > { %1293 = vst [vmem:[%s2436_s29 + $0x144] sm:$0xff] %v1292_v59  }
 0x164 PF: > { %s13_s18 = sadd.s32 1, %s2033_s18   ;;  %s2521_s12 = smov %s2013_s13 }
 0x165   : > { %p10_p11 = scmp.ge.s32.totalorder %s13_s18, 8   ;;  %s2522_s13 = smov %s2114_s27 }
 0x166   : > { %s2523_s14 = smov %s2025_s16  ;;  %s2524_s15 = smov %s2029_s17 }
 0x167   : > { %s2525_s16 = smov %s2528_s19  ;;  %s2526_s17 = smov %s2532_s20 }
 0x168   :  { %12 = sbr.rel (!%p10_p11) target bundleno = 4 (0x4), region = 106 }

// kernel: tile.53
= control target key start
LH: loop header
LB: loop body
LE: loop exit
PB: predicated region body
PF: predicated region fallthrough
CT: control target
= control target key end

     0   :  { %s22_s0 = inlined_call_operand.vmem [shape: f32[5], index: 0, kind: input, shape index: {}]   ;;  %s23_s1 = inlined_call_operand.vmem [shape: f32[4,5], index: 1, kind: output, shape index: {}]  }
   0x1   :  { %v4_v0 = vld [vmem:[%s22_s0] ss:$0 sm:$0xff] }
   0x2   :  { %5 = vst [vmem:[%s23_s1] sm:$0xf] %v4_v0 }

// kernel: tile.54
= control target key start
LH: loop header
LB: loop body
LE: loop exit
PB: predicated region body
PF: predicated region fallthrough
CT: control target
= control target key end

     0   :  { %vm8_vm0 = vcmask 39936   ;;  %s40_s8 = smov 5   ;;  %s41_s9 = smov 10   ;;  %vm14_vm1 = vcmask 162936   ;;  %vm20_vm2 = vcmask 121936   ;;  %vm26_vm3 = vcmask 80936   ;;  %s58_s0 = inlined_call_operand.vmem [shape: f32[4,5], index: 0, kind: input, shape index: {}]   ;;  %s59_s1 = inlined_call_operand.vmem [shape: f32[20], index: 1, kind: output, shape index: {}]  }
   0x1   :  { %v5_v0 = vld [vmem:[%s58_s0] sm:$0xf]  ;;  %s39_s0 = smov 15  }
   0x2   :  { %6 = vst [vmem:[#allocation1] sm:$0xf] %v5_v0 }
   0x9   :  { %v11_v1 = vld [vmem:[#allocation1 + $0x3] sm:$0x1]   ;;  %v23_v2 = vld [vmem:[#allocation1 + $0x1] sm:$0x1]   ;;  %v7_v3 = vld [vmem:[#allocation1] sm:$0x1]  }
   0xa   :  { %12 = vrot.lane.b32.xlu0 %v11_v1, %s39_s0  ;;  %24 = vrot.lane.b32.xlu1 %v23_v2, %s40_s8  ;;  %v17_v4 = vld [vmem:[#allocation1 + $0x2] sm:$0x1]   ;;  %9 = vst.msk [vmem:[#allocation0] sm:$0x1] %vm8_vm0, %v7_v3  }
   0xe   :  { %18 = vrot.lane.b32.xlu0 %v17_v4, %s41_s9 }
  0x7c   :  { %v13_v5 = vpop.permute.xlu0 %12   ;;  %v25_v6 = vpop.permute.xlu1 %24  }
  0x7d   :  { %15 = vst.msk [vmem:[#allocation0] sm:$0x1] %vm14_vm1, %v13_v5  }
  0x80   :  { %v19_v7 = vpop.permute.xlu0 %18  }
  0x81   :  { %21 = vst.msk [vmem:[#allocation0] sm:$0x1] %vm20_vm2, %v19_v7  }
  0x82   :  { %27 = vst.msk [vmem:[#allocation0] sm:$0x1] %vm26_vm3, %v25_v6  }
  0x89   :  { %v32_v8 = vld [vmem:[#allocation0] sm:$0x1] }
  0x8a   :  { %35 = vst [vmem:[%s59_s1] sm:$0x1] %v32_v8 }

// kernel: conv_autoencoder_forward.15
= control target key start
LH: loop header
LB: loop body
LE: loop exit
PB: predicated region body
PF: predicated region fallthrough
CT: control target
= control target key end

     0   :  { %s3945_s12 = smov 0   ;;  %s4411_s0 = inlined_call_operand.vmem [shape: bf16[1376,512], index: 0, kind: input, shape index: {}]   ;;  %s4412_s1 = inlined_call_operand.vmem [shape: bf16[512,128], index: 1, kind: input, shape index: {}]   ;;  %s4413_s2 = inlined_call_operand.vmem [shape: f32[1,128], index: 2, kind: input, shape index: {}]   ;;  %s4414_s3 = inlined_call_operand.vmem [shape: bf16[1376,128], index: 3, kind: output, shape index: {}]  }
   0x1 LB: > { %s2799_s13 = sadd.s32 4294967295, %s3922_s12   ;;  %p2803_p0 = scmp.ge.s32.totalorder %s3922_s12, 1  ;;  %s3922_s12 = sphi %s3945_s12, %s13_s12  }
   0x2   : > { %p139_p1 = scmp.lt.s32.totalorder %s3922_s12, 3 }
   0x4   : > { %p140_p2 = pnand %p2803_p0, %p139_p1 }
   0x5   : > { %s164_s7 = smul.u32 (!%p140_p2), 86, %s2799_s13 }
   0x6   : > { %143 = sbr.rel (%p140_p2) target bundleno = 630 (0x276), region = 32 }
   0x7   : > { %p165_p3 = scmp.lt.s32.totalorder (!%p140_p2), %s164_s7, 171 }
   0xb   : > { %v3453_v0 = vld [vmem:[%s4412_s1 + $0x38] sm:$0xff]   ;;  %v3924_v1 = vmov 0   ;;  %v3455_v3 = vld [vmem:[%s4412_s1 + $0x30] sm:$0xff]   ;;  %v3457_v5 = vld [vmem:[%s4412_s1 + $0x28] sm:$0xff]   ;;  %s4416_s7 = smov (!%p165_p3, %s164_s7), 171 }
   0xc   : > { %1473 = vmatprep.subr.bf16.mxu0 %v3924_v1  ;;  %1850 = vmatprep.subr.bf16.mxu1 %v3924_v1  ;;  %v3454_v2 = vld [vmem:[%s4412_s1 + $0xb8] sm:$0xff]   ;;  %v3456_v4 = vld [vmem:[%s4412_s1 + $0xb0] sm:$0xff]   ;;  %v3458_v6 = vld [vmem:[%s4412_s1 + $0xa8] sm:$0xff]   ;;  %s3100_s21 = sshll.u32 %s4416_s7, 4  ;;  %s2806_s9 = sshll.u32 %s4416_s7, 2 }
   0xd   : > { %1474 = vmatpush1.bf16.msra.mxu0 %v3453_v0  ;;  %1851 = vmatpush1.bf16.msra.mxu1 %v3454_v2  ;;  %v3459_v7 = vld [vmem:[%s4412_s1 + $0x20] sm:$0xff]   ;;  %v3461_v9 = vld [vmem:[%s4412_s1 + $0x18] sm:$0xff]   ;;  %v3463_v11 = vld [vmem:[%s4412_s1 + $0x10] sm:$0xff]   ;;  %s4028_s26 = scalar_lea.vmem %s4411_s0, %s3100_s21  ;;  %s4219_s14 = scalar_lea.vmem %s4414_s3, %s2806_s9 }
   0xe   : > { %1475 = vmatprep.subr.bf16.mxu0 %v3924_v1  ;;  %1852 = vmatprep.subr.bf16.mxu1 %v3924_v1  ;;  %v3460_v8 = vld [vmem:[%s4412_s1 + $0xa0] sm:$0xff]   ;;  %v3462_v10 = vld [vmem:[%s4412_s1 + $0x98] sm:$0xff]   ;;  %v3464_v12 = vld [vmem:[%s4412_s1 + $0x90] sm:$0xff]  }
   0xf   : > { %v3465_v13 = vld [vmem:[%s4412_s1 + $0x8] sm:$0xff]   ;;  %v3467_v15 = vld [vmem:[%s4412_s1] sm:$0xff]   ;;  %v3469_v17 = vld [vmem:[%s4412_s1 + $0x78] sm:$0xff]  }
  0x10   : > { %v3466_v14 = vld [vmem:[%s4412_s1 + $0x88] sm:$0xff]   ;;  %v3468_v16 = vld [vmem:[%s4412_s1 + $0x80] sm:$0xff]   ;;  %v3470_v18 = vld [vmem:[%s4412_s1 + $0xf8] sm:$0xff]  }
  0x11   : > { %1476 = vmatpush1.bf16.msra.mxu0 %v3455_v3  ;;  %1853 = vmatpush1.bf16.msra.mxu1 %v3456_v4  ;;  %v3487_v19 = vld [vmem:[%s4028_s26 + $0x4] ss:$16 sps:$4 sm:$0xff]   ;;  %v3490_v21 = vld [vmem:[%s4028_s26 + $0xc] ss:$16 sps:$4 sm:$0xff]   ;;  %v3485_v35 = vld [vmem:[%s4028_s26] ss:$16 sps:$4 sm:$0xff]  }
  0x12   : > { %1477 = vmatprep.subr.bf16.mxu0 %v3924_v1  ;;  %1854 = vmatprep.subr.bf16.mxu1 %v3924_v1  ;;  %v3471_v20 = vld [vmem:[%s4412_s1 + $0x70] sm:$0xff]   ;;  %v3473_v23 = vld [vmem:[%s4412_s1 + $0x68] sm:$0xff]   ;;  %v3475_v25 = vld [vmem:[%s4412_s1 + $0x60] sm:$0xff]  }
  0x13   : > { %v3472_v22 = vld [vmem:[%s4412_s1 + $0xf0] sm:$0xff]   ;;  %1505 = vmatprep.mubr.bf16.mxu0 %v3487_v19  ;;  %1882 = vmatprep.mubr.bf16.mxu1 %v3490_v21  ;;  %v3474_v24 = vld [vmem:[%s4412_s1 + $0xe8] sm:$0xff]   ;;  %v3476_v26 = vld [vmem:[%s4412_s1 + $0xe0] sm:$0xff]  }
  0x14   : > { %v3477_v27 = vld [vmem:[%s4412_s1 + $0x58] sm:$0xff]   ;;  %v3479_v29 = vld [vmem:[%s4412_s1 + $0x50] sm:$0xff]   ;;  %v3481_v31 = vld [vmem:[%s4412_s1 + $0x48] sm:$0xff]  }
  0x15   : > { %1478 = vmatpush1.bf16.msra.mxu0 %v3457_v5  ;;  %1855 = vmatpush1.bf16.msra.mxu1 %v3458_v6  ;;  %v3478_v28 = vld [vmem:[%s4412_s1 + $0xd8] sm:$0xff]   ;;  %v3480_v30 = vld [vmem:[%s4412_s1 + $0xd0] sm:$0xff]   ;;  %v3482_v32 = vld [vmem:[%s4412_s1 + $0xc8] sm:$0xff]  }
  0x16   : > { %1479 = vmatprep.subr.bf16.mxu0 %v3924_v1  ;;  %1856 = vmatprep.subr.bf16.mxu1 %v3924_v1  ;;  %v3483_v33 = vld [vmem:[%s4412_s1 + $0x40] sm:$0xff]   ;;  %v3488_v36 = vld [vmem:[%s4028_s26 + $0x8] ss:$16 sps:$4 sm:$0xff]   ;;  %v3493_v38 = vld [vmem:[%s4028_s26 + $0x2c] ss:$16 sps:$4 sm:$0xff]  }
  0x17   : > { %v3484_v34 = vld [vmem:[%s4412_s1 + $0xc0] sm:$0xff]   ;;  %v3496_v40 = vld [vmem:[%s4028_s26 + $0x28] ss:$16 sps:$4 sm:$0xff]   ;;  %v3499_v42 = vld [vmem:[%s4028_s26 + $0x4c] ss:$16 sps:$4 sm:$0xff]  }
  0x18   : > { %v3491_v37 = vld [vmem:[%s4028_s26 + $0x24] ss:$16 sps:$4 sm:$0xff]   ;;  %v3495_v39 = vld [vmem:[%s4028_s26 + $0x20] ss:$16 sps:$4 sm:$0xff]   ;;  %v3502_v44 = vld [vmem:[%s4028_s26 + $0x48] ss:$16 sps:$4 sm:$0xff]  }
  0x19   : > { %1480 = vmatpush1.bf16.msra.mxu0 %v3459_v7  ;;  %1857 = vmatpush1.bf16.msra.mxu1 %v3460_v8  ;;  %v3497_v41 = vld [vmem:[%s4028_s26 + $0x44] ss:$16 sps:$4 sm:$0xff]   ;;  %v3501_v43 = vld [vmem:[%s4028_s26 + $0x40] ss:$16 sps:$4 sm:$0xff]   ;;  %v3505_v46 = vld [vmem:[%s4028_s26 + $0x6c] ss:$16 sps:$4 sm:$0xff]  }
  0x1a   : > { %1481 = vmatprep.subr.bf16.mxu0 %v3924_v1  ;;  %1858 = vmatprep.subr.bf16.mxu1 %v3924_v1  ;;  %v3503_v45 = vld [vmem:[%s4028_s26 + $0x64] ss:$16 sps:$4 sm:$0xff]   ;;  %v3507_v47 = vld [vmem:[%s4028_s26 + $0x60] ss:$16 sps:$4 sm:$0xff]   ;;  %v3508_v48 = vld [vmem:[%s4028_s26 + $0x68] ss:$16 sps:$4 sm:$0xff]  }
  0x1b   : > { %v3509_v49 = vld [vmem:[%s4028_s26 + $0x84] ss:$16 sps:$4 sm:$0xff]   ;;  %v3511_v50 = vld [vmem:[%s4028_s26 + $0x8c] ss:$16 sps:$4 sm:$0xff]   ;;  %v3513_v51 = vld [vmem:[%s4028_s26 + $0x80] ss:$16 sps:$4 sm:$0xff]  }
  0x1c   : > { %v3514_v52 = vld [vmem:[%s4028_s26 + $0x88] ss:$16 sps:$4 sm:$0xff]   ;;  %v3515_v53 = vld [vmem:[%s4028_s26 + $0xa4] ss:$16 sps:$4 sm:$0xff]   ;;  %v3517_v54 = vld [vmem:[%s4028_s26 + $0xac] ss:$16 sps:$4 sm:$0xff]  }
  0x1d   : > { %1482 = vmatpush1.bf16.msra.mxu0 %v3461_v9  ;;  %1859 = vmatpush1.bf16.msra.mxu1 %v3462_v10  ;;  %v3519_v55 = vld [vmem:[%s4028_s26 + $0xa0] ss:$16 sps:$4 sm:$0xff]   ;;  %v3520_v56 = vld [vmem:[%s4028_s26 + $0xa8] ss:$16 sps:$4 sm:$0xff]   ;;  %v3521_v57 = vld [vmem:[%s4028_s26 + $0xc4] ss:$16 sps:$4 sm:$0xff]  }
  0x1e   : > { %1483 = vmatprep.subr.bf16.mxu0 %v3924_v1  ;;  %1860 = vmatprep.subr.bf16.mxu1 %v3924_v1  ;;  %v3523_v58 = vld [vmem:[%s4028_s26 + $0xcc] ss:$16 sps:$4 sm:$0xff]   ;;  %v3525_v59 = vld [vmem:[%s4028_s26 + $0xc0] ss:$16 sps:$4 sm:$0xff]   ;;  %v3526_v60 = vld [vmem:[%s4028_s26 + $0xc8] ss:$16 sps:$4 sm:$0xff]  }
  0x1f   : > { %v3527_v61 = vld [vmem:[%s4028_s26 + $0xe4] ss:$16 sps:$4 sm:$0xff]   ;;  %v3529_v62 = vld [vmem:[%s4028_s26 + $0xec] ss:$16 sps:$4 sm:$0xff]   ;;  %v3531_v63 = vld [vmem:[%s4028_s26 + $0xe0] ss:$16 sps:$4 sm:$0xff]  }
  0x20   : > { %v3532_v0 = vld [vmem:[%s4028_s26 + $0xe8] ss:$16 sps:$4 sm:$0xff]   ;;  %v3535_v2 = vld [vmem:[%s4028_s26 + $0x10c] ss:$16 sps:$4 sm:$0xff]   ;;  %v3537_v3 = vld [vmem:[%s4028_s26 + $0x100] ss:$16 sps:$4 sm:$0xff]  }
  0x21   : > { %1484 = vmatpush1.bf16.msra.mxu0 %v3463_v11  ;;  %1861 = vmatpush1.bf16.msra.mxu1 %v3464_v12  ;;  %v3538_v4 = vld [vmem:[%s4028_s26 + $0x108] ss:$16 sps:$4 sm:$0xff]   ;;  %v3539_v5 = vld [vmem:[%s4028_s26 + $0x124] ss:$16 sps:$4 sm:$0xff]   ;;  %v3541_v6 = vld [vmem:[%s4028_s26 + $0x12c] ss:$16 sps:$4 sm:$0xff]  }
  0x22   : > { %1485 = vmatprep.subr.bf16.mxu0 %v3924_v1  ;;  %1862 = vmatprep.subr.bf16.mxu1 %v3924_v1  ;;  %v3543_v7 = vld [vmem:[%s4028_s26 + $0x120] ss:$16 sps:$4 sm:$0xff]   ;;  %v3544_v8 = vld [vmem:[%s4028_s26 + $0x128] ss:$16 sps:$4 sm:$0xff]   ;;  %v3545_v9 = vld [vmem:[%s4028_s26 + $0x144] ss:$16 sps:$4 sm:$0xff]  }
  0x23   : > { %v3547_v10 = vld [vmem:[%s4028_s26 + $0x14c] ss:$16 sps:$4 sm:$0xff]   ;;  %v3549_v11 = vld [vmem:[%s4028_s26 + $0x140] ss:$16 sps:$4 sm:$0xff]   ;;  %v3550_v12 = vld [vmem:[%s4028_s26 + $0x148] ss:$16 sps:$4 sm:$0xff]  }
  0x24   : > { %v3561_v19 = vld [vmem:[%s4028_s26 + $0x180] ss:$16 sps:$4 sm:$0xff]   ;;  %v3563_v21 = vld [vmem:[%s4028_s26 + $0x1a4] ss:$16 sps:$4 sm:$0xff]  }
  0x25   : > { %1486 = vmatpush1.bf16.msra.mxu0 %v3465_v13  ;;  %1863 = vmatpush1.bf16.msra.mxu1 %v3466_v14  ;;  %v3551_v13 = vld [vmem:[%s4028_s26 + $0x164] ss:$16 sps:$4 sm:$0xff]   ;;  %v3553_v14 = vld [vmem:[%s4028_s26 + $0x16c] ss:$16 sps:$4 sm:$0xff]  }
  0x26   : > { %1487 = vmatprep.subr.bf16.mxu0 %v3924_v1  ;;  %1864 = vmatprep.subr.bf16.mxu1 %v3924_v1 }
  0x29   : > { %1488 = vmatpush1.bf16.msra.mxu0 %v3467_v15  ;;  %1865 = vmatpush1.bf16.msra.mxu1 %v3468_v16  ;;  %v3555_v15 = vld [vmem:[%s4028_s26 + $0x160] ss:$16 sps:$4 sm:$0xff]   ;;  %v3556_v16 = vld [vmem:[%s4028_s26 + $0x168] ss:$16 sps:$4 sm:$0xff]  }
  0x2a   : > { %1489 = vmatprep.subr.bf16.mxu0 %v3924_v1  ;;  %1866 = vmatprep.subr.bf16.mxu1 %v3924_v1 }
  0x2d   : > { %1490 = vmatpush2.bf16.msra.mxu0 %v3469_v17  ;;  %1867 = vmatpush2.bf16.msra.mxu1 %v3470_v18  ;;  %v3557_v17 = vld [vmem:[%s4028_s26 + $0x184] ss:$16 sps:$4 sm:$0xff]   ;;  %v3559_v18 = vld [vmem:[%s4028_s26 + $0x18c] ss:$16 sps:$4 sm:$0xff]  }
  0x2e   : > { %1491 = vmatprep.subr.bf16.mxu0 %v3924_v1  ;;  %1868 = vmatprep.subr.bf16.mxu1 %v3924_v1 }
  0x31   : > { %1492 = vmatpush2.bf16.msra.mxu0 %v3471_v20  ;;  %1869 = vmatpush2.bf16.msra.mxu1 %v3472_v22  ;;  %v3562_v20 = vld [vmem:[%s4028_s26 + $0x188] ss:$16 sps:$4 sm:$0xff]   ;;  %v3565_v22 = vld [vmem:[%s4028_s26 + $0x1ac] ss:$16 sps:$4 sm:$0xff]  }
  0x32   : > { %1493 = vmatprep.subr.bf16.mxu0 %v3924_v1  ;;  %1870 = vmatprep.subr.bf16.mxu1 %v3924_v1 }
  0x35   : > { %1494 = vmatpush2.bf16.msra.mxu0 %v3473_v23  ;;  %1871 = vmatpush2.bf16.msra.mxu1 %v3474_v24  ;;  %v3567_v23 = vld [vmem:[%s4028_s26 + $0x1a0] ss:$16 sps:$4 sm:$0xff]   ;;  %v3568_v24 = vld [vmem:[%s4028_s26 + $0x1a8] ss:$16 sps:$4 sm:$0xff]  }
  0x36   : > { %1495 = vmatprep.subr.bf16.mxu0 %v3924_v1  ;;  %1872 = vmatprep.subr.bf16.mxu1 %v3924_v1 }
  0x39   : > { %1496 = vmatpush2.bf16.msra.mxu0 %v3475_v25  ;;  %1873 = vmatpush2.bf16.msra.mxu1 %v3476_v26  ;;  %v3569_v25 = vld [vmem:[%s4028_s26 + $0x1c4] ss:$16 sps:$4 sm:$0xff]   ;;  %v3571_v26 = vld [vmem:[%s4028_s26 + $0x1cc] ss:$16 sps:$4 sm:$0xff]  }
  0x3a   : > { %1497 = vmatprep.subr.bf16.mxu0 %v3924_v1  ;;  %1874 = vmatprep.subr.bf16.mxu1 %v3924_v1 }
  0x3d   : > { %1498 = vmatpush2.bf16.msra.mxu0 %v3477_v27  ;;  %1875 = vmatpush2.bf16.msra.mxu1 %v3478_v28  ;;  %v3573_v27 = vld [vmem:[%s4028_s26 + $0x1c0] ss:$16 sps:$4 sm:$0xff]   ;;  %v3574_v28 = vld [vmem:[%s4028_s26 + $0x1c8] ss:$16 sps:$4 sm:$0xff]  }
  0x3e   : > { %1499 = vmatprep.subr.bf16.mxu0 %v3924_v1  ;;  %1876 = vmatprep.subr.bf16.mxu1 %v3924_v1 }
  0x41   : > { %1500 = vmatpush2.bf16.msra.mxu0 %v3479_v29  ;;  %1877 = vmatpush2.bf16.msra.mxu1 %v3480_v30  ;;  %v3575_v29 = vld [vmem:[%s4028_s26 + $0x1e4] ss:$16 sps:$4 sm:$0xff]   ;;  %v3577_v30 = vld [vmem:[%s4028_s26 + $0x1ec] ss:$16 sps:$4 sm:$0xff]  }
  0x42   : > { %1501 = vmatprep.subr.bf16.mxu0 %v3924_v1  ;;  %1878 = vmatprep.subr.bf16.mxu1 %v3924_v1 }
  0x45   : > { %1502 = vmatpush2.bf16.msra.mxu0 %v3481_v31  ;;  %1879 = vmatpush2.bf16.msra.mxu1 %v3482_v32  ;;  %v3579_v31 = vld [vmem:[%s4028_s26 + $0x1e0] ss:$16 sps:$4 sm:$0xff]   ;;  %v3580_v32 = vld [vmem:[%s4028_s26 + $0x1e8] ss:$16 sps:$4 sm:$0xff]  }
  0x46   : > { %1503 = vmatprep.subr.bf16.mxu0 %v3924_v1  ;;  %1880 = vmatprep.subr.bf16.mxu1 %v3924_v1  ;;  %v3533_v1 = vld [vmem:[%s4028_s26 + $0x104] ss:$16 sps:$4 sm:$0xff]  }
  0x49   : > { %1504 = vmatpush2.bf16.msra.mxu0 %v3483_v33  ;;  %1881 = vmatpush2.bf16.msra.mxu1 %v3484_v34  ;;  %v3581_v33 = vld [vmem:[%s4028_s26 + $0x204] ss:$16 sps:$4 sm:$0xff]   ;;  %v3583_v34 = vld [vmem:[%s4028_s26 + $0x20c] ss:$16 sps:$4 sm:$0xff]  }
  0x4c   : > { %1506 = vmatmul.mubr.bf16.vlgmr.msra.gmra.mxu0 %v3485_v35  ;;  %1883 = vmatmul.mubr.bf16.vlgmr.msra.gmra.mxu1 %v3488_v36  ;;  %v3585_v35 = vld [vmem:[%s4028_s26 + $0x200] ss:$16 sps:$4 sm:$0xff]   ;;  %v3586_v36 = vld [vmem:[%s4028_s26 + $0x208] ss:$16 sps:$4 sm:$0xff]  }
  0x4d   : > { %1513 = vmatprep.mubr.bf16.mxu0 %v3491_v37  ;;  %1890 = vmatprep.mubr.bf16.mxu1 %v3493_v38  ;;  %v3587_v37 = vld [vmem:[%s4028_s26 + $0x224] ss:$16 sps:$4 sm:$0xff]   ;;  %v3589_v38 = vld [vmem:[%s4028_s26 + $0x22c] ss:$16 sps:$4 sm:$0xff]  }
  0x54   : > { %1514 = vmatmul.mubr.bf16.gmra.mxu0 %v3495_v39  ;;  %1891 = vmatmul.mubr.bf16.gmra.mxu1 %v3496_v40  ;;  %v3591_v39 = vld [vmem:[%s4028_s26 + $0x220] ss:$16 sps:$4 sm:$0xff]   ;;  %v3592_v40 = vld [vmem:[%s4028_s26 + $0x228] ss:$16 sps:$4 sm:$0xff]  }
  0x55   : > { %1521 = vmatprep.mubr.bf16.mxu0 %v3497_v41  ;;  %1898 = vmatprep.mubr.bf16.mxu1 %v3499_v42  ;;  %v3593_v41 = vld [vmem:[%s4028_s26 + $0x244] ss:$16 sps:$4 sm:$0xff]   ;;  %v3595_v42 = vld [vmem:[%s4028_s26 + $0x24c] ss:$16 sps:$4 sm:$0xff]  }
  0x5c   : > { %1522 = vmatmul.mubr.bf16.gmra.mxu0 %v3501_v43  ;;  %1899 = vmatmul.mubr.bf16.gmra.mxu1 %v3502_v44  ;;  %v3597_v43 = vld [vmem:[%s4028_s26 + $0x240] ss:$16 sps:$4 sm:$0xff]   ;;  %v3598_v44 = vld [vmem:[%s4028_s26 + $0x248] ss:$16 sps:$4 sm:$0xff]  }
  0x5d   : > { %1529 = vmatprep.mubr.bf16.mxu0 %v3503_v45  ;;  %1906 = vmatprep.mubr.bf16.mxu1 %v3505_v46  ;;  %v3599_v45 = vld [vmem:[%s4028_s26 + $0x264] ss:$16 sps:$4 sm:$0xff]   ;;  %v3601_v46 = vld [vmem:[%s4028_s26 + $0x26c] ss:$16 sps:$4 sm:$0xff]  }
  0x64   : > { %1530 = vmatmul.mubr.bf16.gmra.mxu0 %v3507_v47  ;;  %1907 = vmatmul.mubr.bf16.gmra.mxu1 %v3508_v48  ;;  %v3603_v47 = vld [vmem:[%s4028_s26 + $0x260] ss:$16 sps:$4 sm:$0xff]   ;;  %v3604_v48 = vld [vmem:[%s4028_s26 + $0x268] ss:$16 sps:$4 sm:$0xff]  }
  0x65   : > { %1537 = vmatprep.mubr.bf16.mxu0 %v3509_v49  ;;  %1914 = vmatprep.mubr.bf16.mxu1 %v3511_v50  ;;  %v3605_v49 = vld [vmem:[%s4028_s26 + $0x284] ss:$16 sps:$4 sm:$0xff]   ;;  %v3607_v50 = vld [vmem:[%s4028_s26 + $0x28c] ss:$16 sps:$4 sm:$0xff]  }
  0x6c   : > { %1538 = vmatmul.mubr.bf16.gmra.mxu0 %v3513_v51  ;;  %1915 = vmatmul.mubr.bf16.gmra.mxu1 %v3514_v52  ;;  %v3609_v51 = vld [vmem:[%s4028_s26 + $0x280] ss:$16 sps:$4 sm:$0xff]   ;;  %v3610_v52 = vld [vmem:[%s4028_s26 + $0x288] ss:$16 sps:$4 sm:$0xff]  }
  0x6d   : > { %1545 = vmatprep.mubr.bf16.mxu0 %v3515_v53  ;;  %1922 = vmatprep.mubr.bf16.mxu1 %v3517_v54  ;;  %v3611_v53 = vld [vmem:[%s4028_s26 + $0x2a4] ss:$16 sps:$4 sm:$0xff]   ;;  %v3613_v54 = vld [vmem:[%s4028_s26 + $0x2ac] ss:$16 sps:$4 sm:$0xff]  }
  0x74   : > { %1546 = vmatmul.mubr.bf16.gmra.mxu0 %v3519_v55  ;;  %1923 = vmatmul.mubr.bf16.gmra.mxu1 %v3520_v56  ;;  %v3615_v55 = vld [vmem:[%s4028_s26 + $0x2a0] ss:$16 sps:$4 sm:$0xff]   ;;  %v3616_v56 = vld [vmem:[%s4028_s26 + $0x2a8] ss:$16 sps:$4 sm:$0xff]  }
  0x75   : > { %1553 = vmatprep.mubr.bf16.mxu0 %v3521_v57  ;;  %1930 = vmatprep.mubr.bf16.mxu1 %v3523_v58  ;;  %v3617_v57 = vld [vmem:[%s4028_s26 + $0x2c4] ss:$16 sps:$4 sm:$0xff]   ;;  %v3619_v58 = vld [vmem:[%s4028_s26 + $0x2cc] ss:$16 sps:$4 sm:$0xff]  }
  0x7c   : > { %1554 = vmatmul.mubr.bf16.gmra.mxu0 %v3525_v59  ;;  %1931 = vmatmul.mubr.bf16.gmra.mxu1 %v3526_v60  ;;  %v3621_v59 = vld [vmem:[%s4028_s26 + $0x2c0] ss:$16 sps:$4 sm:$0xff]   ;;  %v3622_v60 = vld [vmem:[%s4028_s26 + $0x2c8] ss:$16 sps:$4 sm:$0xff]  }
  0x7d   : > { %1561 = vmatprep.mubr.bf16.mxu0 %v3527_v61  ;;  %1938 = vmatprep.mubr.bf16.mxu1 %v3529_v62  ;;  %v3623_v61 = vld [vmem:[%s4028_s26 + $0x2e4] ss:$16 sps:$4 sm:$0xff]   ;;  %v3625_v62 = vld [vmem:[%s4028_s26 + $0x2ec] ss:$16 sps:$4 sm:$0xff]  }
  0x84   : > { %1562 = vmatmul.mubr.bf16.gmra.mxu0 %v3531_v63  ;;  %1939 = vmatmul.mubr.bf16.gmra.mxu1 %v3532_v0  ;;  %v3627_v63 = vld [vmem:[%s4028_s26 + $0x2e0] ss:$16 sps:$4 sm:$0xff]   ;;  %v3628_v0 = vld [vmem:[%s4028_s26 + $0x2e8] ss:$16 sps:$4 sm:$0xff]  }
  0x85   : > { %1569 = vmatprep.mubr.bf16.mxu0 %v3533_v1  ;;  %1946 = vmatprep.mubr.bf16.mxu1 %v3535_v2  ;;  %v3629_v1 = vld [vmem:[%s4028_s26 + $0x304] ss:$16 sps:$4 sm:$0xff]   ;;  %v3631_v2 = vld [vmem:[%s4028_s26 + $0x30c] ss:$16 sps:$4 sm:$0xff]  }
  0x8c   : > { %1570 = vmatmul.mubr.bf16.gmra.mxu0 %v3537_v3  ;;  %1947 = vmatmul.mubr.bf16.gmra.mxu1 %v3538_v4  ;;  %v3633_v3 = vld [vmem:[%s4028_s26 + $0x300] ss:$16 sps:$4 sm:$0xff]   ;;  %v3634_v4 = vld [vmem:[%s4028_s26 + $0x308] ss:$16 sps:$4 sm:$0xff]  }
  0x8d   : > { %1577 = vmatprep.mubr.bf16.mxu0 %v3539_v5  ;;  %1954 = vmatprep.mubr.bf16.mxu1 %v3541_v6  ;;  %v3635_v5 = vld [vmem:[%s4028_s26 + $0x324] ss:$16 sps:$4 sm:$0xff]   ;;  %v4195_v6 = vld [vmem:[%s4413_s2] ss:$0 sm:$0xff] }
  0x94   : > { %1578 = vmatmul.mubr.bf16.gmra.mxu0 %v3543_v7  ;;  %1955 = vmatmul.mubr.bf16.gmra.mxu1 %v3544_v8  ;;  %v3637_v7 = vld [vmem:[%s4028_s26 + $0x32c] ss:$16 sps:$4 sm:$0xff]  }
  0x95   : > { %1585 = vmatprep.mubr.bf16.mxu0 %v3545_v9  ;;  %1962 = vmatprep.mubr.bf16.mxu1 %v3547_v10 }
  0x9c   : > { %1586 = vmatmul.mubr.bf16.gmra.mxu0 %v3549_v11  ;;  %1963 = vmatmul.mubr.bf16.gmra.mxu1 %v3550_v12 }
  0x9d   : > { %1593 = vmatprep.mubr.bf16.mxu0 %v3551_v13  ;;  %1970 = vmatprep.mubr.bf16.mxu1 %v3553_v14 }
  0xa4   : > { %1594 = vmatmul.mubr.bf16.gmra.mxu0 %v3555_v15  ;;  %1971 = vmatmul.mubr.bf16.gmra.mxu1 %v3556_v16  ;;  %v3639_v15 = vld [vmem:[%s4028_s26 + $0x320] ss:$16 sps:$4 sm:$0xff]  }
  0xa5   : > { %1601 = vmatprep.mubr.bf16.mxu0 %v3557_v17  ;;  %1978 = vmatprep.mubr.bf16.mxu1 %v3559_v18  ;;  %v3640_v18 = vld [vmem:[%s4028_s26 + $0x328] ss:$16 sps:$4 sm:$0xff]  }
  0xac   : > { %1602 = vmatmul.mubr.bf16.gmra.mxu0 %v3561_v19  ;;  %1979 = vmatmul.mubr.bf16.gmra.mxu1 %v3562_v20  ;;  %v3641_v19 = vld [vmem:[%s4028_s26 + $0x344] ss:$16 sps:$4 sm:$0xff]  }
  0xad   : > { %1609 = vmatprep.mubr.bf16.mxu0 %v3563_v21  ;;  %1986 = vmatprep.mubr.bf16.mxu1 %v3565_v22  ;;  %v3643_v21 = vld [vmem:[%s4028_s26 + $0x34c] ss:$16 sps:$4 sm:$0xff]  }
  0xb4   : > { %1610 = vmatmul.mubr.bf16.gmra.mxu0 %v3567_v23  ;;  %1987 = vmatmul.mubr.bf16.gmra.mxu1 %v3568_v24 }
  0xb5   : > { %1617 = vmatprep.mubr.bf16.mxu0 %v3569_v25  ;;  %1994 = vmatprep.mubr.bf16.mxu1 %v3571_v26 }
  0xbc   : > { %1618 = vmatmul.mubr.bf16.gmra.mxu0 %v3573_v27  ;;  %1995 = vmatmul.mubr.bf16.gmra.mxu1 %v3574_v28 }
  0xbd   : > { %1625 = vmatprep.mubr.bf16.mxu0 %v3575_v29  ;;  %2002 = vmatprep.mubr.bf16.mxu1 %v3577_v30 }
  0xc4   : > { %1626 = vmatmul.mubr.bf16.gmra.mxu0 %v3579_v31  ;;  %2003 = vmatmul.mubr.bf16.gmra.mxu1 %v3580_v32  ;;  %v3645_v31 = vld [vmem:[%s4028_s26 + $0x340] ss:$16 sps:$4 sm:$0xff]  }
  0xc5   : > { %1633 = vmatprep.mubr.bf16.mxu0 %v3581_v33  ;;  %2010 = vmatprep.mubr.bf16.mxu1 %v3583_v34  ;;  %v3646_v34 = vld [vmem:[%s4028_s26 + $0x348] ss:$16 sps:$4 sm:$0xff]  }
  0xcc   : > { %1634 = vmatmul.mubr.bf16.gmra.mxu0 %v3585_v35  ;;  %2011 = vmatmul.mubr.bf16.gmra.mxu1 %v3586_v36  ;;  %v3647_v35 = vld [vmem:[%s4028_s26 + $0x364] ss:$16 sps:$4 sm:$0xff]  }
  0xcd   : > { %1641 = vmatprep.mubr.bf16.mxu0 %v3587_v37  ;;  %2018 = vmatprep.mubr.bf16.mxu1 %v3589_v38  ;;  %v3649_v37 = vld [vmem:[%s4028_s26 + $0x36c] ss:$16 sps:$4 sm:$0xff]  }
  0xd4   : > { %1642 = vmatmul.mubr.bf16.gmra.mxu0 %v3591_v39  ;;  %2019 = vmatmul.mubr.bf16.gmra.mxu1 %v3592_v40 }
  0xd5   : > { %1649 = vmatprep.mubr.bf16.mxu0 %v3593_v41  ;;  %2026 = vmatprep.mubr.bf16.mxu1 %v3595_v42 }
  0xdc   : > { %1650 = vmatmul.mubr.bf16.gmra.mxu0 %v3597_v43  ;;  %2027 = vmatmul.mubr.bf16.gmra.mxu1 %v3598_v44 }
  0xdd   : > { %1657 = vmatprep.mubr.bf16.mxu0 %v3599_v45  ;;  %2034 = vmatprep.mubr.bf16.mxu1 %v3601_v46 }
  0xe4   : > { %1658 = vmatmul.mubr.bf16.gmra.mxu0 %v3603_v47  ;;  %2035 = vmatmul.mubr.bf16.gmra.mxu1 %v3604_v48  ;;  %v3651_v47 = vld [vmem:[%s4028_s26 + $0x360] ss:$16 sps:$4 sm:$0xff]  }
  0xe5   : > { %1665 = vmatprep.mubr.bf16.mxu0 %v3605_v49  ;;  %2042 = vmatprep.mubr.bf16.mxu1 %v3607_v50 }
  0xec   : > { %1666 = vmatmul.mubr.bf16.gmra.mxu0 %v3609_v51  ;;  %2043 = vmatmul.mubr.bf16.gmra.mxu1 %v3610_v52  ;;  %v3652_v51 = vld [vmem:[%s4028_s26 + $0x368] ss:$16 sps:$4 sm:$0xff]   ;;  %v3655_v52 = vld [vmem:[%s4028_s26 + $0x384] ss:$16 sps:$4 sm:$0xff]  }
  0xed   : > { %1673 = vmatprep.mubr.bf16.mxu0 %v3611_v53  ;;  %2050 = vmatprep.mubr.bf16.mxu1 %v3613_v54 }
  0xf4   : > { %1674 = vmatmul.mubr.bf16.gmra.mxu0 %v3615_v55  ;;  %2051 = vmatmul.mubr.bf16.gmra.mxu1 %v3616_v56  ;;  %v3658_v55 = vld [vmem:[%s4028_s26 + $0x38c] ss:$16 sps:$4 sm:$0xff]  }
  0xf5   : > { %1681 = vmatprep.mubr.bf16.mxu0 %v3617_v57  ;;  %2058 = vmatprep.mubr.bf16.mxu1 %v3619_v58 }
  0xfc   : > { %1682 = vmatmul.mubr.bf16.gmra.mxu0 %v3621_v59  ;;  %2059 = vmatmul.mubr.bf16.gmra.mxu1 %v3622_v60 }
  0xfd   : > { %1689 = vmatprep.mubr.bf16.mxu0 %v3623_v61  ;;  %2066 = vmatprep.mubr.bf16.mxu1 %v3625_v62 }
 0x104   : > { %1690 = vmatmul.mubr.bf16.gmra.mxu0 %v3627_v63  ;;  %2067 = vmatmul.mubr.bf16.gmra.mxu1 %v3628_v0 }
 0x105   : > { %1697 = vmatprep.mubr.bf16.mxu0 %v3629_v1  ;;  %2074 = vmatprep.mubr.bf16.mxu1 %v3631_v2  ;;  %v3653_v2 = vld [vmem:[%s4028_s26 + $0x380] ss:$16 sps:$4 sm:$0xff]  }
 0x10c   : > { %v1507_v8 = vpop.f32.mrf.mxu0  ;;  %1698 = vmatmul.mubr.bf16.gmra.mxu0 %v3633_v3  ;;  %v1884_v10 = vpop.f32.mrf.mxu1  ;;  %2075 = vmatmul.mubr.bf16.gmra.mxu1 %v3634_v4 }
 0x10d   : > { %v1508_v9 = vadd.f32 %v4195_v6, %v1507_v8  ;;  %1705 = vmatprep.mubr.bf16.mxu0 %v3635_v5  ;;  %2082 = vmatprep.mubr.bf16.mxu1 %v3637_v7  ;;  %v3656_v7 = vld [vmem:[%s4028_s26 + $0x388] ss:$16 sps:$4 sm:$0xff]   ;;  %v3661_v8 = vld [vmem:[%s4028_s26 + $0x3a4] ss:$16 sps:$4 sm:$0xff]  }
 0x10e   : > { %v1509_v11 = vpop.f32.mrf.mxu0  ;;  %v1886_v12 = vpop.f32.mrf.mxu1 }
 0x10f   : > { %v1885_v13 = vadd.f32 %v1884_v10, %v1508_v9  ;;  %v3664_v11 = vld [vmem:[%s4028_s26 + $0x3ac] ss:$16 sps:$4 sm:$0xff]  }
 0x110   : > { %v1510_v14 = vpop.f32.mrf.mxu0  ;;  %v1887_v17 = vpop.f32.mrf.mxu1 }
 0x111   : > { %v1511_v16 = vadd.f32 %v4195_v6, %v1510_v14  ;;  %3743 = vtanh.f32 %v1885_v13 }
 0x112   : > { %v1512_v20 = vpop.f32.mrf.mxu0  ;;  %v1889_v23 = vpop.f32.mrf.mxu1 }
 0x113   : > { %v1888_v22 = vadd.f32 %v1887_v17, %v1511_v16 }
 0x114   : > { %v1515_v24 = vpop.f32.mrf.mxu0  ;;  %1706 = vmatmul.mubr.bf16.gmra.mxu0 %v3639_v15  ;;  %v1892_v26 = vpop.f32.mrf.mxu1  ;;  %2083 = vmatmul.mubr.bf16.gmra.mxu1 %v3640_v18 }
 0x115   : > { %3745 = vtanh.f32 %v1888_v22  ;;  %v1516_v25 = vadd.f32 %v4195_v6, %v1515_v24  ;;  %1713 = vmatprep.mubr.bf16.mxu0 %v3641_v19  ;;  %2090 = vmatprep.mubr.bf16.mxu1 %v3643_v21  ;;  %v3659_v22 = vld [vmem:[%s4028_s26 + $0x3a0] ss:$16 sps:$4 sm:$0xff]  }
 0x116   : > { %v1517_v27 = vpop.f32.mrf.mxu0  ;;  %v1894_v28 = vpop.f32.mrf.mxu1 }
 0x117   : > { %v1893_v29 = vadd.f32 %v1892_v26, %v1516_v25  ;;  %v3662_v26 = vld [vmem:[%s4028_s26 + $0x3a8] ss:$16 sps:$4 sm:$0xff]   ;;  %v3667_v27 = vld [vmem:[%s4028_s26 + $0x3c4] ss:$16 sps:$4 sm:$0xff]  }
 0x118   : > { %v1518_v30 = vpop.f32.mrf.mxu0  ;;  %v1895_v33 = vpop.f32.mrf.mxu1 }
 0x119   : > { %v1519_v32 = vadd.f32 %v4195_v6, %v1518_v30  ;;  %3747 = vtanh.f32 %v1893_v29  ;;  %v3670_v30 = vld [vmem:[%s4028_s26 + $0x3cc] ss:$16 sps:$4 sm:$0xff]  }
 0x11a   : > { %v1520_v36 = vpop.f32.mrf.mxu0  ;;  %v1897_v39 = vpop.f32.mrf.mxu1 }
 0x11b   : > { %v1896_v38 = vadd.f32 %v1895_v33, %v1519_v32 }
 0x11c   : > { %v1523_v40 = vpop.f32.mrf.mxu0  ;;  %1714 = vmatmul.mubr.bf16.gmra.mxu0 %v3645_v31  ;;  %v1900_v42 = vpop.f32.mrf.mxu1  ;;  %2091 = vmatmul.mubr.bf16.gmra.mxu1 %v3646_v34 }
 0x11d   : > { %3749 = vtanh.f32 %v1896_v38  ;;  %v1524_v41 = vadd.f32 %v4195_v6, %v1523_v40  ;;  %1721 = vmatprep.mubr.bf16.mxu0 %v3647_v35  ;;  %2098 = vmatprep.mubr.bf16.mxu1 %v3649_v37 }
 0x11e   : > { %v1525_v43 = vpop.f32.mrf.mxu0  ;;  %v1902_v44 = vpop.f32.mrf.mxu1 }
 0x11f   : > { %v1901_v45 = vadd.f32 %v1900_v42, %v1524_v41  ;;  %v3744_v48 = vpop.eup %3743  ;;  %v3665_v41 = vld [vmem:[%s4028_s26 + $0x3c0] ss:$16 sps:$4 sm:$0xff]  }
 0x120   : > { %v1526_v46 = vpop.f32.mrf.mxu0  ;;  %v1903_v50 = vpop.f32.mrf.mxu1 }
 0x121   : > { %v1527_v49 = vadd.f32 %v4195_v6, %v1526_v46  ;;  %3751 = vtanh.f32 %v1901_v45  ;;  %v3668_v45 = vld [vmem:[%s4028_s26 + $0x3c8] ss:$16 sps:$4 sm:$0xff]   ;;  %v3673_v46 = vld [vmem:[%s4028_s26 + $0x3e4] ss:$16 sps:$4 sm:$0xff]  }
 0x122   : > { %v3746_v53 = vpop.eup %3745  ;;  %v1528_v54 = vpop.f32.mrf.mxu0 }
 0x123   : > { %v3190_v56 = vpack.c.bf16 %v3746_v53, %v3744_v48  ;;  %v1904_v57 = vadd.f32 %v1903_v50, %v1527_v49  ;;  %v1905_v58 = vpop.f32.mrf.mxu1  ;;  %v3676_v49 = vld [vmem:[%s4028_s26 + $0x3ec] ss:$16 sps:$4 sm:$0xff]  }
 0x124   : > { %v1531_v59 = vpop.f32.mrf.mxu0  ;;  %1722 = vmatmul.mubr.bf16.gmra.mxu0 %v3651_v47  ;;  %2099 = vmatmul.mubr.bf16.gmra.mxu1 %v3652_v51 }
 0x125   : > { %3191 = vst [vmem:[%s4219_s14] sm:$0xff] %v3190_v56   ;;  %3753 = vtanh.f32 %v1904_v57  ;;  %v1532_v60 = vadd.f32 %v4195_v6, %v1531_v59  ;;  %v1908_v61 = vpop.f32.mrf.mxu1  ;;  %1729 = vmatprep.mubr.bf16.mxu0 %v3655_v52  ;;  %2106 = vmatprep.mubr.bf16.mxu1 %v3658_v55 }
 0x126   : > { %v1533_v62 = vpop.f32.mrf.mxu0  ;;  %v3748_v3 = vpop.eup %3747 }
 0x127   : > { %v1910_v63 = vpop.f32.mrf.mxu1  ;;  %v1909_v0 = vadd.f32 %v1908_v61, %v1532_v60  ;;  %v3671_v60 = vld [vmem:[%s4028_s26 + $0x3e0] ss:$16 sps:$4 sm:$0xff]  }
 0x128   : > { %v1534_v1 = vpop.f32.mrf.mxu0 }
 0x129   : > { %v1535_v4 = vadd.f32 %v4195_v6, %v1534_v1  ;;  %v1911_v5 = vpop.f32.mrf.mxu1  ;;  %3755 = vtanh.f32 %v1909_v0  ;;  %v3674_v0 = vld [vmem:[%s4028_s26 + $0x3e8] ss:$16 sps:$4 sm:$0xff]   ;;  %v3679_v1 = vld [vmem:[%s4028_s26 + $0x404] ss:$16 sps:$4 sm:$0xff]  }
 0x12a   : > { %v3750_v9 = vpop.eup %3749  ;;  %v1536_v10 = vpop.f32.mrf.mxu0 }
 0x12b   : > { %v3195_v12 = vpack.c.bf16 %v3750_v9, %v3748_v3  ;;  %v1912_v13 = vadd.f32 %v1911_v5, %v1535_v4  ;;  %v1913_v14 = vpop.f32.mrf.mxu1  ;;  %v3682_v4 = vld [vmem:[%s4028_s26 + $0x40c] ss:$16 sps:$4 sm:$0xff]  }
 0x12c   : > { %v1539_v15 = vpop.f32.mrf.mxu0  ;;  %1730 = vmatmul.mubr.bf16.gmra.mxu0 %v3653_v2  ;;  %2107 = vmatmul.mubr.bf16.gmra.mxu1 %v3656_v7 }
 0x12d   : > { %3402 = vst [vmem:[%s4219_s14 + $0x8] sm:$0xff] %v3195_v12   ;;  %3757 = vtanh.f32 %v1912_v13  ;;  %v1540_v16 = vadd.f32 %v4195_v6, %v1539_v15  ;;  %v1916_v17 = vpop.f32.mrf.mxu1  ;;  %1737 = vmatprep.mubr.bf16.mxu0 %v3661_v8  ;;  %2114 = vmatprep.mubr.bf16.mxu1 %v3664_v11 }
 0x12e   : > { %v1541_v18 = vpop.f32.mrf.mxu0  ;;  %v3752_v23 = vpop.eup %3751 }
 0x12f   : > { %v1918_v19 = vpop.f32.mrf.mxu1  ;;  %v1917_v20 = vadd.f32 %v1916_v17, %v1540_v16  ;;  %v3677_v16 = vld [vmem:[%s4028_s26 + $0x400] ss:$16 sps:$4 sm:$0xff]  }
 0x130   : > { %v1542_v21 = vpop.f32.mrf.mxu0 }
 0x131   : > { %v1543_v24 = vadd.f32 %v4195_v6, %v1542_v21  ;;  %v1919_v25 = vpop.f32.mrf.mxu1  ;;  %3759 = vtanh.f32 %v1917_v20  ;;  %v3680_v20 = vld [vmem:[%s4028_s26 + $0x408] ss:$16 sps:$4 sm:$0xff]   ;;  %v3685_v21 = vld [vmem:[%s4028_s26 + $0x424] ss:$16 sps:$4 sm:$0xff]  }
 0x132   : > { %v3754_v28 = vpop.eup %3753  ;;  %v1544_v29 = vpop.f32.mrf.mxu0 }
 0x133   : > { %v3200_v31 = vpack.c.bf16 %v3754_v28, %v3752_v23  ;;  %v1920_v32 = vadd.f32 %v1919_v25, %v1543_v24  ;;  %v1921_v33 = vpop.f32.mrf.mxu1  ;;  %v3688_v24 = vld [vmem:[%s4028_s26 + $0x42c] ss:$16 sps:$4 sm:$0xff]  }
 0x134   : > { %v1547_v34 = vpop.f32.mrf.mxu0  ;;  %1738 = vmatmul.mubr.bf16.gmra.mxu0 %v3659_v22  ;;  %2115 = vmatmul.mubr.bf16.gmra.mxu1 %v3662_v26 }
 0x135   : > { %3403 = vst [vmem:[%s4219_s14 + $0x10] sm:$0xff] %v3200_v31   ;;  %3761 = vtanh.f32 %v1920_v32  ;;  %v1548_v35 = vadd.f32 %v4195_v6, %v1547_v34  ;;  %v1924_v36 = vpop.f32.mrf.mxu1  ;;  %1745 = vmatprep.mubr.bf16.mxu0 %v3667_v27  ;;  %2122 = vmatprep.mubr.bf16.mxu1 %v3670_v30 }
 0x136   : > { %v1549_v37 = vpop.f32.mrf.mxu0  ;;  %v3756_v42 = vpop.eup %3755 }
 0x137   : > { %v1926_v38 = vpop.f32.mrf.mxu1  ;;  %v1925_v39 = vadd.f32 %v1924_v36, %v1548_v35  ;;  %v3683_v35 = vld [vmem:[%s4028_s26 + $0x420] ss:$16 sps:$4 sm:$0xff]  }
 0x138   : > { %v1550_v40 = vpop.f32.mrf.mxu0 }
 0x139   : > { %v1551_v43 = vadd.f32 %v4195_v6, %v1550_v40  ;;  %v1927_v44 = vpop.f32.mrf.mxu1  ;;  %3763 = vtanh.f32 %v1925_v39  ;;  %v3686_v39 = vld [vmem:[%s4028_s26 + $0x428] ss:$16 sps:$4 sm:$0xff]   ;;  %v3691_v40 = vld [vmem:[%s4028_s26 + $0x444] ss:$16 sps:$4 sm:$0xff]  }
 0x13a   : > { %v3758_v47 = vpop.eup %3757  ;;  %v1552_v48 = vpop.f32.mrf.mxu0 }
 0x13b   : > { %v3205_v50 = vpack.c.bf16 %v3758_v47, %v3756_v42  ;;  %v1928_v51 = vadd.f32 %v1927_v44, %v1551_v43  ;;  %v1929_v52 = vpop.f32.mrf.mxu1  ;;  %v3694_v43 = vld [vmem:[%s4028_s26 + $0x44c] ss:$16 sps:$4 sm:$0xff]  }
 0x13c   : > { %v1555_v53 = vpop.f32.mrf.mxu0  ;;  %1746 = vmatmul.mubr.bf16.gmra.mxu0 %v3665_v41  ;;  %2123 = vmatmul.mubr.bf16.gmra.mxu1 %v3668_v45 }
 0x13d   : > { %3404 = vst [vmem:[%s4219_s14 + $0x18] sm:$0xff] %v3205_v50   ;;  %3765 = vtanh.f32 %v1928_v51  ;;  %v1556_v54 = vadd.f32 %v4195_v6, %v1555_v53  ;;  %v1932_v55 = vpop.f32.mrf.mxu1  ;;  %1753 = vmatprep.mubr.bf16.mxu0 %v3673_v46  ;;  %2130 = vmatprep.mubr.bf16.mxu1 %v3676_v49 }
 0x13e   : > { %v1557_v56 = vpop.f32.mrf.mxu0  ;;  %v3760_v61 = vpop.eup %3759 }
 0x13f   : > { %v1934_v57 = vpop.f32.mrf.mxu1  ;;  %v1933_v58 = vadd.f32 %v1932_v55, %v1556_v54  ;;  %v3689_v54 = vld [vmem:[%s4028_s26 + $0x440] ss:$16 sps:$4 sm:$0xff]  }
 0x140   : > { %v1558_v59 = vpop.f32.mrf.mxu0 }
 0x141   : > { %v1559_v62 = vadd.f32 %v4195_v6, %v1558_v59  ;;  %v1935_v63 = vpop.f32.mrf.mxu1  ;;  %3767 = vtanh.f32 %v1933_v58  ;;  %v3692_v58 = vld [vmem:[%s4028_s26 + $0x448] ss:$16 sps:$4 sm:$0xff]   ;;  %v3697_v59 = vld [vmem:[%s4028_s26 + $0x464] ss:$16 sps:$4 sm:$0xff]  }
 0x142   : > { %v3762_v2 = vpop.eup %3761  ;;  %v1560_v3 = vpop.f32.mrf.mxu0 }
 0x143   : > { %v3210_v5 = vpack.c.bf16 %v3762_v2, %v3760_v61  ;;  %v1936_v7 = vadd.f32 %v1935_v63, %v1559_v62  ;;  %v1937_v8 = vpop.f32.mrf.mxu1  ;;  %v3700_v62 = vld [vmem:[%s4028_s26 + $0x46c] ss:$16 sps:$4 sm:$0xff]  }
 0x144   : > { %v1563_v9 = vpop.f32.mrf.mxu0  ;;  %1754 = vmatmul.mubr.bf16.gmra.mxu0 %v3671_v60  ;;  %2131 = vmatmul.mubr.bf16.gmra.mxu1 %v3674_v0 }
 0x145   : > { %3405 = vst [vmem:[%s4219_s14 + $0x20] sm:$0xff] %v3210_v5   ;;  %3769 = vtanh.f32 %v1936_v7  ;;  %v1564_v10 = vadd.f32 %v4195_v6, %v1563_v9  ;;  %v1940_v11 = vpop.f32.mrf.mxu1  ;;  %1761 = vmatprep.mubr.bf16.mxu0 %v3679_v1  ;;  %2138 = vmatprep.mubr.bf16.mxu1 %v3682_v4 }
 0x146   : > { %v1565_v12 = vpop.f32.mrf.mxu0  ;;  %v3764_v17 = vpop.eup %3763 }
 0x147   : > { %v1942_v13 = vpop.f32.mrf.mxu1  ;;  %v1941_v14 = vadd.f32 %v1940_v11, %v1564_v10  ;;  %v3695_v10 = vld [vmem:[%s4028_s26 + $0x460] ss:$16 sps:$4 sm:$0xff]  }
 0x148   : > { %v1566_v15 = vpop.f32.mrf.mxu0 }
 0x149   : > { %v1567_v18 = vadd.f32 %v4195_v6, %v1566_v15  ;;  %v1943_v19 = vpop.f32.mrf.mxu1  ;;  %3771 = vtanh.f32 %v1941_v14  ;;  %v3698_v14 = vld [vmem:[%s4028_s26 + $0x468] ss:$16 sps:$4 sm:$0xff]   ;;  %v3703_v15 = vld [vmem:[%s4028_s26 + $0x484] ss:$16 sps:$4 sm:$0xff]  }
 0x14a   : > { %v3766_v22 = vpop.eup %3765  ;;  %v1568_v23 = vpop.f32.mrf.mxu0 }
 0x14b   : > { %v3215_v25 = vpack.c.bf16 %v3766_v22, %v3764_v17  ;;  %v1944_v26 = vadd.f32 %v1943_v19, %v1567_v18  ;;  %v1945_v27 = vpop.f32.mrf.mxu1  ;;  %v3706_v18 = vld [vmem:[%s4028_s26 + $0x48c] ss:$16 sps:$4 sm:$0xff]  }
 0x14c   : > { %v1571_v28 = vpop.f32.mrf.mxu0  ;;  %1762 = vmatmul.mubr.bf16.gmra.mxu0 %v3677_v16  ;;  %2139 = vmatmul.mubr.bf16.gmra.mxu1 %v3680_v20 }
 0x14d   : > { %3406 = vst [vmem:[%s4219_s14 + $0x28] sm:$0xff] %v3215_v25   ;;  %3773 = vtanh.f32 %v1944_v26  ;;  %v1572_v29 = vadd.f32 %v4195_v6, %v1571_v28  ;;  %v1948_v30 = vpop.f32.mrf.mxu1  ;;  %1769 = vmatprep.mubr.bf16.mxu0 %v3685_v21  ;;  %2146 = vmatprep.mubr.bf16.mxu1 %v3688_v24 }
 0x14e   : > { %v1573_v31 = vpop.f32.mrf.mxu0  ;;  %v3768_v36 = vpop.eup %3767 }
 0x14f   : > { %v1950_v32 = vpop.f32.mrf.mxu1  ;;  %v1949_v33 = vadd.f32 %v1948_v30, %v1572_v29  ;;  %v3701_v29 = vld [vmem:[%s4028_s26 + $0x480] ss:$16 sps:$4 sm:$0xff]  }
 0x150   : > { %v1574_v34 = vpop.f32.mrf.mxu0 }
 0x151   : > { %v1575_v37 = vadd.f32 %v4195_v6, %v1574_v34  ;;  %v1951_v38 = vpop.f32.mrf.mxu1  ;;  %3775 = vtanh.f32 %v1949_v33  ;;  %v3704_v33 = vld [vmem:[%s4028_s26 + $0x488] ss:$16 sps:$4 sm:$0xff]   ;;  %v3709_v34 = vld [vmem:[%s4028_s26 + $0x4a4] ss:$16 sps:$4 sm:$0xff]  }
 0x152   : > { %v3770_v41 = vpop.eup %3769  ;;  %v1576_v42 = vpop.f32.mrf.mxu0 }
 0x153   : > { %v3220_v44 = vpack.c.bf16 %v3770_v41, %v3768_v36  ;;  %v1952_v45 = vadd.f32 %v1951_v38, %v1575_v37  ;;  %v1953_v46 = vpop.f32.mrf.mxu1  ;;  %v3712_v37 = vld [vmem:[%s4028_s26 + $0x4ac] ss:$16 sps:$4 sm:$0xff]  }
 0x154   : > { %v1579_v47 = vpop.f32.mrf.mxu0  ;;  %1770 = vmatmul.mubr.bf16.gmra.mxu0 %v3683_v35  ;;  %2147 = vmatmul.mubr.bf16.gmra.mxu1 %v3686_v39 }
 0x155   : > { %3407 = vst [vmem:[%s4219_s14 + $0x30] sm:$0xff] %v3220_v44   ;;  %3777 = vtanh.f32 %v1952_v45  ;;  %v1580_v48 = vadd.f32 %v4195_v6, %v1579_v47  ;;  %v1956_v49 = vpop.f32.mrf.mxu1  ;;  %1777 = vmatprep.mubr.bf16.mxu0 %v3691_v40  ;;  %2154 = vmatprep.mubr.bf16.mxu1 %v3694_v43 }
 0x156   : > { %v1581_v50 = vpop.f32.mrf.mxu0  ;;  %v3772_v55 = vpop.eup %3771 }
 0x157   : > { %v1958_v51 = vpop.f32.mrf.mxu1  ;;  %v1957_v52 = vadd.f32 %v1956_v49, %v1580_v48  ;;  %v3707_v48 = vld [vmem:[%s4028_s26 + $0x4a0] ss:$16 sps:$4 sm:$0xff]  }
 0x158   : > { %v1582_v53 = vpop.f32.mrf.mxu0 }
 0x159   : > { %v1583_v56 = vadd.f32 %v4195_v6, %v1582_v53  ;;  %v1959_v57 = vpop.f32.mrf.mxu1  ;;  %3779 = vtanh.f32 %v1957_v52  ;;  %v3710_v52 = vld [vmem:[%s4028_s26 + $0x4a8] ss:$16 sps:$4 sm:$0xff]   ;;  %v3715_v53 = vld [vmem:[%s4028_s26 + $0x4c4] ss:$16 sps:$4 sm:$0xff]  }
 0x15a   : > { %v3774_v60 = vpop.eup %3773  ;;  %v1584_v61 = vpop.f32.mrf.mxu0 }
 0x15b   : > { %v3225_v63 = vpack.c.bf16 %v3774_v60, %v3772_v55  ;;  %v1960_v0 = vadd.f32 %v1959_v57, %v1583_v56  ;;  %v1961_v1 = vpop.f32.mrf.mxu1  ;;  %v3718_v56 = vld [vmem:[%s4028_s26 + $0x4cc] ss:$16 sps:$4 sm:$0xff]  }
 0x15c   : > { %v1587_v2 = vpop.f32.mrf.mxu0  ;;  %1778 = vmatmul.mubr.bf16.gmra.mxu0 %v3689_v54  ;;  %2155 = vmatmul.mubr.bf16.gmra.mxu1 %v3692_v58 }
 0x15d   : > { %3408 = vst [vmem:[%s4219_s14 + $0x38] sm:$0xff] %v3225_v63   ;;  %3781 = vtanh.f32 %v1960_v0  ;;  %v1588_v3 = vadd.f32 %v4195_v6, %v1587_v2  ;;  %v1964_v4 = vpop.f32.mrf.mxu1  ;;  %1785 = vmatprep.mubr.bf16.mxu0 %v3697_v59  ;;  %2162 = vmatprep.mubr.bf16.mxu1 %v3700_v62 }
 0x15e   : > { %v1589_v5 = vpop.f32.mrf.mxu0  ;;  %v3776_v11 = vpop.eup %3775 }
 0x15f   : > { %v1966_v7 = vpop.f32.mrf.mxu1  ;;  %v1965_v8 = vadd.f32 %v1964_v4, %v1588_v3  ;;  %v3713_v3 = vld [vmem:[%s4028_s26 + $0x4c0] ss:$16 sps:$4 sm:$0xff]  }
 0x160   : > { %v1590_v9 = vpop.f32.mrf.mxu0 }
 0x161   : > { %v1591_v12 = vadd.f32 %v4195_v6, %v1590_v9  ;;  %v1967_v13 = vpop.f32.mrf.mxu1  ;;  %3783 = vtanh.f32 %v1965_v8  ;;  %v3716_v8 = vld [vmem:[%s4028_s26 + $0x4c8] ss:$16 sps:$4 sm:$0xff]   ;;  %v3721_v9 = vld [vmem:[%s4028_s26 + $0x4e4] ss:$16 sps:$4 sm:$0xff]  }
 0x162   : > { %v3778_v16 = vpop.eup %3777  ;;  %v1592_v17 = vpop.f32.mrf.mxu0 }
 0x163   : > { %v3230_v19 = vpack.c.bf16 %v3778_v16, %v3776_v11  ;;  %v1968_v20 = vadd.f32 %v1967_v13, %v1591_v12  ;;  %v1969_v21 = vpop.f32.mrf.mxu1  ;;  %v3724_v12 = vld [vmem:[%s4028_s26 + $0x4ec] ss:$16 sps:$4 sm:$0xff]  }
 0x164   : > { %v1595_v22 = vpop.f32.mrf.mxu0  ;;  %1786 = vmatmul.mubr.bf16.gmra.mxu0 %v3695_v10  ;;  %2163 = vmatmul.mubr.bf16.gmra.mxu1 %v3698_v14 }
 0x165   : > { %3409 = vst [vmem:[%s4219_s14 + $0x40] sm:$0xff] %v3230_v19   ;;  %3785 = vtanh.f32 %v1968_v20  ;;  %v1596_v23 = vadd.f32 %v4195_v6, %v1595_v22  ;;  %v1972_v24 = vpop.f32.mrf.mxu1  ;;  %1793 = vmatprep.mubr.bf16.mxu0 %v3703_v15  ;;  %2170 = vmatprep.mubr.bf16.mxu1 %v3706_v18 }
 0x166   : > { %v1597_v25 = vpop.f32.mrf.mxu0  ;;  %v3780_v30 = vpop.eup %3779 }
 0x167   : > { %v1974_v26 = vpop.f32.mrf.mxu1  ;;  %v1973_v27 = vadd.f32 %v1972_v24, %v1596_v23  ;;  %v3719_v23 = vld [vmem:[%s4028_s26 + $0x4e0] ss:$16 sps:$4 sm:$0xff]  }
 0x168   : > { %v1598_v28 = vpop.f32.mrf.mxu0 }
 0x169   : > { %v1599_v31 = vadd.f32 %v4195_v6, %v1598_v28  ;;  %v1975_v32 = vpop.f32.mrf.mxu1  ;;  %3787 = vtanh.f32 %v1973_v27  ;;  %v3722_v27 = vld [vmem:[%s4028_s26 + $0x4e8] ss:$16 sps:$4 sm:$0xff]   ;;  %v3727_v28 = vld [vmem:[%s4028_s26 + $0x504] ss:$16 sps:$4 sm:$0xff]  }
 0x16a   : > { %v3782_v35 = vpop.eup %3781  ;;  %v1600_v36 = vpop.f32.mrf.mxu0 }
 0x16b   : > { %v3235_v38 = vpack.c.bf16 %v3782_v35, %v3780_v30  ;;  %v1976_v39 = vadd.f32 %v1975_v32, %v1599_v31  ;;  %v1977_v40 = vpop.f32.mrf.mxu1  ;;  %v3730_v31 = vld [vmem:[%s4028_s26 + $0x50c] ss:$16 sps:$4 sm:$0xff]  }
 0x16c   : > { %v1603_v41 = vpop.f32.mrf.mxu0  ;;  %1794 = vmatmul.mubr.bf16.gmra.mxu0 %v3701_v29  ;;  %2171 = vmatmul.mubr.bf16.gmra.mxu1 %v3704_v33 }
 0x16d   : > { %3410 = vst [vmem:[%s4219_s14 + $0x48] sm:$0xff] %v3235_v38   ;;  %3789 = vtanh.f32 %v1976_v39  ;;  %v1604_v42 = vadd.f32 %v4195_v6, %v1603_v41  ;;  %v1980_v43 = vpop.f32.mrf.mxu1  ;;  %1801 = vmatprep.mubr.bf16.mxu0 %v3709_v34  ;;  %2178 = vmatprep.mubr.bf16.mxu1 %v3712_v37 }
 0x16e   : > { %v1605_v44 = vpop.f32.mrf.mxu0  ;;  %v3784_v49 = vpop.eup %3783 }
 0x16f   : > { %v1982_v45 = vpop.f32.mrf.mxu1  ;;  %v1981_v46 = vadd.f32 %v1980_v43, %v1604_v42  ;;  %v3725_v42 = vld [vmem:[%s4028_s26 + $0x500] ss:$16 sps:$4 sm:$0xff]  }
 0x170   : > { %v1606_v47 = vpop.f32.mrf.mxu0 }
 0x171   : > { %v1607_v50 = vadd.f32 %v4195_v6, %v1606_v47  ;;  %v1983_v51 = vpop.f32.mrf.mxu1  ;;  %3791 = vtanh.f32 %v1981_v46  ;;  %v3728_v46 = vld [vmem:[%s4028_s26 + $0x508] ss:$16 sps:$4 sm:$0xff]   ;;  %v3733_v47 = vld [vmem:[%s4028_s26 + $0x524] ss:$16 sps:$4 sm:$0xff]  }
 0x172   : > { %v3786_v54 = vpop.eup %3785  ;;  %v1608_v55 = vpop.f32.mrf.mxu0 }
 0x173   : > { %v3240_v57 = vpack.c.bf16 %v3786_v54, %v3784_v49  ;;  %v1984_v58 = vadd.f32 %v1983_v51, %v1607_v50  ;;  %v1985_v59 = vpop.f32.mrf.mxu1  ;;  %v3736_v50 = vld [vmem:[%s4028_s26 + $0x52c] ss:$16 sps:$4 sm:$0xff]  }
 0x174   : > { %v1611_v60 = vpop.f32.mrf.mxu0  ;;  %1802 = vmatmul.mubr.bf16.gmra.mxu0 %v3707_v48  ;;  %2179 = vmatmul.mubr.bf16.gmra.mxu1 %v3710_v52 }
 0x175   : > { %3411 = vst [vmem:[%s4219_s14 + $0x50] sm:$0xff] %v3240_v57   ;;  %3793 = vtanh.f32 %v1984_v58  ;;  %v1612_v61 = vadd.f32 %v4195_v6, %v1611_v60  ;;  %v1988_v62 = vpop.f32.mrf.mxu1  ;;  %1809 = vmatprep.mubr.bf16.mxu0 %v3715_v53  ;;  %2186 = vmatprep.mubr.bf16.mxu1 %v3718_v56 }
 0x176   : > { %v1613_v63 = vpop.f32.mrf.mxu0  ;;  %v3788_v4 = vpop.eup %3787 }
 0x177   : > { %v1990_v0 = vpop.f32.mrf.mxu1  ;;  %v1989_v1 = vadd.f32 %v1988_v62, %v1612_v61  ;;  %v3731_v61 = vld [vmem:[%s4028_s26 + $0x520] ss:$16 sps:$4 sm:$0xff]  }
 0x178   : > { %v1614_v2 = vpop.f32.mrf.mxu0 }
 0x179   : > { %v1615_v5 = vadd.f32 %v4195_v6, %v1614_v2  ;;  %v1991_v7 = vpop.f32.mrf.mxu1  ;;  %3795 = vtanh.f32 %v1989_v1  ;;  %v3734_v1 = vld [vmem:[%s4028_s26 + $0x528] ss:$16 sps:$4 sm:$0xff]   ;;  %v3739_v2 = vld [vmem:[%s4028_s26 + $0x544] ss:$16 sps:$4 sm:$0xff]  }
 0x17a   : > { %v3790_v10 = vpop.eup %3789  ;;  %v1616_v11 = vpop.f32.mrf.mxu0 }
 0x17b   : > { %v3245_v13 = vpack.c.bf16 %v3790_v10, %v3788_v4  ;;  %v1992_v14 = vadd.f32 %v1991_v7, %v1615_v5  ;;  %v1993_v15 = vpop.f32.mrf.mxu1  ;;  %v3742_v5 = vld [vmem:[%s4028_s26 + $0x54c] ss:$16 sps:$4 sm:$0xff]  }
 0x17c   : > { %v1619_v16 = vpop.f32.mrf.mxu0  ;;  %1810 = vmatmul.mubr.bf16.gmra.mxu0 %v3713_v3  ;;  %2187 = vmatmul.mubr.bf16.gmra.mxu1 %v3716_v8 }
 0x17d   : > { %3412 = vst [vmem:[%s4219_s14 + $0x58] sm:$0xff] %v3245_v13   ;;  %3797 = vtanh.f32 %v1992_v14  ;;  %v1620_v17 = vadd.f32 %v4195_v6, %v1619_v16  ;;  %v1996_v18 = vpop.f32.mrf.mxu1  ;;  %1817 = vmatprep.mubr.bf16.mxu0 %v3721_v9  ;;  %2194 = vmatprep.mubr.bf16.mxu1 %v3724_v12 }
 0x17e   : > { %v1621_v19 = vpop.f32.mrf.mxu0  ;;  %v3792_v24 = vpop.eup %3791 }
 0x17f   : > { %v1998_v20 = vpop.f32.mrf.mxu1  ;;  %v1997_v21 = vadd.f32 %v1996_v18, %v1620_v17  ;;  %v3737_v17 = vld [vmem:[%s4028_s26 + $0x540] ss:$16 sps:$4 sm:$0xff]  }
 0x180   : > { %v1622_v22 = vpop.f32.mrf.mxu0 }
 0x181   : > { %v1623_v25 = vadd.f32 %v4195_v6, %v1622_v22  ;;  %v1999_v26 = vpop.f32.mrf.mxu1  ;;  %3799 = vtanh.f32 %v1997_v21  ;;  %v3740_v21 = vld [vmem:[%s4028_s26 + $0x548] ss:$16 sps:$4 sm:$0xff]  }
 0x182   : > { %v3794_v29 = vpop.eup %3793  ;;  %v1624_v30 = vpop.f32.mrf.mxu0 }
 0x183   : > { %v3250_v32 = vpack.c.bf16 %v3794_v29, %v3792_v24  ;;  %v2000_v33 = vadd.f32 %v1999_v26, %v1623_v25  ;;  %v2001_v34 = vpop.f32.mrf.mxu1 }
 0x184   : > { %v1627_v35 = vpop.f32.mrf.mxu0  ;;  %1818 = vmatmul.mubr.bf16.gmra.mxu0 %v3719_v23  ;;  %2195 = vmatmul.mubr.bf16.gmra.mxu1 %v3722_v27 }
 0x185   : > { %3413 = vst [vmem:[%s4219_s14 + $0x60] sm:$0xff] %v3250_v32   ;;  %3801 = vtanh.f32 %v2000_v33  ;;  %v1628_v36 = vadd.f32 %v4195_v6, %v1627_v35  ;;  %v2004_v37 = vpop.f32.mrf.mxu1  ;;  %1825 = vmatprep.mubr.bf16.mxu0 %v3727_v28  ;;  %2202 = vmatprep.mubr.bf16.mxu1 %v3730_v31 }
 0x186   : > { %v1629_v38 = vpop.f32.mrf.mxu0  ;;  %v3796_v43 = vpop.eup %3795 }
 0x187   : > { %v2006_v39 = vpop.f32.mrf.mxu1  ;;  %v2005_v40 = vadd.f32 %v2004_v37, %v1628_v36 }
 0x188   : > { %v1630_v41 = vpop.f32.mrf.mxu0 }
 0x189   : > { %v1631_v44 = vadd.f32 %v4195_v6, %v1630_v41  ;;  %v2007_v45 = vpop.f32.mrf.mxu1  ;;  %3803 = vtanh.f32 %v2005_v40 }
 0x18a   : > { %v3798_v48 = vpop.eup %3797  ;;  %v1632_v49 = vpop.f32.mrf.mxu0 }
 0x18b   : > { %v3255_v51 = vpack.c.bf16 %v3798_v48, %v3796_v43  ;;  %v2008_v52 = vadd.f32 %v2007_v45, %v1631_v44  ;;  %v2009_v53 = vpop.f32.mrf.mxu1 }
 0x18c   : > { %v1635_v54 = vpop.f32.mrf.mxu0  ;;  %1826 = vmatmul.mubr.bf16.gmra.mxu0 %v3725_v42  ;;  %2203 = vmatmul.mubr.bf16.gmra.mxu1 %v3728_v46 }
 0x18d   : > { %3414 = vst [vmem:[%s4219_s14 + $0x68] sm:$0xff] %v3255_v51   ;;  %3805 = vtanh.f32 %v2008_v52  ;;  %v1636_v55 = vadd.f32 %v4195_v6, %v1635_v54  ;;  %v2012_v56 = vpop.f32.mrf.mxu1  ;;  %1833 = vmatprep.mubr.bf16.mxu0 %v3733_v47  ;;  %2210 = vmatprep.mubr.bf16.mxu1 %v3736_v50 }
 0x18e   : > { %v1637_v57 = vpop.f32.mrf.mxu0  ;;  %v3800_v62 = vpop.eup %3799 }
 0x18f   : > { %v2014_v58 = vpop.f32.mrf.mxu1  ;;  %v2013_v59 = vadd.f32 %v2012_v56, %v1636_v55 }
 0x190   : > { %v1638_v60 = vpop.f32.mrf.mxu0 }
 0x191   : > { %v1639_v63 = vadd.f32 %v4195_v6, %v1638_v60  ;;  %v2015_v0 = vpop.f32.mrf.mxu1  ;;  %3807 = vtanh.f32 %v2013_v59 }
 0x192   : > { %v3802_v3 = vpop.eup %3801  ;;  %v1640_v4 = vpop.f32.mrf.mxu0 }
 0x193   : > { %v3260_v7 = vpack.c.bf16 %v3802_v3, %v3800_v62  ;;  %v2016_v8 = vadd.f32 %v2015_v0, %v1639_v63  ;;  %v2017_v9 = vpop.f32.mrf.mxu1 }
 0x194   : > { %v1643_v10 = vpop.f32.mrf.mxu0  ;;  %1834 = vmatmul.mubr.bf16.gmra.mxu0 %v3731_v61  ;;  %2211 = vmatmul.mubr.bf16.gmra.mxu1 %v3734_v1 }
 0x195   : > { %3415 = vst [vmem:[%s4219_s14 + $0x70] sm:$0xff] %v3260_v7   ;;  %3809 = vtanh.f32 %v2016_v8  ;;  %v1644_v11 = vadd.f32 %v4195_v6, %v1643_v10  ;;  %v2020_v12 = vpop.f32.mrf.mxu1  ;;  %1841 = vmatprep.mubr.bf16.mxu0 %v3739_v2  ;;  %2218 = vmatprep.mubr.bf16.mxu1 %v3742_v5  ;;  %v4338_v10 = vld [vmem:[%s4413_s2] ss:$0 sm:$0xff] }
 0x196   : > { %v1645_v13 = vpop.f32.mrf.mxu0  ;;  %v3804_v18 = vpop.eup %3803 }
 0x197   : > { %v2022_v14 = vpop.f32.mrf.mxu1  ;;  %v2021_v15 = vadd.f32 %v2020_v12, %v1644_v11 }
 0x198   : > { %v1646_v16 = vpop.f32.mrf.mxu0 }
 0x199   : > { %v1647_v19 = vadd.f32 %v4195_v6, %v1646_v16  ;;  %v2023_v20 = vpop.f32.mrf.mxu1  ;;  %3811 = vtanh.f32 %v2021_v15 }
 0x19a   : > { %v3806_v22 = vpop.eup %3805  ;;  %v1648_v23 = vpop.f32.mrf.mxu0 }
 0x19b   : > { %v3265_v24 = vpack.c.bf16 %v3806_v22, %v3804_v18  ;;  %v2024_v25 = vadd.f32 %v2023_v20, %v1647_v19  ;;  %v2025_v26 = vpop.f32.mrf.mxu1 }
 0x19c   : > { %v1651_v27 = vpop.f32.mrf.mxu0  ;;  %1842 = vmatmul.mubr.bf16.gmra.mxu0 %v3737_v17  ;;  %2219 = vmatmul.mubr.bf16.gmra.mxu1 %v3740_v21 }
 0x19d   : > { %3416 = vst [vmem:[%s4219_s14 + $0x78] sm:$0xff] %v3265_v24   ;;  %3813 = vtanh.f32 %v2024_v25  ;;  %v1652_v28 = vadd.f32 %v4195_v6, %v1651_v27  ;;  %v2028_v29 = vpop.f32.mrf.mxu1 }
 0x19e   : > { %v1653_v30 = vpop.f32.mrf.mxu0  ;;  %v3808_v34 = vpop.eup %3807 }
 0x19f   : > { %v2030_v31 = vpop.f32.mrf.mxu1  ;;  %v2029_v32 = vadd.f32 %v2028_v29, %v1652_v28 }
 0x1a0   : > { %v1654_v33 = vpop.f32.mrf.mxu0 }
 0x1a1   : > { %v1655_v35 = vadd.f32 %v4195_v6, %v1654_v33  ;;  %v2031_v36 = vpop.f32.mrf.mxu1  ;;  %3815 = vtanh.f32 %v2029_v32 }
 0x1a2   : > { %v3810_v37 = vpop.eup %3809  ;;  %v1656_v38 = vpop.f32.mrf.mxu0 }
 0x1a3   : > { %v3270_v39 = vpack.c.bf16 %v3810_v37, %v3808_v34  ;;  %v2032_v40 = vadd.f32 %v2031_v36, %v1655_v35  ;;  %v2033_v41 = vpop.f32.mrf.mxu1 }
 0x1a4   : > { %v1659_v42 = vpop.f32.mrf.mxu0 }
 0x1a5   : > { %3417 = vst [vmem:[%s4219_s14 + $0x80] sm:$0xff] %v3270_v39   ;;  %3817 = vtanh.f32 %v2032_v40  ;;  %v1660_v43 = vadd.f32 %v4195_v6, %v1659_v42  ;;  %v2036_v44 = vpop.f32.mrf.mxu1 }
 0x1a6   : > { %v1661_v45 = vpop.f32.mrf.mxu0  ;;  %v3812_v49 = vpop.eup %3811 }
 0x1a7   : > { %v2038_v46 = vpop.f32.mrf.mxu1  ;;  %v2037_v47 = vadd.f32 %v2036_v44, %v1660_v43 }
 0x1a8   : > { %v1662_v48 = vpop.f32.mrf.mxu0 }
 0x1a9   : > { %v1663_v50 = vadd.f32 %v4195_v6, %v1662_v48  ;;  %v2039_v51 = vpop.f32.mrf.mxu1  ;;  %3819 = vtanh.f32 %v2037_v47 }
 0x1aa   : > { %v3814_v52 = vpop.eup %3813  ;;  %v1664_v53 = vpop.f32.mrf.mxu0 }
 0x1ab   : > { %v3275_v54 = vpack.c.bf16 %v3814_v52, %v3812_v49  ;;  %v2040_v55 = vadd.f32 %v2039_v51, %v1663_v50  ;;  %v2041_v56 = vpop.f32.mrf.mxu1 }
 0x1ac   : > { %v1667_v57 = vpop.f32.mrf.mxu0 }
 0x1ad   : > { %3418 = vst [vmem:[%s4219_s14 + $0x88] sm:$0xff] %v3275_v54   ;;  %3821 = vtanh.f32 %v2040_v55  ;;  %v1668_v58 = vadd.f32 %v4195_v6, %v1667_v57  ;;  %v2044_v59 = vpop.f32.mrf.mxu1 }
 0x1ae   : > { %v1669_v60 = vpop.f32.mrf.mxu0  ;;  %v3816_v0 = vpop.eup %3815 }
 0x1af   : > { %v2046_v61 = vpop.f32.mrf.mxu1  ;;  %v2045_v62 = vadd.f32 %v2044_v59, %v1668_v58 }
 0x1b0   : > { %v1670_v63 = vpop.f32.mrf.mxu0 }
 0x1b1   : > { %v1671_v1 = vadd.f32 %v4195_v6, %v1670_v63  ;;  %v2047_v2 = vpop.f32.mrf.mxu1  ;;  %3823 = vtanh.f32 %v2045_v62 }
 0x1b2   : > { %v3818_v3 = vpop.eup %3817  ;;  %v1672_v4 = vpop.f32.mrf.mxu0 }
 0x1b3   : > { %v3280_v5 = vpack.c.bf16 %v3818_v3, %v3816_v0  ;;  %v2048_v7 = vadd.f32 %v2047_v2, %v1671_v1  ;;  %v2049_v8 = vpop.f32.mrf.mxu1 }
 0x1b4   : > { %v1675_v9 = vpop.f32.mrf.mxu0 }
 0x1b5   : > { %3419 = vst [vmem:[%s4219_s14 + $0x90] sm:$0xff] %v3280_v5   ;;  %3825 = vtanh.f32 %v2048_v7  ;;  %v1676_v11 = vadd.f32 %v4338_v10, %v1675_v9  ;;  %v2052_v12 = vpop.f32.mrf.mxu1 }
 0x1b6   : > { %v1677_v6 = vpop.f32.mrf.mxu0  ;;  %v3820_v16 = vpop.eup %3819 }
 0x1b7   : > { %v2054_v13 = vpop.f32.mrf.mxu1  ;;  %v2053_v14 = vadd.f32 %v2052_v12, %v1676_v11 }
 0x1b8   : > { %v1678_v15 = vpop.f32.mrf.mxu0 }
 0x1b9   : > { %v1679_v17 = vadd.f32 %v4338_v10, %v1678_v15  ;;  %v2055_v18 = vpop.f32.mrf.mxu1  ;;  %3827 = vtanh.f32 %v2053_v14 }
 0x1ba   : > { %v3822_v19 = vpop.eup %3821  ;;  %v1680_v20 = vpop.f32.mrf.mxu0 }
 0x1bb   : > { %v3285_v21 = vpack.c.bf16 %v3822_v19, %v3820_v16  ;;  %v2056_v22 = vadd.f32 %v2055_v18, %v1679_v17  ;;  %v2057_v23 = vpop.f32.mrf.mxu1 }
 0x1bc   : > { %v1683_v24 = vpop.f32.mrf.mxu0 }
 0x1bd   : > { %3420 = vst [vmem:[%s4219_s14 + $0x98] sm:$0xff] %v3285_v21   ;;  %3829 = vtanh.f32 %v2056_v22  ;;  %v1684_v25 = vadd.f32 %v4338_v10, %v1683_v24  ;;  %v2060_v26 = vpop.f32.mrf.mxu1 }
 0x1be   : > { %v1685_v27 = vpop.f32.mrf.mxu0  ;;  %v3824_v31 = vpop.eup %3823 }
 0x1bf   : > { %v2062_v28 = vpop.f32.mrf.mxu1  ;;  %v2061_v29 = vadd.f32 %v2060_v26, %v1684_v25 }
 0x1c0   : > { %v1686_v30 = vpop.f32.mrf.mxu0 }
 0x1c1   : > { %v1687_v32 = vadd.f32 %v4338_v10, %v1686_v30  ;;  %v2063_v33 = vpop.f32.mrf.mxu1  ;;  %3831 = vtanh.f32 %v2061_v29 }
 0x1c2   : > { %v3826_v34 = vpop.eup %3825  ;;  %v1688_v35 = vpop.f32.mrf.mxu0 }
 0x1c3   : > { %v3290_v36 = vpack.c.bf16 %v3826_v34, %v3824_v31  ;;  %v2064_v37 = vadd.f32 %v2063_v33, %v1687_v32  ;;  %v2065_v38 = vpop.f32.mrf.mxu1 }
 0x1c4   : > { %v1691_v39 = vpop.f32.mrf.mxu0 }
 0x1c5   : > { %3421 = vst [vmem:[%s4219_s14 + $0xa0] sm:$0xff] %v3290_v36   ;;  %3833 = vtanh.f32 %v2064_v37  ;;  %v1692_v40 = vadd.f32 %v4338_v10, %v1691_v39  ;;  %v2068_v41 = vpop.f32.mrf.mxu1 }
 0x1c6   : > { %v1693_v42 = vpop.f32.mrf.mxu0  ;;  %v3828_v46 = vpop.eup %3827 }
 0x1c7   : > { %v2070_v43 = vpop.f32.mrf.mxu1  ;;  %v2069_v44 = vadd.f32 %v2068_v41, %v1692_v40 }
 0x1c8   : > { %v1694_v45 = vpop.f32.mrf.mxu0 }
 0x1c9   : > { %v1695_v47 = vadd.f32 %v4338_v10, %v1694_v45  ;;  %v2071_v48 = vpop.f32.mrf.mxu1  ;;  %3835 = vtanh.f32 %v2069_v44 }
 0x1ca   : > { %v3830_v49 = vpop.eup %3829  ;;  %v1696_v50 = vpop.f32.mrf.mxu0 }
 0x1cb   : > { %v3295_v51 = vpack.c.bf16 %v3830_v49, %v3828_v46  ;;  %v2072_v52 = vadd.f32 %v2071_v48, %v1695_v47  ;;  %v2073_v53 = vpop.f32.mrf.mxu1 }
 0x1cc   : > { %v1699_v54 = vpop.f32.mrf.mxu0 }
 0x1cd   : > { %3422 = vst [vmem:[%s4219_s14 + $0xa8] sm:$0xff] %v3295_v51   ;;  %3837 = vtanh.f32 %v2072_v52  ;;  %v1700_v55 = vadd.f32 %v4338_v10, %v1699_v54  ;;  %v2076_v56 = vpop.f32.mrf.mxu1 }
 0x1ce   : > { %v1701_v57 = vpop.f32.mrf.mxu0  ;;  %v3832_v61 = vpop.eup %3831 }
 0x1cf   : > { %v2078_v58 = vpop.f32.mrf.mxu1  ;;  %v2077_v59 = vadd.f32 %v2076_v56, %v1700_v55 }
 0x1d0   : > { %v1702_v60 = vpop.f32.mrf.mxu0 }
 0x1d1   : > { %v1703_v62 = vadd.f32 %v4338_v10, %v1702_v60  ;;  %v2079_v63 = vpop.f32.mrf.mxu1  ;;  %3839 = vtanh.f32 %v2077_v59 }
 0x1d2   : > { %v3834_v0 = vpop.eup %3833  ;;  %v1704_v1 = vpop.f32.mrf.mxu0 }
 0x1d3   : > { %v3300_v2 = vpack.c.bf16 %v3834_v0, %v3832_v61  ;;  %v2080_v3 = vadd.f32 %v2079_v63, %v1703_v62  ;;  %v2081_v4 = vpop.f32.mrf.mxu1 }
 0x1d4   : > { %v1707_v5 = vpop.f32.mrf.mxu0 }
 0x1d5   : > { %3423 = vst [vmem:[%s4219_s14 + $0xb0] sm:$0xff] %v3300_v2   ;;  %3841 = vtanh.f32 %v2080_v3  ;;  %v1708_v7 = vadd.f32 %v4338_v10, %v1707_v5  ;;  %v2084_v8 = vpop.f32.mrf.mxu1 }
 0x1d6   : > { %v1709_v9 = vpop.f32.mrf.mxu0  ;;  %v3836_v13 = vpop.eup %3835 }
 0x1d7   : > { %v2086_v11 = vpop.f32.mrf.mxu1  ;;  %v2085_v12 = vadd.f32 %v2084_v8, %v1708_v7 }
 0x1d8   : > { %v1710_v6 = vpop.f32.mrf.mxu0 }
 0x1d9   : > { %v1711_v14 = vadd.f32 %v4338_v10, %v1710_v6  ;;  %v2087_v15 = vpop.f32.mrf.mxu1  ;;  %3843 = vtanh.f32 %v2085_v12 }
 0x1da   : > { %v3838_v16 = vpop.eup %3837  ;;  %v1712_v17 = vpop.f32.mrf.mxu0 }
 0x1db   : > { %v3305_v18 = vpack.c.bf16 %v3838_v16, %v3836_v13  ;;  %v2088_v19 = vadd.f32 %v2087_v15, %v1711_v14  ;;  %v2089_v20 = vpop.f32.mrf.mxu1 }
 0x1dc   : > { %v1715_v21 = vpop.f32.mrf.mxu0 }
 0x1dd   : > { %3424 = vst [vmem:[%s4219_s14 + $0xb8] sm:$0xff] %v3305_v18   ;;  %3845 = vtanh.f32 %v2088_v19  ;;  %v1716_v22 = vadd.f32 %v4338_v10, %v1715_v21  ;;  %v2092_v23 = vpop.f32.mrf.mxu1 }
 0x1de   : > { %v1717_v24 = vpop.f32.mrf.mxu0  ;;  %v3840_v28 = vpop.eup %3839 }
 0x1df   : > { %v2094_v25 = vpop.f32.mrf.mxu1  ;;  %v2093_v26 = vadd.f32 %v2092_v23, %v1716_v22 }
 0x1e0   : > { %v1718_v27 = vpop.f32.mrf.mxu0 }
 0x1e1   : > { %v1719_v29 = vadd.f32 %v4338_v10, %v1718_v27  ;;  %v2095_v30 = vpop.f32.mrf.mxu1  ;;  %3847 = vtanh.f32 %v2093_v26 }
 0x1e2   : > { %v3842_v31 = vpop.eup %3841  ;;  %v1720_v32 = vpop.f32.mrf.mxu0 }
 0x1e3   : > { %v3310_v33 = vpack.c.bf16 %v3842_v31, %v3840_v28  ;;  %v2096_v34 = vadd.f32 %v2095_v30, %v1719_v29  ;;  %v2097_v35 = vpop.f32.mrf.mxu1 }
 0x1e4   : > { %v1723_v36 = vpop.f32.mrf.mxu0 }
 0x1e5   : > { %3425 = vst [vmem:[%s4219_s14 + $0xc0] sm:$0xff] %v3310_v33   ;;  %3849 = vtanh.f32 %v2096_v34  ;;  %v1724_v37 = vadd.f32 %v4338_v10, %v1723_v36  ;;  %v2100_v38 = vpop.f32.mrf.mxu1 }
 0x1e6   : > { %v1725_v39 = vpop.f32.mrf.mxu0  ;;  %v3844_v43 = vpop.eup %3843 }
 0x1e7   : > { %v2102_v40 = vpop.f32.mrf.mxu1  ;;  %v2101_v41 = vadd.f32 %v2100_v38, %v1724_v37 }
 0x1e8   : > { %v1726_v42 = vpop.f32.mrf.mxu0 }
 0x1e9   : > { %v1727_v44 = vadd.f32 %v4338_v10, %v1726_v42  ;;  %v2103_v45 = vpop.f32.mrf.mxu1  ;;  %3851 = vtanh.f32 %v2101_v41 }
 0x1ea   : > { %v3846_v46 = vpop.eup %3845  ;;  %v1728_v47 = vpop.f32.mrf.mxu0 }
 0x1eb   : > { %v3315_v48 = vpack.c.bf16 %v3846_v46, %v3844_v43  ;;  %v2104_v49 = vadd.f32 %v2103_v45, %v1727_v44  ;;  %v2105_v50 = vpop.f32.mrf.mxu1 }
 0x1ec   : > { %v1731_v51 = vpop.f32.mrf.mxu0 }
 0x1ed   : > { %3426 = vst [vmem:[%s4219_s14 + $0xc8] sm:$0xff] %v3315_v48   ;;  %3853 = vtanh.f32 %v2104_v49  ;;  %v1732_v52 = vadd.f32 %v4338_v10, %v1731_v51  ;;  %v2108_v53 = vpop.f32.mrf.mxu1 }
 0x1ee   : > { %v1733_v54 = vpop.f32.mrf.mxu0  ;;  %v3848_v58 = vpop.eup %3847 }
 0x1ef   : > { %v2110_v55 = vpop.f32.mrf.mxu1  ;;  %v2109_v56 = vadd.f32 %v2108_v53, %v1732_v52 }
 0x1f0   : > { %v1734_v57 = vpop.f32.mrf.mxu0 }
 0x1f1   : > { %v1735_v59 = vadd.f32 %v4338_v10, %v1734_v57  ;;  %v2111_v60 = vpop.f32.mrf.mxu1  ;;  %3855 = vtanh.f32 %v2109_v56 }
 0x1f2   : > { %v3850_v61 = vpop.eup %3849  ;;  %v1736_v62 = vpop.f32.mrf.mxu0 }
 0x1f3   : > { %v3320_v63 = vpack.c.bf16 %v3850_v61, %v3848_v58  ;;  %v2112_v0 = vadd.f32 %v2111_v60, %v1735_v59  ;;  %v2113_v1 = vpop.f32.mrf.mxu1 }
 0x1f4   : > { %v1739_v2 = vpop.f32.mrf.mxu0 }
 0x1f5   : > { %3427 = vst [vmem:[%s4219_s14 + $0xd0] sm:$0xff] %v3320_v63   ;;  %3857 = vtanh.f32 %v2112_v0  ;;  %v1740_v3 = vadd.f32 %v4338_v10, %v1739_v2  ;;  %v2116_v4 = vpop.f32.mrf.mxu1 }
 0x1f6   : > { %v1741_v5 = vpop.f32.mrf.mxu0  ;;  %v3852_v11 = vpop.eup %3851 }
 0x1f7   : > { %v2118_v7 = vpop.f32.mrf.mxu1  ;;  %v2117_v8 = vadd.f32 %v2116_v4, %v1740_v3 }
 0x1f8   : > { %v1742_v9 = vpop.f32.mrf.mxu0 }
 0x1f9   : > { %v1743_v12 = vadd.f32 %v4338_v10, %v1742_v9  ;;  %v2119_v6 = vpop.f32.mrf.mxu1  ;;  %3859 = vtanh.f32 %v2117_v8 }
 0x1fa   : > { %v3854_v13 = vpop.eup %3853  ;;  %v1744_v14 = vpop.f32.mrf.mxu0 }
 0x1fb   : > { %v3325_v15 = vpack.c.bf16 %v3854_v13, %v3852_v11  ;;  %v2120_v16 = vadd.f32 %v2119_v6, %v1743_v12  ;;  %v2121_v17 = vpop.f32.mrf.mxu1 }
 0x1fc   : > { %v1747_v18 = vpop.f32.mrf.mxu0 }
 0x1fd   : > { %3428 = vst [vmem:[%s4219_s14 + $0xd8] sm:$0xff] %v3325_v15   ;;  %3861 = vtanh.f32 %v2120_v16  ;;  %v1748_v19 = vadd.f32 %v4338_v10, %v1747_v18  ;;  %v2124_v20 = vpop.f32.mrf.mxu1 }
 0x1fe   : > { %v1749_v21 = vpop.f32.mrf.mxu0  ;;  %v3856_v25 = vpop.eup %3855 }
 0x1ff   : > { %v2126_v22 = vpop.f32.mrf.mxu1  ;;  %v2125_v23 = vadd.f32 %v2124_v20, %v1748_v19 }
 0x200   : > { %v1750_v24 = vpop.f32.mrf.mxu0 }
 0x201   : > { %v1751_v26 = vadd.f32 %v4338_v10, %v1750_v24  ;;  %v2127_v27 = vpop.f32.mrf.mxu1  ;;  %3863 = vtanh.f32 %v2125_v23 }
 0x202   : > { %v3858_v28 = vpop.eup %3857  ;;  %v1752_v29 = vpop.f32.mrf.mxu0 }
 0x203   : > { %v3330_v30 = vpack.c.bf16 %v3858_v28, %v3856_v25  ;;  %v2128_v31 = vadd.f32 %v2127_v27, %v1751_v26  ;;  %v2129_v32 = vpop.f32.mrf.mxu1 }
 0x204   : > { %v1755_v33 = vpop.f32.mrf.mxu0 }
 0x205   : > { %3429 = vst [vmem:[%s4219_s14 + $0xe0] sm:$0xff] %v3330_v30   ;;  %3865 = vtanh.f32 %v2128_v31  ;;  %v1756_v34 = vadd.f32 %v4338_v10, %v1755_v33  ;;  %v2132_v35 = vpop.f32.mrf.mxu1 }
 0x206   : > { %v1757_v36 = vpop.f32.mrf.mxu0  ;;  %v3860_v40 = vpop.eup %3859 }
 0x207   : > { %v2134_v37 = vpop.f32.mrf.mxu1  ;;  %v2133_v38 = vadd.f32 %v2132_v35, %v1756_v34 }
 0x208   : > { %v1758_v39 = vpop.f32.mrf.mxu0 }
 0x209   : > { %v1759_v41 = vadd.f32 %v4338_v10, %v1758_v39  ;;  %v2135_v42 = vpop.f32.mrf.mxu1  ;;  %3867 = vtanh.f32 %v2133_v38 }
 0x20a   : > { %v3862_v43 = vpop.eup %3861  ;;  %v1760_v44 = vpop.f32.mrf.mxu0 }
 0x20b   : > { %v3335_v45 = vpack.c.bf16 %v3862_v43, %v3860_v40  ;;  %v2136_v46 = vadd.f32 %v2135_v42, %v1759_v41  ;;  %v2137_v47 = vpop.f32.mrf.mxu1 }
 0x20c   : > { %v1763_v48 = vpop.f32.mrf.mxu0 }
 0x20d   : > { %3430 = vst [vmem:[%s4219_s14 + $0xe8] sm:$0xff] %v3335_v45   ;;  %3869 = vtanh.f32 %v2136_v46  ;;  %v1764_v49 = vadd.f32 %v4338_v10, %v1763_v48  ;;  %v2140_v50 = vpop.f32.mrf.mxu1 }
 0x20e   : > { %v1765_v51 = vpop.f32.mrf.mxu0  ;;  %v3864_v55 = vpop.eup %3863 }
 0x20f   : > { %v2142_v52 = vpop.f32.mrf.mxu1  ;;  %v2141_v53 = vadd.f32 %v2140_v50, %v1764_v49 }
 0x210   : > { %v1766_v54 = vpop.f32.mrf.mxu0 }
 0x211   : > { %v1767_v56 = vadd.f32 %v4338_v10, %v1766_v54  ;;  %v2143_v57 = vpop.f32.mrf.mxu1  ;;  %3871 = vtanh.f32 %v2141_v53 }
 0x212   : > { %v3866_v58 = vpop.eup %3865  ;;  %v1768_v59 = vpop.f32.mrf.mxu0 }
 0x213   : > { %v3340_v60 = vpack.c.bf16 %v3866_v58, %v3864_v55  ;;  %v2144_v61 = vadd.f32 %v2143_v57, %v1767_v56  ;;  %v2145_v62 = vpop.f32.mrf.mxu1 }
 0x214   : > { %v1771_v63 = vpop.f32.mrf.mxu0 }
 0x215   : > { %3431 = vst [vmem:[%s4219_s14 + $0xf0] sm:$0xff] %v3340_v60   ;;  %3873 = vtanh.f32 %v2144_v61  ;;  %v1772_v0 = vadd.f32 %v4338_v10, %v1771_v63  ;;  %v2148_v1 = vpop.f32.mrf.mxu1 }
 0x216   : > { %v1773_v2 = vpop.f32.mrf.mxu0  ;;  %v3868_v7 = vpop.eup %3867 }
 0x217   : > { %v2150_v3 = vpop.f32.mrf.mxu1  ;;  %v2149_v4 = vadd.f32 %v2148_v1, %v1772_v0 }
 0x218   : > { %v1774_v5 = vpop.f32.mrf.mxu0 }
 0x219   : > { %v1775_v8 = vadd.f32 %v4338_v10, %v1774_v5  ;;  %v2151_v9 = vpop.f32.mrf.mxu1  ;;  %3875 = vtanh.f32 %v2149_v4 }
 0x21a   : > { %v3870_v11 = vpop.eup %3869  ;;  %v1776_v12 = vpop.f32.mrf.mxu0 }
 0x21b   : > { %v3345_v6 = vpack.c.bf16 %v3870_v11, %v3868_v7  ;;  %v2152_v13 = vadd.f32 %v2151_v9, %v1775_v8  ;;  %v2153_v14 = vpop.f32.mrf.mxu1 }
 0x21c   : > { %v1779_v15 = vpop.f32.mrf.mxu0 }
 0x21d   : > { %3432 = vst [vmem:[%s4219_s14 + $0xf8] sm:$0xff] %v3345_v6   ;;  %3877 = vtanh.f32 %v2152_v13  ;;  %v1780_v16 = vadd.f32 %v4338_v10, %v1779_v15  ;;  %v2156_v17 = vpop.f32.mrf.mxu1 }
 0x21e   : > { %v1781_v18 = vpop.f32.mrf.mxu0  ;;  %v3872_v22 = vpop.eup %3871 }
 0x21f   : > { %v2158_v19 = vpop.f32.mrf.mxu1  ;;  %v2157_v20 = vadd.f32 %v2156_v17, %v1780_v16 }
 0x220   : > { %v1782_v21 = vpop.f32.mrf.mxu0 }
 0x221   : > { %v1783_v23 = vadd.f32 %v4338_v10, %v1782_v21  ;;  %v2159_v24 = vpop.f32.mrf.mxu1  ;;  %3879 = vtanh.f32 %v2157_v20 }
 0x222   : > { %v3874_v25 = vpop.eup %3873  ;;  %v1784_v26 = vpop.f32.mrf.mxu0 }
 0x223   : > { %v3350_v27 = vpack.c.bf16 %v3874_v25, %v3872_v22  ;;  %v2160_v28 = vadd.f32 %v2159_v24, %v1783_v23  ;;  %v2161_v29 = vpop.f32.mrf.mxu1 }
 0x224   : > { %v1787_v30 = vpop.f32.mrf.mxu0 }
 0x225   : > { %3433 = vst [vmem:[%s4219_s14 + $0x100] sm:$0xff] %v3350_v27   ;;  %3881 = vtanh.f32 %v2160_v28  ;;  %v1788_v31 = vadd.f32 %v4338_v10, %v1787_v30  ;;  %v2164_v32 = vpop.f32.mrf.mxu1 }
 0x226   : > { %v1789_v33 = vpop.f32.mrf.mxu0  ;;  %v3876_v37 = vpop.eup %3875 }
 0x227   : > { %v2166_v34 = vpop.f32.mrf.mxu1  ;;  %v2165_v35 = vadd.f32 %v2164_v32, %v1788_v31 }
 0x228   : > { %v1790_v36 = vpop.f32.mrf.mxu0 }
 0x229   : > { %v1791_v38 = vadd.f32 %v4338_v10, %v1790_v36  ;;  %v2167_v39 = vpop.f32.mrf.mxu1  ;;  %3883 = vtanh.f32 %v2165_v35 }
 0x22a   : > { %v3878_v40 = vpop.eup %3877  ;;  %v1792_v41 = vpop.f32.mrf.mxu0 }
 0x22b   : > { %v3355_v42 = vpack.c.bf16 %v3878_v40, %v3876_v37  ;;  %v2168_v43 = vadd.f32 %v2167_v39, %v1791_v38  ;;  %v2169_v44 = vpop.f32.mrf.mxu1 }
 0x22c   : > { %v1795_v45 = vpop.f32.mrf.mxu0 }
 0x22d   : > { %3434 = vst [vmem:[%s4219_s14 + $0x108] sm:$0xff] %v3355_v42   ;;  %3885 = vtanh.f32 %v2168_v43  ;;  %v1796_v46 = vadd.f32 %v4338_v10, %v1795_v45  ;;  %v2172_v47 = vpop.f32.mrf.mxu1 }
 0x22e   : > { %v1797_v48 = vpop.f32.mrf.mxu0  ;;  %v3880_v52 = vpop.eup %3879 }
 0x22f   : > { %v2174_v49 = vpop.f32.mrf.mxu1  ;;  %v2173_v50 = vadd.f32 %v2172_v47, %v1796_v46 }
 0x230   : > { %v1798_v51 = vpop.f32.mrf.mxu0 }
 0x231   : > { %v1799_v53 = vadd.f32 %v4338_v10, %v1798_v51  ;;  %v2175_v54 = vpop.f32.mrf.mxu1  ;;  %3887 = vtanh.f32 %v2173_v50 }
 0x232   : > { %v3882_v55 = vpop.eup %3881  ;;  %v1800_v56 = vpop.f32.mrf.mxu0 }
 0x233   : > { %v3360_v57 = vpack.c.bf16 %v3882_v55, %v3880_v52  ;;  %v2176_v58 = vadd.f32 %v2175_v54, %v1799_v53  ;;  %v2177_v59 = vpop.f32.mrf.mxu1 }
 0x234   : > { %v1803_v60 = vpop.f32.mrf.mxu0 }
 0x235   : > { %3435 = vst [vmem:[%s4219_s14 + $0x110] sm:$0xff] %v3360_v57   ;;  %3889 = vtanh.f32 %v2176_v58  ;;  %v1804_v61 = vadd.f32 %v4338_v10, %v1803_v60  ;;  %v2180_v62 = vpop.f32.mrf.mxu1 }
 0x236   : > { %v1805_v63 = vpop.f32.mrf.mxu0  ;;  %v3884_v3 = vpop.eup %3883 }
 0x237   : > { %v2182_v0 = vpop.f32.mrf.mxu1  ;;  %v2181_v1 = vadd.f32 %v2180_v62, %v1804_v61 }
 0x238   : > { %v1806_v2 = vpop.f32.mrf.mxu0 }
 0x239   : > { %v1807_v4 = vadd.f32 %v4338_v10, %v1806_v2  ;;  %v2183_v5 = vpop.f32.mrf.mxu1  ;;  %3891 = vtanh.f32 %v2181_v1 }
 0x23a   : > { %v3886_v7 = vpop.eup %3885  ;;  %v1808_v8 = vpop.f32.mrf.mxu0 }
 0x23b   : > { %v3365_v9 = vpack.c.bf16 %v3886_v7, %v3884_v3  ;;  %v2184_v11 = vadd.f32 %v2183_v5, %v1807_v4  ;;  %v2185_v12 = vpop.f32.mrf.mxu1 }
 0x23c   : > { %v1811_v6 = vpop.f32.mrf.mxu0 }
 0x23d   : > { %3436 = vst [vmem:[%s4219_s14 + $0x118] sm:$0xff] %v3365_v9   ;;  %3893 = vtanh.f32 %v2184_v11  ;;  %v1812_v13 = vadd.f32 %v4338_v10, %v1811_v6  ;;  %v2188_v14 = vpop.f32.mrf.mxu1 }
 0x23e   : > { %v1813_v15 = vpop.f32.mrf.mxu0  ;;  %v3888_v19 = vpop.eup %3887 }
 0x23f   : > { %v2190_v16 = vpop.f32.mrf.mxu1  ;;  %v2189_v17 = vadd.f32 %v2188_v14, %v1812_v13 }
 0x240   : > { %v1814_v18 = vpop.f32.mrf.mxu0 }
 0x241   : > { %v1815_v20 = vadd.f32 %v4338_v10, %v1814_v18  ;;  %v2191_v21 = vpop.f32.mrf.mxu1  ;;  %3895 = vtanh.f32 %v2189_v17 }
 0x242   : > { %v3890_v22 = vpop.eup %3889  ;;  %v1816_v23 = vpop.f32.mrf.mxu0 }
 0x243   : > { %v3370_v24 = vpack.c.bf16 %v3890_v22, %v3888_v19  ;;  %v2192_v25 = vadd.f32 %v2191_v21, %v1815_v20  ;;  %v2193_v26 = vpop.f32.mrf.mxu1 }
 0x244   : > { %v1819_v27 = vpop.f32.mrf.mxu0 }
 0x245   : > { %3437 = vst [vmem:[%s4219_s14 + $0x120] sm:$0xff] %v3370_v24   ;;  %3897 = vtanh.f32 %v2192_v25  ;;  %v1820_v28 = vadd.f32 %v4338_v10, %v1819_v27  ;;  %v2196_v29 = vpop.f32.mrf.mxu1 }
 0x246   : > { %v1821_v30 = vpop.f32.mrf.mxu0  ;;  %v3892_v34 = vpop.eup %3891 }
 0x247   : > { %v2198_v31 = vpop.f32.mrf.mxu1  ;;  %v2197_v32 = vadd.f32 %v2196_v29, %v1820_v28 }
 0x248   : > { %v1822_v33 = vpop.f32.mrf.mxu0 }
 0x249   : > { %v1823_v35 = vadd.f32 %v4338_v10, %v1822_v33  ;;  %v2199_v36 = vpop.f32.mrf.mxu1  ;;  %3899 = vtanh.f32 %v2197_v32 }
 0x24a   : > { %v3894_v37 = vpop.eup %3893  ;;  %v1824_v38 = vpop.f32.mrf.mxu0 }
 0x24b   : > { %v3375_v39 = vpack.c.bf16 %v3894_v37, %v3892_v34  ;;  %v2200_v40 = vadd.f32 %v2199_v36, %v1823_v35  ;;  %v2201_v41 = vpop.f32.mrf.mxu1 }
 0x24c   : > { %v1827_v42 = vpop.f32.mrf.mxu0 }
 0x24d   : > { %3438 = vst [vmem:[%s4219_s14 + $0x128] sm:$0xff] %v3375_v39   ;;  %3901 = vtanh.f32 %v2200_v40  ;;  %v1828_v43 = vadd.f32 %v4338_v10, %v1827_v42  ;;  %v2204_v44 = vpop.f32.mrf.mxu1 }
 0x24e   : > { %v1829_v45 = vpop.f32.mrf.mxu0  ;;  %v3896_v49 = vpop.eup %3895 }
 0x24f   : > { %v2206_v46 = vpop.f32.mrf.mxu1  ;;  %v2205_v47 = vadd.f32 %v2204_v44, %v1828_v43 }
 0x250   : > { %v1830_v48 = vpop.f32.mrf.mxu0 }
 0x251   : > { %v1831_v50 = vadd.f32 %v4338_v10, %v1830_v48  ;;  %v2207_v51 = vpop.f32.mrf.mxu1  ;;  %3903 = vtanh.f32 %v2205_v47 }
 0x252   : > { %v3898_v52 = vpop.eup %3897  ;;  %v1832_v53 = vpop.f32.mrf.mxu0 }
 0x253   : > { %v3380_v54 = vpack.c.bf16 %v3898_v52, %v3896_v49  ;;  %v2208_v55 = vadd.f32 %v2207_v51, %v1831_v50  ;;  %v2209_v56 = vpop.f32.mrf.mxu1 }
 0x254   : > { %v1835_v57 = vpop.f32.mrf.mxu0 }
 0x255   : > { %3439 = vst [vmem:[%s4219_s14 + $0x130] sm:$0xff] %v3380_v54   ;;  %3905 = vtanh.f32 %v2208_v55  ;;  %v1836_v58 = vadd.f32 %v4338_v10, %v1835_v57  ;;  %v2212_v59 = vpop.f32.mrf.mxu1 }
 0x256   : > { %v1837_v60 = vpop.f32.mrf.mxu0  ;;  %v3900_v0 = vpop.eup %3899 }
 0x257   : > { %v2214_v61 = vpop.f32.mrf.mxu1  ;;  %v2213_v62 = vadd.f32 %v2212_v59, %v1836_v58 }
 0x258   : > { %v1838_v63 = vpop.f32.mrf.mxu0 }
 0x259   : > { %v1839_v1 = vadd.f32 %v4338_v10, %v1838_v63  ;;  %v2215_v2 = vpop.f32.mrf.mxu1  ;;  %3907 = vtanh.f32 %v2213_v62 }
 0x25a   : > { %v3902_v3 = vpop.eup %3901  ;;  %v1840_v4 = vpop.f32.mrf.mxu0 }
 0x25b   : > { %v3385_v5 = vpack.c.bf16 %v3902_v3, %v3900_v0  ;;  %v2216_v7 = vadd.f32 %v2215_v2, %v1839_v1  ;;  %v2217_v8 = vpop.f32.mrf.mxu1 }
 0x25c   : > { %v1843_v9 = vpop.f32.mrf.mxu0 }
 0x25d   : > { %3440 = vst [vmem:[%s4219_s14 + $0x138] sm:$0xff] %v3385_v5   ;;  %3909 = vtanh.f32 %v2216_v7  ;;  %v1844_v11 = vadd.f32 %v4338_v10, %v1843_v9  ;;  %v2220_v12 = vpop.f32.mrf.mxu1 }
 0x25e   : > { %v1845_v6 = vpop.f32.mrf.mxu0  ;;  %v3904_v16 = vpop.eup %3903 }
 0x25f   : > { %v2222_v13 = vpop.f32.mrf.mxu1  ;;  %v2221_v14 = vadd.f32 %v2220_v12, %v1844_v11 }
 0x260   : > { %v1846_v15 = vpop.f32.mrf.mxu0 }
 0x261   : > { %v1847_v17 = vadd.f32 %v4338_v10, %v1846_v15  ;;  %v2223_v18 = vpop.f32.mrf.mxu1  ;;  %3911 = vtanh.f32 %v2221_v14 }
 0x262   : > { %v3906_v19 = vpop.eup %3905  ;;  %v1848_v20 = vpop.f32.mrf.mxu0 }
 0x263   : > { %v3390_v21 = vpack.c.bf16 %v3906_v19, %v3904_v16  ;;  %v2224_v22 = vadd.f32 %v2223_v18, %v1847_v17  ;;  %v2225_v23 = vpop.f32.mrf.mxu1 }
 0x265   : > { %3441 = vst [vmem:[%s4219_s14 + $0x140] sm:$0xff] %v3390_v21   ;;  %3913 = vtanh.f32 %v2224_v22 }
 0x266   : > { %v3908_v24 = vpop.eup %3907 }
 0x26a   : > { %v3910_v25 = vpop.eup %3909 }
 0x26b   : > { %v3395_v26 = vpack.c.bf16 %v3910_v25, %v3908_v24 }
 0x26d   : > { %3442 = vst [vmem:[%s4219_s14 + $0x148] sm:$0xff] %v3395_v26  }
 0x26e   : > { %v3912_v27 = vpop.eup %3911 }
 0x272   : > { %v3914_v28 = vpop.eup %3913 }
 0x273   : > { %v3400_v29 = vpack.c.bf16 %v3914_v28, %v3912_v27 }
 0x275   : > { %3443 = vst [vmem:[%s4219_s14 + $0x150] sm:$0xff] %v3400_v29  }
 0x276 PF: > { %s13_s12 = sadd.s32 1, %s3922_s12  }
 0x277   : > { %p10_p4 = scmp.ge.s32.totalorder %s13_s12, 4  }
 0x279   :  { %12 = sbr.rel (!%p10_p4) target bundleno = 1 (0x1), region = 62 }

</bundles_post_ra>
